<compile_context>
chip_gen: v7x
topology: tpu7x:2x2x1
jax: 0.10.0
libtpu: 0.0.40
codegen_flags: <defaults>
</compile_context>

<pallas_src>
import jax
import jax.numpy as jnp
from jax import lax
from jax.experimental import pallas as pl
from jax.experimental.pallas import tpu as pltpu


# ------------------------------------------------------------------
# Fused kernel: im2col-conv3x3+ReLU -> im2col-conv3x3+ReLU -> pool(2,2) -> FC.
# Each conv is one bf16 MXU matmul with f32 accumulation; halos live in
# zero-ringed bf16 VMEM buffers; conv weights are streamed in with manual DMAs
# that overlap the im2col construction.
# ------------------------------------------------------------------
def _adaptor_kd_kernel(x_ref, w1_hbm, b1_ref, w2_hbm, b2_ref, wfc_ref, bfc_ref,
                       o_ref,
                       xpad_s, col1_s, a1pad_s, col2_s, act2_s,
                       w1_s, w2_s, pool_s, sem):
    # x_ref:   (N, H, W, Cin) f32      w1_hbm: (9*Cin, C1) bf16 (HBM, manual DMA)
    # b1_ref:  (1, C1) f32             w2_hbm: (9*C1, C2) bf16 (HBM, manual DMA)
    # b2_ref:  (1, C2) f32             wfc_ref: (4*C2, out) bf16
    # bfc_ref: (1, out) f32            o_ref:  (N, out) f32
    N, H, W, Cin = x_ref.shape
    C1 = w1_s.shape[1]
    C2 = w2_s.shape[1]
    M = N * H * W

    # ---- kick off weight DMAs so they overlap halo / im2col construction ----
    w1_cp = pltpu.make_async_copy(w1_hbm, w1_s, sem.at[0])
    w2_cp = pltpu.make_async_copy(w2_hbm, w2_s, sem.at[1])
    w1_cp.start()
    w2_cp.start()

    # ---- padded input (bf16): zero only the 1-px halo ring, write interior once ----
    xpad_s[:, 0:1, :, :] = jnp.zeros((N, 1, W + 2, Cin), jnp.bfloat16)
    xpad_s[:, H + 1:H + 2, :, :] = jnp.zeros((N, 1, W + 2, Cin), jnp.bfloat16)
    xpad_s[:, :, 0:1, :] = jnp.zeros((N, H + 2, 1, Cin), jnp.bfloat16)
    xpad_s[:, :, W + 1:W + 2, :] = jnp.zeros((N, H + 2, 1, Cin), jnp.bfloat16)
    xpad_s[:, 1:H + 1, 1:W + 1, :] = x_ref[...].astype(jnp.bfloat16)

    # ---- im2col for conv1: (M, 9*Cin) bf16, tap order (dy, dx) ----
    for dy in range(3):
        for dx in range(3):
            t = dy * 3 + dx
            col1_s[:, t * Cin:(t + 1) * Cin] = (
                xpad_s[:, dy:dy + H, dx:dx + W, :].reshape(M, Cin))

    # ---- halo ring of the padded act1 buffer (interior written after conv1) ----
    a1pad_s[:, 0:1, :, :] = jnp.zeros((N, 1, W + 2, C1), jnp.bfloat16)
    a1pad_s[:, H + 1:H + 2, :, :] = jnp.zeros((N, 1, W + 2, C1), jnp.bfloat16)
    a1pad_s[:, :, 0:1, :] = jnp.zeros((N, H + 2, 1, C1), jnp.bfloat16)
    a1pad_s[:, :, W + 1:W + 2, :] = jnp.zeros((N, H + 2, 1, C1), jnp.bfloat16)

    # ---- conv1: one long-K (K = 9*Cin) matmul, chunked over output channels ----
    w1_cp.wait()
    cb1 = 256 if C1 % 256 == 0 else C1
    for c0 in range(0, C1, cb1):
        a1c = jnp.dot(col1_s[...], w1_s[:, c0:c0 + cb1],
                      preferred_element_type=jnp.float32)
        a1c = jnp.maximum(a1c + b1_ref[:, c0:c0 + cb1], 0.0)        # bias + ReLU
        a1pad_s[:, 1:H + 1, 1:W + 1, c0:c0 + cb1] = (
            a1c.astype(jnp.bfloat16).reshape(N, H, W, cb1))

    # ---- im2col for conv2: (M, 9*C1) bf16 ----
    for dy in range(3):
        for dx in range(3):
            t = dy * 3 + dx
            col2_s[:, t * C1:(t + 1) * C1] = (
                a1pad_s[:, dy:dy + H, dx:dx + W, :].reshape(M, C1))

    # ---- conv2: one long-K (K = 9*C1) matmul ----
    w2_cp.wait()
    a2 = jnp.dot(col2_s[...], w2_s[...], preferred_element_type=jnp.float32)
    act2_s[...] = jnp.maximum(a2 + b2_ref[...], 0.0).reshape(N, H, W, C2)

    # ---- AdaptiveAvgPool2d((2,2)) + Flatten + Linear as ONE matmul ----
    ph, pw = H // 2, W // 2
    inv = 1.0 / float(ph * pw)
    for i in range(2):
        for j in range(2):
            r = i * 2 + j
            region = act2_s[:, i * ph:(i + 1) * ph, j * pw:(j + 1) * pw, :]
            pool_s[:, r * C2:(r + 1) * C2] = (
                (jnp.sum(region, axis=(1, 2)) * inv).astype(jnp.bfloat16))
    o_ref[...] = (jnp.dot(pool_s[...], wfc_ref[...],
                          preferred_element_type=jnp.float32) + bfc_ref[...])


# ------------------------------------------------------------------
# One-time weight preprocessing (hoisted out of the per-forward path).
# ------------------------------------------------------------------
def prepare_adaptor_kd_params(w1, b1, w2, b2, wl, bl):
    C1, Cin = w1.shape[0], w1.shape[1]
    C2 = w2.shape[0]
    out_dim = wl.shape[0]
    # OIHW -> HWIO -> (9*Cin, C1); row index = (dy*3+dx)*Cin + cin (im2col order).
    w1_flat = jnp.transpose(w1, (2, 3, 1, 0)).reshape(9 * Cin, C1).astype(jnp.bfloat16)
    w2_flat = jnp.transpose(w2, (2, 3, 1, 0)).reshape(9 * C1, C2).astype(jnp.bfloat16)
    # nn.Flatten() on NCHW pooled output orders K as (c, i, j); the kernel's pooled
    # rows are ordered (r = i*2+j, c) -> permute the Linear weight rows to match.
    w_fc = (wl.T.reshape(C2, 2, 2, out_dim).transpose(1, 2, 0, 3)
               .reshape(4 * C2, out_dim).astype(jnp.bfloat16))
    return (w1_flat, b1.reshape(1, C1).astype(jnp.float32),
            w2_flat, b2.reshape(1, C2).astype(jnp.float32),
            w_fc, bl.reshape(1, out_dim).astype(jnp.float32))


# ------------------------------------------------------------------
# Forward pass (params = prepare_adaptor_kd_params(...) reused across calls).
# ------------------------------------------------------------------
def adaptor_kd_forward(x_nchw, params):
    w1_flat, b1r, w2_flat, b2r, w_fc, blr = params
    x = jnp.transpose(x_nchw, (0, 2, 3, 1)).astype(jnp.float32)      # NCHW -> NHWC
    N, H, W, Cin = x.shape
    C1 = w1_flat.shape[1]
    C2 = w2_flat.shape[1]
    out_dim = w_fc.shape[1]
    M = N * H * W
    # AdaptiveAvgPool2d((2,2)) implemented as fixed H//2 x W//2 windows.
    # TODO(synk): generalize pooling bins for odd H/W feature maps.
    assert H % 2 == 0 and W % 2 == 0

    return pl.pallas_call(
        _adaptor_kd_kernel,
        out_shape=jax.ShapeDtypeStruct((N, out_dim), jnp.float32),
        grid_spec=pltpu.PrefetchScalarGridSpec(
            num_scalar_prefetch=0,
            grid=(1,),
            in_specs=[
                pl.BlockSpec((N, H, W, Cin), lambda i: (0, 0, 0, 0)),
                pl.BlockSpec(memory_space=pl.ANY),            # w1: manual DMA
                pl.BlockSpec((1, C1), lambda i: (0, 0)),
                pl.BlockSpec(memory_space=pl.ANY),            # w2: manual DMA
                pl.BlockSpec((1, C2), lambda i: (0, 0)),
                pl.BlockSpec((4 * C2, out_dim), lambda i: (0, 0)),
                pl.BlockSpec((1, out_dim), lambda i: (0, 0)),
            ],
            out_specs=pl.BlockSpec((N, out_dim), lambda i: (0, 0)),
            scratch_shapes=[
                pltpu.VMEM((N, H + 2, W + 2, Cin), jnp.bfloat16),   # padded input
                pltpu.VMEM((M, 9 * Cin), jnp.bfloat16),             # im2col conv1
                pltpu.VMEM((N, H + 2, W + 2, C1), jnp.bfloat16),    # padded act1
                pltpu.VMEM((M, 9 * C1), jnp.bfloat16),              # im2col conv2
                pltpu.VMEM((N, H, W, C2), jnp.float32),             # act2
                pltpu.VMEM((9 * Cin, C1), jnp.bfloat16),            # w1 VMEM copy
                pltpu.VMEM((9 * C1, C2), jnp.bfloat16),             # w2 VMEM copy
                pltpu.VMEM((N, 4 * C2), jnp.bfloat16),              # pooled rows
                pltpu.SemaphoreType.DMA((2,)),                      # weight DMAs
            ]),
        compiler_params=pltpu.CompilerParams(
            dimension_semantics=("arbitrary",)),
    )(x, w1_flat, b1r, w2_flat, b2r, w_fc, blr)


# ------------------------------------------------------------------
# Pure-JAX reference (NCHW, mirrors the PyTorch module exactly).
# ------------------------------------------------------------------
def ref_forward(x, w1, b1, w2, b2, wl, bl):
    dn = ('NCHW', 'OIHW', 'NCHW')
    y = lax.conv_general_dilated(x, w1, (1, 1), ((1, 1), (1, 1)),
                                 dimension_numbers=dn,
                                 precision=lax.Precision.HIGHEST)
    y = jnp.maximum(y + b1[None, :, None, None], 0.0)
    y = lax.conv_general_dilated(y, w2, (1, 1), ((1, 1), (1, 1)),
                                 dimension_numbers=dn,
                                 precision=lax.Precision.HIGHEST)
    y = jnp.maximum(y + b2[None, :, None, None], 0.0)
    N, C, H, W = y.shape
    y = y.reshape(N, C, 2, H // 2, 2, W // 2).mean(axis=(3, 5))   # (N, C, 2, 2)
    y = y.reshape(N, C * 4)                                        # NCHW flatten
    return jnp.dot(y, wl.T, precision=lax.Precision.HIGHEST) + bl


if __name__ == "__main__":
    # Small, module-consistent shapes: AdaptorKD(input_channels=64, output_dim=32)
    # on a (2, 64, 8, 8) NCHW input; inner 512/256 conv channels as in the module.
    N, Cin, H, W = 2, 64, 8, 8
    C1, C2, out_dim = 512, 256, 32

    key = jax.random.PRNGKey(0)
    ks = jax.random.split(key, 7)
    x = jax.random.normal(ks[0], (N, Cin, H, W), jnp.float32)
    w1 = jax.random.normal(ks[1], (C1, Cin, 3, 3), jnp.float32) * 0.05
    b1 = jax.random.normal(ks[2], (C1,), jnp.float32) * 0.05
    w2 = jax.random.normal(ks[3], (C2, C1, 3, 3), jnp.float32) * 0.02
    b2 = jax.random.normal(ks[4], (C2,), jnp.float32) * 0.02
    wl = jax.random.normal(ks[5], (out_dim, C2 * 2 * 2), jnp.float32) * 0.02
    bl = jax.random.normal(ks[6], (out_dim,), jnp.float32) * 0.02

    # One-time weight preprocessing (NOT in the per-forward jit path).
    params = prepare_adaptor_kd_params(w1, b1, w2, b2, wl, bl)
    params = jax.tree_util.tree_map(jax.block_until_ready, params)

    fwd = jax.jit(adaptor_kd_forward)
    out = jax.block_until_ready(fwd(x, params))
    assert out.shape == (N, out_dim)

    ref = ref_forward(x, w1, b1, w2, b2, wl, bl)
    if not bool(jnp.allclose(out, ref, rtol=2e-2, atol=2e-2)):
        raise AssertionError("Pallas AdaptorKD output mismatch vs JAX reference")

    print("KERNEL_OK")
</pallas_src>

<mosaic_0001>
module attributes {stable_mosaic.version = 11 : i64} {
  func.func @_adaptor_kd_kernel(%arg0: i32, %arg1: memref<2x8x8x64xf32, #tpu.memory_space<vmem>>, %arg2: memref<576x512xbf16, #tpu.memory_space<any>>, %arg3: memref<1x512xf32, #tpu.memory_space<vmem>>, %arg4: memref<4608x256xbf16, #tpu.memory_space<any>>, %arg5: memref<1x256xf32, #tpu.memory_space<vmem>>, %arg6: memref<1024x32xbf16, #tpu.memory_space<vmem>>, %arg7: memref<1x32xf32, #tpu.memory_space<vmem>>, %arg8: memref<2x32xf32, #tpu.memory_space<vmem>>, %arg9: memref<2x10x10x64xbf16, #tpu.memory_space<vmem>>, %arg10: memref<128x576xbf16, #tpu.memory_space<vmem>>, %arg11: memref<2x10x10x512xbf16, #tpu.memory_space<vmem>>, %arg12: memref<128x4608xbf16, #tpu.memory_space<vmem>>, %arg13: memref<2x8x8x256xf32, #tpu.memory_space<vmem>>, %arg14: memref<576x512xbf16, #tpu.memory_space<vmem>>, %arg15: memref<4608x256xbf16, #tpu.memory_space<vmem>>, %arg16: memref<2x1024xbf16, #tpu.memory_space<vmem>>, %arg17: memref<2x!tpu.dma_semaphore, #tpu.memory_space<semaphore_mem>>) attributes {dimension_semantics = [#tpu.dimension_semantics<arbitrary>], iteration_bounds = array<i64: 1>, scalar_prefetch = 0 : i64, scratch_operands = 9 : i64, tpu.core_type = #tpu.core_type<tc>, window_params = [{pipeline_mode = #tpu.pipeline_mode<synchronous>, transform_indices = @transform_0, window_bounds = array<i64: 2, 8, 8, 64>}, {}, {pipeline_mode = #tpu.pipeline_mode<synchronous>, transform_indices = @transform_2, window_bounds = array<i64: 1, 512>}, {}, {pipeline_mode = #tpu.pipeline_mode<synchronous>, transform_indices = @transform_4, window_bounds = array<i64: 1, 256>}, {pipeline_mode = #tpu.pipeline_mode<synchronous>, transform_indices = @transform_5, window_bounds = array<i64: 1024, 32>}, {pipeline_mode = #tpu.pipeline_mode<synchronous>, transform_indices = @transform_6, window_bounds = array<i64: 1, 32>}, {pipeline_mode = #tpu.pipeline_mode<synchronous>, transform_indices = @transform_7, window_bounds = array<i64: 2, 32>}]} {
    %c0_i32 = arith.constant 0 : i32
    %0 = tpu.memref_slice %arg17[%c0_i32] : memref<2x!tpu.dma_semaphore, #tpu.memory_space<semaphore_mem>> -> memref<1x!tpu.dma_semaphore, #tpu.memory_space<semaphore_mem>>
    %1 = tpu.memref_squeeze %0 : memref<1x!tpu.dma_semaphore, #tpu.memory_space<semaphore_mem>> -> memref<!tpu.dma_semaphore, #tpu.memory_space<semaphore_mem>>
    tpu.enqueue_dma source(%arg2 : memref<576x512xbf16, #tpu.memory_space<any>>) target(%arg14 : memref<576x512xbf16, #tpu.memory_space<vmem>>) target_semaphore(%1 : memref<!tpu.dma_semaphore, #tpu.memory_space<semaphore_mem>>)
    %c1_i32 = arith.constant 1 : i32
    %2 = tpu.memref_slice %arg17[%c1_i32] : memref<2x!tpu.dma_semaphore, #tpu.memory_space<semaphore_mem>> -> memref<1x!tpu.dma_semaphore, #tpu.memory_space<semaphore_mem>>
    %3 = tpu.memref_squeeze %2 : memref<1x!tpu.dma_semaphore, #tpu.memory_space<semaphore_mem>> -> memref<!tpu.dma_semaphore, #tpu.memory_space<semaphore_mem>>
    tpu.enqueue_dma source(%arg4 : memref<4608x256xbf16, #tpu.memory_space<any>>) target(%arg15 : memref<4608x256xbf16, #tpu.memory_space<vmem>>) target_semaphore(%3 : memref<!tpu.dma_semaphore, #tpu.memory_space<semaphore_mem>>)
    %cst = arith.constant 0.000000e+00 : bf16
    %4 = vector.broadcast %cst : bf16 to vector<2x1x10x64xbf16>
    %c0 = arith.constant 0 : index
    %c0_0 = arith.constant 0 : index
    %c0_1 = arith.constant 0 : index
    %c0_2 = arith.constant 0 : index
    %5 = vector.load %arg9[%c0, %c0_0, %c0_1, %c0_2] : memref<2x10x10x64xbf16, #tpu.memory_space<vmem>>, vector<2x1x10x64xbf16>
    tpu.vector_store %arg9[%c0, %c0_0, %c0_1, %c0_2], %4 {strides = array<i32>} : memref<2x10x10x64xbf16, #tpu.memory_space<vmem>>, vector<2x1x10x64xbf16>,
    %cst_3 = arith.constant 0.000000e+00 : bf16
    %6 = vector.broadcast %cst_3 : bf16 to vector<2x1x10x64xbf16>
    %c0_4 = arith.constant 0 : index
    %c9 = arith.constant 9 : index
    %c0_5 = arith.constant 0 : index
    %c0_6 = arith.constant 0 : index
    %7 = vector.load %arg9[%c0_4, %c9, %c0_5, %c0_6] : memref<2x10x10x64xbf16, #tpu.memory_space<vmem>>, vector<2x1x10x64xbf16>
    tpu.vector_store %arg9[%c0_4, %c9, %c0_5, %c0_6], %6 {strides = array<i32>} : memref<2x10x10x64xbf16, #tpu.memory_space<vmem>>, vector<2x1x10x64xbf16>,
    %cst_7 = arith.constant 0.000000e+00 : bf16
    %8 = vector.broadcast %cst_7 : bf16 to vector<2x10x1x64xbf16>
    %c0_8 = arith.constant 0 : index
    %c0_9 = arith.constant 0 : index
    %c0_10 = arith.constant 0 : index
    %c0_11 = arith.constant 0 : index
    %9 = vector.load %arg9[%c0_8, %c0_9, %c0_10, %c0_11] : memref<2x10x10x64xbf16, #tpu.memory_space<vmem>>, vector<2x10x1x64xbf16>
    tpu.vector_store %arg9[%c0_8, %c0_9, %c0_10, %c0_11], %8 {strides = array<i32>} : memref<2x10x10x64xbf16, #tpu.memory_space<vmem>>, vector<2x10x1x64xbf16>,
    %cst_12 = arith.constant 0.000000e+00 : bf16
    %10 = vector.broadcast %cst_12 : bf16 to vector<2x10x1x64xbf16>
    %c0_13 = arith.constant 0 : index
    %c0_14 = arith.constant 0 : index
    %c9_15 = arith.constant 9 : index
    %c0_16 = arith.constant 0 : index
    %11 = vector.load %arg9[%c0_13, %c0_14, %c9_15, %c0_16] : memref<2x10x10x64xbf16, #tpu.memory_space<vmem>>, vector<2x10x1x64xbf16>
    tpu.vector_store %arg9[%c0_13, %c0_14, %c9_15, %c0_16], %10 {strides = array<i32>} : memref<2x10x10x64xbf16, #tpu.memory_space<vmem>>, vector<2x10x1x64xbf16>,
    %c0_17 = arith.constant 0 : index
    %c0_18 = arith.constant 0 : index
    %c0_19 = arith.constant 0 : index
    %c0_20 = arith.constant 0 : index
    %12 = vector.load %arg1[%c0_17, %c0_18, %c0_19, %c0_20] : memref<2x8x8x64xf32, #tpu.memory_space<vmem>>, vector<2x8x8x64xf32>
    %13 = arith.truncf %12 : vector<2x8x8x64xf32> to vector<2x8x8x64xbf16>
    %c0_21 = arith.constant 0 : index
    %c1 = arith.constant 1 : index
    %c1_22 = arith.constant 1 : index
    %c0_23 = arith.constant 0 : index
    %14 = vector.load %arg9[%c0_21, %c1, %c1_22, %c0_23] : memref<2x10x10x64xbf16, #tpu.memory_space<vmem>>, vector<2x8x8x64xbf16>
    tpu.vector_store %arg9[%c0_21, %c1, %c1_22, %c0_23], %13 {strides = array<i32>} : memref<2x10x10x64xbf16, #tpu.memory_space<vmem>>, vector<2x8x8x64xbf16>,
    %c0_24 = arith.constant 0 : index
    %c0_25 = arith.constant 0 : index
    %c0_26 = arith.constant 0 : index
    %c0_27 = arith.constant 0 : index
    %15 = vector.load %arg9[%c0_24, %c0_25, %c0_26, %c0_27] : memref<2x10x10x64xbf16, #tpu.memory_space<vmem>>, vector<2x8x8x64xbf16>
    %16 = vector.shape_cast %15 : vector<2x8x8x64xbf16> to vector<128x64xbf16>
    %c0_28 = arith.constant 0 : index
    %c0_29 = arith.constant 0 : index
    %17 = vector.load %arg10[%c0_28, %c0_29] : memref<128x576xbf16, #tpu.memory_space<vmem>>, vector<128x64xbf16>
    tpu.vector_store %arg10[%c0_28, %c0_29], %16 {strides = array<i32>} : memref<128x576xbf16, #tpu.memory_space<vmem>>, vector<128x64xbf16>,
    %c0_30 = arith.constant 0 : index
    %c0_31 = arith.constant 0 : index
    %c1_32 = arith.constant 1 : index
    %c0_33 = arith.constant 0 : index
    %18 = vector.load %arg9[%c0_30, %c0_31, %c1_32, %c0_33] : memref<2x10x10x64xbf16, #tpu.memory_space<vmem>>, vector<2x8x8x64xbf16>
    %19 = vector.shape_cast %18 : vector<2x8x8x64xbf16> to vector<128x64xbf16>
    %c0_34 = arith.constant 0 : index
    %c64 = arith.constant 64 : index
    %20 = vector.load %arg10[%c0_34, %c64] : memref<128x576xbf16, #tpu.memory_space<vmem>>, vector<128x64xbf16>
    tpu.vector_store %arg10[%c0_34, %c64], %19 {strides = array<i32>} : memref<128x576xbf16, #tpu.memory_space<vmem>>, vector<128x64xbf16>,
    %c0_35 = arith.constant 0 : index
    %c0_36 = arith.constant 0 : index
    %c2 = arith.constant 2 : index
    %c0_37 = arith.constant 0 : index
    %21 = vector.load %arg9[%c0_35, %c0_36, %c2, %c0_37] : memref<2x10x10x64xbf16, #tpu.memory_space<vmem>>, vector<2x8x8x64xbf16>
    %22 = vector.shape_cast %21 : vector<2x8x8x64xbf16> to vector<128x64xbf16>
    %c0_38 = arith.constant 0 : index
    %c128 = arith.constant 128 : index
    %23 = vector.load %arg10[%c0_38, %c128] : memref<128x576xbf16, #tpu.memory_space<vmem>>, vector<128x64xbf16>
    tpu.vector_store %arg10[%c0_38, %c128], %22 {strides = array<i32>} : memref<128x576xbf16, #tpu.memory_space<vmem>>, vector<128x64xbf16>,
    %c0_39 = arith.constant 0 : index
    %c1_40 = arith.constant 1 : index
    %c0_41 = arith.constant 0 : index
    %c0_42 = arith.constant 0 : index
    %24 = vector.load %arg9[%c0_39, %c1_40, %c0_41, %c0_42] : memref<2x10x10x64xbf16, #tpu.memory_space<vmem>>, vector<2x8x8x64xbf16>
    %25 = vector.shape_cast %24 : vector<2x8x8x64xbf16> to vector<128x64xbf16>
    %c0_43 = arith.constant 0 : index
    %c192 = arith.constant 192 : index
    %26 = vector.load %arg10[%c0_43, %c192] : memref<128x576xbf16, #tpu.memory_space<vmem>>, vector<128x64xbf16>
    tpu.vector_store %arg10[%c0_43, %c192], %25 {strides = array<i32>} : memref<128x576xbf16, #tpu.memory_space<vmem>>, vector<128x64xbf16>,
    %c0_44 = arith.constant 0 : index
    %c1_45 = arith.constant 1 : index
    %c1_46 = arith.constant 1 : index
    %c0_47 = arith.constant 0 : index
    %27 = vector.load %arg9[%c0_44, %c1_45, %c1_46, %c0_47] : memref<2x10x10x64xbf16, #tpu.memory_space<vmem>>, vector<2x8x8x64xbf16>
    %28 = vector.shape_cast %27 : vector<2x8x8x64xbf16> to vector<128x64xbf16>
    %c0_48 = arith.constant 0 : index
    %c256 = arith.constant 256 : index
    %29 = vector.load %arg10[%c0_48, %c256] : memref<128x576xbf16, #tpu.memory_space<vmem>>, vector<128x64xbf16>
    tpu.vector_store %arg10[%c0_48, %c256], %28 {strides = array<i32>} : memref<128x576xbf16, #tpu.memory_space<vmem>>, vector<128x64xbf16>,
    %c0_49 = arith.constant 0 : index
    %c1_50 = arith.constant 1 : index
    %c2_51 = arith.constant 2 : index
    %c0_52 = arith.constant 0 : index
    %30 = vector.load %arg9[%c0_49, %c1_50, %c2_51, %c0_52] : memref<2x10x10x64xbf16, #tpu.memory_space<vmem>>, vector<2x8x8x64xbf16>
    %31 = vector.shape_cast %30 : vector<2x8x8x64xbf16> to vector<128x64xbf16>
    %c0_53 = arith.constant 0 : index
    %c320 = arith.constant 320 : index
    %32 = vector.load %arg10[%c0_53, %c320] : memref<128x576xbf16, #tpu.memory_space<vmem>>, vector<128x64xbf16>
    tpu.vector_store %arg10[%c0_53, %c320], %31 {strides = array<i32>} : memref<128x576xbf16, #tpu.memory_space<vmem>>, vector<128x64xbf16>,
    %c0_54 = arith.constant 0 : index
    %c2_55 = arith.constant 2 : index
    %c0_56 = arith.constant 0 : index
    %c0_57 = arith.constant 0 : index
    %33 = vector.load %arg9[%c0_54, %c2_55, %c0_56, %c0_57] : memref<2x10x10x64xbf16, #tpu.memory_space<vmem>>, vector<2x8x8x64xbf16>
    %34 = vector.shape_cast %33 : vector<2x8x8x64xbf16> to vector<128x64xbf16>
    %c0_58 = arith.constant 0 : index
    %c384 = arith.constant 384 : index
    %35 = vector.load %arg10[%c0_58, %c384] : memref<128x576xbf16, #tpu.memory_space<vmem>>, vector<128x64xbf16>
    tpu.vector_store %arg10[%c0_58, %c384], %34 {strides = array<i32>} : memref<128x576xbf16, #tpu.memory_space<vmem>>, vector<128x64xbf16>,
    %c0_59 = arith.constant 0 : index
    %c2_60 = arith.constant 2 : index
    %c1_61 = arith.constant 1 : index
    %c0_62 = arith.constant 0 : index
    %36 = vector.load %arg9[%c0_59, %c2_60, %c1_61, %c0_62] : memref<2x10x10x64xbf16, #tpu.memory_space<vmem>>, vector<2x8x8x64xbf16>
    %37 = vector.shape_cast %36 : vector<2x8x8x64xbf16> to vector<128x64xbf16>
    %c0_63 = arith.constant 0 : index
    %c448 = arith.constant 448 : index
    %38 = vector.load %arg10[%c0_63, %c448] : memref<128x576xbf16, #tpu.memory_space<vmem>>, vector<128x64xbf16>
    tpu.vector_store %arg10[%c0_63, %c448], %37 {strides = array<i32>} : memref<128x576xbf16, #tpu.memory_space<vmem>>, vector<128x64xbf16>,
    %c0_64 = arith.constant 0 : index
    %c2_65 = arith.constant 2 : index
    %c2_66 = arith.constant 2 : index
    %c0_67 = arith.constant 0 : index
    %39 = vector.load %arg9[%c0_64, %c2_65, %c2_66, %c0_67] : memref<2x10x10x64xbf16, #tpu.memory_space<vmem>>, vector<2x8x8x64xbf16>
    %40 = vector.shape_cast %39 : vector<2x8x8x64xbf16> to vector<128x64xbf16>
    %c0_68 = arith.constant 0 : index
    %c512 = arith.constant 512 : index
    %41 = vector.load %arg10[%c0_68, %c512] : memref<128x576xbf16, #tpu.memory_space<vmem>>, vector<128x64xbf16>
    tpu.vector_store %arg10[%c0_68, %c512], %40 {strides = array<i32>} : memref<128x576xbf16, #tpu.memory_space<vmem>>, vector<128x64xbf16>,
    %cst_69 = arith.constant 0.000000e+00 : bf16
    %42 = vector.broadcast %cst_69 : bf16 to vector<2x1x10x512xbf16>
    %c0_70 = arith.constant 0 : index
    %c0_71 = arith.constant 0 : index
    %c0_72 = arith.constant 0 : index
    %c0_73 = arith.constant 0 : index
    %43 = vector.load %arg11[%c0_70, %c0_71, %c0_72, %c0_73] : memref<2x10x10x512xbf16, #tpu.memory_space<vmem>>, vector<2x1x10x512xbf16>
    tpu.vector_store %arg11[%c0_70, %c0_71, %c0_72, %c0_73], %42 {strides = array<i32>} : memref<2x10x10x512xbf16, #tpu.memory_space<vmem>>, vector<2x1x10x512xbf16>,
    %cst_74 = arith.constant 0.000000e+00 : bf16
    %44 = vector.broadcast %cst_74 : bf16 to vector<2x1x10x512xbf16>
    %c0_75 = arith.constant 0 : index
    %c9_76 = arith.constant 9 : index
    %c0_77 = arith.constant 0 : index
    %c0_78 = arith.constant 0 : index
    %45 = vector.load %arg11[%c0_75, %c9_76, %c0_77, %c0_78] : memref<2x10x10x512xbf16, #tpu.memory_space<vmem>>, vector<2x1x10x512xbf16>
    tpu.vector_store %arg11[%c0_75, %c9_76, %c0_77, %c0_78], %44 {strides = array<i32>} : memref<2x10x10x512xbf16, #tpu.memory_space<vmem>>, vector<2x1x10x512xbf16>,
    %cst_79 = arith.constant 0.000000e+00 : bf16
    %46 = vector.broadcast %cst_79 : bf16 to vector<2x10x1x512xbf16>
    %c0_80 = arith.constant 0 : index
    %c0_81 = arith.constant 0 : index
    %c0_82 = arith.constant 0 : index
    %c0_83 = arith.constant 0 : index
    %47 = vector.load %arg11[%c0_80, %c0_81, %c0_82, %c0_83] : memref<2x10x10x512xbf16, #tpu.memory_space<vmem>>, vector<2x10x1x512xbf16>
    tpu.vector_store %arg11[%c0_80, %c0_81, %c0_82, %c0_83], %46 {strides = array<i32>} : memref<2x10x10x512xbf16, #tpu.memory_space<vmem>>, vector<2x10x1x512xbf16>,
    %cst_84 = arith.constant 0.000000e+00 : bf16
    %48 = vector.broadcast %cst_84 : bf16 to vector<2x10x1x512xbf16>
    %c0_85 = arith.constant 0 : index
    %c0_86 = arith.constant 0 : index
    %c9_87 = arith.constant 9 : index
    %c0_88 = arith.constant 0 : index
    %49 = vector.load %arg11[%c0_85, %c0_86, %c9_87, %c0_88] : memref<2x10x10x512xbf16, #tpu.memory_space<vmem>>, vector<2x10x1x512xbf16>
    tpu.vector_store %arg11[%c0_85, %c0_86, %c9_87, %c0_88], %48 {strides = array<i32>} : memref<2x10x10x512xbf16, #tpu.memory_space<vmem>>, vector<2x10x1x512xbf16>,
    %c0_i32_89 = arith.constant 0 : i32
    %50 = tpu.memref_slice %arg17[%c0_i32_89] : memref<2x!tpu.dma_semaphore, #tpu.memory_space<semaphore_mem>> -> memref<1x!tpu.dma_semaphore, #tpu.memory_space<semaphore_mem>>
    %51 = tpu.memref_squeeze %50 : memref<1x!tpu.dma_semaphore, #tpu.memory_space<semaphore_mem>> -> memref<!tpu.dma_semaphore, #tpu.memory_space<semaphore_mem>>
    tpu.wait_dma2 semaphore(%51 : memref<!tpu.dma_semaphore, #tpu.memory_space<semaphore_mem>>) src(%arg2 : memref<576x512xbf16, #tpu.memory_space<any>>) dst(%arg14 : memref<576x512xbf16, #tpu.memory_space<vmem>>)
    %c0_90 = arith.constant 0 : index
    %c0_91 = arith.constant 0 : index
    %52 = vector.load %arg10[%c0_90, %c0_91] : memref<128x576xbf16, #tpu.memory_space<vmem>>, vector<128x576xbf16>
    %c0_92 = arith.constant 0 : index
    %c0_93 = arith.constant 0 : index
    %53 = vector.load %arg14[%c0_92, %c0_93] : memref<576x512xbf16, #tpu.memory_space<vmem>>, vector<576x256xbf16>
    %cst_94 = arith.constant dense<0.000000e+00> : vector<128x256xf32>
    %54 = tpu.matmul %52, %53, %cst_94 {dimension_numbers = #tpu.dot_dimension_numbers<[1], [0], [0], [1], [0, 0, 1, 1], [], []>} : vector<128x576xbf16>, vector<576x256xbf16>, vector<128x256xf32> -> vector<128x256xf32>
    %c0_95 = arith.constant 0 : index
    %c0_96 = arith.constant 0 : index
    %55 = vector.load %arg3[%c0_95, %c0_96] : memref<1x512xf32, #tpu.memory_space<vmem>>, vector<1x256xf32>
    %56 = vector.broadcast %55 : vector<1x256xf32> to vector<128x256xf32>
    %57 = arith.addf %54, %56 : vector<128x256xf32>
    %cst_97 = arith.constant 0.000000e+00 : f32
    %58 = vector.broadcast %cst_97 : f32 to vector<128x256xf32>
    %59 = arith.maximumf %57, %58 : vector<128x256xf32>
    %60 = arith.truncf %59 : vector<128x256xf32> to vector<128x256xbf16>
    %61 = vector.shape_cast %60 : vector<128x256xbf16> to vector<2x8x8x256xbf16>
    %c0_98 = arith.constant 0 : index
    %c1_99 = arith.constant 1 : index
    %c1_100 = arith.constant 1 : index
    %c0_101 = arith.constant 0 : index
    %62 = vector.load %arg11[%c0_98, %c1_99, %c1_100, %c0_101] : memref<2x10x10x512xbf16, #tpu.memory_space<vmem>>, vector<2x8x8x256xbf16>
    tpu.vector_store %arg11[%c0_98, %c1_99, %c1_100, %c0_101], %61 {strides = array<i32>} : memref<2x10x10x512xbf16, #tpu.memory_space<vmem>>, vector<2x8x8x256xbf16>,
    %c0_102 = arith.constant 0 : index
    %c0_103 = arith.constant 0 : index
    %63 = vector.load %arg10[%c0_102, %c0_103] : memref<128x576xbf16, #tpu.memory_space<vmem>>, vector<128x576xbf16>
    %c0_104 = arith.constant 0 : index
    %c256_105 = arith.constant 256 : index
    %64 = vector.load %arg14[%c0_104, %c256_105] : memref<576x512xbf16, #tpu.memory_space<vmem>>, vector<576x256xbf16>
    %cst_106 = arith.constant dense<0.000000e+00> : vector<128x256xf32>
    %65 = tpu.matmul %63, %64, %cst_106 {dimension_numbers = #tpu.dot_dimension_numbers<[1], [0], [0], [1], [0, 0, 1, 1], [], []>} : vector<128x576xbf16>, vector<576x256xbf16>, vector<128x256xf32> -> vector<128x256xf32>
    %c0_107 = arith.constant 0 : index
    %c256_108 = arith.constant 256 : index
    %66 = vector.load %arg3[%c0_107, %c256_108] : memref<1x512xf32, #tpu.memory_space<vmem>>, vector<1x256xf32>
    %67 = vector.broadcast %66 : vector<1x256xf32> to vector<128x256xf32>
    %68 = arith.addf %65, %67 : vector<128x256xf32>
    %cst_109 = arith.constant 0.000000e+00 : f32
    %69 = vector.broadcast %cst_109 : f32 to vector<128x256xf32>
    %70 = arith.maximumf %68, %69 : vector<128x256xf32>
    %71 = arith.truncf %70 : vector<128x256xf32> to vector<128x256xbf16>
    %72 = vector.shape_cast %71 : vector<128x256xbf16> to vector<2x8x8x256xbf16>
    %c0_110 = arith.constant 0 : index
    %c1_111 = arith.constant 1 : index
    %c1_112 = arith.constant 1 : index
    %c256_113 = arith.constant 256 : index
    %73 = vector.load %arg11[%c0_110, %c1_111, %c1_112, %c256_113] : memref<2x10x10x512xbf16, #tpu.memory_space<vmem>>, vector<2x8x8x256xbf16>
    tpu.vector_store %arg11[%c0_110, %c1_111, %c1_112, %c256_113], %72 {strides = array<i32>} : memref<2x10x10x512xbf16, #tpu.memory_space<vmem>>, vector<2x8x8x256xbf16>,
    %c0_114 = arith.constant 0 : index
    %c0_115 = arith.constant 0 : index
    %c0_116 = arith.constant 0 : index
    %c0_117 = arith.constant 0 : index
    %74 = vector.load %arg11[%c0_114, %c0_115, %c0_116, %c0_117] : memref<2x10x10x512xbf16, #tpu.memory_space<vmem>>, vector<2x8x8x512xbf16>
    %75 = vector.shape_cast %74 : vector<2x8x8x512xbf16> to vector<128x512xbf16>
    %c0_118 = arith.constant 0 : index
    %c0_119 = arith.constant 0 : index
    %76 = vector.load %arg12[%c0_118, %c0_119] : memref<128x4608xbf16, #tpu.memory_space<vmem>>, vector<128x512xbf16>
    tpu.vector_store %arg12[%c0_118, %c0_119], %75 {strides = array<i32>} : memref<128x4608xbf16, #tpu.memory_space<vmem>>, vector<128x512xbf16>,
    %c0_120 = arith.constant 0 : index
    %c0_121 = arith.constant 0 : index
    %c1_122 = arith.constant 1 : index
    %c0_123 = arith.constant 0 : index
    %77 = vector.load %arg11[%c0_120, %c0_121, %c1_122, %c0_123] : memref<2x10x10x512xbf16, #tpu.memory_space<vmem>>, vector<2x8x8x512xbf16>
    %78 = vector.shape_cast %77 : vector<2x8x8x512xbf16> to vector<128x512xbf16>
    %c0_124 = arith.constant 0 : index
    %c512_125 = arith.constant 512 : index
    %79 = vector.load %arg12[%c0_124, %c512_125] : memref<128x4608xbf16, #tpu.memory_space<vmem>>, vector<128x512xbf16>
    tpu.vector_store %arg12[%c0_124, %c512_125], %78 {strides = array<i32>} : memref<128x4608xbf16, #tpu.memory_space<vmem>>, vector<128x512xbf16>,
    %c0_126 = arith.constant 0 : index
    %c0_127 = arith.constant 0 : index
    %c2_128 = arith.constant 2 : index
    %c0_129 = arith.constant 0 : index
    %80 = vector.load %arg11[%c0_126, %c0_127, %c2_128, %c0_129] : memref<2x10x10x512xbf16, #tpu.memory_space<vmem>>, vector<2x8x8x512xbf16>
    %81 = vector.shape_cast %80 : vector<2x8x8x512xbf16> to vector<128x512xbf16>
    %c0_130 = arith.constant 0 : index
    %c1024 = arith.constant 1024 : index
    %82 = vector.load %arg12[%c0_130, %c1024] : memref<128x4608xbf16, #tpu.memory_space<vmem>>, vector<128x512xbf16>
    tpu.vector_store %arg12[%c0_130, %c1024], %81 {strides = array<i32>} : memref<128x4608xbf16, #tpu.memory_space<vmem>>, vector<128x512xbf16>,
    %c0_131 = arith.constant 0 : index
    %c1_132 = arith.constant 1 : index
    %c0_133 = arith.constant 0 : index
    %c0_134 = arith.constant 0 : index
    %83 = vector.load %arg11[%c0_131, %c1_132, %c0_133, %c0_134] : memref<2x10x10x512xbf16, #tpu.memory_space<vmem>>, vector<2x8x8x512xbf16>
    %84 = vector.shape_cast %83 : vector<2x8x8x512xbf16> to vector<128x512xbf16>
    %c0_135 = arith.constant 0 : index
    %c1536 = arith.constant 1536 : index
    %85 = vector.load %arg12[%c0_135, %c1536] : memref<128x4608xbf16, #tpu.memory_space<vmem>>, vector<128x512xbf16>
    tpu.vector_store %arg12[%c0_135, %c1536], %84 {strides = array<i32>} : memref<128x4608xbf16, #tpu.memory_space<vmem>>, vector<128x512xbf16>,
    %c0_136 = arith.constant 0 : index
    %c1_137 = arith.constant 1 : index
    %c1_138 = arith.constant 1 : index
    %c0_139 = arith.constant 0 : index
    %86 = vector.load %arg11[%c0_136, %c1_137, %c1_138, %c0_139] : memref<2x10x10x512xbf16, #tpu.memory_space<vmem>>, vector<2x8x8x512xbf16>
    %87 = vector.shape_cast %86 : vector<2x8x8x512xbf16> to vector<128x512xbf16>
    %c0_140 = arith.constant 0 : index
    %c2048 = arith.constant 2048 : index
    %88 = vector.load %arg12[%c0_140, %c2048] : memref<128x4608xbf16, #tpu.memory_space<vmem>>, vector<128x512xbf16>
    tpu.vector_store %arg12[%c0_140, %c2048], %87 {strides = array<i32>} : memref<128x4608xbf16, #tpu.memory_space<vmem>>, vector<128x512xbf16>,
    %c0_141 = arith.constant 0 : index
    %c1_142 = arith.constant 1 : index
    %c2_143 = arith.constant 2 : index
    %c0_144 = arith.constant 0 : index
    %89 = vector.load %arg11[%c0_141, %c1_142, %c2_143, %c0_144] : memref<2x10x10x512xbf16, #tpu.memory_space<vmem>>, vector<2x8x8x512xbf16>
    %90 = vector.shape_cast %89 : vector<2x8x8x512xbf16> to vector<128x512xbf16>
    %c0_145 = arith.constant 0 : index
    %c2560 = arith.constant 2560 : index
    %91 = vector.load %arg12[%c0_145, %c2560] : memref<128x4608xbf16, #tpu.memory_space<vmem>>, vector<128x512xbf16>
    tpu.vector_store %arg12[%c0_145, %c2560], %90 {strides = array<i32>} : memref<128x4608xbf16, #tpu.memory_space<vmem>>, vector<128x512xbf16>,
    %c0_146 = arith.constant 0 : index
    %c2_147 = arith.constant 2 : index
    %c0_148 = arith.constant 0 : index
    %c0_149 = arith.constant 0 : index
    %92 = vector.load %arg11[%c0_146, %c2_147, %c0_148, %c0_149] : memref<2x10x10x512xbf16, #tpu.memory_space<vmem>>, vector<2x8x8x512xbf16>
    %93 = vector.shape_cast %92 : vector<2x8x8x512xbf16> to vector<128x512xbf16>
    %c0_150 = arith.constant 0 : index
    %c3072 = arith.constant 3072 : index
    %94 = vector.load %arg12[%c0_150, %c3072] : memref<128x4608xbf16, #tpu.memory_space<vmem>>, vector<128x512xbf16>
    tpu.vector_store %arg12[%c0_150, %c3072], %93 {strides = array<i32>} : memref<128x4608xbf16, #tpu.memory_space<vmem>>, vector<128x512xbf16>,
    %c0_151 = arith.constant 0 : index
    %c2_152 = arith.constant 2 : index
    %c1_153 = arith.constant 1 : index
    %c0_154 = arith.constant 0 : index
    %95 = vector.load %arg11[%c0_151, %c2_152, %c1_153, %c0_154] : memref<2x10x10x512xbf16, #tpu.memory_space<vmem>>, vector<2x8x8x512xbf16>
    %96 = vector.shape_cast %95 : vector<2x8x8x512xbf16> to vector<128x512xbf16>
    %c0_155 = arith.constant 0 : index
    %c3584 = arith.constant 3584 : index
    %97 = vector.load %arg12[%c0_155, %c3584] : memref<128x4608xbf16, #tpu.memory_space<vmem>>, vector<128x512xbf16>
    tpu.vector_store %arg12[%c0_155, %c3584], %96 {strides = array<i32>} : memref<128x4608xbf16, #tpu.memory_space<vmem>>, vector<128x512xbf16>,
    %c0_156 = arith.constant 0 : index
    %c2_157 = arith.constant 2 : index
    %c2_158 = arith.constant 2 : index
    %c0_159 = arith.constant 0 : index
    %98 = vector.load %arg11[%c0_156, %c2_157, %c2_158, %c0_159] : memref<2x10x10x512xbf16, #tpu.memory_space<vmem>>, vector<2x8x8x512xbf16>
    %99 = vector.shape_cast %98 : vector<2x8x8x512xbf16> to vector<128x512xbf16>
    %c0_160 = arith.constant 0 : index
    %c4096 = arith.constant 4096 : index
    %100 = vector.load %arg12[%c0_160, %c4096] : memref<128x4608xbf16, #tpu.memory_space<vmem>>, vector<128x512xbf16>
    tpu.vector_store %arg12[%c0_160, %c4096], %99 {strides = array<i32>} : memref<128x4608xbf16, #tpu.memory_space<vmem>>, vector<128x512xbf16>,
    %c1_i32_161 = arith.constant 1 : i32
    %101 = tpu.memref_slice %arg17[%c1_i32_161] : memref<2x!tpu.dma_semaphore, #tpu.memory_space<semaphore_mem>> -> memref<1x!tpu.dma_semaphore, #tpu.memory_space<semaphore_mem>>
    %102 = tpu.memref_squeeze %101 : memref<1x!tpu.dma_semaphore, #tpu.memory_space<semaphore_mem>> -> memref<!tpu.dma_semaphore, #tpu.memory_space<semaphore_mem>>
    tpu.wait_dma2 semaphore(%102 : memref<!tpu.dma_semaphore, #tpu.memory_space<semaphore_mem>>) src(%arg4 : memref<4608x256xbf16, #tpu.memory_space<any>>) dst(%arg15 : memref<4608x256xbf16, #tpu.memory_space<vmem>>)
    %c0_162 = arith.constant 0 : index
    %c0_163 = arith.constant 0 : index
    %103 = vector.load %arg12[%c0_162, %c0_163] : memref<128x4608xbf16, #tpu.memory_space<vmem>>, vector<128x4608xbf16>
    %c0_164 = arith.constant 0 : index
    %c0_165 = arith.constant 0 : index
    %104 = vector.load %arg15[%c0_164, %c0_165] : memref<4608x256xbf16, #tpu.memory_space<vmem>>, vector<4608x256xbf16>
    %cst_166 = arith.constant dense<0.000000e+00> : vector<128x256xf32>
    %105 = tpu.matmul %103, %104, %cst_166 {dimension_numbers = #tpu.dot_dimension_numbers<[1], [0], [0], [1], [0, 0, 1, 1], [], []>} : vector<128x4608xbf16>, vector<4608x256xbf16>, vector<128x256xf32> -> vector<128x256xf32>
    %c0_167 = arith.constant 0 : index
    %c0_168 = arith.constant 0 : index
    %106 = vector.load %arg5[%c0_167, %c0_168] : memref<1x256xf32, #tpu.memory_space<vmem>>, vector<1x256xf32>
    %107 = vector.broadcast %106 : vector<1x256xf32> to vector<128x256xf32>
    %108 = arith.addf %105, %107 : vector<128x256xf32>
    %cst_169 = arith.constant 0.000000e+00 : f32
    %109 = vector.broadcast %cst_169 : f32 to vector<128x256xf32>
    %110 = arith.maximumf %108, %109 : vector<128x256xf32>
    %111 = vector.shape_cast %110 : vector<128x256xf32> to vector<2x8x8x256xf32>
    %c0_170 = arith.constant 0 : index
    %c0_171 = arith.constant 0 : index
    %c0_172 = arith.constant 0 : index
    %c0_173 = arith.constant 0 : index
    %112 = vector.load %arg13[%c0_170, %c0_171, %c0_172, %c0_173] : memref<2x8x8x256xf32, #tpu.memory_space<vmem>>, vector<2x8x8x256xf32>
    tpu.vector_store %arg13[%c0_170, %c0_171, %c0_172, %c0_173], %111 {strides = array<i32>} : memref<2x8x8x256xf32, #tpu.memory_space<vmem>>, vector<2x8x8x256xf32>,
    %c0_174 = arith.constant 0 : index
    %c0_175 = arith.constant 0 : index
    %c0_176 = arith.constant 0 : index
    %c0_177 = arith.constant 0 : index
    %113 = vector.load %arg13[%c0_174, %c0_175, %c0_176, %c0_177] : memref<2x8x8x256xf32, #tpu.memory_space<vmem>>, vector<2x4x4x256xf32>
    %cst_178 = arith.constant dense<0.000000e+00> : vector<2x256xf32>
    %114 = vector.multi_reduction <add>, %113, %cst_178 [1, 2] : vector<2x4x4x256xf32> to vector<2x256xf32>
    %cst_179 = arith.constant 6.250000e-02 : f32
    %115 = vector.broadcast %cst_179 : f32 to vector<2x256xf32>
    %116 = arith.mulf %114, %115 : vector<2x256xf32>
    %117 = arith.truncf %116 : vector<2x256xf32> to vector<2x256xbf16>
    %c0_180 = arith.constant 0 : index
    %c0_181 = arith.constant 0 : index
    %118 = vector.load %arg16[%c0_180, %c0_181] : memref<2x1024xbf16, #tpu.memory_space<vmem>>, vector<2x256xbf16>
    tpu.vector_store %arg16[%c0_180, %c0_181], %117 {strides = array<i32>} : memref<2x1024xbf16, #tpu.memory_space<vmem>>, vector<2x256xbf16>,
    %c0_182 = arith.constant 0 : index
    %c0_183 = arith.constant 0 : index
    %c4 = arith.constant 4 : index
    %c0_184 = arith.constant 0 : index
    %119 = vector.load %arg13[%c0_182, %c0_183, %c4, %c0_184] : memref<2x8x8x256xf32, #tpu.memory_space<vmem>>, vector<2x4x4x256xf32>
    %cst_185 = arith.constant dense<0.000000e+00> : vector<2x256xf32>
    %120 = vector.multi_reduction <add>, %119, %cst_185 [1, 2] : vector<2x4x4x256xf32> to vector<2x256xf32>
    %cst_186 = arith.constant 6.250000e-02 : f32
    %121 = vector.broadcast %cst_186 : f32 to vector<2x256xf32>
    %122 = arith.mulf %120, %121 : vector<2x256xf32>
    %123 = arith.truncf %122 : vector<2x256xf32> to vector<2x256xbf16>
    %c0_187 = arith.constant 0 : index
    %c256_188 = arith.constant 256 : index
    %124 = vector.load %arg16[%c0_187, %c256_188] : memref<2x1024xbf16, #tpu.memory_space<vmem>>, vector<2x256xbf16>
    tpu.vector_store %arg16[%c0_187, %c256_188], %123 {strides = array<i32>} : memref<2x1024xbf16, #tpu.memory_space<vmem>>, vector<2x256xbf16>,
    %c0_189 = arith.constant 0 : index
    %c4_190 = arith.constant 4 : index
    %c0_191 = arith.constant 0 : index
    %c0_192 = arith.constant 0 : index
    %125 = vector.load %arg13[%c0_189, %c4_190, %c0_191, %c0_192] : memref<2x8x8x256xf32, #tpu.memory_space<vmem>>, vector<2x4x4x256xf32>
    %cst_193 = arith.constant dense<0.000000e+00> : vector<2x256xf32>
    %126 = vector.multi_reduction <add>, %125, %cst_193 [1, 2] : vector<2x4x4x256xf32> to vector<2x256xf32>
    %cst_194 = arith.constant 6.250000e-02 : f32
    %127 = vector.broadcast %cst_194 : f32 to vector<2x256xf32>
    %128 = arith.mulf %126, %127 : vector<2x256xf32>
    %129 = arith.truncf %128 : vector<2x256xf32> to vector<2x256xbf16>
    %c0_195 = arith.constant 0 : index
    %c512_196 = arith.constant 512 : index
    %130 = vector.load %arg16[%c0_195, %c512_196] : memref<2x1024xbf16, #tpu.memory_space<vmem>>, vector<2x256xbf16>
    tpu.vector_store %arg16[%c0_195, %c512_196], %129 {strides = array<i32>} : memref<2x1024xbf16, #tpu.memory_space<vmem>>, vector<2x256xbf16>,
    %c0_197 = arith.constant 0 : index
    %c4_198 = arith.constant 4 : index
    %c4_199 = arith.constant 4 : index
    %c0_200 = arith.constant 0 : index
    %131 = vector.load %arg13[%c0_197, %c4_198, %c4_199, %c0_200] : memref<2x8x8x256xf32, #tpu.memory_space<vmem>>, vector<2x4x4x256xf32>
    %cst_201 = arith.constant dense<0.000000e+00> : vector<2x256xf32>
    %132 = vector.multi_reduction <add>, %131, %cst_201 [1, 2] : vector<2x4x4x256xf32> to vector<2x256xf32>
    %cst_202 = arith.constant 6.250000e-02 : f32
    %133 = vector.broadcast %cst_202 : f32 to vector<2x256xf32>
    %134 = arith.mulf %132, %133 : vector<2x256xf32>
    %135 = arith.truncf %134 : vector<2x256xf32> to vector<2x256xbf16>
    %c0_203 = arith.constant 0 : index
    %c768 = arith.constant 768 : index
    %136 = vector.load %arg16[%c0_203, %c768] : memref<2x1024xbf16, #tpu.memory_space<vmem>>, vector<2x256xbf16>
    tpu.vector_store %arg16[%c0_203, %c768], %135 {strides = array<i32>} : memref<2x1024xbf16, #tpu.memory_space<vmem>>, vector<2x256xbf16>,
    %c0_204 = arith.constant 0 : index
    %c0_205 = arith.constant 0 : index
    %137 = vector.load %arg16[%c0_204, %c0_205] : memref<2x1024xbf16, #tpu.memory_space<vmem>>, vector<2x1024xbf16>
    %c0_206 = arith.constant 0 : index
    %c0_207 = arith.constant 0 : index
    %138 = vector.load %arg6[%c0_206, %c0_207] : memref<1024x32xbf16, #tpu.memory_space<vmem>>, vector<1024x32xbf16>
    %cst_208 = arith.constant dense<0.000000e+00> : vector<2x32xf32>
    %139 = tpu.matmul %137, %138, %cst_208 {dimension_numbers = #tpu.dot_dimension_numbers<[1], [0], [0], [1], [0, 0, 1, 1], [], []>} : vector<2x1024xbf16>, vector<1024x32xbf16>, vector<2x32xf32> -> vector<2x32xf32>
    %c0_209 = arith.constant 0 : index
    %c0_210 = arith.constant 0 : index
    %140 = vector.load %arg7[%c0_209, %c0_210] : memref<1x32xf32, #tpu.memory_space<vmem>>, vector<1x32xf32>
    %141 = vector.broadcast %140 : vector<1x32xf32> to vector<2x32xf32>
    %142 = arith.addf %139, %141 : vector<2x32xf32>
    %c0_211 = arith.constant 0 : index
    %c0_212 = arith.constant 0 : index
    %143 = vector.load %arg8[%c0_211, %c0_212] : memref<2x32xf32, #tpu.memory_space<vmem>>, vector<2x32xf32>
    tpu.vector_store %arg8[%c0_211, %c0_212], %142 {strides = array<i32>} : memref<2x32xf32, #tpu.memory_space<vmem>>, vector<2x32xf32>,
    return
  }
  func.func @transform_0(%arg0: i32) -> (i32, i32, i32, i32) {
    %c0_i32 = arith.constant 0 : i32
    %c0_i32_0 = arith.constant 0 : i32
    %c0_i32_1 = arith.constant 0 : i32
    %c0_i32_2 = arith.constant 0 : i32
    %c0_i32_3 = arith.constant 0 : i32
    return %c0_i32, %c0_i32_0, %c0_i32_1, %c0_i32_2 : i32, i32, i32, i32
  }
  func.func @transform_2(%arg0: i32) -> (i32, i32) {
    %c0_i32 = arith.constant 0 : i32
    %c0_i32_0 = arith.constant 0 : i32
    %c0_i32_1 = arith.constant 0 : i32
    return %c0_i32, %c0_i32_0 : i32, i32
  }
  func.func @transform_4(%arg0: i32) -> (i32, i32) {
    %c0_i32 = arith.constant 0 : i32
    %c0_i32_0 = arith.constant 0 : i32
    %c0_i32_1 = arith.constant 0 : i32
    return %c0_i32, %c0_i32_0 : i32, i32
  }
  func.func @transform_5(%arg0: i32) -> (i32, i32) {
    %c0_i32 = arith.constant 0 : i32
    %c0_i32_0 = arith.constant 0 : i32
    %c0_i32_1 = arith.constant 0 : i32
    return %c0_i32, %c0_i32_0 : i32, i32
  }
  func.func @transform_6(%arg0: i32) -> (i32, i32) {
    %c0_i32 = arith.constant 0 : i32
    %c0_i32_0 = arith.constant 0 : i32
    %c0_i32_1 = arith.constant 0 : i32
    return %c0_i32, %c0_i32_0 : i32, i32
  }
  func.func @transform_7(%arg0: i32) -> (i32, i32) {
    %c0_i32 = arith.constant 0 : i32
    %c0_i32_0 = arith.constant 0 : i32
    %c0_i32_1 = arith.constant 0 : i32
    return %c0_i32, %c0_i32_0 : i32, i32
  }
}

</mosaic_0001>

<bundles_post_ra>
// kernel: adaptor_kd_forward.1
= control target key start
LH: loop header
LB: loop body
LE: loop exit
PB: predicated region body
PF: predicated region fallthrough
CT: control target
= control target key end

     0   :  { %12 = vsyncpa [#allocation12], 0  ;;  %s19836_s0 = inlined_call_operand.hbm [shape: f32[2,8,8,64], index: 0, kind: input, shape index: {}]   ;;  %s19837_s1 = inlined_call_operand.hbm [shape: bf16[576,512], index: 1, kind: input, shape index: {}]   ;;  %s19838_s2 = inlined_call_operand.hbm [shape: f32[1,512], index: 2, kind: input, shape index: {}]   ;;  %s19839_s3 = inlined_call_operand.hbm [shape: bf16[4608,256], index: 3, kind: input, shape index: {}]   ;;  %s19840_s4 = inlined_call_operand.hbm [shape: f32[1,256], index: 4, kind: input, shape index: {}]   ;;  %s19841_s5 = inlined_call_operand.vmem [shape: bf16[1024,32], index: 5, kind: input, shape index: {}]   ;;  %s19842_s6 = inlined_call_operand.hbm [shape: f32[1,32], index: 6, kind: input, shape index: {}]   ;;  %s19843_s7 = inlined_call_operand.hbm [shape: f32[2,32], index: 7, kind: output, shape index: {}]  }
   0x1   :  { %13 = vsyncpa [#allocation15], 0 }
   0x2   :  { %14 = vsyncpa [#allocation18], 0 }
   0x3   :  { %15 = vsyncpa [#allocation13], 0  ;;  %s14544_s24 = smov [#allocation14]   ;;  %s14545_s26 = smov [#allocation11]  }
   0x4   :  { %s34_s25 = sshll.u32 %s14544_s24, 4  ;;  %s21_s27 = sshll.u32 %s14545_s26, 4  ;;  %s35_s25 = int_to_ptr.vmem [resolvable:$true] %s34_s25  ;;  %s14605_s27 = int_to_ptr.vmem [resolvable:$true] %s21_s27 }
   0x5   :  { %s14422_s30 = scalar_lea.hbm %s19838_s2, 64 }
   0x6   :  { %p14423_p0 = scmp.ne.s32.totalorder %s19838_s2, %s14422_s30  ;;  %p14426_p1 = scmp.lt.u32.totalorder %s14422_s30, %s19838_s2 }
   0x8   :  { %p14428_p2 = pnand %p14426_p1, %p14423_p0 }
   0xa   :  { %14431 = shalt.err (!%p14428_p2)
}
   0xb   :  { %s14432_s12 = scalar_lea.vmem %s35_s25, 64  ;;  %p14437_p4 = scmp.lt.s32.totalorder %s35_s25, %s35_s25 }
   0xc   :  { %p14433_p3 = scmp.ne.s32.totalorder %s35_s25, %s14432_s12  ;;  %p14438_p5 = scmp.lt.s32.totalorder %s14432_s12, %s14432_s12 }
   0xe   :  { %p14439_p6 = por %p14438_p5, %p14437_p4 }
  0x10   :  { %p14440_p7 = pnand %p14439_p6, %p14433_p3 }
  0x12   :  { %14443 = shalt.err (!%p14440_p7)
}
  0x13   :  { %37 = dma.hbm_to_vmem [thread:$0]  %s19838_s2, 64, %s35_s25, [#allocation15]  }
  0x14   :  { %s14444_s17 = scalar_lea.hbm %s19836_s0, 2048 }
  0x15   :  { %p14445_p8 = scmp.ne.s32.totalorder %s19836_s0, %s14444_s17  ;;  %p14448_p9 = scmp.lt.u32.totalorder %s14444_s17, %s19836_s0 }
  0x17   :  { %p14450_p10 = pnand %p14448_p9, %p14445_p8 }
  0x19   :  { %14453 = shalt.err (!%p14450_p10)
}
  0x1a   :  { %s14454_s22 = scalar_lea.vmem %s14605_s27, 2048  ;;  %p14459_p12 = scmp.lt.s32.totalorder %s14605_s27, %s14605_s27 }
  0x1b   :  { %p14455_p11 = scmp.ne.s32.totalorder %s14605_s27, %s14454_s22  ;;  %p14460_p13 = scmp.lt.s32.totalorder %s14454_s22, %s14454_s22 }
  0x1d   :  { %p14461_p0 = por %p14460_p13, %p14459_p12 }
  0x1f   :  { %p14462_p1 = pnand %p14461_p0, %p14455_p11 }
  0x21   :  { %14465 = shalt.err (!%p14462_p1)
}
  0x22   :  { %s14546_s2 = smov 128   ;;  %s14547_s23 = smov 8  }
  0x23   :  { %27 = dma.hbm_to_vmem [thread:$0]  %s19836_s0, 2048, %s14605_s27, [#allocation12], %s14546_s2, %s14546_s2, %s14547_s23  }
  0x24   :  { %s14548_s26 = smov [#allocation16]   ;;  %s14549_s29 = smov [#allocation17]  }
  0x25   :  { %s44_s28 = sshll.u32 %s14548_s26, 4  ;;  %s56_s30 = sshll.u32 %s14549_s29, 4  ;;  %s45_s28 = int_to_ptr.vmem [resolvable:$true] %s44_s28  ;;  %s57_s30 = int_to_ptr.vmem [resolvable:$true] %s56_s30 }
  0x26   :  { %s14466_s10 = scalar_lea.hbm %s19840_s4, 32 }
  0x27   :  { %p14467_p2 = scmp.ne.s32.totalorder %s19840_s4, %s14466_s10  ;;  %p14470_p3 = scmp.lt.u32.totalorder %s14466_s10, %s19840_s4 }
  0x29   :  { %p14472_p4 = pnand %p14470_p3, %p14467_p2 }
  0x2b   :  { %14475 = shalt.err (!%p14472_p4)
}
  0x2c   :  { %s14476_s0 = scalar_lea.vmem %s45_s28, 32  ;;  %p14481_p6 = scmp.lt.s32.totalorder %s45_s28, %s45_s28 }
  0x2d   :  { %p14477_p5 = scmp.ne.s32.totalorder %s45_s28, %s14476_s0  ;;  %p14482_p7 = scmp.lt.s32.totalorder %s14476_s0, %s14476_s0 }
  0x2f   :  { %p14483_p8 = por %p14482_p7, %p14481_p6 }
  0x31   :  { %p14484_p9 = pnand %p14483_p8, %p14477_p5 }
  0x33   :  { %14487 = shalt.err (!%p14484_p9)
}
  0x34   :  { %47 = dma.hbm_to_vmem [thread:$0]  %s19840_s4, 32, %s45_s28, [#allocation15]  }
  0x35   :  { %s14488_s18 = scalar_lea.hbm %s19842_s6, 16 }
  0x36   :  { %p14489_p10 = scmp.ne.s32.totalorder %s19842_s6, %s14488_s18  ;;  %p14492_p11 = scmp.lt.u32.totalorder %s14488_s18, %s19842_s6 }
  0x38   :  { %p14494_p12 = pnand %p14492_p11, %p14489_p10 }
  0x3a   :  { %14497 = shalt.err (!%p14494_p12)
}
  0x3b   :  { %s14498_s23 = scalar_lea.vmem %s57_s30, 16  ;;  %s14502_s24 = scalar_lea.vmem %s57_s30, 32 }
  0x3c   :  { %p14499_p13 = scmp.ne.s32.totalorder %s57_s30, %s14498_s23  ;;  %p14503_p0 = scmp.lt.s32.totalorder %s57_s30, %s57_s30 }
  0x3d   :  { %p14504_p1 = scmp.lt.s32.totalorder %s14502_s24, %s14498_s23 }
  0x3f   :  { %p14505_p2 = por %p14504_p1, %p14503_p0 }
  0x41   :  { %p14506_p3 = pnand %p14505_p2, %p14499_p13 }
  0x43   :  { %14509 = shalt.err (!%p14506_p3)
}
  0x44   :  { %59 = dma.hbm_to_vmem [thread:$0]  %s19842_s6, 16, %s57_s30, [#allocation18]  }
  0x45   :  { %14532 = dma.done.wait [#allocation12], 2048  }
  0x46   :  { %14533 = vsyncadd [#allocation12], 4294965248 }
  0x47   :  { %14534 = dma.done.wait [#allocation15], 96  }
  0x48   :  { %14535 = vsyncadd [#allocation15], 4294967200 }
  0x49   :  { %14536 = dma.done.wait [#allocation18], 16  }
  0x4a   :  { %14537 = vsyncadd [#allocation18], 4294967280  ;;  %s77_s26 = sld [smem:[#allocation0]]   ;;  %s14550_s28 = smov 512   ;;  %vm143_vm0 = vcmask 519168   ;;  %vm2316_vm1 = vcmask 1040384  }
  0x4b   :  { %89 = sst [smem:[#allocation21]] %s14550_s28  ;;  %s14551_s29 = smov 64   ;;  %vm145_vm2 = vcmask 516096   ;;  %vm2318_vm3 = vcmask 1044484   ;;  %vm2319_vm4 = vsmask.f32 4352 }
  0x4c   :  { %91 = sst [smem:[#allocation21 + $0x1]] %s14550_s28  ;;  %s14552_s8 = smov [#allocation7]   ;;  %vm155_vm5 = vsmask.f32 256  ;;  %v19844_v0 = vmov 0   ;;  %vm2320_vm7 = vmand %vm2318_vm3, %vm2319_vm4  ;;  %vm682_vm4 = vcmask 523264  }
  0x4d   :  { %95 = sst [smem:[#allocation21 + $0x3]] %s14551_s29  ;;  %s85_s9 = sshll.u32 %s14552_s8, 4  ;;  %vm2317_vm6 = vmand %vm2316_vm1, %vm155_vm5  ;;  %vm217_vm9 = vsmask.f32 7938  ;;  %vm2443_vm11 = vsmask.f32 7954  ;;  %s86_s9 = int_to_ptr.vmem [resolvable:$true] %s85_s9 }
  0x4e   :  { %97 = sst [smem:[#allocation21 + $0x4]] %s14546_s2  ;;  %s14553_s6 = smov 4   ;;  %vm14713_vm8 = vmand %vm145_vm2, %vm155_vm5  ;;  %vm723_vm5 = vsmask.f32 3328 }
  0x4f   :  { %103 = sst [smem:[#allocation21 + $0x7]] %s14551_s29  ;;  %s14554_s10 = smov 2   ;;  %vm14717_vm10 = vmor %vm2320_vm7, %vm2317_vm6  ;;  %vm724_vm6 = vsmask.f32 7440 }
  0x50   :  { %93 = sst [smem:[#allocation21 + $0x2]] %s14553_s6  ;;  %s12722_s30 = sshll.u32 %s77_s26, 26  ;;  %vm14748_vm12 = vmand %vm143_vm0, %vm217_vm9 }
  0x51   :  { %99 = sst [smem:[#allocation21 + $0x5]] %s14554_s10  ;;  %s12723_s11 = sadd.s32 134217728, %s12722_s30  ;;  %vm14795_vm13 = vmand %vm2316_vm1, %vm217_vm9  ;;  %vm1071_vm1 = vcmask 1042432  }
  0x52   :  { %s14555_s12 = smov 256   ;;  %105 = sst [smem:[#allocation21 + $0x8]] %s14553_s6  ;;  %vm2444_vm14 = vmand %vm2318_vm3, %vm2443_vm11 }
  0x53   :  { %101 = sst [smem:[#allocation21 + $0x6]] %s14555_s12  ;;  %s14556_s13 = smov [#allocation10]   ;;  %vm14816_vm15 = vmor %vm2444_vm14, %vm14795_vm13 }
  0x54   :  { %s14557_s14 = smov [#allocation20]   ;;  %s14558_s15 = smov [#allocation8]   ;;  %vm15311_vm7 = vmor %vm723_vm5, %vm724_vm6 }
  0x55   :  { %107 = dma.general %s19837_s1, 18432, %s86_s9, %s14556_s13, %s14557_s14, [#allocation21], %s12723_s11, 0  }
  0x56   :  { %124 = sst [smem:[#allocation23]] %s14555_s12  ;;  %s120_s16 = sshll.u32 %s14558_s15, 4  ;;  %s121_s16 = int_to_ptr.vmem [resolvable:$true] %s120_s16 }
  0x57   :  { %126 = sst [smem:[#allocation23 + $0x1]] %s14555_s12  ;;  %s14559_s17 = smov [#allocation10 + $0x1]  }
  0x58   :  { %128 = sst [smem:[#allocation23 + $0x2]] %s14554_s10  ;;  %s14560_s1 = smov [#allocation22]  }
  0x59   :  { %130 = sst [smem:[#allocation23 + $0x3]] %s14551_s29 }
  0x5a   :  { %132 = sst [smem:[#allocation23 + $0x4]] %s14546_s2 }
  0x5b   :  { %134 = sst [smem:[#allocation23 + $0x5]] %s14554_s10 }
  0x5c   :  { %136 = sst [smem:[#allocation23 + $0x6]] %s14546_s2 }
  0x5d   :  { %138 = sst [smem:[#allocation23 + $0x7]] %s14551_s29 }
  0x5e   :  { %140 = sst [smem:[#allocation23 + $0x8]] %s14553_s6 }
  0x5f   :  { %142 = dma.general %s19839_s3, 73728, %s121_s16, %s14559_s17, %s14560_s1, [#allocation23], %s12723_s11, 0  }
  0x60   :  { %144 = vst.msk [vmem:[#allocation2] sm:$0xf] %vm143_vm0, %v19844_v0  ;;  %2299 = vst [vmem:[#allocation4] sm:$0xff] %v19844_v0  ;;  %v166_v3 = vld [vmem:[#allocation2 + $0x18] sm:$0x1]  ;;  %v282_v8 = vld [vmem:[#allocation11 + $0x18] sm:$0xff] }
  0x61   :  { %146 = vst.msk [vmem:[#allocation2 + $0x4] sm:$0x1] %vm145_vm2, %v19844_v0  ;;  %2300 = vst [vmem:[#allocation4 + $0x8] sm:$0xff] %v19844_v0  ;;  %v169_v4 = vld [vmem:[#allocation2 + $0x20] sm:$0x1]  ;;  %v281_v5 = vld [vmem:[#allocation11 + $0x10] sm:$0xff]  ;;  %v13376_v12 = vpack.c.bf16 %v282_v8, %v282_v8 }
  0x62   :  { %2301 = vst [vmem:[#allocation4 + $0x10] sm:$0x11] %v19844_v0  ;;  %2302 = vst [vmem:[#allocation4 + $0x18] sm:$0x11] %v19844_v0  ;;  %v167_v6 = vsel %vm14713_vm8, 0, %v166_v3  ;;  %v170_v7 = vsel %vm14713_vm8, 0, %v169_v4  ;;  %v13375_v9 = vpack.c.bf16 %v281_v5, %v281_v5 }
  0x63   :  { %2303 = vst [vmem:[#allocation4 + $0x140] sm:$0xff] %v19844_v0  ;;  %2304 = vst [vmem:[#allocation4 + $0x148] sm:$0xff] %v19844_v0  ;;  %v2328_v10 = vld [vmem:[#allocation4 + $0x20] sm:$0x11]  ;;  %v279_v11 = vld [vmem:[#allocation11] sm:$0xff]  ;;  %v384_v21 = vshrl.u32 %v13376_v12, 16 }
  0x64   :  { %2305 = vst [vmem:[#allocation4 + $0x150] sm:$0x11] %v19844_v0  ;;  %2306 = vst [vmem:[#allocation4 + $0x158] sm:$0x11] %v19844_v0  ;;  %v2329_v13 = vsel %vm14717_vm10, 0, %v2328_v10  ;;  %v376_v16 = vshrl.u32 %v13375_v9, 16  ;;  %v14733_v25 = vpack.c.bf16 %v279_v11, %v279_v11 }
  0x65   :  { %2308 = vst [vmem:[#allocation4 + $0x120] sm:$0xff] %v19844_v0  ;;  %2309 = vst [vmem:[#allocation4 + $0x128] sm:$0xff] %v19844_v0  ;;  %v2331_v14 = vld [vmem:[#allocation4 + $0x28] sm:$0x11]  ;;  %v2334_v15 = vld [vmem:[#allocation4 + $0x40] sm:$0x11] }
  0x66   :  { %2310 = vst [vmem:[#allocation4 + $0x130] sm:$0x11] %v19844_v0  ;;  %2311 = vst [vmem:[#allocation4 + $0x138] sm:$0x11] %v19844_v0  ;;  %v379_v17 = vshll.u32 %v13375_v9, 16  ;;  %v2332_v18 = vsel %vm14717_vm10, 0, %v2331_v14 }
  0x67   :  { %2312 = vst [vmem:[#allocation4 + $0x260] sm:$0xff] %v19844_v0  ;;  %2313 = vst [vmem:[#allocation4 + $0x268] sm:$0xff] %v19844_v0  ;;  %v2335_v19 = vsel %vm14717_vm10, 0, %v2334_v15  ;;  %v2337_v20 = vld [vmem:[#allocation4 + $0x48] sm:$0x11]  ;;  %v387_v22 = vshll.u32 %v13376_v12, 16 }
  0x68   :  { %2314 = vst [vmem:[#allocation4 + $0x270] sm:$0x11] %v19844_v0  ;;  %2315 = vst [vmem:[#allocation4 + $0x278] sm:$0x11] %v19844_v0  ;;  %v2338_v23 = vsel %vm14717_vm10, 0, %v2337_v20  ;;  %v14735_v26 = vrot.slane %v376_v16, 7 }
  0x69   :  { %147 = vst.msk [vmem:[#allocation2 + $0x50] sm:$0xf] %vm143_vm0, %v19844_v0  ;;  %150 = vst.msk [vmem:[#allocation2 + $0x48] sm:$0xf] %vm143_vm0, %v19844_v0  ;;  %v2340_v24 = vld [vmem:[#allocation4 + $0x60] sm:$0x11] }
  0x6a   :  { %148 = vst.msk [vmem:[#allocation2 + $0x54] sm:$0x1] %vm145_vm2, %v19844_v0  ;;  %151 = vst.msk [vmem:[#allocation2 + $0x4c] sm:$0x1] %vm145_vm2, %v19844_v0  ;;  %v2341_v27 = vsel %vm14717_vm10, 0, %v2340_v24  ;;  %v14739_v30 = vrot.slane %v384_v21, 7  ;;  %v381_v34 = vor.u32 %v379_v17, %v14735_v26 }
  0x6b   :  { %152 = vst.msk [vmem:[#allocation2 + $0x98] sm:$0xf] %vm143_vm0, %v19844_v0  ;;  %168 = vst [vmem:[#allocation2 + $0x18] sm:$0x1] %v167_v6  ;;  %v2343_v28 = vld [vmem:[#allocation4 + $0x68] sm:$0x11] }
  0x6c   :  { %153 = vst.msk [vmem:[#allocation2 + $0x9c] sm:$0x1] %vm145_vm2, %v19844_v0  ;;  %171 = vst [vmem:[#allocation2 + $0x20] sm:$0x1] %v170_v7  ;;  %v2346_v29 = vld [vmem:[#allocation4 + $0x80] sm:$0x11]  ;;  %v389_v39 = vor.u32 %v387_v22, %v14739_v30 }
  0x6d   :  { %2330 = vst [vmem:[#allocation4 + $0x20] sm:$0x11] %v2329_v13  ;;  %2333 = vst [vmem:[#allocation4 + $0x28] sm:$0x11] %v2332_v18  ;;  %v2344_v31 = vsel %vm14717_vm10, 0, %v2343_v28  ;;  %v2347_v32 = vsel %vm14717_vm10, 0, %v2346_v29 }
  0x6e   :  { %2336 = vst [vmem:[#allocation4 + $0x40] sm:$0x11] %v2335_v19  ;;  %2339 = vst [vmem:[#allocation4 + $0x48] sm:$0x11] %v2338_v23  ;;  %v2349_v33 = vld [vmem:[#allocation4 + $0x88] sm:$0x11] }
  0x6f   :  { %2342 = vst [vmem:[#allocation4 + $0x60] sm:$0x11] %v2341_v27  ;;  %2345 = vst [vmem:[#allocation4 + $0x68] sm:$0x11] %v2344_v31  ;;  %v2350_v36 = vsel %vm14717_vm10, 0, %v2349_v33  ;;  %v360_v43 = vshrl.u32 %v14733_v25, 16 }
  0x70   :  { %2348 = vst [vmem:[#allocation4 + $0x80] sm:$0x11] %v2347_v32  ;;  %v2352_v37 = vld [vmem:[#allocation4 + $0xa0] sm:$0x11]  ;;  %v2355_v38 = vld [vmem:[#allocation4 + $0xa8] sm:$0x11]  ;;  %vm15012_vm0 = vmand %vm145_vm2, %vm217_vm9 }
  0x71   :  { %2351 = vst [vmem:[#allocation4 + $0x88] sm:$0x11] %v2350_v36  ;;  %v2353_v40 = vsel %vm14717_vm10, 0, %v2352_v37  ;;  %v2356_v41 = vsel %vm14717_vm10, 0, %v2355_v38  ;;  %v2358_v42 = vld [vmem:[#allocation4 + $0xc0] sm:$0x11] }
  0x72   :  { %v534_v44 = vld [vmem:[#allocation2 + $0x18] sm:$0xf]  ;;  %2354 = vst [vmem:[#allocation4 + $0xa0] sm:$0x11] %v2353_v40  ;;  %2357 = vst [vmem:[#allocation4 + $0xa8] sm:$0x11] %v2356_v41 }
  0x73   :  { %v540_v45 = vld [vmem:[#allocation2 + $0x20] sm:$0xf]  ;;  %v2359_v46 = vsel %vm14717_vm10, 0, %v2358_v42  ;;  %v535_v47 = vsel %vm14748_vm12, %v381_v34, %v534_v44  ;;  %v2361_v49 = vld [vmem:[#allocation4 + $0xc8] sm:$0x11]  ;;  %v382_v52 = vrot.slane %v14735_v26, 4 }
  0x74   :  { %v541_v48 = vsel %vm14748_vm12, %v389_v39, %v540_v45  ;;  %2360 = vst [vmem:[#allocation4 + $0xc0] sm:$0x11] %v2359_v46  ;;  %v2364_v50 = vld [vmem:[#allocation4 + $0xe0] sm:$0x11]  ;;  %v2367_v51 = vld [vmem:[#allocation4 + $0xe8] sm:$0x11] }
  0x75   :  { %536 = vst [vmem:[#allocation2 + $0x18] sm:$0xf] %v535_v47  ;;  %542 = vst [vmem:[#allocation2 + $0x20] sm:$0xf] %v541_v48  ;;  %v2362_v53 = vsel %vm14717_vm10, 0, %v2361_v49  ;;  %v2365_v54 = vsel %vm14717_vm10, 0, %v2364_v50 }
  0x76   :  { %v2368_v55 = vsel %vm14717_vm10, 0, %v2367_v51  ;;  %v2370_v56 = vld [vmem:[#allocation4 + $0x100] sm:$0x11]  ;;  %2363 = vst [vmem:[#allocation4 + $0xc8] sm:$0x11] %v2362_v53  ;;  %v14775_v60 = vrot.slane %v360_v43, 7 }
  0x77   :  { %2366 = vst [vmem:[#allocation4 + $0xe0] sm:$0x11] %v2365_v54  ;;  %2369 = vst [vmem:[#allocation4 + $0xe8] sm:$0x11] %v2368_v55  ;;  %v2371_v57 = vsel %vm14717_vm10, 0, %v2370_v56  ;;  %v390_v22 = vrot.slane %v14739_v30, 4 }
  0x78   :  { %v2373_v58 = vld [vmem:[#allocation4 + $0x108] sm:$0x11]  ;;  %v2388_v59 = vld [vmem:[#allocation4 + $0x160] sm:$0x11]  ;;  %2372 = vst [vmem:[#allocation4 + $0x100] sm:$0x11] %v2371_v57 }
  0x79   :  { %v2374_v61 = vsel %vm14717_vm10, 0, %v2373_v58  ;;  %v2389_v62 = vsel %vm14717_vm10, 0, %v2388_v59  ;;  %v2391_v63 = vld [vmem:[#allocation4 + $0x168] sm:$0x11]  ;;  %v2394_v3 = vld [vmem:[#allocation4 + $0x180] sm:$0x11] }
  0x7a   :  { %2375 = vst [vmem:[#allocation4 + $0x108] sm:$0x11] %v2374_v61  ;;  %2390 = vst [vmem:[#allocation4 + $0x160] sm:$0x11] %v2389_v62  ;;  %v2392_v4 = vsel %vm14717_vm10, 0, %v2391_v63  ;;  %v2395_v5 = vsel %vm14717_vm10, 0, %v2394_v3 }
  0x7b   :  { %v2397_v6 = vld [vmem:[#allocation4 + $0x188] sm:$0x11]  ;;  %v2400_v7 = vld [vmem:[#allocation4 + $0x1a0] sm:$0x11]  ;;  %2393 = vst [vmem:[#allocation4 + $0x168] sm:$0x11] %v2392_v4 }
  0x7c   :  { %2396 = vst [vmem:[#allocation4 + $0x180] sm:$0x11] %v2395_v5  ;;  %v2398_v8 = vsel %vm14717_vm10, 0, %v2397_v6  ;;  %v2401_v9 = vsel %vm14717_vm10, 0, %v2400_v7  ;;  %v2403_v10 = vld [vmem:[#allocation4 + $0x1a8] sm:$0x11] }
  0x7d   :  { %v2406_v11 = vld [vmem:[#allocation4 + $0x1c0] sm:$0x11]  ;;  %2399 = vst [vmem:[#allocation4 + $0x188] sm:$0x11] %v2398_v8  ;;  %2402 = vst [vmem:[#allocation4 + $0x1a0] sm:$0x11] %v2401_v9 }
  0x7e   :  { %v2404_v12 = vsel %vm14717_vm10, 0, %v2403_v10  ;;  %v2407_v13 = vsel %vm14717_vm10, 0, %v2406_v11  ;;  %v2409_v14 = vld [vmem:[#allocation4 + $0x1c8] sm:$0x11]  ;;  %v2412_v15 = vld [vmem:[#allocation4 + $0x1e0] sm:$0x11] }
  0x7f   :  { %2405 = vst [vmem:[#allocation4 + $0x1a8] sm:$0x11] %v2404_v12  ;;  %2408 = vst [vmem:[#allocation4 + $0x1c0] sm:$0x11] %v2407_v13  ;;  %v2410_v17 = vsel %vm14717_vm10, 0, %v2409_v14  ;;  %v2413_v18 = vsel %vm14717_vm10, 0, %v2412_v15 }
  0x80   :  { %v2415_v19 = vld [vmem:[#allocation4 + $0x1e8] sm:$0x11]  ;;  %v2418_v20 = vld [vmem:[#allocation4 + $0x200] sm:$0x11]  ;;  %2411 = vst [vmem:[#allocation4 + $0x1c8] sm:$0x11] %v2410_v17 }
  0x81   :  { %v14330_v21 = vld [vmem:[#allocation2 + $0x18] ss:$8 sps:$4 sm:$0xff]   ;;  %2414 = vst [vmem:[#allocation4 + $0x1e0] sm:$0x11] %v2413_v18  ;;  %v2416_v24 = vsel %vm14717_vm10, 0, %v2415_v19  ;;  %v2419_v27 = vsel %vm14717_vm10, 0, %v2418_v20 }
  0x82   :  { %v14806_v23 = vld [vmem:[#allocation2 + $0x18] sm:$0xe]  ;;  %v363_v28 = vshll.u32 %v14733_v25, 16  ;;  %2417 = vst [vmem:[#allocation4 + $0x1e8] sm:$0x11] %v2416_v24  ;;  %1236 = vrot.lane.b32.xlu1 %v14330_v21, %s14551_s29  ;;  %v366_v34 = vrot.slane %v14775_v60, 4 }
  0x83   :  { %v12839_v29 = vrot.slane %v14806_v23, 9  ;;  %2420 = vst [vmem:[#allocation4 + $0x200] sm:$0x11] %v2419_v27  ;;  %v2421_v31 = vld [vmem:[#allocation4 + $0x208] sm:$0x11]  ;;  %v280_v17 = vld [vmem:[#allocation11 + $0x8] sm:$0xff] }
  0x84   :  { %v2424_v32 = vld [vmem:[#allocation4 + $0x220] sm:$0x11]  ;;  %v2422_v36 = vsel %vm14717_vm10, 0, %v2421_v31  ;;  %v2427_v38 = vld [vmem:[#allocation4 + $0x228] sm:$0x11]  ;;  %v285_v24 = vld [vmem:[#allocation11 + $0x30] sm:$0xff] }
  0x85   :  { %v2425_v37 = vsel %vm14717_vm10, 0, %v2424_v32  ;;  %v2430_v39 = vld [vmem:[#allocation4 + $0x240] sm:$0x11]  ;;  %2423 = vst [vmem:[#allocation4 + $0x208] sm:$0x11] %v2422_v36  ;;  %v2428_v40 = vsel %vm14717_vm10, 0, %v2427_v38 }
  0x86   :  { %2426 = vst [vmem:[#allocation4 + $0x220] sm:$0x11] %v2425_v37  ;;  %v2431_v41 = vsel %vm14717_vm10, 0, %v2430_v39  ;;  %v2433_v42 = vld [vmem:[#allocation4 + $0x248] sm:$0x11]  ;;  %v289_v25 = vld [vmem:[#allocation11 + $0x50] sm:$0xff] }
  0x87   :  { %v2452_v43 = vld [vmem:[#allocation4 + $0x30] sm:$0x11]  ;;  %2429 = vst [vmem:[#allocation4 + $0x228] sm:$0x11] %v2428_v40  ;;  %2432 = vst [vmem:[#allocation4 + $0x240] sm:$0x11] %v2431_v41 }
  0x88   :  { %v2434_v44 = vsel %vm14717_vm10, 0, %v2433_v42  ;;  %v2453_v45 = vsel %vm14816_vm15, 0, %v2452_v43  ;;  %v2455_v46 = vld [vmem:[#allocation4 + $0x38] sm:$0x11]  ;;  %v2458_v47 = vld [vmem:[#allocation4 + $0x50] sm:$0x11] }
  0x89   :  { %2435 = vst [vmem:[#allocation4 + $0x248] sm:$0x11] %v2434_v44  ;;  %2454 = vst [vmem:[#allocation4 + $0x30] sm:$0x11] %v2453_v45  ;;  %v2456_v48 = vsel %vm14816_vm15, 0, %v2455_v46  ;;  %v2459_v49 = vsel %vm14816_vm15, 0, %v2458_v47 }
  0x8a   :  { %v2461_v50 = vld [vmem:[#allocation4 + $0x58] sm:$0x11]  ;;  %v2464_v51 = vld [vmem:[#allocation4 + $0x70] sm:$0x11]  ;;  %2457 = vst [vmem:[#allocation4 + $0x38] sm:$0x11] %v2456_v48 }
  0x8b   :  { %2460 = vst [vmem:[#allocation4 + $0x50] sm:$0x11] %v2459_v49  ;;  %v2462_v53 = vsel %vm14816_vm15, 0, %v2461_v50  ;;  %v2465_v54 = vsel %vm14816_vm15, 0, %v2464_v51  ;;  %v2467_v55 = vld [vmem:[#allocation4 + $0x78] sm:$0x11]  ;;  %v13374_v50 = vpack.c.bf16 %v280_v17, %v280_v17 }
  0x8c   :  { %v2470_v56 = vld [vmem:[#allocation4 + $0x90] sm:$0x11]  ;;  %2463 = vst [vmem:[#allocation4 + $0x58] sm:$0x11] %v2462_v53  ;;  %2466 = vst [vmem:[#allocation4 + $0x70] sm:$0x11] %v2465_v54 }
  0x8d   :  { %v2468_v57 = vsel %vm14816_vm15, 0, %v2467_v55  ;;  %v2471_v58 = vsel %vm14816_vm15, 0, %v2470_v56  ;;  %v2473_v59 = vld [vmem:[#allocation4 + $0x98] sm:$0x11]  ;;  %v2476_v61 = vld [vmem:[#allocation4 + $0xb0] sm:$0x11]  ;;  %v13379_v56 = vpack.c.bf16 %v285_v24, %v285_v24 }
  0x8e   :  { %2469 = vst [vmem:[#allocation4 + $0x78] sm:$0x11] %v2468_v57  ;;  %2472 = vst [vmem:[#allocation4 + $0x90] sm:$0x11] %v2471_v58  ;;  %v2474_v62 = vsel %vm14816_vm15, 0, %v2473_v59  ;;  %v2477_v63 = vsel %vm14816_vm15, 0, %v2476_v61 }
  0x8f   :  { %v2479_v3 = vld [vmem:[#allocation4 + $0xb8] sm:$0x11]  ;;  %v2482_v4 = vld [vmem:[#allocation4 + $0xd0] sm:$0x11]  ;;  %2475 = vst [vmem:[#allocation4 + $0x98] sm:$0x11] %v2474_v62 }
  0x90   :  { %2478 = vst [vmem:[#allocation4 + $0xb0] sm:$0x11] %v2477_v63  ;;  %v2480_v5 = vsel %vm14816_vm15, 0, %v2479_v3  ;;  %v2483_v6 = vsel %vm14816_vm15, 0, %v2482_v4  ;;  %v2485_v7 = vld [vmem:[#allocation4 + $0xd8] sm:$0x11] }
  0x91   :  { %v2488_v8 = vld [vmem:[#allocation4 + $0xf0] sm:$0x11]  ;;  %2481 = vst [vmem:[#allocation4 + $0xb8] sm:$0x11] %v2480_v5  ;;  %2484 = vst [vmem:[#allocation4 + $0xd0] sm:$0x11] %v2483_v6 }
  0x92   :  { %v2486_v9 = vsel %vm14816_vm15, 0, %v2485_v7  ;;  %v2489_v10 = vsel %vm14816_vm15, 0, %v2488_v8  ;;  %v2491_v11 = vld [vmem:[#allocation4 + $0xf8] sm:$0x11]  ;;  %v2494_v12 = vld [vmem:[#allocation4 + $0x110] sm:$0x11] }
  0x93   :  { %2487 = vst [vmem:[#allocation4 + $0xd8] sm:$0x11] %v2486_v9  ;;  %2490 = vst [vmem:[#allocation4 + $0xf0] sm:$0x11] %v2489_v10  ;;  %v2492_v13 = vsel %vm14816_vm15, 0, %v2491_v11  ;;  %v2495_v14 = vsel %vm14816_vm15, 0, %v2494_v12 }
  0x94   :  { %v2497_v15 = vld [vmem:[#allocation4 + $0x118] sm:$0x11]  ;;  %v2512_v16 = vld [vmem:[#allocation4 + $0x170] sm:$0x11]  ;;  %2493 = vst [vmem:[#allocation4 + $0xf8] sm:$0x11] %v2492_v13 }
  0x95   :  { %2496 = vst [vmem:[#allocation4 + $0x110] sm:$0x11] %v2495_v14  ;;  %v2498_v18 = vsel %vm14816_vm15, 0, %v2497_v15  ;;  %v2513_v19 = vsel %vm14816_vm15, 0, %v2512_v16  ;;  %v2515_v20 = vld [vmem:[#allocation4 + $0x178] sm:$0x11] }
  0x96   :  { %v2518_v21 = vld [vmem:[#allocation4 + $0x190] sm:$0x11]  ;;  %2499 = vst [vmem:[#allocation4 + $0x118] sm:$0x11] %v2498_v18  ;;  %2514 = vst [vmem:[#allocation4 + $0x170] sm:$0x11] %v2513_v19 }
  0x97   :  { %v2516_v27 = vsel %vm14816_vm15, 0, %v2515_v20  ;;  %v2519_v31 = vsel %vm14816_vm15, 0, %v2518_v21  ;;  %v2521_v32 = vld [vmem:[#allocation4 + $0x198] sm:$0x11]  ;;  %v2524_v36 = vld [vmem:[#allocation4 + $0x1b0] sm:$0x11] }
  0x98   :  { %2517 = vst [vmem:[#allocation4 + $0x178] sm:$0x11] %v2516_v27  ;;  %2520 = vst [vmem:[#allocation4 + $0x190] sm:$0x11] %v2519_v31  ;;  %v2522_v37 = vsel %vm14816_vm15, 0, %v2521_v32  ;;  %v2525_v38 = vsel %vm14816_vm15, 0, %v2524_v36 }
  0x99   :  { %v2527_v39 = vld [vmem:[#allocation4 + $0x1b8] sm:$0x11]  ;;  %v2530_v40 = vld [vmem:[#allocation4 + $0x1d0] sm:$0x11]  ;;  %v286_v41 = vld [vmem:[#allocation11 + $0x38] sm:$0xff]  ;;  %v368_v10 = vshrl.u32 %v13374_v50, 16 }
  0x9a   :  { %2523 = vst [vmem:[#allocation4 + $0x198] sm:$0x11] %v2522_v37  ;;  %2526 = vst [vmem:[#allocation4 + $0x1b0] sm:$0x11] %v2525_v38  ;;  %v2528_v42 = vsel %vm14816_vm15, 0, %v2527_v39  ;;  %v2531_v43 = vsel %vm14816_vm15, 0, %v2530_v40  ;;  %v13380_v6 = vpack.c.bf16 %v286_v41, %v286_v41  ;;  %v365_v37 = vor.u32 %v363_v28, %v14775_v60 }
  0x9b   :  { %v2533_v44 = vld [vmem:[#allocation4 + $0x1d8] sm:$0x11]  ;;  %v2536_v45 = vld [vmem:[#allocation4 + $0x1f0] sm:$0x11]  ;;  %2529 = vst [vmem:[#allocation4 + $0x1b8] sm:$0x11] %v2528_v42 }
  0x9c   :  { %2532 = vst [vmem:[#allocation4 + $0x1d0] sm:$0x11] %v2531_v43  ;;  %v2534_v46 = vsel %vm14816_vm15, 0, %v2533_v44  ;;  %v2537_v47 = vsel %vm14816_vm15, 0, %v2536_v45  ;;  %v2539_v48 = vld [vmem:[#allocation4 + $0x1f8] sm:$0x11] }
  0x9d   :  { %v2542_v49 = vld [vmem:[#allocation4 + $0x210] sm:$0x11]  ;;  %2535 = vst [vmem:[#allocation4 + $0x1d8] sm:$0x11] %v2534_v46  ;;  %2538 = vst [vmem:[#allocation4 + $0x1f0] sm:$0x11] %v2537_v47 }
  0x9e   :  { %v2540_v51 = vsel %vm14816_vm15, 0, %v2539_v48  ;;  %v2543_v53 = vsel %vm14816_vm15, 0, %v2542_v49  ;;  %v2545_v54 = vld [vmem:[#allocation4 + $0x218] sm:$0x11]  ;;  %v2548_v55 = vld [vmem:[#allocation4 + $0x230] sm:$0x11] }
  0x9f   :  { %2541 = vst [vmem:[#allocation4 + $0x1f8] sm:$0x11] %v2540_v51  ;;  %2544 = vst [vmem:[#allocation4 + $0x210] sm:$0x11] %v2543_v53  ;;  %v2546_v57 = vsel %vm14816_vm15, 0, %v2545_v54  ;;  %v2549_v58 = vsel %vm14816_vm15, 0, %v2548_v55  ;;  %v13383_v51 = vpack.c.bf16 %v289_v25, %v289_v25 }
  0xa0   :  { %v2551_v59 = vld [vmem:[#allocation4 + $0x238] sm:$0x11]  ;;  %v2554_v61 = vld [vmem:[#allocation4 + $0x250] sm:$0x11]  ;;  %v14890_v62 = vld [vmem:[#allocation2 + $0x20] sm:$0xe] }
  0xa1   :  { %2547 = vst [vmem:[#allocation4 + $0x218] sm:$0x11] %v2546_v57  ;;  %2550 = vst [vmem:[#allocation4 + $0x230] sm:$0x11] %v2549_v58  ;;  %v2552_v63 = vsel %vm14816_vm15, 0, %v2551_v59  ;;  %v2555_v3 = vsel %vm14816_vm15, 0, %v2554_v61 }
  0xa2   :  { %v2557_v4 = vld [vmem:[#allocation4 + $0x258] sm:$0x11]  ;;  %v160_v5 = vld [vmem:[#allocation2 + $0x8] sm:$0x1]  ;;  %2553 = vst [vmem:[#allocation4 + $0x238] sm:$0x11] %v2552_v63 }
  0xa3   :  { %2556 = vst [vmem:[#allocation4 + $0x250] sm:$0x11] %v2555_v3  ;;  %v2558_v7 = vsel %vm14816_vm15, 0, %v2557_v4  ;;  %v161_v8 = vsel %vm14713_vm8, 0, %v160_v5  ;;  %v163_v9 = vld [vmem:[#allocation2 + $0x10] sm:$0x1] }
  0xa4   :  { %v371_v11 = vshll.u32 %v13374_v50, 16  ;;  %2559 = vst [vmem:[#allocation4 + $0x258] sm:$0x11] %v2558_v7  ;;  %162 = vst [vmem:[#allocation2 + $0x8] sm:$0x1] %v161_v8  ;;  %v164_v12 = vsel %vm14713_vm8, 0, %v163_v9 }
  0xa5   :  { %v178_v13 = vld [vmem:[#allocation2 + $0x38] sm:$0x1]  ;;  %v181_v14 = vld [vmem:[#allocation2 + $0x40] sm:$0x1]  ;;  %v408_v15 = vshrl.u32 %v13379_v56, 16  ;;  %v14902_v16 = vrot.slane %v368_v10, 7 }
  0xa6   :  { %165 = vst [vmem:[#allocation2 + $0x10] sm:$0x1] %v164_v12  ;;  %v179_v17 = vsel %vm14713_vm8, 0, %v178_v13  ;;  %v182_v18 = vsel %vm14713_vm8, 0, %v181_v14  ;;  %v411_v19 = vshll.u32 %v13379_v56, 16  ;;  %v416_v24 = vshrl.u32 %v13380_v6, 16 }
  0xa7   :  { %v172_v20 = vld [vmem:[#allocation2 + $0x28] sm:$0x1]  ;;  %180 = vst [vmem:[#allocation2 + $0x38] sm:$0x1] %v179_v17  ;;  %183 = vst [vmem:[#allocation2 + $0x40] sm:$0x1] %v182_v18  ;;  %v373_v38 = vor.u32 %v371_v11, %v14902_v16 }
  0xa8   :  { %v14908_v21 = vrot.slane %v408_v15, 7  ;;  %v419_v27 = vshll.u32 %v13380_v6, 16  ;;  %v173_v31 = vsel %vm14713_vm8, 0, %v172_v20  ;;  %v175_v32 = vld [vmem:[#allocation2 + $0x30] sm:$0x1]  ;;  %v283_v40 = vld [vmem:[#allocation11 + $0x20] sm:$0xff] }
  0xa9   :  { %174 = vst [vmem:[#allocation2 + $0x28] sm:$0x1] %v173_v31  ;;  %v176_v39 = vsel %vm14713_vm8, 0, %v175_v32  ;;  %v284_v41 = vld [vmem:[#allocation11 + $0x28] sm:$0xff]  ;;  %v196_v42 = vld [vmem:[#allocation2 + $0x68] sm:$0x1]  ;;  %v13377_v46 = vpack.c.bf16 %v283_v40, %v283_v40 }
  0xaa   :  { %v374_v43 = vrot.slane %v14902_v16, 4  ;;  %v413_v44 = vor.u32 %v411_v19, %v14908_v21  ;;  %v14921_v45 = vrot.slane %v416_v24, 7  ;;  %177 = vst [vmem:[#allocation2 + $0x30] sm:$0x1] %v176_v39  ;;  %v199_v47 = vld [vmem:[#allocation2 + $0x70] sm:$0x1]  ;;  %v13378_v48 = vpack.c.bf16 %v284_v41, %v284_v41 }
  0xab   :  { %v290_v28 = vld [vmem:[#allocation11 + $0x58] sm:$0xff]  ;;  %v197_v49 = vsel %vm14713_vm8, 0, %v196_v42  ;;  %v200_v50 = vsel %vm14713_vm8, 0, %v199_v47  ;;  %v190_v53 = vld [vmem:[#allocation2 + $0x58] sm:$0x1]  ;;  %v414_v54 = vrot.slane %v14908_v21, 4 }
  0xac   :  { %v421_v55 = vor.u32 %v419_v27, %v14921_v45  ;;  %v392_v56 = vshrl.u32 %v13377_v46, 16  ;;  %v395_v57 = vshll.u32 %v13377_v46, 16  ;;  %198 = vst [vmem:[#allocation2 + $0x68] sm:$0x1] %v197_v49  ;;  %201 = vst [vmem:[#allocation2 + $0x70] sm:$0x1] %v200_v50  ;;  %v13384_v3 = vpack.c.bf16 %v290_v28, %v290_v28 }
  0xad   :  { %v287_v58 = vld [vmem:[#allocation11 + $0x40] sm:$0xff]  ;;  %v400_v61 = vshrl.u32 %v13378_v48, 16  ;;  %v403_v63 = vshll.u32 %v13378_v48, 16  ;;  %v440_v4 = vshrl.u32 %v13383_v51, 16  ;;  %v193_v5 = vld [vmem:[#allocation2 + $0x60] sm:$0x1] }
  0xae   :  { %v522_v59 = vld [vmem:[#allocation2 + $0x8] sm:$0xf]  ;;  %v528_v7 = vld [vmem:[#allocation2 + $0x10] sm:$0xf]  ;;  %v14931_v8 = vrot.slane %v392_v56, 7  ;;  %v443_v9 = vshll.u32 %v13383_v51, 16  ;;  %v13381_v17 = vpack.c.bf16 %v287_v58, %v287_v58 }
  0xaf   :  { %v523_v6 = vsel %vm14748_vm12, %v365_v37, %v522_v59  ;;  %v191_v10 = vsel %vm14713_vm8, 0, %v190_v53  ;;  %v529_v11 = vsel %vm14748_vm12, %v373_v38, %v528_v7  ;;  %v558_v12 = vld [vmem:[#allocation2 + $0x38] sm:$0xf]  ;;  %v564_v13 = vld [vmem:[#allocation2 + $0x40] sm:$0xf]  ;;  %v14937_v14 = vrot.slane %v400_v61, 7 }
  0xb0   :  { %524 = vst [vmem:[#allocation2 + $0x8] sm:$0xf] %v523_v6  ;;  %v14939_v15 = vrot.slane %v440_v4, 7  ;;  %192 = vst [vmem:[#allocation2 + $0x58] sm:$0x1] %v191_v10  ;;  %v422_v18 = vrot.slane %v14921_v45, 4  ;;  %v559_v19 = vsel %vm14748_vm12, %v413_v44, %v558_v12  ;;  %v565_v20 = vsel %vm14748_vm12, %v421_v55, %v564_v13 }
  0xb1   :  { %530 = vst [vmem:[#allocation2 + $0x10] sm:$0xf] %v529_v11  ;;  %v397_v24 = vor.u32 %v395_v57, %v14931_v8  ;;  %v546_v27 = vld [vmem:[#allocation2 + $0x28] sm:$0xf]  ;;  %v288_v31 = vld [vmem:[#allocation11 + $0x48] sm:$0xff]  ;;  %v405_v32 = vor.u32 %v403_v63, %v14937_v14  ;;  %v448_v42 = vshrl.u32 %v13384_v3, 16 }
  0xb2   :  { %560 = vst [vmem:[#allocation2 + $0x38] sm:$0xf] %v559_v19  ;;  %566 = vst [vmem:[#allocation2 + $0x40] sm:$0xf] %v565_v20  ;;  %v552_v37 = vld [vmem:[#allocation2 + $0x30] sm:$0xf]  ;;  %v445_v38 = vor.u32 %v443_v9, %v14939_v15  ;;  %v14955_v28 = vpack.c.bf16 %v288_v31, %v288_v31 }
  0xb3   :  { %v208_v39 = vld [vmem:[#allocation2 + $0x88] sm:$0x1]  ;;  %v211_v40 = vld [vmem:[#allocation2 + $0x90] sm:$0x1]  ;;  %v547_v41 = vsel %vm14748_vm12, %v397_v24, %v546_v27  ;;  %v451_v44 = vshll.u32 %v13384_v3, 16  ;;  %v194_v46 = vsel %vm14713_vm8, 0, %v193_v5  ;;  %v553_v47 = vsel %vm14748_vm12, %v405_v32, %v552_v37 }
  0xb4   :  { %548 = vst [vmem:[#allocation2 + $0x28] sm:$0xf] %v547_v41  ;;  %v582_v25 = vld [vmem:[#allocation2 + $0x68] sm:$0xf]  ;;  %195 = vst [vmem:[#allocation2 + $0x60] sm:$0x1] %v194_v46 }
  0xb5   :  { %v424_v48 = vshrl.u32 %v13381_v17, 16  ;;  %v427_v49 = vshll.u32 %v13381_v17, 16  ;;  %v202_v50 = vld [vmem:[#allocation2 + $0x78] sm:$0x1]  ;;  %554 = vst [vmem:[#allocation2 + $0x30] sm:$0xf] %v553_v47  ;;  %v583_v53 = vsel %vm14748_vm12, %v445_v38, %v582_v25 }
  0xb6   :  { %v14957_v51 = vrot.slane %v448_v42, 7  ;;  %v209_v55 = vsel %vm14713_vm8, 0, %v208_v39  ;;  %v212_v56 = vsel %vm14713_vm8, 0, %v211_v40  ;;  %v398_v57 = vrot.slane %v14931_v8, 4  ;;  %584 = vst [vmem:[#allocation2 + $0x68] sm:$0xf] %v583_v53 }
  0xb7   :  { %v588_v58 = vld [vmem:[#allocation2 + $0x70] sm:$0xf]  ;;  %v14966_v59 = vrot.slane %v424_v48, 7  ;;  %210 = vst [vmem:[#allocation2 + $0x88] sm:$0x1] %v209_v55  ;;  %v293_v61 = vld [vmem:[#allocation11 + $0x70] sm:$0xff] }
  0xb8   :  { %213 = vst [vmem:[#allocation2 + $0x90] sm:$0x1] %v212_v56  ;;  %v294_v63 = vld [vmem:[#allocation11 + $0x78] sm:$0xff]  ;;  %v406_v3 = vrot.slane %v14937_v14, 4  ;;  %v453_v4 = vor.u32 %v451_v44, %v14957_v51  ;;  %v570_v5 = vld [vmem:[#allocation2 + $0x58] sm:$0xf]  ;;  %v13387_v37 = vpack.c.bf16 %v293_v61, %v293_v61 }
  0xb9   :  { %v203_v6 = vsel %vm14713_vm8, 0, %v202_v50  ;;  %v14331_v7 = vld [vmem:[#allocation2 + $0x8] ss:$8 sps:$4 sm:$0xff]   ;;  %v446_v9 = vrot.slane %v14939_v15, 4  ;;  %v429_v10 = vor.u32 %v427_v49, %v14966_v59  ;;  %v432_v11 = vshrl.u32 %v14955_v28, 16 }
  0xba   :  { %204 = vst [vmem:[#allocation2 + $0x78] sm:$0x1] %v203_v6  ;;  %v291_v12 = vld [vmem:[#allocation11 + $0x60] sm:$0xff]  ;;  %v292_v13 = vld [vmem:[#allocation11 + $0x68] sm:$0xff]  ;;  %v454_v17 = vrot.slane %v14957_v51, 4  ;;  %v589_v19 = vsel %vm14748_vm12, %v453_v4, %v588_v58  ;;  %v435_v20 = vshll.u32 %v14955_v28, 16  ;;  %1234 = vrot.lane.b32.xlu0 %v14331_v7, %s14551_s29  ;;  %v13388_v40 = vpack.c.bf16 %v294_v63, %v294_v63 }
  0xbb   :  { %v14979_v24 = vld [vmem:[#allocation2 + $0x10] sm:$0xe]  ;;  %v14332_v27 = vld [vmem:[#allocation2 + $0x38] ss:$8 sps:$4 sm:$0xff]   ;;  %590 = vst [vmem:[#allocation2 + $0x70] sm:$0xf] %v589_v19  ;;  %v571_v32 = vsel %vm14748_vm12, %v429_v10, %v570_v5  ;;  %v13385_v28 = vpack.c.bf16 %v291_v12, %v291_v12  ;;  %v13386_v48 = vpack.c.bf16 %v292_v13, %v292_v13 }
  0xbc   :  { %v14982_v31 = vld [vmem:[#allocation2 + $0x38] sm:$0xe]  ;;  %v14986_v38 = vld [vmem:[#allocation2 + $0x40] sm:$0xe]  ;;  %v14988_v39 = vld [vmem:[#allocation2 + $0x28] sm:$0xe]  ;;  %1240 = vrot.lane.b32.xlu1 %v14332_v27, %s14551_s29 }
  0xbd   :  { %572 = vst [vmem:[#allocation2 + $0x58] sm:$0xf] %v571_v32  ;;  %v205_v41 = vld [vmem:[#allocation2 + $0x80] sm:$0x1]  ;;  %v14333_v42 = vld [vmem:[#allocation2 + $0x28] ss:$8 sps:$4 sm:$0xff]  }
  0xbe   :  { %v14991_v44 = vld [vmem:[#allocation2 + $0x30] sm:$0xe]  ;;  %v12838_v46 = vrot.slane %v14979_v24, 9  ;;  %v14994_v47 = vld [vmem:[#allocation2 + $0x68] sm:$0xe]  ;;  %1238 = vrot.lane.b32.xlu0 %v14333_v42, %s14551_s29  ;;  %v14999_v50 = vrot.slane %v432_v11, 7 }
  0xbf   :  { %v472_v53 = vshrl.u32 %v13387_v37, 16  ;;  %v475_v55 = vshll.u32 %v13387_v37, 16  ;;  %v576_v63 = vld [vmem:[#allocation2 + $0x60] sm:$0xf]  ;;  %v480_v4 = vshrl.u32 %v13388_v40, 16  ;;  %v206_v11 = vsel %vm14713_vm8, 0, %v205_v41 }
  0xc0   :  { %v228_v5 = vld [vmem:[#allocation2 + $0x1c] sm:$0x1]  ;;  %v437_v7 = vor.u32 %v435_v20, %v14999_v50  ;;  %v606_v12 = vld [vmem:[#allocation2 + $0x88] sm:$0xf]  ;;  %v483_v32 = vshll.u32 %v13388_v40, 16  ;;  %v456_v56 = vshrl.u32 %v13385_v28, 16 }
  0xc1   :  { %v15006_v10 = vrot.slane %v472_v53, 7  ;;  %207 = vst [vmem:[#allocation2 + $0x80] sm:$0x1] %v206_v11  ;;  %v612_v53 = vld [vmem:[#allocation2 + $0x90] sm:$0xf]  ;;  %v15023_v0 = vrot.slane %v480_v4, 7 }
  0xc2   :  { %v14334_v19 = vld [vmem:[#allocation2 + $0x68] ss:$8 sps:$4 sm:$0xff]   ;;  %v577_v20 = vsel %vm14748_vm12, %v437_v7, %v576_v63  ;;  %v231_v41 = vld [vmem:[#allocation2 + $0x24] sm:$0x1]  ;;  %v459_v6 = vshll.u32 %v13385_v28, 16  ;;  %v464_v25 = vshrl.u32 %v13386_v48, 16 }
  0xc3   :  { %v15017_v37 = vld [vmem:[#allocation2 + $0x70] sm:$0xe]  ;;  %v477_v42 = vor.u32 %v475_v55, %v15006_v10  ;;  %1244 = vrot.lane.b32.xlu1 %v14334_v19, %s14551_s29  ;;  %578 = vst [vmem:[#allocation2 + $0x60] sm:$0xf] %v577_v20  ;;  %v15025_v27 = vld [vmem:[#allocation2 + $0x18] sm:$0xe]  ;;  %v485_v28 = vor.u32 %v483_v32, %v15023_v0 }
  0xc4   :  { %v467_v11 = vshll.u32 %v13386_v48, 16  ;;  %v594_v61 = vld [vmem:[#allocation2 + $0x78] sm:$0xf]  ;;  %v229_v55 = vsel %vm15012_vm0, 0, %v228_v5  ;;  %v232_v63 = vsel %vm15012_vm0, 0, %v231_v41  ;;  %v15037_v19 = vrot.slane %v456_v56, 7 }
  0xc5   :  { %v607_v40 = vsel %vm14748_vm12, %v477_v42, %v606_v12  ;;  %v15033_v7 = vld [vmem:[#allocation2 + $0x20] sm:$0xe]  ;;  %v15039_v20 = vrot.slane %v464_v25, 7  ;;  %230 = vst [vmem:[#allocation2 + $0x1c] sm:$0x1] %v229_v55  ;;  %v12800_v42 = vrot.slane %v15025_v27, 9  ;;  %v613_v32 = vsel %vm14748_vm12, %v485_v28, %v612_v53 }
  0xc6   :  { %608 = vst [vmem:[#allocation2 + $0x88] sm:$0xf] %v607_v40  ;;  %233 = vst [vmem:[#allocation2 + $0x24] sm:$0x1] %v232_v63  ;;  %v222_v48 = vld [vmem:[#allocation2 + $0xc] sm:$0x1]  ;;  %v461_v56 = vor.u32 %v459_v6, %v15037_v19 }
  0xc7   :  { %v223_v41 = vsel %vm15012_vm0, 0, %v222_v48  ;;  %v225_v4 = vld [vmem:[#allocation2 + $0x14] sm:$0x1]  ;;  %v469_v25 = vor.u32 %v467_v11, %v15039_v20  ;;  %v12801_v40 = vrot.slane %v15033_v7, 9  ;;  %v15051_v55 = vld [vmem:[#allocation2 + $0x8] sm:$0xe] }
  0xc8   :  { %224 = vst [vmem:[#allocation2 + $0xc] sm:$0x1] %v223_v41  ;;  %614 = vst [vmem:[#allocation2 + $0x90] sm:$0xf] %v613_v32  ;;  %v600_v5 = vld [vmem:[#allocation2 + $0x80] sm:$0xf]  ;;  %v595_v6 = vsel %vm14748_vm12, %v461_v56, %v594_v61 }
  0xc9   :  { %v226_v48 = vsel %vm15012_vm0, 0, %v225_v4  ;;  %v15056_v12 = vld [vmem:[#allocation2 + $0x10] sm:$0xe]  ;;  %v601_v11 = vsel %vm14748_vm12, %v469_v25, %v600_v5  ;;  %v12798_v28 = vrot.slane %v15051_v55, 9  ;;  %v240_v41 = vld [vmem:[#allocation2 + $0x3c] sm:$0x1] }
  0xca   :  { %227 = vst [vmem:[#allocation2 + $0x14] sm:$0x1] %v226_v48  ;;  %v243_v32 = vld [vmem:[#allocation2 + $0x44] sm:$0x1]  ;;  %v14335_v63 = vld [vmem:[#allocation2 + $0x58] ss:$8 sps:$4 sm:$0xff]  }
  0xcb   :  { %v15064_v58 = vld [vmem:[#allocation2 + $0x60] sm:$0xe]  ;;  %596 = vst [vmem:[#allocation2 + $0x78] sm:$0xf] %v595_v6  ;;  %602 = vst [vmem:[#allocation2 + $0x80] sm:$0xf] %v601_v11  ;;  %1242 = vrot.lane.b32.xlu0 %v14335_v63, %s14551_s29 }
  0xcc   :  { %vm1072_vm2 = vcmask 1046532   ;;  %v12799_v53 = vrot.slane %v15056_v12, 9  ;;  %v241_v35 = vsel %vm15012_vm0, 0, %v240_v41  ;;  %v244_v61 = vsel %vm15012_vm0, 0, %v243_v32  ;;  %v15072_v5 = vld [vmem:[#allocation2 + $0x38] sm:$0xe] }
  0xcd   :  { %v537_v56 = vld [vmem:[#allocation2 + $0x1c] sm:$0x1]  ;;  %242 = vst [vmem:[#allocation2 + $0x3c] sm:$0x1] %v241_v35  ;;  %245 = vst [vmem:[#allocation2 + $0x44] sm:$0x1] %v244_v61 }
  0xce   :  { %v15075_v25 = vld [vmem:[#allocation2 + $0x40] sm:$0xe]  ;;  %v15077_v48 = vld [vmem:[#allocation2 + $0x88] sm:$0xe]  ;;  %v538_v6 = vsel %vm14713_vm8, %v382_v52, %v537_v56  ;;  %v543_v11 = vld [vmem:[#allocation2 + $0x24] sm:$0x1] }
  0xcf   :  { %v234_v41 = vld [vmem:[#allocation2 + $0x2c] sm:$0x1]  ;;  %539 = vst [vmem:[#allocation2 + $0x1c] sm:$0x1] %v538_v6  ;;  %v544_v63 = vsel %vm14713_vm8, %v390_v22, %v543_v11  ;;  %v12804_v35 = vrot.slane %v15072_v5, 9  ;;  %v12805_v6 = vrot.slane %v15075_v25, 9  ;;  %vm15127_vm3 = vmor %vm1071_vm1, %vm1072_vm2 }
  0xd0   :  { %v525_v32 = vld [vmem:[#allocation2 + $0xc] sm:$0x1]  ;;  %v235_v61 = vsel %vm15012_vm0, 0, %v234_v41  ;;  %v237_v4 = vld [vmem:[#allocation2 + $0x34] sm:$0x1]  ;;  %v20276_v25 = vrot.slane %v14890_v62, 9 }
  0xd1   :  { %v14336_v49 = vld [vmem:[#allocation2 + $0x88] ss:$8 sps:$4 sm:$0xff]   ;;  %545 = vst [vmem:[#allocation2 + $0x24] sm:$0x1] %v544_v63  ;;  %v526_v52 = vsel %vm14713_vm8, %v366_v34, %v525_v32  ;;  %236 = vst [vmem:[#allocation2 + $0x2c] sm:$0x1] %v235_v61 }
  0xd2   :  { %v15090_v26 = vld [vmem:[#allocation2 + $0x90] sm:$0xe]  ;;  %527 = vst [vmem:[#allocation2 + $0xc] sm:$0x1] %v526_v52  ;;  %v531_v56 = vld [vmem:[#allocation2 + $0x14] sm:$0x1]  ;;  %1248 = vrot.lane.b32.xlu1 %v14336_v49, %s14551_s29 }
  0xd3   :  { %v238_v11 = vsel %vm15012_vm0, 0, %v237_v4  ;;  %v14337_v41 = vld [vmem:[#allocation2 + $0x78] ss:$8 sps:$4 sm:$0xff]   ;;  %v532_v60 = vsel %vm14713_vm8, %v374_v43, %v531_v56  ;;  %v15110_v32 = vld [vmem:[#allocation2 + $0x28] sm:$0xe]  ;;  %v20277_v51 = vrot.slane %v14982_v31, 9 }
  0xd4   :  { %239 = vst [vmem:[#allocation2 + $0x34] sm:$0x1] %v238_v11  ;;  %v15106_v34 = vld [vmem:[#allocation2 + $0x78] sm:$0xe]  ;;  %v15108_v63 = vld [vmem:[#allocation2 + $0x80] sm:$0xe]  ;;  %1246 = vrot.lane.b32.xlu0 %v14337_v41, %s14551_s29 }
  0xd5   :  { %533 = vst [vmem:[#allocation2 + $0x14] sm:$0x1] %v532_v60  ;;  %v561_v61 = vld [vmem:[#allocation2 + $0x3c] sm:$0x1]  ;;  %v567_v4 = vld [vmem:[#allocation2 + $0x44] sm:$0x1] }
  0xd6   :  { %v15113_v52 = vld [vmem:[#allocation2 + $0x30] sm:$0xe]  ;;  %v562_v43 = vsel %vm14713_vm8, %v414_v54, %v561_v61  ;;  %v568_v56 = vsel %vm14713_vm8, %v422_v18, %v567_v4  ;;  %v258_v11 = vld [vmem:[#allocation2 + $0x6c] sm:$0x1]  ;;  %v261_v41 = vld [vmem:[#allocation2 + $0x74] sm:$0x1] }
  0xd7   :  { %v1567_v22 = vld [vmem:[#allocation2 + $0x1c] sm:$0x1]  ;;  %563 = vst [vmem:[#allocation2 + $0x3c] sm:$0x1] %v562_v43  ;;  %569 = vst [vmem:[#allocation2 + $0x44] sm:$0x1] %v568_v56 }
  0xd8   :  { %v2134_v16 = vld [vmem:[#allocation2 + $0x1c] sm:$0x1]  ;;  %v259_v21 = vsel %vm15012_vm0, 0, %v258_v11  ;;  %v262_v45 = vsel %vm15012_vm0, 0, %v261_v41  ;;  %v1569_v54 = vld [vmem:[#allocation2 + $0x24] sm:$0x1] }
  0xd9   :  { %v1636_v18 = vrot.slane %v1567_v22, 5  ;;  %v15135_v61 = vld [vmem:[#allocation2 + $0x24] sm:$0x1]  ;;  %v2201_v4 = vrot.slane %v2134_v16, 5  ;;  %260 = vst [vmem:[#allocation2 + $0x6c] sm:$0x1] %v259_v21 }
  0xda   :  { %263 = vst [vmem:[#allocation2 + $0x74] sm:$0x1] %v262_v45  ;;  %v1640_v49 = vrot.slane %v1569_v54, 5  ;;  %v1563_v30 = vld [vmem:[#allocation2 + $0xc] sm:$0x1]  ;;  %v12802_v43 = vrot.slane %v15110_v32, 9 }
  0xdb   :  { %v549_v36 = vld [vmem:[#allocation2 + $0x2c] sm:$0x1]  ;;  %v1637_v56 = vsel %vm15127_vm3, %v12800_v42, %v1636_v18  ;;  %v1628_v11 = vrot.slane %v1563_v30, 5  ;;  %v555_v16 = vld [vmem:[#allocation2 + $0x34] sm:$0x1]  ;;  %v12803_v41 = vrot.slane %v15113_v52, 9  ;;  %v2202_v27 = vsel %vm15127_vm3, %v12839_v29, %v2201_v4 }
  0xdc   :  { %v550_v22 = vsel %vm14713_vm8, %v398_v57, %v549_v36  ;;  %v1641_v21 = vsel %vm15127_vm3, %v12801_v40, %v1640_v49  ;;  %v2205_v42 = vrot.slane %v15135_v61, 5  ;;  %v1565_v30 = vld [vmem:[#allocation2 + $0x14] sm:$0x1]  ;;  %v556_v36 = vsel %vm14713_vm8, %v406_v3, %v555_v16  ;;  %v252_v29 = vld [vmem:[#allocation2 + $0x5c] sm:$0x1] }
  0xdd   :  { %v2132_v8 = vld [vmem:[#allocation2 + $0x14] sm:$0x1]  ;;  %551 = vst [vmem:[#allocation2 + $0x2c] sm:$0x1] %v550_v22  ;;  %v12815_v57 = vcombine.low %v1637_v56, %v1641_v21  ;;  %v1629_v7 = vsel %vm15127_vm3, %v12798_v28, %v1628_v11  ;;  %v1632_v23 = vrot.slane %v1565_v30, 5  ;;  %v253_v14 = vsel %vm15012_vm0, 0, %v252_v29 }
  0xde   :  { %v2197_v40 = vrot.slane %v2132_v8, 5  ;;  %557 = vst [vmem:[#allocation2 + $0x34] sm:$0x1] %v556_v36  ;;  %v255_v49 = vld [vmem:[#allocation2 + $0x64] sm:$0x1]  ;;  %v20279_v32 = vrot.slane %v14991_v44, 9 }
  0xdf   :  { %v15164_v45 = vld [vmem:[#allocation2 + $0x68] sm:$0xe]  ;;  %v15166_v54 = vld [vmem:[#allocation2 + $0x70] sm:$0xe]  ;;  %v256_v3 = vsel %vm15012_vm0, 0, %v255_v49  ;;  %1716 = vrot.lane.b32.xlu1 %v12815_v57, %s14551_s29  ;;  %v1633_v55 = vsel %vm15127_vm3, %v12799_v53, %v1632_v23  ;;  %v20281_v52 = vrot.slane %v14999_v50, 4 }
  0xe0   :  { %v2198_v28 = vsel %vm15127_vm3, %v12838_v46, %v2197_v40  ;;  %v1575_v18 = vld [vmem:[#allocation2 + $0x3c] sm:$0x1]  ;;  %v1577_v61 = vld [vmem:[#allocation2 + $0x44] sm:$0x1]  ;;  %254 = vst [vmem:[#allocation2 + $0x5c] sm:$0x1] %v253_v14  ;;  %v12814_v56 = vcombine.low %v1629_v7, %v1633_v55 }
  0xe1   :  { %v2142_v4 = vld [vmem:[#allocation2 + $0x3c] sm:$0x1]  ;;  %257 = vst [vmem:[#allocation2 + $0x64] sm:$0x1] %v256_v3  ;;  %v12854_v11 = vcombine.low %v2198_v28, %v2202_v27  ;;  %v1652_v22 = vrot.slane %v1575_v18, 5  ;;  %v1656_v16 = vrot.slane %v1577_v61, 5 }
  0xe2   :  { %v585_v21 = vld [vmem:[#allocation2 + $0x6c] sm:$0x1]  ;;  %v2217_v30 = vrot.slane %v2142_v4, 5  ;;  %v591_v24 = vld [vmem:[#allocation2 + $0x74] sm:$0x1]  ;;  %v12808_v53 = vrot.slane %v15164_v45, 9  ;;  %1714 = vrot.lane.b32.xlu0 %v12814_v56, %s14551_s29 }
  0xe3   :  { %v586_v12 = vsel %vm14713_vm8, %v446_v9, %v585_v21  ;;  %v12809_v46 = vrot.slane %v15166_v54, 9  ;;  %2291 = vst.msk [vmem:[#allocation3 + $0x20] sm:$0xff] %vm682_vm4, %v12854_v11  ;;  %v1653_v27 = vsel %vm15127_vm3, %v12804_v35, %v1652_v22  ;;  %v1657_v15 = vsel %vm15127_vm3, %v12805_v6, %v1656_v16  ;;  %v15201_v8 = vld [vmem:[#allocation2 + $0x58] sm:$0xe]  ;;  %v270_v36 = vld [vmem:[#allocation2 + $0x8c] sm:$0x1] }
  0xe4   :  { %587 = vst [vmem:[#allocation2 + $0x6c] sm:$0x1] %v586_v12  ;;  %v592_v9 = vsel %vm14713_vm8, %v454_v17, %v591_v24  ;;  %v273_v57 = vld [vmem:[#allocation2 + $0x94] sm:$0x1]  ;;  %v12817_v7 = vcombine.low %v1653_v27, %v1657_v15  ;;  %v15203_v5 = vld [vmem:[#allocation2 + $0x44] sm:$0x1]  ;;  %v2206_v6 = vsel %vm15127_vm3, %v20276_v25, %v2205_v42  ;;  %v2218_v17 = vsel %vm15127_vm3, %v20277_v51, %v2217_v30 }
  0xe5   :  { %v1571_v23 = vld [vmem:[#allocation2 + $0x2c] sm:$0x1]  ;;  %593 = vst [vmem:[#allocation2 + $0x74] sm:$0x1] %v592_v9  ;;  %v1573_v40 = vld [vmem:[#allocation2 + $0x34] sm:$0x1] }
  0xe6   :  { %v2138_v35 = vld [vmem:[#allocation2 + $0x2c] sm:$0x1]  ;;  %v1644_v29 = vrot.slane %v1571_v23, 5  ;;  %v2140_v49 = vld [vmem:[#allocation2 + $0x34] sm:$0x1]  ;;  %1720 = vrot.lane.b32.xlu1 %v12817_v7, %s14551_s29  ;;  %v1648_v3 = vrot.slane %v1573_v40, 5 }
  0xe7   :  { %v2209_v14 = vrot.slane %v2138_v35, 5  ;;  %v2213_v55 = vrot.slane %v2140_v49, 5  ;;  %v15214_v28 = vld [vmem:[#allocation2 + $0x60] sm:$0xe]  ;;  %v271_v62 = vsel %vm15012_vm0, 0, %v270_v36  ;;  %v274_v42 = vsel %vm15012_vm0, 0, %v273_v57 }
  0xe8   :  { %v2221_v31 = vrot.slane %v15203_v5, 5  ;;  %v1645_v18 = vsel %vm15127_vm3, %v12802_v43, %v1644_v29  ;;  %v20278_v61 = vrot.slane %v14988_v39, 9  ;;  %v573_v56 = vld [vmem:[#allocation2 + $0x5c] sm:$0x1]  ;;  %v579_v11 = vld [vmem:[#allocation2 + $0x64] sm:$0x1]  ;;  %v1649_v16 = vsel %vm15127_vm3, %v12803_v41, %v1648_v3 }
  0xe9   :  { %v12806_v22 = vrot.slane %v15201_v8, 9  ;;  %272 = vst [vmem:[#allocation2 + $0x8c] sm:$0x1] %v271_v62  ;;  %275 = vst [vmem:[#allocation2 + $0x94] sm:$0x1] %v274_v42  ;;  %v2214_v43 = vsel %vm15127_vm3, %v20279_v32, %v2213_v55  ;;  %v20280_v21 = vrot.slane %v14966_v59, 4  ;;  %v12816_v27 = vcombine.low %v1645_v18, %v1649_v16 }
  0xea   :  { %v2210_v4 = vsel %vm15127_vm3, %v20278_v61, %v2209_v14  ;;  %v15242_v12 = vld [vmem:[#allocation2 + $0x88] sm:$0xe]  ;;  %v264_v24 = vld [vmem:[#allocation2 + $0x7c] sm:$0x1]  ;;  %v12856_v15 = vcombine.low %v2214_v43, %v2218_v17  ;;  %v580_v44 = vsel %vm14713_vm8, %v20281_v52, %v579_v11  ;;  %v15248_v41 = vld [vmem:[#allocation2 + $0x90] sm:$0xe] }
  0xeb   :  { %v12855_v39 = vcombine.low %v2206_v6, %v2210_v4  ;;  %v574_v30 = vsel %vm14713_vm8, %v20280_v21, %v573_v56  ;;  %v267_v9 = vld [vmem:[#allocation2 + $0x84] sm:$0x1]  ;;  %v699_v36 = vld [vmem:[#allocation2 + $0x20] sm:$0xf]  ;;  %v1583_v59 = vld [vmem:[#allocation2 + $0x6c] sm:$0x1]  ;;  %1718 = vrot.lane.b32.xlu0 %v12816_v27, %s14551_s29 }
  0xec   :  { %575 = vst [vmem:[#allocation2 + $0x5c] sm:$0x1] %v574_v30  ;;  %v2150_v57 = vld [vmem:[#allocation2 + $0x6c] sm:$0x1]  ;;  %581 = vst [vmem:[#allocation2 + $0x64] sm:$0x1] %v580_v44 }
  0xed   :  { %2292 = vst.msk [vmem:[#allocation3 + $0x48] sm:$0xff] %vm682_vm4, %v12855_v39  ;;  %v12807_v7 = vrot.slane %v15214_v28, 9  ;;  %v265_v23 = vsel %vm15012_vm0, 0, %v264_v24  ;;  %2293 = vst.msk [vmem:[#allocation3 + $0x70] sm:$0xff] %vm682_vm4, %v12856_v15  ;;  %v1585_v50 = vld [vmem:[#allocation2 + $0x74] sm:$0x1] }
  0xee   :  { %v1668_v35 = vrot.slane %v1583_v59, 5  ;;  %v15256_v25 = vld [vmem:[#allocation2 + $0x74] sm:$0x1]  ;;  %v12812_v6 = vrot.slane %v15242_v12, 9  ;;  %266 = vst [vmem:[#allocation2 + $0x7c] sm:$0x1] %v265_v23 }
  0xef   :  { %v15259_v51 = vld [vmem:[#allocation2 + $0x78] sm:$0xe]  ;;  %v1672_v17 = vrot.slane %v1585_v50, 5  ;;  %v2233_v40 = vrot.slane %v2150_v57, 5  ;;  %v12813_v29 = vrot.slane %v15248_v41, 9  ;;  %v268_v49 = vsel %vm15012_vm0, 0, %v267_v9 }
  0xf0   :  { %v700_v14 = vld [vmem:[#allocation2 + $0x24] sm:$0x1]  ;;  %v1669_v3 = vsel %vm15127_vm3, %v12808_v53, %v1668_v35  ;;  %v2237_v55 = vrot.slane %v15256_v25, 5  ;;  %269 = vst [vmem:[#allocation2 + $0x84] sm:$0x1] %v268_v49  ;;  %v783_v42 = vshrl.u32 %v699_v36, 16 }
  0xf1   :  { %v701_v28 = vld [vmem:[#allocation2 + $0x28] sm:$0xf]  ;;  %v702_v62 = vld [vmem:[#allocation2 + $0x2c] sm:$0x1]  ;;  %v1673_v18 = vsel %vm15127_vm3, %v12809_v46, %v1672_v17  ;;  %v615_v4 = vld [vmem:[#allocation2 + $0x94] sm:$0x1] }
  0xf2   :  { %v609_v61 = vld [vmem:[#allocation2 + $0x8c] sm:$0x1]  ;;  %v786_v56 = vshll.u32 %v699_v36, 16  ;;  %v792_v11 = vshll.u32 %v700_v14, 16  ;;  %v12819_v16 = vcombine.low %v1669_v3, %v1673_v18  ;;  %v20282_v45 = vrot.slane %v15006_v10, 4 }
  0xf3   :  { %v20283_v32 = vrot.slane %v15023_v0, 4  ;;  %v785_v39 = vrot.slane %v783_v42, 4  ;;  %v157_v54 = vld [vmem:[#allocation2] sm:$0x1]  ;;  %v1579_v21 = vld [vmem:[#allocation2 + $0x5c] sm:$0x1] }
  0xf4   :  { %v610_v53 = vsel %vm14713_vm8, %v20282_v45, %v609_v61  ;;  %v12810_v46 = vrot.slane %v15259_v51, 9  ;;  %v788_v30 = vrot.slane %v786_v56, 5  ;;  %v797_v24 = vshrl.u32 %v701_v28, 16  ;;  %1724 = vrot.lane.b32.xlu1 %v12819_v16, %s14551_s29  ;;  %v1581_v0 = vld [vmem:[#allocation2 + $0x64] sm:$0x1] }
  0xf5   :  { %v616_v43 = vsel %vm14713_vm8, %v20283_v32, %v615_v4  ;;  %611 = vst [vmem:[#allocation2 + $0x8c] sm:$0x1] %v610_v53  ;;  %v800_v27 = vshll.u32 %v701_v28, 16  ;;  %v20284_v10 = vrot.slane %v14994_v47, 9  ;;  %v1660_v52 = vrot.slane %v1579_v21, 5 }
  0xf6   :  { %617 = vst [vmem:[#allocation2 + $0x94] sm:$0x1] %v616_v43  ;;  %v2148_v44 = vld [vmem:[#allocation2 + $0x64] sm:$0x1]  ;;  %v806_v9 = vshll.u32 %v702_v62, 16  ;;  %v1664_v36 = vrot.slane %v1581_v0, 5  ;;  %v789_v23 = vor.u32 %v788_v30, %v785_v39 }
  0xf7   :  { %v2234_v15 = vsel %vm15127_vm3, %v20284_v10, %v2233_v40  ;;  %v2229_v59 = vrot.slane %v2148_v44, 5  ;;  %v597_v57 = vld [vmem:[#allocation2 + $0x7c] sm:$0x1]  ;;  %v799_v50 = vrot.slane %v797_v24, 4  ;;  %v1661_v35 = vsel %vm15127_vm3, %v12806_v22, %v1660_v52  ;;  %v219_v14 = vld [vmem:[#allocation2 + $0x4] sm:$0x1] }
  0xf8   :  { %v20285_v47 = vrot.slane %v15037_v19, 4  ;;  %v794_v40 = vrot.slane %v792_v11, 5  ;;  %v802_v49 = vrot.slane %v800_v27, 5  ;;  %v693_v3 = vld [vmem:[#allocation2 + $0x8] sm:$0xf]  ;;  %v1665_v28 = vsel %vm15127_vm3, %v12807_v7, %v1664_v36 }
  0xf9   :  { %v20286_v62 = vrot.slane %v15064_v58, 9  ;;  %v603_v42 = vld [vmem:[#allocation2 + $0x84] sm:$0x1]  ;;  %v808_v22 = vrot.slane %v806_v9, 5  ;;  %v158_v19 = vsel %vm14713_vm8, 0, %v157_v54  ;;  %v12818_v18 = vcombine.low %v1661_v35, %v1665_v28 }
  0xfa   :  { %v598_v17 = vsel %vm14713_vm8, %v20285_v47, %v597_v57  ;;  %v20287_v4 = vrot.slane %v15039_v20, 4  ;;  %v15307_v11 = vld [vmem:[#allocation2 + $0x80] sm:$0xe]  ;;  %v803_v7 = vor.u32 %v802_v49, %v799_v50  ;;  %159 = vst [vmem:[#allocation2] sm:$0x1] %v158_v19  ;;  %v790_v16 = vrot.slane %v789_v23, 4 }
  0xfb   :  { %v2230_v8 = vsel %vm15127_vm3, %v20286_v62, %v2229_v59  ;;  %599 = vst [vmem:[#allocation2 + $0x7c] sm:$0x1] %v598_v17  ;;  %v220_v45 = vsel %vm15012_vm0, 0, %v219_v14  ;;  %v694_v53 = vld [vmem:[#allocation2 + $0xc] sm:$0x1]  ;;  %v741_v20 = vshrl.u32 %v693_v3, 16  ;;  %1722 = vrot.lane.b32.xlu0 %v12818_v18, %s14551_s29 }
  0xfc   :  { %v12858_v61 = vcombine.low %v2230_v8, %v2234_v15  ;;  %v604_v56 = vsel %vm14713_vm8, %v20287_v4, %v603_v42  ;;  %v744_v32 = vshll.u32 %v693_v3, 16  ;;  %v1591_v43 = vld [vmem:[#allocation2 + $0x8c] sm:$0x1]  ;;  %221 = vst [vmem:[#allocation2 + $0x4] sm:$0x1] %v220_v45  ;;  %v12811_v27 = vrot.slane %v15307_v11, 9 }
  0xfd   :  { %605 = vst [vmem:[#allocation2 + $0x84] sm:$0x1] %v604_v56  ;;  %v1593_v39 = vld [vmem:[#allocation2 + $0x94] sm:$0x1]  ;;  %v2158_v54 = vld [vmem:[#allocation2 + $0x8c] sm:$0x1]  ;;  %v795_v57 = vsel %vm15311_vm7, %v790_v16, %v794_v40 }
  0xfe   :  { %2295 = vst.msk [vmem:[#allocation3 + $0xc0] sm:$0xff] %vm682_vm4, %v12858_v61  ;;  %v1684_v21 = vrot.slane %v1591_v43, 5  ;;  %v1688_v30 = vrot.slane %v1593_v39, 5  ;;  %v15319_v24 = vld [vmem:[#allocation2 + $0x94] sm:$0x1]  ;;  %v804_v10 = vrot.slane %v803_v7, 4 }
  0xff   :  { %v2249_v15 = vrot.slane %v2158_v54, 5  ;;  %v743_v0 = vrot.slane %v741_v20, 4  ;;  %v746_v52 = vrot.slane %v744_v32, 5  ;;  %v750_v44 = vshll.u32 %v694_v53, 16  ;;  %v2322_v9 = vld [vmem:[#allocation4] sm:$0x11] }
 0x100   :  { %v1685_v36 = vsel %vm15127_vm3, %v12812_v6, %v1684_v21  ;;  %v1689_v59 = vsel %vm15127_vm3, %v12813_v29, %v1688_v30  ;;  %v809_v23 = vsel %vm15311_vm7, %v804_v10, %v808_v22  ;;  %v20290_v50 = vrot.slane %v15017_v37, 9  ;;  %v2325_v29 = vld [vmem:[#allocation4 + $0x8] sm:$0x11]  ;;  %v2376_v19 = vld [vmem:[#allocation4 + $0x120] sm:$0x11] }
 0x101   :  { %v12821_v35 = vcombine.low %v1685_v36, %v1689_v59  ;;  %v2253_v6 = vrot.slane %v15319_v24, 5  ;;  %v747_v17 = vor.u32 %v746_v52, %v743_v0  ;;  %v691_v40 = vld [vmem:[#allocation2] sm:$0xf]  ;;  %v15341_v3 = vrot.slane %v750_v44, 5  ;;  %v2379_v18 = vld [vmem:[#allocation4 + $0x128] sm:$0x11] }
 0x102   :  { %v2238_v12 = vsel %vm15127_vm3, %v20290_v50, %v2237_v55  ;;  %v1587_v41 = vld [vmem:[#allocation2 + $0x7c] sm:$0x1]  ;;  %v2323_v25 = vsel %vm14717_vm10, 0, %v2322_v9  ;;  %v20291_v37 = vrot.slane %v15077_v48, 9  ;;  %v12752_v8 = vcombine.low %v795_v57, %v809_v23  ;;  %v2382_v61 = vld [vmem:[#allocation4 + $0x140] sm:$0x11] }
 0x103   :  { %v2154_v47 = vld [vmem:[#allocation2 + $0x7c] sm:$0x1]  ;;  %v1676_v49 = vrot.slane %v1587_v41, 5  ;;  %1728 = vrot.lane.b32.xlu1 %v12821_v35, %s14551_s29  ;;  %v727_v42 = vshrl.u32 %v691_v40, 16  ;;  %v730_v22 = vshll.u32 %v691_v40, 16  ;;  %v20292_v56 = vrot.slane %v15106_v34, 9 }
 0x104   :  { %v2241_v14 = vrot.slane %v2154_v47, 5  ;;  %v2250_v55 = vsel %vm15127_vm3, %v20291_v37, %v2249_v15  ;;  %v1589_v28 = vld [vmem:[#allocation2 + $0x84] sm:$0x1]  ;;  %2324 = vst [vmem:[#allocation4] sm:$0x11] %v2323_v25  ;;  %v20293_v34 = vrot.slane %v15108_v63, 9 }
 0x105   :  { %v2156_v62 = vld [vmem:[#allocation2 + $0x84] sm:$0x1]  ;;  %v1677_v4 = vsel %vm15127_vm3, %v12810_v46, %v1676_v49  ;;  %v1680_v48 = vrot.slane %v1589_v28, 5  ;;  %v2385_v45 = vld [vmem:[#allocation4 + $0x148] sm:$0x11]  ;;  %v729_v43 = vrot.slane %v727_v42, 4 }
 0x106   :  { %v2242_v11 = vsel %vm15127_vm3, %v20292_v56, %v2241_v14  ;;  %v2245_v7 = vrot.slane %v2156_v62, 5  ;;  %v692_v16 = vld [vmem:[#allocation2 + $0x4] sm:$0x1]  ;;  %v2439_v20 = vld [vmem:[#allocation4 + $0x268] sm:$0x11]  ;;  %v732_v39 = vrot.slane %v730_v22, 5 }
 0x107   :  { %v2436_v53 = vld [vmem:[#allocation4 + $0x260] sm:$0x11]  ;;  %v12859_v32 = vcombine.low %v2238_v12, %v2242_v11  ;;  %v736_v54 = vshll.u32 %v692_v16, 16  ;;  %v2446_v21 = vld [vmem:[#allocation4 + $0x10] sm:$0x11]  ;;  %v1681_v46 = vsel %vm15127_vm3, %v12811_v27, %v1680_v48  ;;  %v748_v0 = vrot.slane %v747_v17, 4  ;;  %978 = vrot.lane.b32.xlu1 %v12752_v8, %s14551_s29 }
 0x108   :  { %v2449_v51 = vld [vmem:[#allocation4 + $0x18] sm:$0x11]  ;;  %v2500_v30 = vld [vmem:[#allocation4 + $0x130] sm:$0x11]  ;;  %v2246_v15 = vsel %vm15127_vm3, %v20293_v34, %v2245_v7  ;;  %v2326_v52 = vsel %vm14717_vm10, 0, %v2325_v29  ;;  %v12820_v36 = vcombine.low %v1677_v4, %v1681_v46  ;;  %v733_v57 = vor.u32 %v732_v39, %v729_v43 }
 0x109   :  { %v2503_v10 = vld [vmem:[#allocation4 + $0x138] sm:$0x11]  ;;  %v2506_v44 = vld [vmem:[#allocation4 + $0x150] sm:$0x11]  ;;  %v12860_v59 = vcombine.low %v2246_v15, %v2250_v55  ;;  %2296 = vst.msk [vmem:[#allocation3 + $0xe8] sm:$0xff] %vm682_vm4, %v12859_v32  ;;  %v738_v23 = vrot.slane %v736_v54, 5  ;;  %v753_v50 = vsel %vm15311_vm7, %v748_v0, %v15341_v3 }
 0x10a   :  { %v2509_v9 = vld [vmem:[#allocation4 + $0x158] sm:$0x11]  ;;  %2327 = vst [vmem:[#allocation4 + $0x8] sm:$0x11] %v2326_v52  ;;  %v2560_v27 = vld [vmem:[#allocation4 + $0x270] sm:$0x11]  ;;  %1726 = vrot.lane.b32.xlu0 %v12820_v36, %s14551_s29 }
 0x10b   :  { %v2563_v63 = vld [vmem:[#allocation4 + $0x278] sm:$0x11]  ;;  %v2377_v12 = vsel %vm14717_vm10, 0, %v2376_v19  ;;  %v2380_v35 = vsel %vm14717_vm10, 0, %v2379_v18  ;;  %v2383_v41 = vsel %vm14717_vm10, 0, %v2382_v61  ;;  %2297 = vst.msk [vmem:[#allocation3 + $0x110] sm:$0xff] %vm682_vm4, %v12860_v59 }
 0x10c   :  { %v703_v47 = vld [vmem:[#allocation2 + $0x30] sm:$0xf]  ;;  %v734_v17 = vrot.slane %v733_v57, 4  ;;  %2378 = vst [vmem:[#allocation4 + $0x120] sm:$0x11] %v2377_v12  ;;  %v2386_v29 = vsel %vm14717_vm10, 0, %v2385_v45 }
 0x10d   :  { %2381 = vst [vmem:[#allocation4 + $0x128] sm:$0x11] %v2380_v35  ;;  %2384 = vst [vmem:[#allocation4 + $0x140] sm:$0x11] %v2383_v41  ;;  %v2437_v49 = vsel %vm14717_vm10, 0, %v2436_v53  ;;  %v2440_v14 = vsel %vm14717_vm10, 0, %v2439_v20 }
 0x10e   :  { %v704_v40 = vld [vmem:[#allocation2 + $0x34] sm:$0x1]  ;;  %2387 = vst [vmem:[#allocation4 + $0x148] sm:$0x11] %v2386_v29  ;;  %2438 = vst [vmem:[#allocation4 + $0x260] sm:$0x11] %v2437_v49  ;;  %v739_v62 = vsel %vm15311_vm7, %v734_v17, %v738_v23 }
 0x10f   :  { %2441 = vst [vmem:[#allocation4 + $0x268] sm:$0x11] %v2440_v14  ;;  %v2447_v3 = vsel %vm14816_vm15, 0, %v2446_v21  ;;  %v2450_v25 = vsel %vm14816_vm15, 0, %v2449_v51  ;;  %v2501_v37 = vsel %vm14816_vm15, 0, %v2500_v30  ;;  %v2504_v55 = vsel %vm14816_vm15, 0, %v2503_v10 }
 0x110   :  { %v705_v28 = vld [vmem:[#allocation2 + $0x38] sm:$0xf]  ;;  %2448 = vst [vmem:[#allocation4 + $0x10] sm:$0x11] %v2447_v3  ;;  %2451 = vst [vmem:[#allocation4 + $0x18] sm:$0x11] %v2450_v25  ;;  %v12750_v18 = vcombine.low %v739_v62, %v753_v50 }
 0x111   :  { %2502 = vst [vmem:[#allocation4 + $0x130] sm:$0x11] %v2501_v37  ;;  %2505 = vst [vmem:[#allocation4 + $0x138] sm:$0x11] %v2504_v55  ;;  %v2507_v8 = vsel %vm14816_vm15, 0, %v2506_v44  ;;  %v2510_v42 = vsel %vm14816_vm15, 0, %v2509_v9 }
 0x112   :  { %v2561_v22 = vsel %vm14816_vm15, 0, %v2560_v27  ;;  %v706_v19 = vld [vmem:[#allocation2 + $0x3c] sm:$0x1]  ;;  %2508 = vst [vmem:[#allocation4 + $0x150] sm:$0x11] %v2507_v8  ;;  %v2564_v61 = vsel %vm14816_vm15, 0, %v2563_v63  ;;  %974 = vrot.lane.b32.xlu0 %v12750_v18, %s14551_s29 }
 0x113   :  { %2511 = vst [vmem:[#allocation4 + $0x158] sm:$0x11] %v2510_v42  ;;  %2562 = vst [vmem:[#allocation4 + $0x270] sm:$0x11] %v2561_v22  ;;  %v811_v4 = vshrl.u32 %v703_v47, 16  ;;  %v814_v48 = vshll.u32 %v703_v47, 16 }
 0x114   :  { %v695_v56 = vld [vmem:[#allocation2 + $0x10] sm:$0xf]  ;;  %2565 = vst [vmem:[#allocation4 + $0x278] sm:$0x11] %v2564_v61  ;;  %v820_v11 = vshll.u32 %v704_v40, 16  ;;  %v825_v7 = vshrl.u32 %v705_v28, 16 }
 0x115   :  { %v828_v16 = vshll.u32 %v705_v28, 16  ;;  %v834_v45 = vshll.u32 %v706_v19, 16  ;;  %v696_v53 = vld [vmem:[#allocation2 + $0x14] sm:$0x1]  ;;  %v813_v20 = vrot.slane %v811_v4, 4  ;;  %v816_v32 = vrot.slane %v814_v48, 5 }
 0x116   :  { %v697_v43 = vld [vmem:[#allocation2 + $0x18] sm:$0xf]  ;;  %v698_v39 = vld [vmem:[#allocation2 + $0x1c] sm:$0x1]  ;;  %v822_v54 = vrot.slane %v820_v11, 5  ;;  %v827_v21 = vrot.slane %v825_v7, 4 }
 0x117   :  { %v830_v51 = vrot.slane %v828_v16, 5  ;;  %v836_v33 = vrot.slane %v834_v45, 5  ;;  %v817_v30 = vor.u32 %v816_v32, %v813_v20  ;;  %v755_v10 = vshrl.u32 %v695_v56, 16  ;;  %v711_v15 = vld [vmem:[#allocation2 + $0x60] sm:$0xf] }
 0x118   :  { %v758_v46 = vshll.u32 %v695_v56, 16  ;;  %v764_v34 = vshll.u32 %v696_v53, 16  ;;  %v769_v52 = vshrl.u32 %v697_v43, 16  ;;  %v772_v44 = vshll.u32 %v697_v43, 16  ;;  %v712_v36 = vld [vmem:[#allocation2 + $0x64] sm:$0x1] }
 0x119   :  { %v831_v0 = vor.u32 %v830_v51, %v827_v21  ;;  %v778_v9 = vshll.u32 %v698_v39, 16  ;;  %v818_v59 = vrot.slane %v817_v30, 4  ;;  %v757_v57 = vrot.slane %v755_v10, 4  ;;  %v713_v63 = vld [vmem:[#allocation2 + $0x68] sm:$0xf] }
 0x11a   :  { %v760_v23 = vrot.slane %v758_v46, 5  ;;  %v766_v27 = vrot.slane %v764_v34, 5  ;;  %v771_v12 = vrot.slane %v769_v52, 4  ;;  %v774_v35 = vrot.slane %v772_v44, 5  ;;  %v714_v29 = vld [vmem:[#allocation2 + $0x6c] sm:$0x1] }
 0x11b   :  { %v832_v50 = vrot.slane %v831_v0, 4  ;;  %v780_v41 = vrot.slane %v778_v9, 5  ;;  %v823_v47 = vsel %vm15311_vm7, %v818_v59, %v822_v54  ;;  %v867_v49 = vshrl.u32 %v711_v15, 16  ;;  %v187_v55 = vld [vmem:[#allocation2 + $0x50] sm:$0x1] }
 0x11c   :  { %v761_v17 = vor.u32 %v760_v23, %v757_v57  ;;  %v870_v14 = vshll.u32 %v711_v15, 16  ;;  %v775_v3 = vor.u32 %v774_v35, %v771_v12  ;;  %v876_v25 = vshll.u32 %v712_v36, 16  ;;  %v249_v28 = vld [vmem:[#allocation2 + $0x54] sm:$0x1]  ;;  %v709_v19 = vld [vmem:[#allocation2 + $0x58] sm:$0xf] }
 0x11d   :  { %v837_v40 = vsel %vm15311_vm7, %v832_v50, %v836_v33  ;;  %v881_v37 = vshrl.u32 %v713_v63, 16  ;;  %v869_v42 = vrot.slane %v867_v49, 4  ;;  %v884_v48 = vshll.u32 %v713_v63, 16  ;;  %v710_v45 = vld [vmem:[#allocation2 + $0x5c] sm:$0x1] }
 0x11e   :  { %v12753_v62 = vcombine.low %v823_v47, %v837_v40  ;;  %v762_v8 = vrot.slane %v761_v17, 4  ;;  %v872_v22 = vrot.slane %v870_v14, 5  ;;  %v776_v18 = vrot.slane %v775_v3, 4  ;;  %v719_v53 = vld [vmem:[#allocation2 + $0x80] sm:$0xf] }
 0x11f   :  { %v878_v61 = vrot.slane %v876_v25, 5  ;;  %v883_v4 = vrot.slane %v881_v37, 4  ;;  %v890_v7 = vshll.u32 %v714_v29, 16  ;;  %v188_v16 = vsel %vm14713_vm8, 0, %v187_v55  ;;  %v720_v54 = vld [vmem:[#allocation2 + $0x84] sm:$0x1] }
 0x120   :  { %980 = vrot.lane.b32.xlu1 %v12753_v62, %s14551_s29  ;;  %v767_v56 = vsel %vm15311_vm7, %v762_v8, %v766_v27  ;;  %v873_v11 = vor.u32 %v872_v22, %v869_v42  ;;  %v781_v20 = vsel %vm15311_vm7, %v776_v18, %v780_v41  ;;  %v886_v32 = vrot.slane %v884_v48, 5  ;;  %189 = vst [vmem:[#allocation2 + $0x50] sm:$0x1] %v188_v16  ;;  %v721_v10 = vld [vmem:[#allocation2 + $0x88] sm:$0xf] }
 0x121   :  { %v250_v43 = vsel %vm15012_vm0, 0, %v249_v28  ;;  %v853_v39 = vshrl.u32 %v709_v19, 16  ;;  %v12751_v21 = vcombine.low %v767_v56, %v781_v20  ;;  %v892_v33 = vrot.slane %v890_v7, 5  ;;  %v722_v0 = vld [vmem:[#allocation2 + $0x8c] sm:$0x1] }
 0x122   :  { %v874_v51 = vrot.slane %v873_v11, 4  ;;  %251 = vst [vmem:[#allocation2 + $0x54] sm:$0x1] %v250_v43  ;;  %v856_v30 = vshll.u32 %v709_v19, 16  ;;  %v887_v46 = vor.u32 %v886_v32, %v883_v4  ;;  %v862_v15 = vshll.u32 %v710_v45, 16 }
 0x123   :  { %v855_v34 = vrot.slane %v853_v39, 4  ;;  %v923_v52 = vshrl.u32 %v719_v53, 16  ;;  %976 = vrot.lane.b32.xlu0 %v12751_v21, %s14551_s29  ;;  %v926_v36 = vshll.u32 %v719_v53, 16  ;;  %v932_v59 = vshll.u32 %v720_v54, 16  ;;  %v715_v57 = vld [vmem:[#allocation2 + $0x70] sm:$0xf] }
 0x124   :  { %v879_v44 = vsel %vm15311_vm7, %v874_v51, %v878_v61  ;;  %v858_v9 = vrot.slane %v856_v30, 5  ;;  %v888_v23 = vrot.slane %v887_v46, 4  ;;  %v15420_v27 = vrot.slane %v862_v15, 5  ;;  %v716_v14 = vld [vmem:[#allocation2 + $0x74] sm:$0x1] }
 0x125   :  { %v925_v63 = vrot.slane %v923_v52, 4  ;;  %v937_v50 = vshrl.u32 %v721_v10, 16  ;;  %v928_v35 = vrot.slane %v926_v36, 5  ;;  %v934_v41 = vrot.slane %v932_v59, 5  ;;  %v717_v62 = vld [vmem:[#allocation2 + $0x78] sm:$0xf] }
 0x126   :  { %v859_v12 = vor.u32 %v858_v9, %v855_v34  ;;  %v940_v47 = vshll.u32 %v721_v10, 16  ;;  %v893_v17 = vsel %vm15311_vm7, %v888_v23, %v892_v33  ;;  %v946_v49 = vshll.u32 %v722_v0, 16  ;;  %v718_v11 = vld [vmem:[#allocation2 + $0x7c] sm:$0x1]  ;;  %v1823_v20 = vld [vmem:[#allocation2 + $0x20] sm:$0xf] }
 0x127   :  { %v939_v29 = vrot.slane %v937_v50, 4  ;;  %v895_v40 = vshrl.u32 %v715_v57, 16  ;;  %v12755_v3 = vcombine.low %v879_v44, %v893_v17  ;;  %v707_v25 = vld [vmem:[#allocation2 + $0x50] sm:$0xf]  ;;  %v929_v55 = vor.u32 %v928_v35, %v925_v63  ;;  %v1824_v10 = vld [vmem:[#allocation2 + $0x24] sm:$0x1] }
 0x128   :  { %v860_v37 = vrot.slane %v859_v12, 4  ;;  %v942_v28 = vrot.slane %v940_v47, 5  ;;  %v839_v42 = vshrl.u32 %v707_v25, 16  ;;  %v842_v22 = vshll.u32 %v707_v25, 16  ;;  %v1825_v0 = vld [vmem:[#allocation2 + $0x28] sm:$0xf] }
 0x129   :  { %v708_v8 = vld [vmem:[#allocation2 + $0x54] sm:$0x1]  ;;  %v948_v19 = vrot.slane %v946_v49, 5  ;;  %v897_v18 = vrot.slane %v895_v40, 4  ;;  %984 = vrot.lane.b32.xlu1 %v12755_v3, %s14551_s29  ;;  %v930_v48 = vrot.slane %v929_v55, 4  ;;  %v898_v45 = vshll.u32 %v715_v57, 16 }
 0x12a   :  { %v848_v61 = vshll.u32 %v708_v8, 16  ;;  %v865_v4 = vsel %vm15311_vm7, %v860_v37, %v15420_v27  ;;  %v943_v56 = vor.u32 %v942_v28, %v939_v29  ;;  %v841_v7 = vrot.slane %v839_v42, 4  ;;  %v1826_v23 = vld [vmem:[#allocation2 + $0x2c] sm:$0x1]  ;;  %v1819_v17 = vld [vmem:[#allocation2 + $0x10] sm:$0xf] }
 0x12b   :  { %v844_v16 = vrot.slane %v842_v22, 5  ;;  %v904_v53 = vshll.u32 %v716_v14, 16  ;;  %v935_v43 = vsel %vm15311_vm7, %v930_v48, %v934_v41  ;;  %v909_v54 = vshrl.u32 %v717_v62, 16  ;;  %v1820_v29 = vld [vmem:[#allocation2 + $0x14] sm:$0x1] }
 0x12c   :  { %v850_v32 = vrot.slane %v848_v61, 5  ;;  %v944_v39 = vrot.slane %v943_v56, 4  ;;  %v900_v51 = vrot.slane %v898_v45, 5  ;;  %v912_v30 = vshll.u32 %v717_v62, 16  ;;  %v1821_v25 = vld [vmem:[#allocation2 + $0x18] sm:$0xf] }
 0x12d   :  { %v845_v21 = vor.u32 %v844_v16, %v841_v7  ;;  %v906_v33 = vrot.slane %v904_v53, 5  ;;  %v911_v34 = vrot.slane %v909_v54, 4  ;;  %v918_v15 = vshll.u32 %v718_v11, 16  ;;  %v1822_v22 = vld [vmem:[#allocation2 + $0x1c] sm:$0x1] }
 0x12e   :  { %v949_v46 = vsel %vm15311_vm7, %v944_v39, %v948_v19  ;;  %v1880_v52 = vshrl.u32 %v1823_v20, 16  ;;  %v901_v36 = vor.u32 %v900_v51, %v897_v18  ;;  %v914_v59 = vrot.slane %v912_v30, 5  ;;  %v184_v11 = vld [vmem:[#allocation2 + $0x48] sm:$0x1]  ;;  %v1832_v51 = vld [vmem:[#allocation2 + $0x44] sm:$0x1] }
 0x12f   :  { %v846_v44 = vrot.slane %v845_v21, 4  ;;  %v12757_v9 = vcombine.low %v935_v43, %v949_v46  ;;  %v920_v57 = vrot.slane %v918_v15, 5  ;;  %v1883_v63 = vshll.u32 %v1823_v20, 16  ;;  %v246_v20 = vld [vmem:[#allocation2 + $0x4c] sm:$0x1] }
 0x130   :  { %v1882_v27 = vrot.slane %v1880_v52, 4  ;;  %v1889_v50 = vshll.u32 %v1824_v10, 16  ;;  %v902_v35 = vrot.slane %v901_v36, 4  ;;  %v915_v41 = vor.u32 %v914_v59, %v911_v34  ;;  %v2145_v34 = vld [vmem:[#allocation2 + $0x48] sm:$0xe] }
 0x131   :  { %v851_v12 = vsel %vm15311_vm7, %v846_v44, %v850_v32  ;;  %988 = vrot.lane.b32.xlu1 %v12757_v9, %s14551_s29  ;;  %v1894_v47 = vshrl.u32 %v1825_v0, 16  ;;  %v1885_v14 = vrot.slane %v1883_v63, 5  ;;  %v1897_v3 = vshll.u32 %v1825_v0, 16  ;;  %v1831_v32 = vld [vmem:[#allocation2 + $0x40] sm:$0xf] }
 0x132   :  { %v12754_v49 = vcombine.low %v851_v12, %v865_v4  ;;  %v1891_v40 = vrot.slane %v1889_v50, 5  ;;  %v907_v37 = vsel %vm15311_vm7, %v902_v35, %v906_v33  ;;  %v916_v55 = vrot.slane %v915_v41, 4  ;;  %v1827_v9 = vld [vmem:[#allocation2 + $0x30] sm:$0xf]  ;;  %v1829_v41 = vld [vmem:[#allocation2 + $0x38] sm:$0xf] }
 0x133   :  { %v1896_v28 = vrot.slane %v1894_v47, 4  ;;  %v1903_v62 = vshll.u32 %v1826_v23, 16  ;;  %v1886_v8 = vor.u32 %v1885_v14, %v1882_v27  ;;  %v1899_v42 = vrot.slane %v1897_v3, 5  ;;  %v1828_v27 = vld [vmem:[#allocation2 + $0x34] sm:$0x1] }
 0x134   :  { %982 = vrot.lane.b32.xlu0 %v12754_v49, %s14551_s29  ;;  %v1852_v19 = vshrl.u32 %v1819_v17, 16  ;;  %v1855_v18 = vshll.u32 %v1819_v17, 16  ;;  %v921_v61 = vsel %vm15311_vm7, %v916_v55, %v920_v57  ;;  %v1861_v48 = vshll.u32 %v1820_v29, 16  ;;  %v1830_v49 = vld [vmem:[#allocation2 + $0x3c] sm:$0x1] }
 0x135   :  { %v1905_v4 = vrot.slane %v1903_v62, 5  ;;  %v1866_v56 = vshrl.u32 %v1821_v25, 16  ;;  %v12756_v7 = vcombine.low %v907_v37, %v921_v61  ;;  %v1887_v16 = vrot.slane %v1886_v8, 4  ;;  %v1839_v61 = vld [vmem:[#allocation2 + $0x70] sm:$0xf] }
 0x136   :  { %v1900_v45 = vor.u32 %v1899_v42, %v1896_v28  ;;  %v1854_v53 = vrot.slane %v1852_v19, 4  ;;  %v1857_v43 = vrot.slane %v1855_v18, 5  ;;  %v1863_v39 = vrot.slane %v1861_v48, 5  ;;  %v1840_v5 = vld [vmem:[#allocation2 + $0x74] sm:$0x1] }
 0x137   :  { %v1868_v54 = vrot.slane %v1866_v56, 4  ;;  %v1869_v21 = vshll.u32 %v1821_v25, 16  ;;  %v1892_v33 = vsel %vm15311_vm7, %v1887_v16, %v1891_v40  ;;  %v1875_v10 = vshll.u32 %v1822_v22, 16 }
 0x138   :  { %986 = vrot.lane.b32.xlu0 %v12756_v7, %s14551_s29  ;;  %v1901_v30 = vrot.slane %v1900_v45, 4  ;;  %v185_v46 = vsel %vm14713_vm8, 0, %v184_v11  ;;  %v1858_v15 = vor.u32 %v1857_v43, %v1854_v53  ;;  %v247_v52 = vsel %vm15012_vm0, 0, %v246_v20 }
 0x139   :  { %v1871_v0 = vrot.slane %v1869_v21, 5  ;;  %186 = vst [vmem:[#allocation2 + $0x48] sm:$0x1] %v185_v46  ;;  %v1936_v44 = vshrl.u32 %v1831_v32, 16  ;;  %v1877_v59 = vrot.slane %v1875_v10, 5  ;;  %v1939_v57 = vshll.u32 %v1831_v32, 16 }
 0x13a   :  { %v1906_v36 = vsel %vm15311_vm7, %v1901_v30, %v1905_v4  ;;  %248 = vst [vmem:[#allocation2 + $0x4c] sm:$0x1] %v247_v52  ;;  %v1945_v23 = vshll.u32 %v1832_v51, 16  ;;  %v1859_v50 = vrot.slane %v1858_v15, 4  ;;  %v12845_v29 = vrot.slane %v2145_v34, 9 }
 0x13b   :  { %v12831_v63 = vcombine.low %v1892_v33, %v1906_v36  ;;  %v1872_v12 = vor.u32 %v1871_v0, %v1868_v54  ;;  %v1938_v35 = vrot.slane %v1936_v44, 4  ;;  %v1941_v47 = vrot.slane %v1939_v57, 5 }
 0x13c   :  { %v15449_v17 = vrot.slane %v1945_v23, 5  ;;  %v1908_v14 = vshrl.u32 %v1827_v9, 16  ;;  %v1864_v40 = vsel %vm15311_vm7, %v1859_v50, %v1863_v39  ;;  %v1911_v25 = vshll.u32 %v1827_v9, 16  ;;  %v1835_v23 = vld [vmem:[#allocation2 + $0x60] sm:$0xf] }
 0x13d   :  { %2101 = vrot.lane.b32.xlu1 %v12831_v63, %s14551_s29  ;;  %v1873_v3 = vrot.slane %v1872_v12, 4  ;;  %v1917_v37 = vshll.u32 %v1828_v27, 16  ;;  %v1942_v55 = vor.u32 %v1941_v47, %v1938_v35  ;;  %v1922_v62 = vshrl.u32 %v1829_v41, 16 }
 0x13e   :  { %v1910_v28 = vrot.slane %v1908_v14, 4  ;;  %v1925_v8 = vshll.u32 %v1829_v41, 16  ;;  %v1913_v22 = vrot.slane %v1911_v25, 5  ;;  %v1931_v18 = vshll.u32 %v1830_v49, 16 }
 0x13f   :  { %v1878_v42 = vsel %vm15311_vm7, %v1873_v3, %v1877_v59  ;;  %v1919_v19 = vrot.slane %v1917_v37, 5  ;;  %v1943_v56 = vrot.slane %v1942_v55, 4  ;;  %v1924_v11 = vrot.slane %v1922_v62, 4  ;;  %v1842_v59 = vld [vmem:[#allocation2 + $0x7c] sm:$0x1] }
 0x140   :  { %v12830_v4 = vcombine.low %v1864_v40, %v1878_v42  ;;  %v1833_v48 = vld [vmem:[#allocation2 + $0x48] sm:$0xf]  ;;  %v1927_v7 = vrot.slane %v1925_v8, 5  ;;  %v20294_v16 = vrot.slane %v14986_v38, 9  ;;  %v1914_v39 = vor.u32 %v1913_v22, %v1910_v28  ;;  %v1838_v62 = vld [vmem:[#allocation2 + $0x6c] sm:$0x1] }
 0x141   :  { %v1834_v53 = vld [vmem:[#allocation2 + $0x4c] sm:$0x1]  ;;  %v1950_v20 = vshrl.u32 %v1833_v48, 16  ;;  %v1953_v32 = vshll.u32 %v1833_v48, 16  ;;  %v1948_v54 = vsel %vm15311_vm7, %v1943_v56, %v15449_v17  ;;  %v1933_v46 = vrot.slane %v1931_v18, 5 }
 0x142   :  { %v2222_v45 = vsel %vm15127_vm3, %v20294_v16, %v2221_v31  ;;  %v2146_v43 = vld [vmem:[#allocation2 + $0x4c] sm:$0x1]  ;;  %2099 = vrot.lane.b32.xlu0 %v12830_v4, %s14551_s29  ;;  %v1959_v21 = vshll.u32 %v1834_v53, 16  ;;  %v1928_v33 = vor.u32 %v1927_v7, %v1924_v11  ;;  %v1915_v10 = vrot.slane %v1914_v39, 4  ;;  %v1841_v31 = vld [vmem:[#allocation2 + $0x78] sm:$0xf] }
 0x143   :  { %v2225_v51 = vrot.slane %v2146_v43, 5  ;;  %v1952_v30 = vrot.slane %v1950_v20, 4  ;;  %v1955_v38 = vrot.slane %v1953_v32, 5  ;;  %v1992_v52 = vshrl.u32 %v1839_v61, 16  ;;  %v1837_v3 = vld [vmem:[#allocation2 + $0x68] sm:$0xf] }
 0x144   :  { %v1961_v34 = vrot.slane %v1959_v21, 5  ;;  %v1929_v0 = vrot.slane %v1928_v33, 4  ;;  %v1920_v36 = vsel %vm15311_vm7, %v1915_v10, %v1919_v19  ;;  %v1995_v57 = vshll.u32 %v1839_v61, 16  ;;  %v214_v42 = vld [vmem:[#allocation2 + $0x98] sm:$0x1] }
 0x145   :  { %v2226_v15 = vsel %vm15127_vm3, %v12845_v29, %v2225_v51  ;;  %v1956_v44 = vor.u32 %v1955_v38, %v1952_v30  ;;  %v1994_v63 = vrot.slane %v1992_v52, 4  ;;  %v2001_v50 = vshll.u32 %v1840_v5, 16  ;;  %v1836_v29 = vld [vmem:[#allocation2 + $0x64] sm:$0x1]  ;;  %v276_v4 = vld [vmem:[#allocation2 + $0x9c] sm:$0x1] }
 0x146   :  { %v12857_v9 = vcombine.low %v2222_v45, %v2226_v15  ;;  %v1934_v27 = vsel %vm15311_vm7, %v1929_v0, %v1933_v46  ;;  %v2006_v12 = vshrl.u32 %v1841_v31, 16  ;;  %v1997_v47 = vrot.slane %v1995_v57, 5  ;;  %v1847_v16 = vld [vmem:[#allocation2 + $0x90] sm:$0xf]  ;;  %v1848_v43 = vld [vmem:[#allocation2 + $0x94] sm:$0x1] }
 0x147   :  { %v1957_v35 = vrot.slane %v1956_v44, 4  ;;  %v12832_v41 = vcombine.low %v1920_v36, %v1934_v27  ;;  %v2009_v17 = vshll.u32 %v1841_v31, 16  ;;  %v2003_v49 = vrot.slane %v2001_v50, 5  ;;  %v15481_v33 = vld [vmem:[#allocation2 + $0x98] sm:$0xe] }
 0x148   :  { %2294 = vst.msk [vmem:[#allocation3 + $0x98] sm:$0xff] %vm682_vm4, %v12857_v9  ;;  %v2008_v14 = vrot.slane %v2006_v12, 4  ;;  %v2015_v40 = vshll.u32 %v1842_v59, 16  ;;  %v1964_v25 = vshrl.u32 %v1835_v23, 16  ;;  %v1998_v55 = vor.u32 %v1997_v47, %v1994_v63  ;;  %v1843_v5 = vld [vmem:[#allocation2 + $0x80] sm:$0xf] }
 0x149   :  { %v1962_v37 = vsel %vm15311_vm7, %v1957_v35, %v1961_v34  ;;  %2103 = vrot.lane.b32.xlu0 %v12832_v41, %s14551_s29  ;;  %v2011_v28 = vrot.slane %v2009_v17, 5  ;;  %v1967_v8 = vshll.u32 %v1835_v23, 16  ;;  %v1973_v61 = vshll.u32 %v1836_v29, 16  ;;  %v1844_v31 = vld [vmem:[#allocation2 + $0x84] sm:$0x1] }
 0x14a   :  { %v12833_v22 = vcombine.low %v1948_v54, %v1962_v37  ;;  %v2017_v19 = vrot.slane %v2015_v40, 5  ;;  %v1966_v18 = vrot.slane %v1964_v25, 4  ;;  %v1999_v48 = vrot.slane %v1998_v55, 4  ;;  %v1845_v52 = vld [vmem:[#allocation2 + $0x88] sm:$0xf]  ;;  %v15493_v40 = vpop.permute.xlu1 %1236 }
 0x14b   :  { %v2012_v56 = vor.u32 %v2011_v28, %v2008_v14  ;;  %v1969_v11 = vrot.slane %v1967_v8, 5  ;;  %v1978_v7 = vshrl.u32 %v1837_v3, 16  ;;  %v1975_v45 = vrot.slane %v1973_v61, 5  ;;  %v1846_v57 = vld [vmem:[#allocation2 + $0x8c] sm:$0x1] }
 0x14c   :  { %2105 = vrot.lane.b32.xlu1 %v12833_v22, %s14551_s29  ;;  %v1981_v53 = vshll.u32 %v1837_v3, 16  ;;  %v1987_v20 = vshll.u32 %v1838_v62, 16  ;;  %v215_v32 = vsel %vm14713_vm8, 0, %v214_v42  ;;  %v2004_v39 = vsel %vm15311_vm7, %v1999_v48, %v2003_v49  ;;  %v1012_v14 = vld [vmem:[#allocation2 + $0x14] sm:$0x1] }
 0x14d   :  { %v2013_v54 = vrot.slane %v2012_v56, 4  ;;  %v1970_v21 = vor.u32 %v1969_v11, %v1966_v18  ;;  %v1980_v51 = vrot.slane %v1978_v7, 4  ;;  %216 = vst [vmem:[#allocation2 + $0x98] sm:$0x1] %v215_v32  ;;  %v277_v10 = vsel %vm15012_vm0, 0, %v276_v4 }
 0x14e   :  { %v1983_v30 = vrot.slane %v1981_v53, 5  ;;  %v1989_v38 = vrot.slane %v1987_v20, 5  ;;  %v2048_v46 = vshrl.u32 %v1847_v16, 16  ;;  %278 = vst [vmem:[#allocation2 + $0x9c] sm:$0x1] %v277_v10  ;;  %v2051_v15 = vshll.u32 %v1847_v16, 16 }
 0x14f   :  { %v2018_v1 = vsel %vm15311_vm7, %v2013_v54, %v2017_v19  ;;  %v1971_v34 = vrot.slane %v1970_v21, 4  ;;  %v2057_v0 = vshll.u32 %v1848_v43, 16  ;;  %v12853_v59 = vrot.slane %v15481_v33, 9  ;;  %v1014_v62 = vld [vmem:[#allocation2 + $0x1c] sm:$0x1] }
 0x150   :  { %v12835_v44 = vcombine.low %v2004_v39, %v2018_v1  ;;  %v1984_v9 = vor.u32 %v1983_v30, %v1980_v51  ;;  %v2050_v36 = vrot.slane %v2048_v46, 4  ;;  %v2053_v23 = vrot.slane %v2051_v15, 5  ;;  %v1011_v8 = vld [vmem:[#allocation2 + $0x10] sm:$0xe]  ;;  %v1013_v61 = vld [vmem:[#allocation2 + $0x18] sm:$0xe]  ;;  %v15507_v46 = vpop.permute.xlu0 %1234 }
 0x151   :  { %v1976_v13 = vsel %vm15311_vm7, %v1971_v34, %v1975_v45  ;;  %v15490_v27 = vrot.slane %v2057_v0, 5  ;;  %v2020_v63 = vshrl.u32 %v1843_v5, 16  ;;  %v2023_v12 = vshll.u32 %v1843_v5, 16  ;;  %v1010_v53 = vld [vmem:[#allocation2 + $0xc] sm:$0x1]  ;;  %v15509_v34 = vpop.permute.xlu1 %1240 }
 0x152   :  { %2109 = vrot.lane.b32.xlu1 %v12835_v44, %s14551_s29  ;;  %v1985_v50 = vrot.slane %v1984_v9, 4  ;;  %v2029_v35 = vshll.u32 %v1844_v31, 16  ;;  %v2034_v41 = vshrl.u32 %v1845_v52, 16  ;;  %v2054_v47 = vor.u32 %v2053_v23, %v2050_v36  ;;  %v1007_v39 = vld [vmem:[#allocation2] sm:$0xe] }
 0x153   :  { %v2022_v17 = vrot.slane %v2020_v63, 4  ;;  %v2037_v29 = vshll.u32 %v1845_v52, 16  ;;  %v2043_v49 = vshll.u32 %v1846_v57, 16  ;;  %v2025_v37 = vrot.slane %v2023_v12, 5  ;;  %v1009_v33 = vld [vmem:[#allocation2 + $0x8] sm:$0xe] }
 0x154   :  { %v1990_v3 = vsel %vm15311_vm7, %v1985_v50, %v1989_v38  ;;  %v1849_v25 = vld [vmem:[#allocation2 + $0x98] sm:$0xf]  ;;  %v2031_v55 = vrot.slane %v2029_v35, 5  ;;  %v2036_v28 = vrot.slane %v2034_v41, 4  ;;  %v2055_v22 = vrot.slane %v2054_v47, 4 }
 0x155   :  { %v12834_v42 = vcombine.low %v1976_v13, %v1990_v3  ;;  %v2062_v19 = vshrl.u32 %v1849_v25, 16  ;;  %v2065_v18 = vshll.u32 %v1849_v25, 16  ;;  %vm998_vm8 = vcmask 1048064   ;;  %v1850_v56 = vld [vmem:[#allocation2 + $0x9c] sm:$0x1] }
 0x156   :  { %v20295_v4 = vrot.slane %v15090_v26, 9  ;;  %v2162_v11 = vld [vmem:[#allocation2 + $0x9c] sm:$0x1]  ;;  %v2026_v7 = vor.u32 %v2025_v37, %v2022_v17  ;;  %v2039_v16 = vrot.slane %v2037_v29, 5  ;;  %v2045_v45 = vrot.slane %v2043_v49, 5 }
 0x157   :  { %2107 = vrot.lane.b32.xlu0 %v12834_v42, %s14551_s29  ;;  %v2060_v20 = vsel %vm15311_vm7, %v2055_v22, %v15490_v27  ;;  %v2064_v32 = vrot.slane %v2062_v19, 4  ;;  %v2067_v43 = vrot.slane %v2065_v18, 5  ;;  %v2071_v24 = vshll.u32 %v1850_v56, 16  ;;  %v1008_v26 = vld [vmem:[#allocation2 + $0x4] sm:$0x1] }
 0x158   :  { %v2254_v48 = vsel %vm15127_vm3, %v20295_v4, %v2253_v6  ;;  %v2257_v54 = vrot.slane %v2162_v11, 5  ;;  %v2027_v21 = vrot.slane %v2026_v7, 4  ;;  %v2040_v6 = vor.u32 %v2039_v16, %v2036_v28  ;;  %v1019_v31 = vld [vmem:[#allocation2 + $0x30] sm:$0xe]  ;;  %v1020_v1 = vld [vmem:[#allocation2 + $0x34] sm:$0x1]  ;;  %v1239_v11 = vpop.permute.xlu0 %1238  ;;  %v1245_v7 = vpop.permute.xlu1 %1244 }
 0x159   :  { %v1084_v51 = vrot.slane %v1012_v14, 5  ;;  %v2068_v5 = vor.u32 %v2067_v43, %v2064_v32  ;;  %v2073_v30 = vrot.slane %v2071_v24, 5  ;;  %v1088_v38 = vrot.slane %v1014_v62, 5  ;;  %v1021_v9 = vld [vmem:[#allocation2 + $0x38] sm:$0xe] }
 0x15a   :  { %v12760_v10 = vrot.slane %v1011_v8, 9  ;;  %v2258_v15 = vsel %vm15127_vm3, %v12853_v59, %v2257_v54  ;;  %v2032_v0 = vsel %vm15311_vm7, %v2027_v21, %v2031_v55  ;;  %v2041_v52 = vrot.slane %v2040_v6, 4  ;;  %v1022_v36 = vld [vmem:[#allocation2 + $0x3c] sm:$0x1]  ;;  %v1015_v57 = vld [vmem:[#allocation2 + $0x20] sm:$0xe] }
 0x15b   :  { %v12761_v44 = vrot.slane %v1013_v61, 9  ;;  %v2069_v13 = vrot.slane %v2068_v5, 4  ;;  %v12861_v23 = vcombine.low %v2254_v48, %v2258_v15  ;;  %v1080_v63 = vrot.slane %v1010_v53, 5  ;;  %v1016_v50 = vld [vmem:[#allocation2 + $0x24] sm:$0x1] }
 0x15c   :  { %v1085_v27 = vsel %vm15127_vm3, %v12760_v10, %v1084_v51  ;;  %v1017_v12 = vld [vmem:[#allocation2 + $0x28] sm:$0xe]  ;;  %v2046_v35 = vsel %vm15311_vm7, %v2041_v52, %v2045_v45  ;;  %v12758_v41 = vrot.slane %v1007_v39, 9  ;;  %v1076_v47 = vrot.slane %v1008_v26, 5  ;;  %v1018_v17 = vld [vmem:[#allocation2 + $0x2c] sm:$0x1] }
 0x15d   :  { %v1089_v59 = vsel %vm15127_vm3, %v12761_v44, %v1088_v38  ;;  %v1027_v29 = vld [vmem:[#allocation2 + $0x60] sm:$0xe]  ;;  %v1028_v49 = vld [vmem:[#allocation2 + $0x64] sm:$0x1]  ;;  %v2074_v14 = vsel %vm15311_vm7, %v2069_v13, %v2073_v30  ;;  %2298 = vst.msk [vmem:[#allocation3 + $0x138] sm:$0xff] %vm682_vm4, %v12861_v23  ;;  %v12836_v3 = vcombine.low %v2032_v0, %v2046_v35  ;;  %v12759_v37 = vrot.slane %v1009_v33, 9  ;;  %v1249_v35 = vpop.permute.xlu1 %1248 }
 0x15e   :  { %v12775_v25 = vcombine.low %v1085_v27, %v1089_v59  ;;  %v1029_v55 = vld [vmem:[#allocation2 + $0x68] sm:$0xe]  ;;  %v1030_v28 = vld [vmem:[#allocation2 + $0x6c] sm:$0x1]  ;;  %v12837_v62 = vcombine.low %v2060_v20, %v2074_v14  ;;  %v1077_v8 = vsel %vm15127_vm3, %v12758_v41, %v1076_v47  ;;  %v12764_v42 = vrot.slane %v1019_v31, 9 }
 0x15f   :  { %v1100_v22 = vrot.slane %v1020_v1, 5  ;;  %v1025_v19 = vld [vmem:[#allocation2 + $0x58] sm:$0xe]  ;;  %v1026_v18 = vld [vmem:[#allocation2 + $0x5c] sm:$0x1]  ;;  %2111 = vrot.lane.b32.xlu0 %v12836_v3, %s14551_s29  ;;  %v1081_v61 = vsel %vm15127_vm3, %v12759_v37, %v1080_v63  ;;  %v12765_v4 = vrot.slane %v1021_v9, 9  ;;  %v1243_v63 = vpop.permute.xlu0 %1242 }
 0x160   :  { %1171 = vst.msk [vmem:[#allocation3 + $0x30] sm:$0xff] %vm682_vm4, %v12775_v25  ;;  %v1104_v48 = vrot.slane %v1022_v36, 5  ;;  %v12762_v56 = vrot.slane %v1015_v57, 9  ;;  %v1023_v16 = vld [vmem:[#allocation2 + $0x50] sm:$0xe]  ;;  %2113 = vrot.lane.b32.xlu1 %v12837_v62, %s14551_s29  ;;  %v12774_v45 = vcombine.low %v1077_v8, %v1081_v61  ;;  %v1092_v20 = vrot.slane %v1016_v50, 5 }
 0x161   :  { %1259 = vst.msk [vmem:[#allocation3 + $0x30] sm:$0xff] %vm998_vm8, %v15493_v40  ;;  %v1101_v53 = vsel %vm15127_vm3, %v12764_v42, %v1100_v22  ;;  %v12763_v32 = vrot.slane %v1017_v12, 9  ;;  %v1024_v43 = vld [vmem:[#allocation2 + $0x54] sm:$0x1]  ;;  %v1035_v24 = vld [vmem:[#allocation2 + $0x80] sm:$0xe] }
 0x162   :  { %v1105_v39 = vsel %vm15127_vm3, %v12765_v4, %v1104_v48  ;;  %v1096_v26 = vrot.slane %v1018_v17, 5  ;;  %v12768_v54 = vrot.slane %v1027_v29, 9  ;;  %v1116_v21 = vrot.slane %v1028_v49, 5  ;;  %v1036_v6 = vld [vmem:[#allocation2 + $0x84] sm:$0x1]  ;;  %1170 = vst.msk [vmem:[#allocation3 + $0x8] sm:$0xff] %vm682_vm4, %v12774_v45 }
 0x163   :  { %v12777_v51 = vcombine.low %v1101_v53, %v1105_v39  ;;  %v1093_v40 = vsel %vm15127_vm3, %v12762_v56, %v1092_v20  ;;  %v12769_v33 = vrot.slane %v1029_v55, 9  ;;  %v1120_v5 = vrot.slane %v1030_v28, 5  ;;  %v1037_v30 = vld [vmem:[#allocation2 + $0x88] sm:$0xe]  ;;  %v1038_v38 = vld [vmem:[#allocation2 + $0x8c] sm:$0x1]  ;;  %v1247_v20 = vpop.permute.xlu0 %1246  ;;  %v1717_v39 = vpop.permute.xlu1 %1716 }
 0x164   :  { %1258 = vst.msk [vmem:[#allocation3 + $0x8] sm:$0xff] %vm998_vm8, %v15507_v46  ;;  %v1097_v10 = vsel %vm15127_vm3, %v12763_v32, %v1096_v26  ;;  %v1117_v31 = vsel %vm15127_vm3, %v12768_v54, %v1116_v21  ;;  %v12767_v1 = vrot.slane %v1025_v19, 9  ;;  %v1112_v15 = vrot.slane %v1026_v18, 5  ;;  %v1031_v0 = vld [vmem:[#allocation2 + $0x70] sm:$0xe] }
 0x165   :  { %v1032_v52 = vld [vmem:[#allocation2 + $0x74] sm:$0x1]  ;;  %1173 = vst.msk [vmem:[#allocation3 + $0x80] sm:$0xff] %vm682_vm4, %v12777_v51  ;;  %v12776_v44 = vcombine.low %v1093_v40, %v1097_v10  ;;  %v1121_v9 = vsel %vm15127_vm3, %v12769_v33, %v1120_v5  ;;  %v12766_v36 = vrot.slane %v1023_v16, 9  ;;  %v1108_v57 = vrot.slane %v1024_v43, 5 }
 0x166   :  { %v1033_v13 = vld [vmem:[#allocation2 + $0x78] sm:$0xe]  ;;  %v1034_v46 = vld [vmem:[#allocation2 + $0x7c] sm:$0x1]  ;;  %1261 = vst.msk [vmem:[#allocation3 + $0x80] sm:$0xff] %vm998_vm8, %v15509_v34  ;;  %v12779_v23 = vcombine.low %v1117_v31, %v1121_v9  ;;  %v1113_v27 = vsel %vm15127_vm3, %v12767_v1, %v1112_v15  ;;  %v12772_v50 = vrot.slane %v1035_v24, 9 }
 0x167   :  { %v1132_v12 = vrot.slane %v1036_v6, 5  ;;  %v1270_v59 = vld [vmem:[#allocation2 + $0x18] sm:$0xf]  ;;  %v1271_v41 = vld [vmem:[#allocation2 + $0x1c] sm:$0x1]  ;;  %1172 = vst.msk [vmem:[#allocation3 + $0x58] sm:$0xff] %vm682_vm4, %v12776_v44  ;;  %v1109_v47 = vsel %vm15127_vm3, %v12766_v36, %v1108_v57 }
 0x168   :  { %v12773_v17 = vrot.slane %v1037_v30, 9  ;;  %v1136_v29 = vrot.slane %v1038_v38, 5  ;;  %v12770_v49 = vrot.slane %v1031_v0, 9  ;;  %v1272_v14 = vld [vmem:[#allocation2 + $0x20] sm:$0xf]  ;;  %1260 = vst.msk [vmem:[#allocation3 + $0x58] sm:$0xff] %vm998_vm8, %v1239_v11  ;;  %v12778_v34 = vcombine.low %v1109_v47, %v1113_v27 }
 0x169   :  { %1175 = vst.msk [vmem:[#allocation3 + $0xd0] sm:$0xff] %vm682_vm4, %v12779_v23  ;;  %v1133_v3 = vsel %vm15127_vm3, %v12772_v50, %v1132_v12  ;;  %v1124_v25 = vrot.slane %v1032_v52, 5  ;;  %v12771_v37 = vrot.slane %v1033_v13, 9  ;;  %v1128_v28 = vrot.slane %v1034_v46, 5  ;;  %v1273_v62 = vld [vmem:[#allocation2 + $0x24] sm:$0x1] }
 0x16a   :  { %1263 = vst.msk [vmem:[#allocation3 + $0xd0] sm:$0xff] %vm998_vm8, %v1245_v7  ;;  %v1137_v55 = vsel %vm15127_vm3, %v12773_v17, %v1136_v29  ;;  %v1327_v8 = vshrl.u32 %v1270_v59, 16  ;;  %v1330_v42 = vshll.u32 %v1270_v59, 16  ;;  %v1336_v18 = vshll.u32 %v1271_v41, 16  ;;  %v1266_v4 = vld [vmem:[#allocation2 + $0x8] sm:$0xf]  ;;  %v1715_v59 = vpop.permute.xlu0 %1714  ;;  %v15575_v17 = vpop.permute.xlu1 %1720 }
 0x16b   :  { %1174 = vst.msk [vmem:[#allocation3 + $0xa8] sm:$0xff] %vm682_vm4, %v12778_v34  ;;  %v12781_v22 = vcombine.low %v1133_v3, %v1137_v55  ;;  %v1125_v19 = vsel %vm15127_vm3, %v12770_v49, %v1124_v25  ;;  %v1341_v61 = vshrl.u32 %v1272_v14, 16  ;;  %v1267_v48 = vld [vmem:[#allocation2 + $0xc] sm:$0x1]  ;;  %v1129_v56 = vsel %vm15127_vm3, %v12771_v37, %v1128_v28  ;;  %v1268_v45 = vld [vmem:[#allocation2 + $0x10] sm:$0xf] }
 0x16c   :  { %1262 = vst.msk [vmem:[#allocation3 + $0xa8] sm:$0xff] %vm998_vm8, %v1243_v63  ;;  %v1329_v11 = vrot.slane %v1327_v8, 4  ;;  %v1332_v7 = vrot.slane %v1330_v42, 5  ;;  %v1344_v16 = vshll.u32 %v1272_v14, 16  ;;  %v12780_v53 = vcombine.low %v1125_v19, %v1129_v56  ;;  %v1269_v21 = vld [vmem:[#allocation2 + $0x14] sm:$0x1] }
 0x16d   :  { %1177 = vst.msk [vmem:[#allocation3 + $0x120] sm:$0xff] %vm682_vm4, %v12781_v22  ;;  %v1338_v32 = vrot.slane %v1336_v18, 5  ;;  %v1343_v43 = vrot.slane %v1341_v61, 4  ;;  %v1350_v24 = vshll.u32 %v1273_v62, 16  ;;  %v1299_v6 = vshrl.u32 %v1266_v4, 16 }
 0x16e   :  { %1265 = vst.msk [vmem:[#allocation3 + $0x120] sm:$0xff] %vm998_vm8, %v1249_v35  ;;  %v1333_v26 = vor.u32 %v1332_v7, %v1329_v11  ;;  %v1346_v54 = vrot.slane %v1344_v16, 5  ;;  %v1302_v51 = vshll.u32 %v1266_v4, 16  ;;  %v1308_v33 = vshll.u32 %v1267_v48, 16  ;;  %v1278_v38 = vld [vmem:[#allocation2 + $0x38] sm:$0xf] }
 0x16f   :  { %1176 = vst.msk [vmem:[#allocation3 + $0xf8] sm:$0xff] %vm682_vm4, %v12780_v53  ;;  %v1352_v40 = vrot.slane %v1350_v24, 5  ;;  %v1313_v5 = vshrl.u32 %v1268_v45, 16  ;;  %v1316_v30 = vshll.u32 %v1268_v45, 16  ;;  %v1301_v1 = vrot.slane %v1299_v6, 4  ;;  %v15585_v6 = vpop.permute.xlu0 %1718 }
 0x170   :  { %1264 = vst.msk [vmem:[#allocation3 + $0xf8] sm:$0xff] %vm998_vm8, %v1247_v20  ;;  %v1334_v10 = vrot.slane %v1333_v26, 4  ;;  %v1347_v31 = vor.u32 %v1346_v54, %v1343_v43  ;;  %v1304_v15 = vrot.slane %v1302_v51, 5  ;;  %v1279_v0 = vld [vmem:[#allocation2 + $0x3c] sm:$0x1]  ;;  %v1310_v52 = vrot.slane %v1308_v33, 5  ;;  %v15587_v51 = vpop.permute.xlu1 %1724 }
 0x171   :  { %v1315_v44 = vrot.slane %v1313_v5, 4  ;;  %v1318_v9 = vrot.slane %v1316_v30, 5  ;;  %v1322_v36 = vshll.u32 %v1269_v21, 16  ;;  %v1280_v57 = vld [vmem:[#allocation2 + $0x40] sm:$0xf]  ;;  %v1383_v63 = vshrl.u32 %v1278_v38, 16 }
 0x172   :  { %v1339_v13 = vsel %vm15311_vm7, %v1334_v10, %v1338_v32  ;;  %v1348_v46 = vrot.slane %v1347_v31, 4  ;;  %v1305_v23 = vor.u32 %v1304_v15, %v1301_v1  ;;  %v1281_v27 = vld [vmem:[#allocation2 + $0x44] sm:$0x1]  ;;  %v1274_v50 = vld [vmem:[#allocation2 + $0x28] sm:$0xf]  ;;  %v1386_v41 = vshll.u32 %v1278_v38, 16 }
 0x173   :  { %v1319_v12 = vor.u32 %v1318_v9, %v1315_v44  ;;  %v1324_v35 = vrot.slane %v1322_v36, 5  ;;  %v1392_v47 = vshll.u32 %v1279_v0, 16  ;;  %v1275_v29 = vld [vmem:[#allocation2 + $0x2c] sm:$0x1]  ;;  %v1385_v34 = vrot.slane %v1383_v63, 4 }
 0x174   :  { %v1353_v49 = vsel %vm15311_vm7, %v1348_v46, %v1352_v40  ;;  %v1306_v14 = vrot.slane %v1305_v23, 4  ;;  %v1397_v3 = vshrl.u32 %v1280_v57, 16  ;;  %v1276_v25 = vld [vmem:[#allocation2 + $0x30] sm:$0xf]  ;;  %v1388_v28 = vrot.slane %v1386_v41, 5 }
 0x175   :  { %v12791_v37 = vcombine.low %v1339_v13, %v1353_v49  ;;  %v1320_v55 = vrot.slane %v1319_v12, 4  ;;  %v1394_v62 = vrot.slane %v1392_v47, 5  ;;  %v1277_v8 = vld [vmem:[#allocation2 + $0x34] sm:$0x1]  ;;  %v1400_v19 = vshll.u32 %v1280_v57, 16 }
 0x176   :  { %v1311_v42 = vsel %vm15311_vm7, %v1306_v14, %v1310_v52  ;;  %v1399_v22 = vrot.slane %v1397_v3, 4  ;;  %v1406_v18 = vshll.u32 %v1281_v27, 16  ;;  %v1286_v61 = vld [vmem:[#allocation2 + $0x68] sm:$0xf]  ;;  %v1389_v48 = vor.u32 %v1388_v28, %v1385_v34  ;;  %v1287_v32 = vld [vmem:[#allocation2 + $0x6c] sm:$0x1]  ;;  %v15602_v3 = vpop.permute.xlu0 %1722 }
 0x177   :  { %1555 = vst.msk [vmem:[#allocation3 + $0x38] sm:$0xff] %vm682_vm4, %v12791_v37  ;;  %v1325_v4 = vsel %vm15311_vm7, %v1320_v55, %v1324_v35  ;;  %v1355_v56 = vshrl.u32 %v1274_v50, 16  ;;  %v1358_v11 = vshll.u32 %v1274_v50, 16  ;;  %v14338_v7 = vld [vmem:[#allocation2 + $0x20] ss:$8 sps:$4 sm:$0xff]   ;;  %v1402_v45 = vrot.slane %v1400_v19, 5 }
 0x178   :  { %1739 = vst.msk [vmem:[#allocation3 + $0x38] sm:$0xff] %vm998_vm8, %v1717_v39  ;;  %v12790_v16 = vcombine.low %v1311_v42, %v1325_v4  ;;  %v1408_v53 = vrot.slane %v1406_v18, 5  ;;  %v1364_v20 = vshll.u32 %v1275_v29, 16  ;;  %v1288_v43 = vld [vmem:[#allocation2 + $0x70] sm:$0xf]  ;;  %v1390_v24 = vrot.slane %v1389_v48, 4 }
 0x179   :  { %v1357_v26 = vrot.slane %v1355_v56, 4  ;;  %v1360_v54 = vrot.slane %v1358_v11, 5  ;;  %v1369_v21 = vshrl.u32 %v1276_v25, 16  ;;  %685 = vst.msk [vmem:[#allocation3 + $0x50] sm:$0xff] %vm682_vm4, %v14338_v7  ;;  %v1403_v40 = vor.u32 %v1402_v45, %v1399_v22  ;;  %v14339_v30 = vld [vmem:[#allocation2] ss:$8 sps:$4 sm:$0xff]  }
 0x17a   :  { %1554 = vst.msk [vmem:[#allocation3 + $0x10] sm:$0xff] %vm682_vm4, %v12790_v16  ;;  %v1366_v39 = vrot.slane %v1364_v20, 5  ;;  %v1372_v33 = vshll.u32 %v1276_v25, 16  ;;  %v1378_v5 = vshll.u32 %v1277_v8, 16  ;;  %v1395_v38 = vsel %vm15311_vm7, %v1390_v24, %v1394_v62  ;;  %v1289_v1 = vld [vmem:[#allocation2 + $0x74] sm:$0x1]  ;;  %v15604_v25 = vpop.permute.xlu1 %1728 }
 0x17b   :  { %1738 = vst.msk [vmem:[#allocation3 + $0x10] sm:$0xff] %vm998_vm8, %v1715_v59  ;;  %v1361_v10 = vor.u32 %v1360_v54, %v1357_v26  ;;  %v1371_v31 = vrot.slane %v1369_v21, 4  ;;  %v1439_v15 = vshrl.u32 %v1286_v61, 16  ;;  %v1404_v0 = vrot.slane %v1403_v40, 4  ;;  %v1282_v36 = vld [vmem:[#allocation2 + $0x58] sm:$0xf] }
 0x17c   :  { %v1374_v52 = vrot.slane %v1372_v33, 5  ;;  %v1380_v44 = vrot.slane %v1378_v5, 5  ;;  %v1442_v9 = vshll.u32 %v1286_v61, 16  ;;  %v1283_v57 = vld [vmem:[#allocation2 + $0x5c] sm:$0x1]  ;;  %683 = vst.msk [vmem:[#allocation3] sm:$0xff] %vm682_vm4, %v14339_v30 }
 0x17d   :  { %v15594_v13 = vld [vmem:[#allocation2 + $0x60] sm:$0xf]  ;;  %v14340_v46 = vld [vmem:[#allocation2 + $0x30] ss:$8 sps:$4 sm:$0xff]   ;;  %v1362_v23 = vrot.slane %v1361_v10, 4  ;;  %v1441_v27 = vrot.slane %v1439_v15, 4  ;;  %v1409_v12 = vsel %vm15311_vm7, %v1404_v0, %v1408_v53 }
 0x17e   :  { %v1448_v63 = vshll.u32 %v1287_v32, 16  ;;  %v1453_v50 = vshrl.u32 %v1288_v43, 16  ;;  %v1375_v35 = vor.u32 %v1374_v52, %v1371_v31  ;;  %v1444_v59 = vrot.slane %v1442_v9, 5  ;;  %686 = vst.msk [vmem:[#allocation3 + $0x78] sm:$0xff] %vm682_vm4, %v14340_v46  ;;  %v14341_v47 = vld [vmem:[#allocation2 + $0x10] ss:$8 sps:$4 sm:$0xff]   ;;  %v979_v26 = vpop.permute.xlu1 %978 }
 0x17f   :  { %v1456_v41 = vshll.u32 %v1288_v43, 16  ;;  %v12793_v29 = vcombine.low %v1395_v38, %v1409_v12  ;;  %v1367_v49 = vsel %vm15311_vm7, %v1362_v23, %v1366_v39  ;;  %v1462_v62 = vshll.u32 %v1289_v1, 16  ;;  %v1285_v8 = vld [vmem:[#allocation2 + $0x64] sm:$0x1]  ;;  %v1294_v42 = vld [vmem:[#allocation2 + $0x88] sm:$0xf]  ;;  %v15620_v1 = vpop.permute.xlu0 %1726 }
 0x180   :  { %v1450_v14 = vrot.slane %v1448_v63, 5  ;;  %v1455_v34 = vrot.slane %v1453_v50, 4  ;;  %v1376_v37 = vrot.slane %v1375_v35, 4  ;;  %v1445_v55 = vor.u32 %v1444_v59, %v1441_v27  ;;  %684 = vst.msk [vmem:[#allocation3 + $0x28] sm:$0xff] %vm682_vm4, %v14341_v47  ;;  %v14342_v22 = vld [vmem:[#allocation2 + $0x60] ss:$8 sps:$4 sm:$0xff]  }
 0x181   :  { %v1458_v28 = vrot.slane %v1456_v41, 5  ;;  %1557 = vst.msk [vmem:[#allocation3 + $0x88] sm:$0xff] %vm682_vm4, %v12793_v29  ;;  %v1411_v19 = vshrl.u32 %v1282_v36, 16  ;;  %v1414_v18 = vshll.u32 %v1282_v36, 16  ;;  %v1420_v61 = vshll.u32 %v1283_v57, 16  ;;  %688 = vst.msk [vmem:[#allocation3 + $0xc8] sm:$0xff] %vm682_vm4, %v14342_v22 }
 0x182   :  { %v1425_v4 = vshrl.u32 %v15594_v13, 16  ;;  %v1296_v48 = vld [vmem:[#allocation2 + $0x90] sm:$0xf]  ;;  %1741 = vst.msk [vmem:[#allocation3 + $0x88] sm:$0xff] %vm998_vm8, %v15575_v17  ;;  %v1381_v56 = vsel %vm15311_vm7, %v1376_v37, %v1380_v44  ;;  %v1446_v11 = vrot.slane %v1445_v55, 4  ;;  %v1464_v16 = vrot.slane %v1462_v62, 5 }
 0x183   :  { %v1459_v7 = vor.u32 %v1458_v28, %v1455_v34  ;;  %v1295_v45 = vld [vmem:[#allocation2 + $0x8c] sm:$0x1]  ;;  %v14343_v53 = vld [vmem:[#allocation2 + $0x50] ss:$8 sps:$4 sm:$0xff]   ;;  %v12792_v20 = vcombine.low %v1367_v49, %v1381_v56  ;;  %v1413_v32 = vrot.slane %v1411_v19, 4  ;;  %v1416_v43 = vrot.slane %v1414_v18, 5 }
 0x184   :  { %v1422_v24 = vrot.slane %v1420_v61, 5  ;;  %v1451_v54 = vsel %vm15311_vm7, %v1446_v11, %v1450_v14  ;;  %v1427_v17 = vrot.slane %v1425_v4, 4  ;;  %v1428_v40 = vshll.u32 %v15594_v13, 16  ;;  %v1297_v39 = vld [vmem:[#allocation2 + $0x94] sm:$0x1]  ;;  %1001 = vst.msk [vmem:[#allocation3 + $0x50] sm:$0xff] %vm998_vm8, %v979_v26  ;;  %v975_v37 = vpop.permute.xlu0 %974 }
 0x185   :  { %v1460_v21 = vrot.slane %v1459_v7, 4  ;;  %v1290_v33 = vld [vmem:[#allocation2 + $0x78] sm:$0xf]  ;;  %687 = vst.msk [vmem:[#allocation3 + $0xa0] sm:$0xff] %vm682_vm4, %v14343_v53  ;;  %1556 = vst.msk [vmem:[#allocation3 + $0x60] sm:$0xff] %vm682_vm4, %v12792_v20  ;;  %v1417_v5 = vor.u32 %v1416_v43, %v1413_v32  ;;  %v1434_v30 = vshll.u32 %v1285_v8, 16 }
 0x186   :  { %v1495_v38 = vshrl.u32 %v1294_v42, 16  ;;  %v1498_v10 = vshll.u32 %v1294_v42, 16  ;;  %v1291_v31 = vld [vmem:[#allocation2 + $0x7c] sm:$0x1]  ;;  %v14344_v15 = vld [vmem:[#allocation2 + $0x80] ss:$8 sps:$4 sm:$0xff]  }
 0x187   :  { %1740 = vst.msk [vmem:[#allocation3 + $0x60] sm:$0xff] %vm998_vm8, %v15585_v6  ;;  %v1465_v0 = vsel %vm15311_vm7, %v1460_v21, %v1464_v16  ;;  %v1430_v52 = vrot.slane %v1428_v40, 5  ;;  %v1509_v44 = vshrl.u32 %v1296_v48, 16  ;;  %v1292_v9 = vld [vmem:[#allocation2 + $0x80] sm:$0xf]  ;;  %v1418_v57 = vrot.slane %v1417_v5, 4 }
 0x188   :  { %v12795_v36 = vcombine.low %v1451_v54, %v1465_v0  ;;  %v1497_v13 = vrot.slane %v1495_v38, 4  ;;  %v1504_v46 = vshll.u32 %v1295_v45, 16  ;;  %690 = vst.msk [vmem:[#allocation3 + $0x118] sm:$0xff] %vm682_vm4, %v14344_v15  ;;  %v1436_v27 = vrot.slane %v1434_v30, 5  ;;  %v14345_v12 = vld [vmem:[#allocation2 + $0x70] ss:$8 sps:$4 sm:$0xff]  }
 0x189   :  { %v1431_v23 = vor.u32 %v1430_v52, %v1427_v17  ;;  %v1500_v63 = vrot.slane %v1498_v10, 5  ;;  %v1511_v50 = vrot.slane %v1509_v44, 4  ;;  %v1423_v6 = vsel %vm15311_vm7, %v1418_v57, %v1422_v24  ;;  %v1293_v41 = vld [vmem:[#allocation2 + $0x84] sm:$0x1]  ;;  %689 = vst.msk [vmem:[#allocation3 + $0xf0] sm:$0xff] %vm682_vm4, %v14345_v12 }
 0x18a   :  { %1559 = vst.msk [vmem:[#allocation3 + $0xd8] sm:$0xff] %vm682_vm4, %v12795_v36  ;;  %v1512_v35 = vshll.u32 %v1296_v48, 16  ;;  %v1518_v59 = vshll.u32 %v1297_v39, 16  ;;  %v1467_v47 = vshrl.u32 %v1290_v33, 16  ;;  %v1470_v14 = vshll.u32 %v1290_v33, 16 }
 0x18b   :  { %1743 = vst.msk [vmem:[#allocation3 + $0xd8] sm:$0xff] %vm998_vm8, %v15587_v51  ;;  %v1432_v29 = vrot.slane %v1431_v23, 4  ;;  %v1501_v49 = vor.u32 %v1500_v63, %v1497_v13  ;;  %v1476_v34 = vshll.u32 %v1291_v31, 16  ;;  %v1506_v55 = vrot.slane %v1504_v46, 5  ;;  %999 = vst.msk [vmem:[#allocation3] sm:$0xff] %vm998_vm8, %v975_v37 }
 0x18c   :  { %v1514_v28 = vrot.slane %v1512_v35, 5  ;;  %v1469_v62 = vrot.slane %v1467_v47, 4  ;;  %v1481_v8 = vshrl.u32 %v1292_v9, 16  ;;  %v14346_v42 = vld [vmem:[#allocation2 + $0x20] ss:$8 sps:$4 sm:$0xff]   ;;  %v1520_v18 = vrot.slane %v1518_v59, 5 }
 0x18d   :  { %v1437_v22 = vsel %vm15311_vm7, %v1432_v29, %v1436_v27  ;;  %v1502_v19 = vrot.slane %v1501_v49, 4  ;;  %v1472_v51 = vrot.slane %v1470_v14, 5  ;;  %v1484_v56 = vshll.u32 %v1292_v9, 16  ;;  %1812 = vst.msk [vmem:[#allocation3 + $0x40] sm:$0xff] %vm682_vm4, %v14346_v42  ;;  %v14347_v11 = vld [vmem:[#allocation2 + $0x10] ss:$8 sps:$4 sm:$0xff]  }
 0x18e   :  { %v12794_v61 = vcombine.low %v1423_v6, %v1437_v22  ;;  %v1515_v4 = vor.u32 %v1514_v28, %v1511_v50  ;;  %v1483_v48 = vrot.slane %v1481_v8, 4  ;;  %v1478_v16 = vrot.slane %v1476_v34, 5  ;;  %1811 = vst.msk [vmem:[#allocation3 + $0x18] sm:$0xff] %vm682_vm4, %v14347_v11  ;;  %v14348_v43 = vld [vmem:[#allocation2 + $0x40] ss:$8 sps:$4 sm:$0xff]  }
 0x18f   :  { %v1473_v7 = vor.u32 %v1472_v51, %v1469_v62  ;;  %v1490_v45 = vshll.u32 %v1293_v41, 16  ;;  %v1507_v53 = vsel %vm15311_vm7, %v1502_v19, %v1506_v55  ;;  %v1486_v32 = vrot.slane %v1484_v56, 5  ;;  %v14349_v54 = vld [vmem:[#allocation2 + $0x30] ss:$8 sps:$4 sm:$0xff]   ;;  %1814 = vst.msk [vmem:[#allocation3 + $0x90] sm:$0xff] %vm682_vm4, %v14348_v43 }
 0x190   :  { %1558 = vst.msk [vmem:[#allocation3 + $0xb0] sm:$0xff] %vm682_vm4, %v12794_v61  ;;  %v1516_v20 = vrot.slane %v1515_v4, 4  ;;  %v14350_v40 = vld [vmem:[#allocation2 + $0x70] ss:$8 sps:$4 sm:$0xff]   ;;  %1813 = vst.msk [vmem:[#allocation3 + $0x68] sm:$0xff] %vm682_vm4, %v14349_v54 }
 0x191   :  { %1742 = vst.msk [vmem:[#allocation3 + $0xb0] sm:$0xff] %vm998_vm8, %v15602_v3  ;;  %v1474_v24 = vrot.slane %v1473_v7, 4  ;;  %v1492_v26 = vrot.slane %v1490_v45, 5  ;;  %v1487_v17 = vor.u32 %v1486_v32, %v1483_v48  ;;  %v14351_v33 = vld [vmem:[#allocation2 + $0x60] ss:$8 sps:$4 sm:$0xff]  }
 0x192   :  { %v1521_v21 = vsel %vm15311_vm7, %v1516_v20, %v1520_v18  ;;  %1816 = vst.msk [vmem:[#allocation3 + $0xe0] sm:$0xff] %vm682_vm4, %v14350_v40  ;;  %v981_v3 = vpop.permute.xlu1 %980  ;;  %1815 = vst.msk [vmem:[#allocation3 + $0xb8] sm:$0xff] %vm682_vm4, %v14351_v33  ;;  %v14352_v38 = vld [vmem:[#allocation2 + $0x90] ss:$8 sps:$4 sm:$0xff]   ;;  %v14353_v31 = vld [vmem:[#allocation2 + $0x80] ss:$8 sps:$4 sm:$0xff]  }
 0x193   :  { %v12797_v39 = vcombine.low %v1507_v53, %v1521_v21  ;;  %v1479_v5 = vsel %vm15311_vm7, %v1474_v24, %v1478_v16  ;;  %v1488_v30 = vrot.slane %v1487_v17, 4  ;;  %1002 = vst.msk [vmem:[#allocation3 + $0x78] sm:$0xff] %vm998_vm8, %v981_v3 }
 0x194   :  { %1818 = vst.msk [vmem:[#allocation3 + $0x130] sm:$0xff] %vm682_vm4, %v14352_v38  ;;  %1817 = vst.msk [vmem:[#allocation3 + $0x108] sm:$0xff] %vm682_vm4, %v14353_v31 }
 0x195   :  { %1561 = vst.msk [vmem:[#allocation3 + $0x128] sm:$0xff] %vm682_vm4, %v12797_v39  ;;  %v1493_v10 = vsel %vm15311_vm7, %v1488_v30, %v1492_v26  ;;  %v977_v0 = vpop.permute.xlu0 %976 }
 0x196   :  { %1745 = vst.msk [vmem:[#allocation3 + $0x128] sm:$0xff] %vm998_vm8, %v15604_v25  ;;  %v12796_v15 = vcombine.low %v1479_v5, %v1493_v10  ;;  %1000 = vst.msk [vmem:[#allocation3 + $0x28] sm:$0xff] %vm998_vm8, %v977_v0 }
 0x198   :  { %1560 = vst.msk [vmem:[#allocation3 + $0x100] sm:$0xff] %vm682_vm4, %v12796_v15 }
 0x199   :  { %1744 = vst.msk [vmem:[#allocation3 + $0x100] sm:$0xff] %vm998_vm8, %v15620_v1 }
 0x19b   :  { %v985_v25 = vpop.permute.xlu1 %984 }
 0x19c   :  { %1004 = vst.msk [vmem:[#allocation3 + $0xc8] sm:$0xff] %vm998_vm8, %v985_v25 }
 0x1a3   :  { %v989_v52 = vpop.permute.xlu1 %988 }
 0x1a4   :  { %1006 = vst.msk [vmem:[#allocation3 + $0x118] sm:$0xff] %vm998_vm8, %v989_v52 }
 0x1a6   :  { %v983_v44 = vpop.permute.xlu0 %982 }
 0x1a7   :  { %1003 = vst.msk [vmem:[#allocation3 + $0xa0] sm:$0xff] %vm998_vm8, %v983_v44 }
 0x1aa   :  { %v987_v9 = vpop.permute.xlu0 %986 }
 0x1ab   :  { %1005 = vst.msk [vmem:[#allocation3 + $0xf0] sm:$0xff] %vm998_vm8, %v987_v9 }
 0x1af   :  { %v2102_v36 = vpop.permute.xlu1 %2101 }
 0x1b0   :  { %2124 = vst.msk [vmem:[#allocation3 + $0x40] sm:$0xff] %vm998_vm8, %v2102_v36 }
 0x1b4   :  { %v2100_v57 = vpop.permute.xlu0 %2099 }
 0x1b5   :  { %2123 = vst.msk [vmem:[#allocation3 + $0x18] sm:$0xff] %vm998_vm8, %v2100_v57 }
 0x1bb   :  { %v2104_v1 = vpop.permute.xlu0 %2103 }
 0x1bc   :  { %2125 = vst.msk [vmem:[#allocation3 + $0x68] sm:$0xff] %vm998_vm8, %v2104_v1 }
 0x1be   :  { %v2106_v13 = vpop.permute.xlu1 %2105 }
 0x1bf   :  { %2126 = vst.msk [vmem:[#allocation3 + $0x90] sm:$0xff] %vm998_vm8, %v2106_v13 }
 0x1c4   :  { %v2110_v46 = vpop.permute.xlu1 %2109 }
 0x1c5   :  { %2128 = vst.msk [vmem:[#allocation3 + $0xe0] sm:$0xff] %vm998_vm8, %v2110_v46 }
 0x1c9   :  { %v2108_v23 = vpop.permute.xlu0 %2107 }
 0x1ca   :  { %2127 = vst.msk [vmem:[#allocation3 + $0xb8] sm:$0xff] %vm998_vm8, %v2108_v23 }
 0x1d1   :  { %v2112_v27 = vpop.permute.xlu0 %2111 }
 0x1d2   :  { %v2114_v63 = vpop.permute.xlu1 %2113  ;;  %2129 = vst.msk [vmem:[#allocation3 + $0x108] sm:$0xff] %vm998_vm8, %v2112_v27 }
 0x1d3   :  { %2130 = vst.msk [vmem:[#allocation3 + $0x130] sm:$0xff] %vm998_vm8, %v2114_v63 }
 0x1d4   :  { %14538 = dma.done.wait [#allocation10], 18432 }
 0x1d5   :  { %14539 = vsyncadd [#allocation10], 4294948864  ;;  %v20296_v50 = vmov 0   ;;  %v2611_v12 = vld [vmem:[#allocation7 + $0x8] sm:$0xff]  ;;  %v2610_v6 = vld [vmem:[#allocation7] sm:$0xff]  ;;  %vm3330_vm12 = vcmask 1043456  }
 0x1d6   :  { %2976 = vmatprep.mubr.bf16.mxu0 %v20296_v50  ;;  %v2613_v35 = vld [vmem:[#allocation7 + $0x28] sm:$0xff]  ;;  %2718 = vmatprep.subr.bf16.mxu1 %v2611_v12  ;;  %v2612_v59 = vld [vmem:[#allocation7 + $0x20] sm:$0xff]  ;;  %v15689_v5 = vld [vmem:[#allocation3 + $0x70] sm:$0xff]  ;;  %vm3332_vm13 = vcmask 1047556  }
 0x1d7   :  { %2719 = vmatpush1.bf16.msra.mxu1 %v2610_v6  ;;  %v2615_v41 = vld [vmem:[#allocation7 + $0x48] sm:$0xff]  ;;  %v2614_v47 = vld [vmem:[#allocation7 + $0x40] sm:$0xff]  ;;  %v15696_v15 = vld [vmem:[#allocation3 + $0x98] sm:$0xff] }
 0x1d8   :  { %2720 = vmatprep.subr.bf16.mxu1 %v2613_v35  ;;  %v2617_v29 = vld [vmem:[#allocation7 + $0x68] sm:$0xff]  ;;  %v2616_v14 = vld [vmem:[#allocation7 + $0x60] sm:$0xff]  ;;  %v15698_v25 = vld [vmem:[#allocation3 + $0x30] sm:$0xff] }
 0x1d9   :  { %v15676_v49 = vld [vmem:[#allocation3 + $0x8] sm:$0xff]  ;;  %v2618_v37 = vld [vmem:[#allocation7 + $0x80] sm:$0xff]  ;;  %v15707_v13 = vld [vmem:[#allocation3 + $0x58] sm:$0xff] }
 0x1da   :  { %2750 = vmatprep.mubr.bf16.mxu1 %v15676_v49  ;;  %v2619_v34 = vld [vmem:[#allocation7 + $0x88] sm:$0xff]  ;;  %v2620_v28 = vld [vmem:[#allocation7 + $0xa0] sm:$0xff]  ;;  %v15713_v63 = vld [vmem:[#allocation3 + $0x50] sm:$0xff] }
 0x1db   :  { %2721 = vmatpush1.bf16.msra.mxu1 %v2612_v59  ;;  %v2621_v55 = vld [vmem:[#allocation7 + $0xa8] sm:$0xff]  ;;  %v2622_v8 = vld [vmem:[#allocation7 + $0xc0] sm:$0xff]  ;;  %vm15939_vm14 = vmand %vm3330_vm12, %vm217_vm9 }
 0x1dc   :  { %2722 = vmatprep.subr.bf16.mxu1 %v2615_v41  ;;  %v2623_v62 = vld [vmem:[#allocation7 + $0xc8] sm:$0xff]  ;;  %v2674_v19 = vld [vmem:[#allocation7 + $0x400] sm:$0xff]  ;;  %vm15951_vm15 = vmand %vm3332_vm13, %vm2443_vm11 }
 0x1dd   :  { %v2625_v42 = vld [vmem:[#allocation7 + $0xe8] sm:$0xff]  ;;  %v2624_v51 = vld [vmem:[#allocation7 + $0xe0] sm:$0xff]  ;;  %vm15968_vm9 = vmor %vm15951_vm15, %vm15939_vm14 }
 0x1de   :  { %v2675_v22 = vld [vmem:[#allocation7 + $0x408] sm:$0xff]  ;;  %v2676_v61 = vld [vmem:[#allocation7 + $0x420] sm:$0xff] }
 0x1df   :  { %2723 = vmatpush1.bf16.msra.mxu1 %v2614_v47  ;;  %2944 = vmatprep.subr.bf16.mxu0 %v2675_v22  ;;  %v2677_v18 = vld [vmem:[#allocation7 + $0x428] sm:$0xff]  ;;  %v2626_v56 = vld [vmem:[#allocation7 + $0x100] sm:$0xff] }
 0x1e0   :  { %2724 = vmatprep.subr.bf16.mxu1 %v2617_v29  ;;  %2945 = vmatpush1.bf16.msra.mxu0 %v2674_v19  ;;  %v2627_v4 = vld [vmem:[#allocation7 + $0x108] sm:$0xff]  ;;  %v2678_v11 = vld [vmem:[#allocation7 + $0x440] sm:$0xff]  ;;  %v15721_v29 = vld [vmem:[#allocation3 + $0x78] sm:$0xff] }
 0x1e1   :  { %2946 = vmatprep.subr.bf16.mxu0 %v2677_v18  ;;  %v2679_v48 = vld [vmem:[#allocation7 + $0x448] sm:$0xff]  ;;  %v2628_v45 = vld [vmem:[#allocation7 + $0x120] sm:$0xff]  ;;  %v15731_v19 = vld [vmem:[#allocation3 + $0xd0] sm:$0xff] }
 0x1e2   :  { %v2629_v7 = vld [vmem:[#allocation7 + $0x128] sm:$0xff]  ;;  %v2680_v53 = vld [vmem:[#allocation7 + $0x460] sm:$0xff] }
 0x1e3   :  { %2725 = vmatpush1.bf16.msra.mxu1 %v2616_v14  ;;  %v2681_v16 = vld [vmem:[#allocation7 + $0x468] sm:$0xff]  ;;  %v15679_v32 = vld [vmem:[#allocation3 + $0x20] sm:$0xff]  ;;  %v2604_v14 = vld [vmem:[#allocation3 + $0x110] sm:$0xff] }
 0x1e4   :  { %2726 = vmatprep.subr.bf16.mxu1 %v2619_v34  ;;  %2947 = vmatpush1.bf16.msra.mxu0 %v2676_v61  ;;  %v2631_v20 = vld [vmem:[#allocation7 + $0x148] sm:$0xff]  ;;  %v2630_v43 = vld [vmem:[#allocation7 + $0x140] sm:$0xff] }
 0x1e5   :  { %2948 = vmatprep.subr.bf16.mxu0 %v2679_v48  ;;  %v2633_v24 = vld [vmem:[#allocation7 + $0x168] sm:$0xff]  ;;  %v2632_v26 = vld [vmem:[#allocation7 + $0x160] sm:$0xff] }
 0x1e6   :  { %v2635_v54 = vld [vmem:[#allocation7 + $0x188] sm:$0xff]  ;;  %v2634_v17 = vld [vmem:[#allocation7 + $0x180] sm:$0xff] }
 0x1e7   :  { %2727 = vmatpush1.bf16.msra.mxu1 %v2618_v37  ;;  %v15684_v21 = vld [vmem:[#allocation3 + $0x48] sm:$0xff]  ;;  %v2636_v39 = vld [vmem:[#allocation7 + $0x1a0] sm:$0xff] }
 0x1e8   :  { %2728 = vmatprep.subr.bf16.mxu1 %v2621_v55  ;;  %2949 = vmatpush1.bf16.msra.mxu0 %v2678_v11  ;;  %v2637_v40 = vld [vmem:[#allocation7 + $0x1a8] sm:$0xff]  ;;  %v2638_v30 = vld [vmem:[#allocation7 + $0x1c0] sm:$0xff] }
 0x1e9   :  { %2950 = vmatprep.subr.bf16.mxu0 %v2681_v16  ;;  %v2639_v33 = vld [vmem:[#allocation7 + $0x1c8] sm:$0xff]  ;;  %v2640_v38 = vld [vmem:[#allocation7 + $0x1e0] sm:$0xff] }
 0x1ea   :  { %v2641_v3 = vld [vmem:[#allocation7 + $0x1e8] sm:$0xff]  ;;  %v15694_v31 = vld [vmem:[#allocation3] sm:$0xff] }
 0x1eb   :  { %2729 = vmatpush1.bf16.msra.mxu1 %v2620_v28  ;;  %v2643_v10 = vld [vmem:[#allocation7 + $0x208] sm:$0xff]  ;;  %v2642_v0 = vld [vmem:[#allocation7 + $0x200] sm:$0xff] }
 0x1ec   :  { %2730 = vmatprep.subr.bf16.mxu1 %v2623_v62  ;;  %2951 = vmatpush1.bf16.msra.mxu0 %v2680_v53  ;;  %v2645_v52 = vld [vmem:[#allocation7 + $0x228] sm:$0xff]  ;;  %v2644_v44 = vld [vmem:[#allocation7 + $0x220] sm:$0xff] }
 0x1ed   :  { %v2647_v9 = vld [vmem:[#allocation7 + $0x248] sm:$0xff]  ;;  %v2594_v57 = vld [vmem:[#allocation3 + $0xc0] sm:$0xff] }
 0x1ee   :  { %v15705_v36 = vld [vmem:[#allocation3 + $0x28] sm:$0xff]  ;;  %v2646_v1 = vld [vmem:[#allocation7 + $0x240] sm:$0xff] }
 0x1ef   :  { %2731 = vmatpush1.bf16.msra.mxu1 %v2622_v8  ;;  %12862 = vmatmul.mubr.msk.bf16.vlgmr.msra.gmra.mrb[0].mxu0 %vm682_vm4, %v15679_v32  ;;  %v2649_v46 = vld [vmem:[#allocation7 + $0x268] sm:$0xff]  ;;  %v2648_v23 = vld [vmem:[#allocation7 + $0x260] sm:$0xff] }
 0x1f0   :  { %2732 = vmatprep.subr.bf16.mxu1 %v2625_v42  ;;  %2986 = vmatprep.mubr.bf16.mxu0 %v20296_v50  ;;  %v2651_v27 = vld [vmem:[#allocation7 + $0x288] sm:$0xff]  ;;  %v2650_v6 = vld [vmem:[#allocation7 + $0x280] sm:$0xff]  ;;  %v2609_v42 = vld [vmem:[#allocation3 + $0x138] sm:$0xff] }
 0x1f1   :  { %v2599_v12 = vld [vmem:[#allocation3 + $0xe8] sm:$0xff]  ;;  %v15715_v35 = vld [vmem:[#allocation3 + $0x80] sm:$0xff] }
 0x1f2   :  { %v2653_v59 = vld [vmem:[#allocation7 + $0x2a8] sm:$0xff]  ;;  %v2652_v41 = vld [vmem:[#allocation7 + $0x2a0] sm:$0xff] }
 0x1f3   :  { %2733 = vmatpush1.bf16.msra.mxu1 %v2624_v51  ;;  %v2655_v47 = vld [vmem:[#allocation7 + $0x2c8] sm:$0xff]  ;;  %v2654_v34 = vld [vmem:[#allocation7 + $0x2c0] sm:$0xff] }
 0x1f4   :  { %2734 = vmatprep.subr.bf16.mxu1 %v2627_v4  ;;  %v15723_v37 = vld [vmem:[#allocation3 + $0xa8] sm:$0xff]  ;;  %v2656_v28 = vld [vmem:[#allocation7 + $0x2e0] sm:$0xff] }
 0x1f5   :  { %v2657_v55 = vld [vmem:[#allocation7 + $0x2e8] sm:$0xff]  ;;  %v15729_v8 = vld [vmem:[#allocation3 + $0xa0] sm:$0xff] }
 0x1f6   :  { %v2659_v62 = vld [vmem:[#allocation7 + $0x308] sm:$0xff]  ;;  %v2658_v22 = vld [vmem:[#allocation7 + $0x300] sm:$0xff] }
 0x1f7   :  { %2735 = vmatpush1.bf16.msra.mxu1 %v2626_v56  ;;  %12863 = vmatmul.mubr.msk.bf16.gmra.mrb[4].mxu0 %vm682_vm4, %v15684_v21  ;;  %v2661_v18 = vld [vmem:[#allocation7 + $0x328] sm:$0xff]  ;;  %v2660_v51 = vld [vmem:[#allocation7 + $0x320] sm:$0xff]  ;;  %v15738_v56 = vld [vmem:[#allocation3 + $0xf8] sm:$0xff] }
 0x1f8   :  { %2736 = vmatprep.subr.bf16.mxu1 %v2629_v7  ;;  %2996 = vmatprep.mubr.bf16.mxu0 %v20296_v50  ;;  %v2663_v61 = vld [vmem:[#allocation7 + $0x348] sm:$0xff]  ;;  %v2662_v48 = vld [vmem:[#allocation7 + $0x340] sm:$0xff] }
 0x1f9   :  { %v15736_v4 = vld [vmem:[#allocation3 + $0xc8] sm:$0xff]  ;;  %v2664_v7 = vld [vmem:[#allocation7 + $0x360] sm:$0xff] }
 0x1fa   :  { %v2665_v11 = vld [vmem:[#allocation7 + $0x368] sm:$0xff]  ;;  %v2666_v53 = vld [vmem:[#allocation7 + $0x380] sm:$0xff] }
 0x1fb   :  { %2737 = vmatpush1.bf16.msra.mxu1 %v2628_v45  ;;  %v2667_v16 = vld [vmem:[#allocation7 + $0x388] sm:$0xff]  ;;  %v15742_v45 = vld [vmem:[#allocation3 + $0xf0] sm:$0xff] }
 0x1fc   :  { %2738 = vmatprep.subr.bf16.mxu1 %v2631_v20  ;;  %v15744_v20 = vld [vmem:[#allocation3 + $0x120] sm:$0xff] }
 0x1ff   :  { %2739 = vmatpush1.bf16.msra.mxu1 %v2630_v43  ;;  %12864 = vmatmul.mubr.msk.bf16.gmra.mrb[8].mxu0 %vm682_vm4, %v15689_v5  ;;  %v2669_v43 = vld [vmem:[#allocation7 + $0x3a8] sm:$0xff] }
 0x200   :  { %2740 = vmatprep.subr.bf16.mxu1 %v2633_v24  ;;  %3006 = vmatprep.mubr.bf16.mxu0 %v20296_v50  ;;  %v2668_v24 = vld [vmem:[#allocation7 + $0x3a0] sm:$0xff] }
 0x203   :  { %2741 = vmatpush1.bf16.msra.mxu1 %v2632_v26  ;;  %v2671_v26 = vld [vmem:[#allocation7 + $0x3c8] sm:$0xff] }
 0x204   :  { %2742 = vmatprep.subr.bf16.mxu1 %v2635_v54  ;;  %v15748_v54 = vld [vmem:[#allocation3 + $0x118] sm:$0xff] }
 0x207   :  { %2743 = vmatpush1.bf16.msra.mxu1 %v2634_v17  ;;  %12865 = vmatmul.mubr.msk.bf16.gmra.mrb[12].mxu0 %vm682_vm4, %v15696_v15  ;;  %v2670_v17 = vld [vmem:[#allocation7 + $0x3c0] sm:$0xff] }
 0x208   :  { %2744 = vmatprep.subr.bf16.mxu1 %v2637_v40  ;;  %3016 = vmatprep.mubr.bf16.mxu0 %v20296_v50  ;;  %v15750_v40 = vld [vmem:[#allocation3 + $0x18] sm:$0xff] }
 0x20b   :  { %2745 = vmatpush1.bf16.msra.mxu1 %v2636_v39  ;;  %v2673_v39 = vld [vmem:[#allocation7 + $0x3e8] sm:$0xff] }
 0x20c   :  { %2746 = vmatprep.subr.bf16.mxu1 %v2639_v33  ;;  %v2672_v33 = vld [vmem:[#allocation7 + $0x3e0] sm:$0xff] }
 0x20f   :  { %2747 = vmatpush1.bf16.msra.mxu1 %v2638_v30  ;;  %12866 = vmatmul.mubr.msk.bf16.gmra.mrb[16].mxu0 %vm682_vm4, %v2594_v57  ;;  %v3472_v30 = vld [vmem:[#allocation7 + $0x18] sm:$0xff]  ;;  %v3475_v57 = vld [vmem:[#allocation7 + $0x50] sm:$0xff] }
 0x210   :  { %2748 = vmatprep.subr.bf16.mxu1 %v2641_v3  ;;  %3026 = vmatprep.mubr.bf16.mxu0 %v20296_v50  ;;  %v15754_v3 = vld [vmem:[#allocation3 + $0x10] sm:$0xff] }
 0x213   :  { %2749 = vmatpush1.bf16.msra.mxu1 %v2640_v38  ;;  %v3471_v38 = vld [vmem:[#allocation7 + $0x10] sm:$0xff] }
 0x214   :  { %2831 = vmatprep.subr.bf16.mxu1 %v2643_v10  ;;  %v15756_v10 = vld [vmem:[#allocation3 + $0x40] sm:$0xff] }
 0x216   :  { %2751 = vmatmul.mubr.bf16.vlgmr.msra.gmra.mrb[0].mxu1 %v15694_v31 }
 0x217   :  { %2832 = vmatpush1.bf16.msra.mxu1 %v2642_v0  ;;  %2760 = vmatprep.mubr.bf16.mxu1 %v15698_v25  ;;  %v3474_v0 = vld [vmem:[#allocation7 + $0x38] sm:$0xff] }
 0x218   :  { %2833 = vmatprep.subr.bf16.mxu1 %v2645_v52  ;;  %12867 = vmatmul.mubr.msk.bf16.gmra.mrb[20].mxu0 %vm682_vm4, %v2599_v12  ;;  %v3473_v52 = vld [vmem:[#allocation7 + $0x30] sm:$0xff]  ;;  %v15766_v12 = vld [vmem:[#allocation3 + $0x60] sm:$0xff] }
 0x219   :  { %3036 = vmatprep.mubr.bf16.mxu0 %v20296_v50 }
 0x21b   :  { %2834 = vmatpush1.bf16.msra.mxu1 %v2644_v44  ;;  %v3476_v44 = vld [vmem:[#allocation7 + $0x58] sm:$0xff] }
 0x21c   :  { %2835 = vmatprep.subr.bf16.mxu1 %v2647_v9  ;;  %v15760_v9 = vld [vmem:[#allocation3 + $0x38] sm:$0xff] }
 0x21e   :  { %2761 = vmatmul.mubr.bf16.gmra.mrb[4].mxu1 %v15705_v36 }
 0x21f   :  { %2836 = vmatpush1.bf16.msra.mxu1 %v2646_v1  ;;  %2770 = vmatprep.mubr.bf16.mxu1 %v15707_v13  ;;  %v15762_v1 = vld [vmem:[#allocation3 + $0x68] sm:$0xff] }
 0x220   :  { %2837 = vmatprep.subr.bf16.mxu1 %v2649_v46  ;;  %12868 = vmatmul.mubr.msk.bf16.gmra.mrb[24].mxu0 %vm682_vm4, %v2604_v14  ;;  %v3478_v46 = vld [vmem:[#allocation7 + $0x78] sm:$0xff] }
 0x221   :  { %3046 = vmatprep.mubr.bf16.mxu0 %v20296_v50  ;;  %v3484_v14 = vld [vmem:[#allocation7 + $0xd8] sm:$0xff] }
 0x223   :  { %2838 = vmatpush1.bf16.msra.mxu1 %v2648_v23  ;;  %v3477_v23 = vld [vmem:[#allocation7 + $0x70] sm:$0xff] }
 0x224   :  { %2839 = vmatprep.subr.bf16.mxu1 %v2651_v27  ;;  %v3480_v27 = vld [vmem:[#allocation7 + $0x98] sm:$0xff] }
 0x226   :  { %2771 = vmatmul.mubr.bf16.gmra.mrb[8].mxu1 %v15713_v63 }
 0x227   :  { %2840 = vmatpush1.bf16.msra.mxu1 %v2650_v6  ;;  %2780 = vmatprep.mubr.bf16.mxu1 %v15715_v35  ;;  %v3479_v6 = vld [vmem:[#allocation7 + $0x90] sm:$0xff] }
 0x228   :  { %2841 = vmatprep.subr.bf16.mxu1 %v2653_v59  ;;  %12869 = vmatmul.mubr.msk.bf16.gmra.mrb[28].mxu0 %vm682_vm4, %v2609_v42  ;;  %v15768_v59 = vld [vmem:[#allocation3 + $0x90] sm:$0xff] }
 0x229   :  { %v3485_v42 = vld [vmem:[#allocation7 + $0xf0] sm:$0xff] }
 0x22b   :  { %2842 = vmatpush1.bf16.msra.mxu1 %v2652_v41  ;;  %v3482_v41 = vld [vmem:[#allocation7 + $0xb8] sm:$0xff] }
 0x22c   :  { %2843 = vmatprep.subr.bf16.mxu1 %v2655_v47  ;;  %v3481_v47 = vld [vmem:[#allocation7 + $0xb0] sm:$0xff] }
 0x22e   :  { %2781 = vmatmul.mubr.bf16.gmra.mrb[12].mxu1 %v15721_v29 }
 0x22f   :  { %2844 = vmatpush1.bf16.msra.mxu1 %v2654_v34  ;;  %2790 = vmatprep.mubr.bf16.mxu1 %v15723_v37  ;;  %v15772_v34 = vld [vmem:[#allocation3 + $0x88] sm:$0xff] }
 0x230   :  { %2845 = vmatprep.subr.bf16.mxu1 %v2657_v55  ;;  %v3483_v55 = vld [vmem:[#allocation7 + $0xd0] sm:$0xff] }
 0x233   :  { %2846 = vmatpush1.bf16.msra.mxu1 %v2656_v28  ;;  %v15774_v28 = vld [vmem:[#allocation3 + $0xb8] sm:$0xff] }
 0x234   :  { %2847 = vmatprep.subr.bf16.mxu1 %v2659_v62  ;;  %v3486_v62 = vld [vmem:[#allocation7 + $0xf8] sm:$0xff] }
 0x236   :  { %2791 = vmatmul.mubr.bf16.gmra.mrb[16].mxu1 %v15729_v8 }
 0x237   :  { %2848 = vmatpush1.bf16.msra.mxu1 %v2658_v22  ;;  %2800 = vmatprep.mubr.bf16.mxu1 %v15731_v19  ;;  %v3488_v22 = vld [vmem:[#allocation7 + $0x118] sm:$0xff] }
 0x238   :  { %2849 = vmatprep.subr.bf16.mxu1 %v2661_v18  ;;  %v15778_v18 = vld [vmem:[#allocation3 + $0xb0] sm:$0xff] }
 0x23b   :  { %2850 = vmatpush1.bf16.msra.mxu1 %v2660_v51  ;;  %v3487_v51 = vld [vmem:[#allocation7 + $0x110] sm:$0xff] }
 0x23c   :  { %2851 = vmatprep.subr.bf16.mxu1 %v2663_v61  ;;  %v15780_v61 = vld [vmem:[#allocation3 + $0xe0] sm:$0xff] }
 0x23e   :  { %2801 = vmatmul.mubr.bf16.gmra.mrb[20].mxu1 %v15736_v4 }
 0x23f   :  { %2852 = vmatpush1.bf16.msra.mxu1 %v2662_v48  ;;  %2810 = vmatprep.mubr.bf16.mxu1 %v15738_v56  ;;  %v3490_v48 = vld [vmem:[#allocation7 + $0x138] sm:$0xff] }
 0x240   :  { %2853 = vmatprep.subr.bf16.mxu1 %v2665_v11  ;;  %v3489_v11 = vld [vmem:[#allocation7 + $0x130] sm:$0xff] }
 0x243   :  { %2854 = vmatpush1.bf16.msra.mxu1 %v2664_v7  ;;  %v3492_v7 = vld [vmem:[#allocation7 + $0x158] sm:$0xff] }
 0x244   :  { %2855 = vmatprep.subr.bf16.mxu1 %v2667_v16  ;;  %v15784_v16 = vld [vmem:[#allocation3 + $0xd8] sm:$0xff] }
 0x246   :  { %2811 = vmatmul.mubr.bf16.gmra.mrb[24].mxu1 %v15742_v45 }
 0x247   :  { %2856 = vmatpush1.bf16.msra.mxu1 %v2666_v53  ;;  %2820 = vmatprep.mubr.bf16.mxu1 %v15744_v20  ;;  %v3491_v53 = vld [vmem:[#allocation7 + $0x150] sm:$0xff] }
 0x248   :  { %2857 = vmatprep.subr.bf16.mxu1 %v2669_v43  ;;  %v15786_v43 = vld [vmem:[#allocation3 + $0x108] sm:$0xff] }
 0x24b   :  { %2858 = vmatpush1.bf16.msra.mxu1 %v2668_v24  ;;  %v3494_v24 = vld [vmem:[#allocation7 + $0x178] sm:$0xff] }
 0x24c   :  { %2859 = vmatprep.subr.bf16.mxu1 %v2671_v26  ;;  %v3493_v26 = vld [vmem:[#allocation7 + $0x170] sm:$0xff] }
 0x24e   :  { %2821 = vmatmul.mubr.bf16.gmra.mrb[28].mxu1 %v15748_v54 }
 0x24f   :  { %2860 = vmatpush1.bf16.msra.mxu1 %v2670_v17  ;;  %2863 = vmatprep.mubr.bf16.mxu1 %v15750_v40  ;;  %v3496_v17 = vld [vmem:[#allocation7 + $0x198] sm:$0xff] }
 0x250   :  { %2861 = vmatprep.subr.bf16.mxu1 %v2673_v39  ;;  %v15790_v39 = vld [vmem:[#allocation3 + $0x100] sm:$0xff] }
 0x253   :  { %2862 = vmatpush1.bf16.msra.mxu1 %v2672_v33  ;;  %v3495_v33 = vld [vmem:[#allocation7 + $0x190] sm:$0xff] }
 0x254   :  { %3579 = vmatprep.subr.bf16.mxu1 %v3472_v30  ;;  %v15792_v30 = vld [vmem:[#allocation3 + $0x130] sm:$0xff] }
 0x256   :  { %2864 = vmatmul.mubr.bf16.vlgmr.msra.gmra.mrb[0].mxu1 %v15754_v3 }
 0x257   :  { %3580 = vmatpush1.bf16.msra.mxu1 %v3471_v38  ;;  %2873 = vmatprep.mubr.bf16.mxu1 %v15756_v10  ;;  %v3498_v38 = vld [vmem:[#allocation7 + $0x1b8] sm:$0xff] }
 0x258   :  { %3581 = vmatprep.subr.bf16.mxu1 %v3474_v0  ;;  %v3497_v0 = vld [vmem:[#allocation7 + $0x1b0] sm:$0xff] }
 0x25b   :  { %3582 = vmatpush1.bf16.msra.mxu1 %v3473_v52  ;;  %v3500_v52 = vld [vmem:[#allocation7 + $0x1d8] sm:$0xff] }
 0x25c   :  { %3583 = vmatprep.subr.bf16.mxu1 %v3476_v44  ;;  %v15796_v44 = vld [vmem:[#allocation3 + $0x128] sm:$0xff] }
 0x25e   :  { %2874 = vmatmul.mubr.bf16.gmra.mrb[4].mxu1 %v15760_v9 }
 0x25f   :  { %3584 = vmatpush1.bf16.msra.mxu1 %v3475_v57  ;;  %2883 = vmatprep.mubr.bf16.mxu1 %v15762_v1  ;;  %v3499_v57 = vld [vmem:[#allocation7 + $0x1d0] sm:$0xff] }
 0x260   :  { %3585 = vmatprep.subr.bf16.mxu1 %v3478_v46  ;;  %v3502_v46 = vld [vmem:[#allocation7 + $0x1f8] sm:$0xff] }
 0x263   :  { %3586 = vmatpush1.bf16.msra.mxu1 %v3477_v23  ;;  %v3501_v23 = vld [vmem:[#allocation7 + $0x1f0] sm:$0xff] }
 0x264   :  { %3587 = vmatprep.subr.bf16.mxu1 %v3480_v27  ;;  %v3504_v27 = vld [vmem:[#allocation7 + $0x218] sm:$0xff] }
 0x266   :  { %2884 = vmatmul.mubr.bf16.gmra.mrb[8].mxu1 %v15766_v12 }
 0x267   :  { %3588 = vmatpush1.bf16.msra.mxu1 %v3479_v6  ;;  %2893 = vmatprep.mubr.bf16.mxu1 %v15768_v59  ;;  %v3503_v6 = vld [vmem:[#allocation7 + $0x210] sm:$0xff] }
 0x268   :  { %3589 = vmatprep.subr.bf16.mxu1 %v3482_v41  ;;  %v3506_v41 = vld [vmem:[#allocation7 + $0x238] sm:$0xff] }
 0x26b   :  { %3590 = vmatpush1.bf16.msra.mxu1 %v3481_v47  ;;  %v3505_v47 = vld [vmem:[#allocation7 + $0x230] sm:$0xff] }
 0x26c   :  { %3591 = vmatprep.subr.bf16.mxu1 %v3484_v14  ;;  %v3508_v14 = vld [vmem:[#allocation7 + $0x258] sm:$0xff] }
 0x26e   :  { %2894 = vmatmul.mubr.bf16.gmra.mrb[12].mxu1 %v15772_v34 }
 0x26f   :  { %3592 = vmatpush1.bf16.msra.mxu1 %v3483_v55  ;;  %2903 = vmatprep.mubr.bf16.mxu1 %v15774_v28  ;;  %v3507_v55 = vld [vmem:[#allocation7 + $0x250] sm:$0xff] }
 0x270   :  { %3593 = vmatprep.subr.bf16.mxu1 %v3486_v62  ;;  %v3510_v62 = vld [vmem:[#allocation7 + $0x278] sm:$0xff] }
 0x273   :  { %3594 = vmatpush1.bf16.msra.mxu1 %v3485_v42  ;;  %v3512_v42 = vld [vmem:[#allocation7 + $0x298] sm:$0xff] }
 0x274   :  { %3595 = vmatprep.subr.bf16.mxu1 %v3488_v22  ;;  %v3514_v22 = vld [vmem:[#allocation7 + $0x2b8] sm:$0xff] }
 0x276   :  { %2904 = vmatmul.mubr.bf16.gmra.mrb[16].mxu1 %v15778_v18 }
 0x277   :  { %3596 = vmatpush1.bf16.msra.mxu1 %v3487_v51  ;;  %2913 = vmatprep.mubr.bf16.mxu1 %v15780_v61  ;;  %v3516_v51 = vld [vmem:[#allocation7 + $0x2d8] sm:$0xff] }
 0x278   :  { %3597 = vmatprep.subr.bf16.mxu1 %v3490_v48  ;;  %v3518_v48 = vld [vmem:[#allocation7 + $0x2f8] sm:$0xff] }
 0x27b   :  { %3598 = vmatpush1.bf16.msra.mxu1 %v3489_v11  ;;  %v3520_v11 = vld [vmem:[#allocation7 + $0x318] sm:$0xff] }
 0x27c   :  { %3599 = vmatprep.subr.bf16.mxu1 %v3492_v7  ;;  %v3522_v7 = vld [vmem:[#allocation7 + $0x338] sm:$0xff] }
 0x27e   :  { %2914 = vmatmul.mubr.bf16.gmra.mrb[20].mxu1 %v15784_v16 }
 0x27f   :  { %3600 = vmatpush1.bf16.msra.mxu1 %v3491_v53  ;;  %2923 = vmatprep.mubr.bf16.mxu1 %v15786_v43  ;;  %v3524_v53 = vld [vmem:[#allocation7 + $0x358] sm:$0xff] }
 0x280   :  { %3601 = vmatprep.subr.bf16.mxu1 %v3494_v24  ;;  %v3526_v24 = vld [vmem:[#allocation7 + $0x378] sm:$0xff] }
 0x283   :  { %3602 = vmatpush1.bf16.msra.mxu1 %v3493_v26  ;;  %v3528_v26 = vld [vmem:[#allocation7 + $0x398] sm:$0xff] }
 0x284   :  { %3603 = vmatprep.subr.bf16.mxu1 %v3496_v17  ;;  %v3530_v17 = vld [vmem:[#allocation7 + $0x3b8] sm:$0xff] }
 0x286   :  { %2924 = vmatmul.mubr.bf16.gmra.mrb[24].mxu1 %v15790_v39 }
 0x287   :  { %3604 = vmatpush1.bf16.msra.mxu1 %v3495_v33  ;;  %2933 = vmatprep.mubr.bf16.mxu1 %v15792_v30  ;;  %v3532_v33 = vld [vmem:[#allocation7 + $0x3d8] sm:$0xff] }
 0x288   :  { %3605 = vmatprep.subr.bf16.mxu1 %v3498_v38  ;;  %v3534_v38 = vld [vmem:[#allocation7 + $0x3f8] sm:$0xff] }
 0x28b   :  { %3606 = vmatpush1.bf16.msra.mxu1 %v3497_v0  ;;  %v3536_v0 = vld [vmem:[#allocation7 + $0x418] sm:$0xff] }
 0x28c   :  { %3607 = vmatprep.subr.bf16.mxu1 %v3500_v52 }
 0x28e   :  { %2934 = vmatmul.mubr.bf16.gmra.mrb[28].mxu1 %v15796_v44 }
 0x28f   :  { %3608 = vmatpush1.bf16.msra.mxu1 %v3499_v57  ;;  %3611 = vmatprep.mubr.bf16.mxu1 %v15676_v49  ;;  %v3509_v49 = vld [vmem:[#allocation7 + $0x270] sm:$0xff] }
 0x290   :  { %3609 = vmatprep.subr.bf16.mxu1 %v3502_v46  ;;  %v3535_v57 = vld [vmem:[#allocation7 + $0x410] sm:$0xff] }
 0x293   :  { %3610 = vmatpush1.bf16.msra.mxu1 %v3501_v23  ;;  %v3538_v23 = vld [vmem:[#allocation7 + $0x438] sm:$0xff] }
 0x294   :  { %3692 = vmatprep.subr.bf16.mxu1 %v3504_v27 }
 0x296   :  { %3612 = vmatmul.mubr.bf16.vlgmr.msra.gmra.mrb[32].mxu1 %v15694_v31  ;;  %v3511_v31 = vld [vmem:[#allocation7 + $0x290] sm:$0xff] }
 0x297   :  { %3693 = vmatpush1.bf16.msra.mxu1 %v3503_v6  ;;  %3621 = vmatprep.mubr.bf16.mxu1 %v15698_v25  ;;  %v3513_v25 = vld [vmem:[#allocation7 + $0x2b0] sm:$0xff] }
 0x298   :  { %3694 = vmatprep.subr.bf16.mxu1 %v3506_v41 }
 0x29b   :  { %3695 = vmatpush1.bf16.msra.mxu1 %v3505_v47  ;;  %v3539_v47 = vld [vmem:[#allocation7 + $0x450] sm:$0xff] }
 0x29c   :  { %3696 = vmatprep.subr.bf16.mxu1 %v3508_v14 }
 0x29e   :  { %3622 = vmatmul.mubr.bf16.gmra.mrb[36].mxu1 %v15705_v36  ;;  %v3515_v36 = vld [vmem:[#allocation7 + $0x2d0] sm:$0xff] }
 0x29f   :  { %3697 = vmatpush1.bf16.msra.mxu1 %v3507_v55  ;;  %3631 = vmatprep.mubr.bf16.mxu1 %v15707_v13  ;;  %v3517_v13 = vld [vmem:[#allocation7 + $0x2f0] sm:$0xff]  ;;  %v3542_v55 = vld [vmem:[#allocation7 + $0x478] sm:$0xff] }
 0x2a0   :  { %3698 = vmatprep.subr.bf16.mxu1 %v3510_v62 }
 0x2a3   :  { %3699 = vmatpush1.bf16.msra.mxu1 %v3509_v49 }
 0x2a4   :  { %3700 = vmatprep.subr.bf16.mxu1 %v3512_v42 }
 0x2a6   :  { %3632 = vmatmul.mubr.bf16.gmra.mrb[40].mxu1 %v15713_v63  ;;  %v3519_v63 = vld [vmem:[#allocation7 + $0x310] sm:$0xff] }
 0x2a7   :  { %3701 = vmatpush1.bf16.msra.mxu1 %v3511_v31  ;;  %3641 = vmatprep.mubr.bf16.mxu1 %v15715_v35  ;;  %v3521_v35 = vld [vmem:[#allocation7 + $0x330] sm:$0xff] }
 0x2a8   :  { %3702 = vmatprep.subr.bf16.mxu1 %v3514_v22 }
 0x2ab   :  { %3703 = vmatpush1.bf16.msra.mxu1 %v3513_v25  ;;  %v2682_v25 = vld [vmem:[#allocation14] sm:$0x3] }
 0x2ac   :  { %3704 = vmatprep.subr.bf16.mxu1 %v3516_v51  ;;  %v15894_v51 = vld [vmem:[#allocation4] sm:$0xff] }
 0x2ad   :  { %20300 = vst [vmem:[#allocation33_spill] sm:$0xff] %v15894_v51 }
 0x2ae   :  { %3642 = vmatmul.mubr.bf16.gmra.mrb[44].mxu1 %v15721_v29  ;;  %v3523_v29 = vld [vmem:[#allocation7 + $0x350] sm:$0xff] }
 0x2af   :  { %3705 = vmatpush1.bf16.msra.mxu1 %v3515_v36  ;;  %3651 = vmatprep.mubr.bf16.mxu1 %v15723_v37  ;;  %v3525_v37 = vld [vmem:[#allocation7 + $0x370] sm:$0xff]  ;;  %v4575_v36 = vshrl.u32 %v15894_v51, 16 }
 0x2b0   :  { %3706 = vmatprep.subr.bf16.mxu1 %v3518_v48  ;;  %v4578_v48 = vshll.u32 %v15894_v51, 16 }
 0x2b3   :  { %3707 = vmatpush1.bf16.msra.mxu1 %v3517_v13 }
 0x2b4   :  { %3708 = vmatprep.subr.bf16.mxu1 %v3520_v11 }
 0x2b6   :  { %3652 = vmatmul.mubr.bf16.gmra.mrb[48].mxu1 %v15729_v8  ;;  %v3527_v8 = vld [vmem:[#allocation7 + $0x390] sm:$0xff] }
 0x2b7   :  { %3709 = vmatpush1.bf16.msra.mxu1 %v3519_v63  ;;  %3661 = vmatprep.mubr.bf16.mxu1 %v15731_v19  ;;  %v3529_v19 = vld [vmem:[#allocation7 + $0x3b0] sm:$0xff] }
 0x2b8   :  { %3710 = vmatprep.subr.bf16.mxu1 %v3522_v7 }
 0x2bb   :  { %3711 = vmatpush1.bf16.msra.mxu1 %v3521_v35  ;;  %v4512_v35 = vld [vmem:[#allocation4 + $0x10] sm:$0x11] }
 0x2bc   :  { %3712 = vmatprep.subr.bf16.mxu1 %v3524_v53  ;;  %v4577_v53 = vrot.slane %v4575_v36, 4 }
 0x2be   :  { %3662 = vmatmul.mubr.bf16.gmra.mrb[52].mxu1 %v15736_v4  ;;  %v3531_v4 = vld [vmem:[#allocation7 + $0x3d0] sm:$0xff] }
 0x2bf   :  { %3713 = vmatpush1.bf16.msra.mxu1 %v3523_v29  ;;  %3671 = vmatprep.mubr.bf16.mxu1 %v15738_v56  ;;  %v3533_v56 = vld [vmem:[#allocation7 + $0x3f0] sm:$0xff]  ;;  %v4580_v29 = vrot.slane %v4578_v48, 5 }
 0x2c0   :  { %3714 = vmatprep.subr.bf16.mxu1 %v3526_v24 }
 0x2c2   :  { %v15816_v52 = vpop.f32.mrb[0].mxu0 }
 0x2c3   :  { %3715 = vmatpush1.bf16.msra.mxu1 %v3525_v37  ;;  %v5182_v37 = vld [vmem:[#allocation4] sm:$0xee] }
 0x2c4   :  { %3716 = vmatprep.subr.bf16.mxu1 %v3528_v26  ;;  %v5184_v26 = vld [vmem:[#allocation4 + $0x10] sm:$0x11]  ;;  %v12974_v48 = vrot.slane %v5182_v37, 9 }
 0x2c6   :  { %3672 = vmatmul.mubr.bf16.gmra.mrb[56].mxu1 %v15742_v45  ;;  %v15818_v45 = vpop.f32.mrb[1].mxu0 }
 0x2c7   :  { %3717 = vmatpush1.bf16.msra.mxu1 %v3527_v8  ;;  %3681 = vmatprep.mubr.bf16.mxu1 %v15744_v20  ;;  %v15820_v20 = vpop.f32.mrb[2].mxu0 }
 0x2c8   :  { %3718 = vmatprep.subr.bf16.mxu1 %v3530_v17  ;;  %v15822_v46 = vpop.f32.mrb[3].mxu0 }
 0x2ca   :  { %v15826_v27 = vpop.f32.mrb[4].mxu0 }
 0x2cb   :  { %3719 = vmatpush1.bf16.msra.mxu1 %v3529_v19  ;;  %v15828_v6 = vpop.f32.mrb[5].mxu0 }
 0x2cc   :  { %3720 = vmatprep.subr.bf16.mxu1 %v3532_v33  ;;  %v15830_v41 = vpop.f32.mrb[6].mxu0 }
 0x2cd   :  { %v15832_v14 = vpop.f32.mrb[7].mxu0 }
 0x2ce   :  { %3682 = vmatmul.mubr.bf16.gmra.mrb[60].mxu1 %v15748_v54  ;;  %v3537_v54 = vld [vmem:[#allocation7 + $0x430] sm:$0xff] }
 0x2cf   :  { %3721 = vmatpush1.bf16.msra.mxu1 %v3531_v4  ;;  %3724 = vmatprep.mubr.bf16.mxu1 %v15750_v40  ;;  %v3540_v40 = vld [vmem:[#allocation7 + $0x458] sm:$0xff]  ;;  %v4302_v4 = vld [vmem:[#allocation4 + $0x140] sm:$0xff] }
 0x2d0   :  { %3722 = vmatprep.subr.bf16.mxu1 %v3534_v38 }
 0x2d3   :  { %3723 = vmatpush1.bf16.msra.mxu1 %v3533_v56 }
 0x2d4   :  { %3805 = vmatprep.subr.bf16.mxu1 %v3536_v0 }
 0x2d6   :  { %3725 = vmatmul.mubr.bf16.vlgmr.msra.gmra.mrb[32].mxu1 %v15754_v3  ;;  %v3541_v3 = vld [vmem:[#allocation7 + $0x470] sm:$0xff] }
 0x2d7   :  { %3806 = vmatpush1.bf16.msra.mxu1 %v3535_v57  ;;  %3734 = vmatprep.mubr.bf16.mxu1 %v15756_v10  ;;  %v15836_v10 = vpop.f32.mrb[8].mxu0  ;;  %v7165_v57 = vld [vmem:[#allocation4 + $0x130] sm:$0x11] }
 0x2d8   :  { %3807 = vmatprep.subr.bf16.mxu1 %v3538_v23  ;;  %v15838_v62 = vpop.f32.mrb[9].mxu0  ;;  %v4799_v23 = vshrl.u32 %v4302_v4, 16 }
 0x2d9   :  { %v15840_v49 = vpop.f32.mrb[10].mxu0 }
 0x2da   :  { %v15842_v42 = vpop.f32.mrb[11].mxu0 }
 0x2db   :  { %3808 = vmatpush1.bf16.msra.mxu1 %v3537_v54  ;;  %v15846_v31 = vpop.f32.mrb[12].mxu0  ;;  %v4802_v54 = vshll.u32 %v4302_v4, 16  ;;  %v7405_v4 = vshll.u32 %v7165_v57, 16  ;;  %v15935_v57 = vld [vmem:[#allocation4 + $0x140] sm:$0xee] }
 0x2dc   :  { %3809 = vmatprep.subr.bf16.mxu1 %v3540_v40 }
 0x2de   :  { %3735 = vmatmul.mubr.bf16.gmra.mrb[36].mxu1 %v15760_v9  ;;  %v15848_v9 = vpop.f32.mrb[13].mxu0 }
 0x2df   :  { %3744 = vmatprep.mubr.bf16.mxu1 %v15762_v1  ;;  %3810 = vmatpush1.bf16.msra.mxu1 %v3539_v47  ;;  %v15851_v1 = vpop.f32.mrb[14].mxu0 }
 0x2e0   :  { %3811 = vmatprep.subr.bf16.mxu1 %v3542_v55  ;;  %v15854_v22 = vpop.f32.mrb[15].mxu0 }
 0x2e3   :  { %3812 = vmatpush1.bf16.msra.mxu1 %v3541_v3  ;;  %v4581_v3 = vor.u32 %v4580_v29, %v4577_v53  ;;  %v15924_v53 = vld [vmem:[#allocation4 + $0x130] sm:$0x11]  ;;  %v4804_v29 = vrot.slane %v4802_v54, 5 }
 0x2e5   :  { %v15926_v37 = vrot.slane %v4581_v3, 4 }
 0x2e6   :  { %3745 = vmatmul.mubr.bf16.gmra.mrb[40].mxu1 %v15766_v12  ;;  %v15860_v12 = vpop.f32.mrb[16].mxu0 }
 0x2e7   :  { %3754 = vmatprep.mubr.bf16.mxu1 %v15768_v59  ;;  %v15862_v59 = vpop.f32.mrb[17].mxu0 }
 0x2ee   :  { %3755 = vmatmul.mubr.bf16.gmra.mrb[44].mxu1 %v15772_v34  ;;  %v15866_v34 = vpop.f32.mrb[18].mxu0 }
 0x2ef   :  { %3764 = vmatprep.mubr.bf16.mxu1 %v15774_v28  ;;  %v15868_v28 = vpop.f32.mrb[19].mxu0 }
 0x2f6   :  { %3765 = vmatmul.mubr.bf16.gmra.mrb[48].mxu1 %v15778_v18  ;;  %v15872_v18 = vpop.f32.mrb[20].mxu0 }
 0x2f7   :  { %3774 = vmatprep.mubr.bf16.mxu1 %v15780_v61  ;;  %v15874_v61 = vpop.f32.mrb[21].mxu0 }
 0x2fe   :  { %3775 = vmatmul.mubr.bf16.gmra.mrb[52].mxu1 %v15784_v16  ;;  %v2684_v16 = vlaneseq }
 0x2ff   :  { %3784 = vmatprep.mubr.bf16.mxu1 %v15786_v43  ;;  %v15879_v43 = vpop.f32.mrb[22].mxu0 }
 0x306   :  { %3785 = vmatmul.mubr.bf16.gmra.mrb[56].mxu1 %v15790_v39  ;;  %v15883_v39 = vshrl.u32 %v2684_v16, 7  ;;  %v4584_v16 = vshll.u32 %v4512_v35, 16 }
 0x307   :  { %3794 = vmatprep.mubr.bf16.mxu1 %v15792_v30  ;;  %v15885_v30 = vpop.f32.mrb[23].mxu0 }
 0x308   :  { %20297 = vst [vmem:[#allocation30_spill] sm:$0xff] %v15883_v39  ;;  %v15907_v8 = vpop.f32.mrb[24].mxu0 }
 0x309   :  { %20301 = vst [vmem:[#allocation34_spill] sm:$0xff] %v15907_v8  ;;  %v15910_v38 = vpop.f32.mrb[25].mxu0 }
 0x30a   :  { %20302 = vst [vmem:[#allocation35_spill] sm:$0xff] %v15910_v38 }
 0x30e   :  { %3795 = vmatmul.mubr.bf16.gmra.mrb[60].mxu1 %v15796_v44  ;;  %v15889_v44 = vsub.s32 0, %v15883_v39 }
 0x30f   :  { %3837 = vmatprep.mubr.bf16.mxu1 %v20296_v50 }
 0x310   :  { %20298 = vst [vmem:[#allocation31_spill] sm:$0xff] %v15889_v44  ;;  %v15901_v13 = vrot.slane %v2682_v25, %v15889_v44 }
 0x316   :  { %12886 = vmatmul.mubr.msk.bf16.vlgmr.msra.gmra.mrb[32].mxu1 %vm682_vm4, %v15679_v32  ;;  %v15892_v32 = vsub.s32 1, %v15883_v39 }
 0x317   :  { %3847 = vmatprep.mubr.bf16.mxu1 %v20296_v50 }
 0x318   :  { %20299 = vst [vmem:[#allocation32_spill] sm:$0xff] %v15892_v32  ;;  %v15904_v7 = vrot.slane %v2682_v25, %v15892_v32 }
 0x31e   :  { %12887 = vmatmul.mubr.msk.bf16.gmra.mrb[36].mxu1 %vm682_vm4, %v15684_v21  ;;  %v6925_v21 = vld [vmem:[#allocation4 + $0x120] sm:$0xff] }
 0x31f   :  { %3857 = vmatprep.mubr.bf16.mxu1 %v20296_v50  ;;  %v7396_v11 = vshrl.u32 %v6925_v21, 16  ;;  %v7399_v63 = vshll.u32 %v6925_v21, 16  ;;  %v5312_v21 = vrot.slane %v5184_v26, 5  ;;  %v15928_v26 = vrot.slane %v4584_v16, 5 }
 0x321   :  { %v7398_v19 = vrot.slane %v7396_v11, 4  ;;  %v7401_v33 = vrot.slane %v7399_v63, 5  ;;  %v4544_v11 = vld [vmem:[#allocation4 + $0x150] sm:$0x11] }
 0x326   :  { %12888 = vmatmul.mubr.msk.bf16.gmra.mrb[40].mxu1 %vm682_vm4, %v15689_v5 }
 0x327   :  { %3867 = vmatprep.mubr.bf16.mxu1 %v20296_v50 }
 0x329   :  { %v2865_v24 = vpop.f32.mrb[0].mxu1 }
 0x32a   :  { %v13541_v5 = vadd.f32 %v2865_v24, %v15901_v13  ;;  %v2867_v17 = vpop.f32.mrb[1].mxu1 }
 0x32b   :  { %v13543_v56 = vadd.f32 %v2867_v17, %v15904_v7  ;;  %v2869_v0 = vpop.f32.mrb[2].mxu1  ;;  %v7402_v17 = vor.u32 %v7401_v33, %v7398_v19  ;;  %v15932_v19 = vsel %vm15127_vm3, %v12974_v48, %v5312_v21 }
 0x32c   :  { %v13545_v40 = vadd.f32 %v2869_v0, %v15901_v13  ;;  %v13542_v47 = vadd.f32 %v13541_v5, %v15816_v52  ;;  %v2871_v55 = vpop.f32.mrb[3].mxu1  ;;  %v15920_v0 = vld [vmem:[#allocation4 + $0x120] sm:$0xee]  ;;  %v4808_v5 = vshll.u32 %v4544_v11, 16  ;;  %20303 = vst [vmem:[#allocation36_spill] sm:$0xff] %v15932_v19 }
 0x32d   :  { %v13547_v25 = vadd.f32 %v2871_v55, %v15904_v7  ;;  %v13544_v36 = vadd.f32 %v13543_v56, %v15818_v45  ;;  %v4801_v45 = vrot.slane %v4799_v23, 4  ;;  %v15946_v55 = vrot.slane %v7405_v4, 5  ;;  %v3455_v11 = vld [vmem:[#allocation3 + $0xc0] sm:$0xff] }
 0x32e   :  { %v3057_v63 = vmax.f32 %v13542_v47, 0.0  ;;  %v13546_v24 = vadd.f32 %v13545_v40, %v15820_v20  ;;  %12889 = vmatmul.mubr.msk.bf16.gmra.mrb[44].mxu1 %vm682_vm4, %v15696_v15  ;;  %v15944_v47 = vrot.slane %v7402_v17, 4 }
 0x32f   :  { %v3058_v52 = vmax.f32 %v13544_v36, 0.0  ;;  %v13548_v35 = vadd.f32 %v13547_v25, %v15822_v46  ;;  %3877 = vmatprep.mubr.bf16.mxu1 %v20296_v50  ;;  %v3341_v25 = vld [vmem:[#allocation4 + $0x40] sm:$0xff] }
 0x330   :  { %v3059_v20 = vmax.f32 %v13546_v24, 0.0 }
 0x331   :  { %v13389_v15 = vpack.c.bf16 %v3058_v52, %v3057_v63  ;;  %v3060_v33 = vmax.f32 %v13548_v35, 0.0  ;;  %v2875_v56 = vpop.f32.mrb[4].mxu1  ;;  %v4805_v63 = vor.u32 %v4804_v29, %v4801_v45  ;;  %v15958_v52 = vrot.slane %v4808_v5, 5  ;;  %v3338_v29 = vld [vmem:[#allocation4 + $0x30] sm:$0x11] }
 0x332   :  { %v13549_v54 = vadd.f32 %v2875_v56, %v15901_v13  ;;  %v2877_v40 = vpop.f32.mrb[5].mxu1 }
 0x333   :  { %v3170_v16 = vshrl.u32 %v13389_v15, 16  ;;  %v13390_v36 = vpack.c.bf16 %v3060_v33, %v3059_v20  ;;  %v13551_v48 = vadd.f32 %v2877_v40, %v15904_v7  ;;  %v2879_v21 = vpop.f32.mrb[6].mxu1  ;;  %20308 = vst [vmem:[#allocation37_spill] sm:$0xff] %v15958_v52  ;;  %v3173_v46 = vshll.u32 %v13389_v15, 16  ;;  %v15962_v20 = vld [vmem:[#allocation4 + $0x150] sm:$0x11] }
 0x334   :  { %v13553_v24 = vadd.f32 %v2879_v21, %v15901_v13  ;;  %v13550_v17 = vadd.f32 %v13549_v54, %v15826_v27  ;;  %v2881_v4 = vpop.f32.mrb[7].mxu1  ;;  %v3335_v27 = vld [vmem:[#allocation4 + $0x20] sm:$0xff]  ;;  %v15975_v40 = vpop.f32.mrb[26].mxu0 }
 0x335   :  { %v3172_v56 = vrot.slane %v3170_v16, 7  ;;  %v3178_v3 = vshrl.u32 %v13390_v36, 16  ;;  %v13555_v39 = vadd.f32 %v2881_v4, %v15904_v7  ;;  %v3181_v5 = vshll.u32 %v13390_v36, 16  ;;  %20311 = vst [vmem:[#allocation38_spill] sm:$0xff] %v15975_v40  ;;  %v15979_v35 = vpop.f32.mrb[27].mxu0 }
 0x336   :  { %v3061_v33 = vmax.f32 %v13550_v17, 0.0  ;;  %v13552_v54 = vadd.f32 %v13551_v48, %v15828_v6  ;;  %v13554_v15 = vadd.f32 %v13553_v24, %v15830_v41  ;;  %12890 = vmatmul.mubr.msk.bf16.gmra.mrb[48].mxu1 %vm682_vm4, %v3455_v11  ;;  %20312 = vst [vmem:[#allocation39_spill] sm:$0xff] %v15979_v35  ;;  %v3344_v36 = vld [vmem:[#allocation4 + $0x50] sm:$0x11]  ;;  %v15981_v6 = vrot.slane %v4805_v63, 4 }
 0x337   :  { %v3175_v16 = vor.u32 %v3173_v46, %v3172_v56  ;;  %v3176_v23 = vrot.slane %v3172_v56, 4  ;;  %v3180_v21 = vrot.slane %v3178_v3, 7  ;;  %v13556_v4 = vadd.f32 %v13555_v39, %v15832_v14  ;;  %3887 = vmatprep.mubr.bf16.mxu1 %v20296_v50 }
 0x338   :  { %v3062_v17 = vmax.f32 %v13552_v54, 0.0  ;;  %v3063_v32 = vmax.f32 %v13554_v15, 0.0  ;;  %20313 = vst [vmem:[#allocation40_spill] sm:$0xff] %v15981_v6 }
 0x339   :  { %v15986_v48 = vsel %vm15968_vm9, %v3175_v16, %v3335_v27  ;;  %v3339_v46 = vsel %vm14717_vm10, %v3176_v23, %v3338_v29  ;;  %v3183_v3 = vor.u32 %v3181_v5, %v3180_v21  ;;  %v3184_v14 = vrot.slane %v3180_v21, 4  ;;  %v2885_v39 = vpop.f32.mrb[8].mxu1  ;;  %v3460_v23 = vld [vmem:[#allocation3 + $0xe8] sm:$0xff] }
 0x33a   :  { %20314 = vst [vmem:[#allocation41_spill] sm:$0xff] %v15986_v48  ;;  %3337 = vst [vmem:[#allocation4 + $0x20] sm:$0xff] %v15986_v48  ;;  %v4603_v24 = vshrl.u32 %v15986_v48, 16  ;;  %v4606_v56 = vshll.u32 %v15986_v48, 16  ;;  %v2887_v27 = vpop.f32.mrb[9].mxu1  ;;  %v13391_v54 = vpack.c.bf16 %v3062_v17, %v3061_v33  ;;  %v3064_v15 = vmax.f32 %v13556_v4, 0.0 }
 0x33b   :  { %3340 = vst [vmem:[#allocation4 + $0x30] sm:$0x11] %v3339_v46  ;;  %v15999_v29 = vsel %vm15968_vm9, %v3183_v3, %v3341_v25  ;;  %v3345_v5 = vsel %vm14717_vm10, %v3184_v14, %v3344_v36  ;;  %v2889_v16 = vpop.f32.mrb[10].mxu1  ;;  %v13559_v51 = vadd.f32 %v2887_v27, %v15904_v7 }
 0x33c   :  { %20315 = vst [vmem:[#allocation42_spill] sm:$0xff] %v15999_v29  ;;  %v4605_v21 = vrot.slane %v4603_v24, 4  ;;  %v4608_v46 = vrot.slane %v4606_v56, 5  ;;  %3343 = vst [vmem:[#allocation4 + $0x40] sm:$0xff] %v15999_v29  ;;  %v4631_v11 = vshrl.u32 %v15999_v29, 16  ;;  %v4634_v63 = vshll.u32 %v15999_v29, 16 }
 0x33d   :  { %3346 = vst [vmem:[#allocation4 + $0x50] sm:$0x11] %v3345_v5  ;;  %v16006_v41 = vpop.f32.mrb[11].mxu1  ;;  %v3186_v4 = vshrl.u32 %v13391_v54, 16  ;;  %v3189_v36 = vshll.u32 %v13391_v54, 16  ;;  %v16012_v24 = vpack.c.bf16 %v3064_v15, %v3063_v32  ;;  %v13557_v5 = vadd.f32 %v2885_v39, %v15901_v13  ;;  %v3347_v54 = vld [vmem:[#allocation4 + $0x60] sm:$0xff] }
 0x33e   :  { %v4609_v17 = vor.u32 %v4608_v46, %v4605_v21  ;;  %v4633_v3 = vrot.slane %v4631_v11, 4  ;;  %v4636_v14 = vrot.slane %v4634_v63, 5  ;;  %12891 = vmatmul.mubr.msk.bf16.gmra.mrb[52].mxu1 %vm682_vm4, %v3460_v23  ;;  %v13561_v25 = vadd.f32 %v2889_v16, %v15901_v13  ;;  %v3465_v46 = vld [vmem:[#allocation3 + $0x110] sm:$0xff] }
 0x33f   :  { %v16015_v56 = vrot.slane %v3186_v4, 7  ;;  %3897 = vmatprep.mubr.bf16.mxu1 %v20296_v50  ;;  %v16027_v15 = vsel %vm15311_vm7, %v15926_v37, %v15928_v26  ;;  %v16031_v23 = vadd.f32 %v13557_v5, %v15836_v10  ;;  %v16034_v21 = vadd.f32 %v13559_v51, %v15838_v62 }
 0x340   :  { %v4610_v33 = vrot.slane %v4609_v17, 4  ;;  %v4637_v48 = vor.u32 %v4636_v14, %v4633_v3  ;;  %20316 = vst [vmem:[#allocation43_spill] sm:$0xff] %v16027_v15  ;;  %v16044_v10 = vadd.f32 %v13561_v25, %v15840_v49  ;;  %v13563_v19 = vadd.f32 %v16006_v41, %v15904_v7 }
 0x341   :  { %v5186_v39 = vld [vmem:[#allocation4 + $0x20] sm:$0xee]  ;;  %v3191_v16 = vor.u32 %v3189_v36, %v16015_v56  ;;  %v3192_v44 = vrot.slane %v16015_v56, 4 }
 0x342   :  { %v4516_v63 = vld [vmem:[#allocation4 + $0x30] sm:$0x11]  ;;  %v12976_v17 = vrot.slane %v5186_v39, 9  ;;  %v16036_v32 = vrot.slane %v4637_v48, 4  ;;  %v6494_v37 = vld [vmem:[#allocation4 + $0x20] sm:$0xee] }
 0x343   :  { %v5188_v27 = vld [vmem:[#allocation4 + $0x30] sm:$0x11]  ;;  %v4612_v4 = vshll.u32 %v4516_v63, 16  ;;  %v16041_v36 = vsel %vm15968_vm9, %v3191_v16, %v3347_v54  ;;  %v13102_v5 = vrot.slane %v6494_v37, 9  ;;  %v5190_v16 = vld [vmem:[#allocation4 + $0x40] sm:$0xee] }
 0x344   :  { %v5320_v3 = vrot.slane %v5188_v27, 5  ;;  %v5824_v14 = vld [vmem:[#allocation4 + $0x30] sm:$0x11]  ;;  %20317 = vst [vmem:[#allocation44_spill] sm:$0xff] %v16041_v36  ;;  %3349 = vst [vmem:[#allocation4 + $0x60] sm:$0xff] %v16041_v36  ;;  %v16051_v27 = vpop.f32.mrb[12].mxu1 }
 0x345   :  { %v5896_v11 = vshll.u32 %v5824_v14, 16  ;;  %v6496_v26 = vld [vmem:[#allocation4 + $0x30] sm:$0x11]  ;;  %v4614_v62 = vrot.slane %v4612_v4, 5  ;;  %v7807_v35 = vld [vmem:[#allocation4 + $0x40] sm:$0xee] }
 0x346   :  { %v16048_v51 = vsel %vm15127_vm3, %v12976_v17, %v5320_v3  ;;  %v6624_v48 = vrot.slane %v6496_v26, 5  ;;  %v4520_v63 = vld [vmem:[#allocation4 + $0x50] sm:$0x11]  ;;  %v12978_v3 = vrot.slane %v5190_v16, 9  ;;  %v6498_v26 = vld [vmem:[#allocation4 + $0x40] sm:$0xee]  ;;  %12892 = vmatmul.mubr.msk.bf16.gmra.mrb[56].mxu1 %vm682_vm4, %v3465_v46 }
 0x347   :  { %20318 = vst [vmem:[#allocation45_spill] sm:$0xff] %v16048_v51  ;;  %v3350_v39 = vld [vmem:[#allocation4 + $0x70] sm:$0x11]  ;;  %v5898_v25 = vrot.slane %v5896_v11, 5  ;;  %v4640_v54 = vshll.u32 %v4520_v63, 16  ;;  %v16059_v17 = vsel %vm15311_vm7, %v4610_v33, %v4614_v62  ;;  %v16068_v62 = vpop.f32.mrb[13].mxu1  ;;  %3907 = vmatprep.mubr.bf16.mxu1 %v20296_v50 }
 0x348   :  { %v5192_v4 = vld [vmem:[#allocation4 + $0x50] sm:$0x11]  ;;  %20319 = vst [vmem:[#allocation46_spill] sm:$0xff] %v16059_v17  ;;  %v16073_v16 = vsel %vm15127_vm3, %v13102_v5, %v6624_v48  ;;  %v2899_v40 = vpop.f32.mrb[14].mxu1  ;;  %v13230_v41 = vrot.slane %v7807_v35, 9  ;;  %v3351_v15 = vsel %vm14717_vm10, %v3192_v44, %v3350_v39 }
 0x349   :  { %v5328_v14 = vrot.slane %v5192_v4, 5  ;;  %v5828_v37 = vld [vmem:[#allocation4 + $0x50] sm:$0x11]  ;;  %v4642_v11 = vrot.slane %v4640_v54, 5  ;;  %20320 = vst [vmem:[#allocation47_spill] sm:$0xff] %v16073_v16  ;;  %v13104_v4 = vrot.slane %v6498_v26, 9  ;;  %v16077_v54 = vsel %vm15311_vm7, %v4610_v33, %v5898_v25 }
 0x34a   :  { %v6500_v63 = vld [vmem:[#allocation4 + $0x50] sm:$0x11]  ;;  %v5924_v46 = vshll.u32 %v5828_v37, 16  ;;  %20321 = vst [vmem:[#allocation48_spill] sm:$0xff] %v16077_v54  ;;  %v2901_v50 = vpop.f32.mrb[15].mxu1  ;;  %v16087_v37 = vcombine.low %v15999_v29, %v16041_v36  ;;  %v3470_v26 = vld [vmem:[#allocation3 + $0x138] sm:$0xff] }
 0x34b   :  { %v7137_v51 = vld [vmem:[#allocation4 + $0x50] sm:$0x11]  ;;  %v6632_v56 = vrot.slane %v6500_v63, 5  ;;  %3352 = vst [vmem:[#allocation4 + $0x70] sm:$0x11] %v3351_v15  ;;  %v16089_v33 = vpop.f32.mrb[16].mxu1  ;;  %v16095_v35 = vsel %vm15127_vm3, %v12978_v3, %v5328_v14  ;;  %v16103_v15 = vcombine.high %v15999_v29, %v16041_v36  ;;  %v16112_v3 = vsel %vm15311_vm7, %v16036_v32, %v4642_v11 }
 0x34c   :  { %v7209_v49 = vshll.u32 %v7137_v51, 16  ;;  %v7809_v17 = vld [vmem:[#allocation4 + $0x50] sm:$0x11]  ;;  %v5926_v38 = vrot.slane %v5924_v46, 5  ;;  %20323 = vst [vmem:[#allocation50_spill] sm:$0xff] %v16087_v37  ;;  %v16091_v51 = vpop.f32.mrb[28].mxu0 }
 0x34d   :  { %v16083_v5 = vsel %vm15127_vm3, %v13104_v4, %v6632_v56  ;;  %v7937_v48 = vrot.slane %v7809_v17, 5  ;;  %20324 = vst [vmem:[#allocation51_spill] sm:$0xff] %v16091_v51  ;;  %20325 = vst [vmem:[#allocation52_spill] sm:$0xff] %v16095_v35  ;;  %v5194_v56 = vld [vmem:[#allocation4 + $0x60] sm:$0xee]  ;;  %v16107_v17 = vpop.f32.mrb[17].mxu1 }
 0x34e   :  { %20322 = vst [vmem:[#allocation49_spill] sm:$0xff] %v16083_v5  ;;  %20326 = vst [vmem:[#allocation53_spill] sm:$0xff] %v16103_v15  ;;  %v16105_v25 = vld [vmem:[#allocation4 + $0x60] sm:$0xee]  ;;  %v16117_v14 = vsel %vm15311_vm7, %v16036_v32, %v5926_v38  ;;  %v4659_v63 = vshrl.u32 %v16041_v36, 16  ;;  %v4662_v46 = vshll.u32 %v16041_v36, 16  ;;  %12893 = vmatmul.mubr.msk.bf16.gmra.mrb[60].mxu1 %vm682_vm4, %v3470_v26  ;;  %v13565_v26 = vadd.f32 %v16051_v27, %v15901_v13 }
 0x34f   :  { %20327 = vst [vmem:[#allocation54_spill] sm:$0xff] %v16112_v3  ;;  %20328 = vst [vmem:[#allocation55_spill] sm:$0xff] %v16117_v14  ;;  %v16121_v4 = vld [vmem:[#allocation4 + $0x60] sm:$0xee]  ;;  %v16123_v44 = vpop.f32.mrb[18].mxu1  ;;  %v16125_v39 = vpop.f32.mrb[29].mxu0  ;;  %v16133_v38 = vsel %vm15127_vm3, %v13230_v41, %v7937_v48 }
 0x350   :  { %20329 = vst [vmem:[#allocation56_spill] sm:$0xff] %v16125_v39  ;;  %v7211_v16 = vrot.slane %v7209_v49, 5  ;;  %20330 = vst [vmem:[#allocation57_spill] sm:$0xff] %v16133_v38  ;;  %v16135_v29 = vpop.f32.mrb[19].mxu1  ;;  %v16137_v37 = vpop.f32.mrb[30].mxu0  ;;  %v4661_v15 = vrot.slane %v4659_v63, 4 }
 0x351   :  { %20331 = vst [vmem:[#allocation58_spill] sm:$0xff] %v16137_v37  ;;  %v4664_v51 = vrot.slane %v4662_v46, 5  ;;  %v12980_v8 = vrot.slane %v5194_v56, 9  ;;  %v16141_v5 = vpop.f32.mrb[31].mxu0  ;;  %v13232_v11 = vrot.slane %v16121_v4, 9  ;;  %v20333_v49 = vshrl.u32 %v16012_v24, 16 }
 0x352   :  { %20332 = vst [vmem:[#allocation59_spill] sm:$0xff] %v16141_v5  ;;  %v3065_v41 = vmax.f32 %v16031_v23, 0.0  ;;  %v3066_v48 = vmax.f32 %v16034_v21, 0.0  ;;  %v3353_v37 = vld [vmem:[#allocation4 + $0x80] sm:$0xff]  ;;  %v16150_v56 = vadd.f32 %v13563_v19, %v15842_v42  ;;  %v16157_v46 = vsel %vm15311_vm7, %v16036_v32, %v7211_v16  ;;  %v4524_v4 = vld [vmem:[#allocation4 + $0x70] sm:$0x11] }
 0x353   :  { %v3196_v14 = vrot.slane %v20333_v49, 7  ;;  %v4665_v54 = vor.u32 %v4664_v51, %v4661_v15  ;;  %20334 = vst [vmem:[#allocation60_spill] sm:$0xff] %v16157_v46  ;;  %v5196_v49 = vld [vmem:[#allocation4 + $0x70] sm:$0x11]  ;;  %v20335_v21 = vshll.u32 %v16012_v24, 16  ;;  %v13567_v42 = vadd.f32 %v16068_v62, %v15904_v7 }
 0x354   :  { %v5832_v23 = vld [vmem:[#allocation4 + $0x70] sm:$0x11]  ;;  %v16161_v39 = vpack.c.bf16 %v3066_v48, %v3065_v41  ;;  %v4668_v19 = vshll.u32 %v4524_v4, 16  ;;  %v5336_v63 = vrot.slane %v5196_v49, 5  ;;  %v13569_v32 = vadd.f32 %v2899_v40, %v15901_v13  ;;  %v16181_v40 = vpop.f32.mrb[20].mxu1 }
 0x355   :  { %v3199_v51 = vor.u32 %v20335_v21, %v3196_v14  ;;  %v3356_v15 = vld [vmem:[#allocation4 + $0x90] sm:$0x11]  ;;  %v5952_v27 = vshll.u32 %v5832_v23, 16  ;;  %v3200_v52 = vrot.slane %v3196_v14, 4  ;;  %v16173_v41 = vadd.f32 %v13565_v26, %v15846_v31 }
 0x356   :  { %v16165_v5 = vld [vmem:[#allocation4 + $0x70] sm:$0x11]  ;;  %v13571_v48 = vadd.f32 %v2901_v50, %v15904_v7  ;;  %v4666_v62 = vrot.slane %v4665_v54, 4  ;;  %v4670_v4 = vrot.slane %v4668_v19, 5  ;;  %v16178_v49 = vsel %vm15127_vm3, %v12980_v8, %v5336_v63  ;;  %v16188_v54 = vpop.f32.mrb[21].mxu1 }
 0x357   :  { %v7141_v16 = vld [vmem:[#allocation4 + $0x70] sm:$0x11]  ;;  %v16170_v24 = vsel %vm15968_vm9, %v3199_v51, %v3353_v37  ;;  %20337 = vst [vmem:[#allocation62_spill] sm:$0xff] %v16178_v49  ;;  %v6640_v14 = vrot.slane %v16165_v5, 5  ;;  %v5954_v63 = vrot.slane %v5952_v27, 5  ;;  %v3357_v21 = vsel %vm14717_vm10, %v3200_v52, %v3356_v15  ;;  %v16196_v51 = vpop.f32.mrb[22].mxu1 }
 0x358   :  { %v7813_v6 = vld [vmem:[#allocation4 + $0x70] sm:$0x11]  ;;  %20336 = vst [vmem:[#allocation61_spill] sm:$0xff] %v16170_v24  ;;  %v7237_v23 = vshll.u32 %v7141_v16, 16  ;;  %3355 = vst [vmem:[#allocation4 + $0x80] sm:$0xff] %v16170_v24  ;;  %v16192_v8 = vsel %vm15311_vm7, %v4666_v62, %v4670_v4  ;;  %v4687_v16 = vshrl.u32 %v16170_v24, 16 }
 0x359   :  { %v7945_v50 = vrot.slane %v7813_v6, 5  ;;  %20338 = vst [vmem:[#allocation63_spill] sm:$0xff] %v16192_v8  ;;  %3358 = vst [vmem:[#allocation4 + $0x90] sm:$0x11] %v3357_v21  ;;  %v16207_v27 = vpop.f32.mrb[23].mxu1  ;;  %v3202_v4 = vshrl.u32 %v16161_v39, 16 }
 0x35a   :  { %v7239_v26 = vrot.slane %v7237_v23, 5  ;;  %v4690_v23 = vshll.u32 %v16170_v24, 16  ;;  %v4689_v21 = vrot.slane %v4687_v16, 4  ;;  %v3205_v19 = vshll.u32 %v16161_v39, 16 }
 0x35b   :  { %v16204_v6 = vsel %vm15127_vm3, %v13232_v11, %v7945_v50  ;;  %v13568_v16 = vadd.f32 %v13567_v42, %v15848_v9  ;;  %v16236_v50 = vadd.f32 %v13569_v32, %v15851_v1  ;;  %v20341_v37 = vrot.slane %v15924_v53, 5  ;;  %v3359_v32 = vld [vmem:[#allocation4 + $0xa0] sm:$0xff] }
 0x35c   :  { %20339 = vst [vmem:[#allocation64_spill] sm:$0xff] %v16204_v6  ;;  %v16211_v52 = vsel %vm15311_vm7, %v4666_v62, %v7239_v26  ;;  %v16224_v26 = vpop.f32.mrb[24].mxu1  ;;  %v4692_v31 = vrot.slane %v4690_v23, 5  ;;  %v16239_v23 = vadd.f32 %v13571_v48, %v15854_v22  ;;  %v20342_v15 = vrot.slane %v15920_v0, 9 }
 0x35d   :  { %20340 = vst [vmem:[#allocation65_spill] sm:$0xff] %v16211_v52  ;;  %v16230_v5 = vpop.f32.mrb[25].mxu1  ;;  %v13573_v9 = vadd.f32 %v16089_v33, %v15901_v13  ;;  %v3204_v1 = vrot.slane %v3202_v4, 7  ;;  %v3068_v22 = vmax.f32 %v16150_v56, 0.0  ;;  %v3069_v53 = vmax.f32 %v16173_v41, 0.0 }
 0x35e   :  { %v16247_v39 = vsel %vm15127_vm3, %v20342_v15, %v20341_v37  ;;  %v4693_v52 = vor.u32 %v4692_v31, %v4689_v21  ;;  %v16251_v42 = vpop.f32.mrb[26].mxu1  ;;  %v3070_v48 = vmax.f32 %v13568_v16, 0.0  ;;  %v16259_v37 = vsel %vm15311_vm7, %v4666_v62, %v5954_v63 }
 0x35f   :  { %v5198_v11 = vld [vmem:[#allocation4 + $0x80] sm:$0xee]  ;;  %20343 = vst [vmem:[#allocation66_spill] sm:$0xff] %v16247_v39  ;;  %v16255_v0 = vpop.f32.mrb[27].mxu1  ;;  %20345 = vst [vmem:[#allocation68_spill] sm:$0xff] %v16259_v37  ;;  %v20346_v31 = vrot.slane %v16105_v25, 9  ;;  %v3207_v35 = vor.u32 %v3205_v19, %v3204_v1  ;;  %v13575_v19 = vadd.f32 %v16107_v17, %v15904_v7 }
 0x360   :  { %v6506_v6 = vld [vmem:[#allocation4 + $0x80] sm:$0xee]  ;;  %v12982_v46 = vrot.slane %v5198_v11, 9  ;;  %20344 = vst [vmem:[#allocation67_spill] sm:$0xff] %v16255_v0  ;;  %v16267_v15 = vrot.slane %v4693_v52, 4  ;;  %v20348_v62 = vmax.f32 %v16044_v10, 0.0  ;;  %v16275_v52 = vadd.f32 %v13573_v9, %v15860_v12 }
 0x361   :  { %v16232_v38 = vld [vmem:[#allocation4 + $0x80] sm:$0xee]  ;;  %v13108_v49 = vrot.slane %v6506_v6, 9  ;;  %v16265_v33 = vsel %vm15127_vm3, %v20346_v31, %v6640_v14  ;;  %v4528_v6 = vld [vmem:[#allocation4 + $0x90] sm:$0x11]  ;;  %v16272_v14 = vpack.c.bf16 %v3070_v48, %v3069_v53  ;;  %v3208_v53 = vrot.slane %v3204_v1, 4 }
 0x362   :  { %20347 = vst [vmem:[#allocation69_spill] sm:$0xff] %v16265_v33  ;;  %v5200_v4 = vld [vmem:[#allocation4 + $0x90] sm:$0x11]  ;;  %v13234_v56 = vrot.slane %v16232_v38, 9  ;;  %v4696_v41 = vshll.u32 %v4528_v6, 16  ;;  %v13394_v63 = vpack.c.bf16 %v3068_v22, %v20348_v62  ;;  %v3071_v6 = vmax.f32 %v16236_v50, 0.0 }
 0x363   :  { %v5344_v11 = vrot.slane %v5200_v4, 5  ;;  %v5836_v21 = vld [vmem:[#allocation4 + $0x90] sm:$0x11]  ;;  %v16280_v4 = vpop.f32.mrb[28].mxu1  ;;  %v16288_v12 = vsel %vm15968_vm9, %v3207_v35, %v3359_v32 }
 0x364   :  { %v6508_v16 = vld [vmem:[#allocation4 + $0x90] sm:$0x11]  ;;  %v5980_v8 = vshll.u32 %v5836_v21, 16  ;;  %v4698_v31 = vrot.slane %v4696_v41, 5  ;;  %20350 = vst [vmem:[#allocation71_spill] sm:$0xff] %v16288_v12  ;;  %v16290_v9 = vpop.f32.mrb[29].mxu1 }
 0x365   :  { %v6648_v25 = vrot.slane %v6508_v16, 5  ;;  %v7145_v3 = vld [vmem:[#allocation4 + $0x90] sm:$0x11]  ;;  %3361 = vst [vmem:[#allocation4 + $0xa0] sm:$0xff] %v16288_v12  ;;  %v16303_v35 = vsel %vm15127_vm3, %v12982_v46, %v5344_v11  ;;  %v16329_v11 = vcombine.high %v16170_v24, %v16288_v12  ;;  %v4715_v16 = vshrl.u32 %v16288_v12, 16  ;;  %v3365_v46 = vld [vmem:[#allocation4 + $0xc0] sm:$0xff] }
 0x366   :  { %v7817_v36 = vld [vmem:[#allocation4 + $0x90] sm:$0x11]  ;;  %v7265_v0 = vshll.u32 %v7145_v3, 16  ;;  %v5982_v10 = vrot.slane %v5980_v8, 5  ;;  %v16299_v8 = vpop.f32.mrb[30].mxu1  ;;  %20351 = vst [vmem:[#allocation72_spill] sm:$0xff] %v16303_v35 }
 0x367   :  { %v3362_v38 = vld [vmem:[#allocation4 + $0xb0] sm:$0x11]  ;;  %v16284_v22 = vsel %vm15127_vm3, %v13108_v49, %v6648_v25  ;;  %v7953_v50 = vrot.slane %v7817_v36, 5  ;;  %v13577_v49 = vadd.f32 %v16123_v44, %v15901_v13  ;;  %v16314_v36 = vcombine.low %v16170_v24, %v16288_v12  ;;  %v16316_v48 = vpop.f32.mrb[31].mxu1  ;;  %20355 = vst [vmem:[#allocation76_spill] sm:$0xff] %v16329_v11 }
 0x368   :  { %20349 = vst [vmem:[#allocation70_spill] sm:$0xff] %v16284_v22  ;;  %v16308_v1 = vsel %vm15311_vm7, %v16267_v15, %v5982_v10  ;;  %v3363_v32 = vsel %vm14717_vm10, %v3208_v53, %v3362_v38  ;;  %v16321_v44 = vsel %vm15311_vm7, %v16267_v15, %v4698_v31  ;;  %v7267_v21 = vrot.slane %v7265_v0, 5  ;;  %v3368_v41 = vld [vmem:[#allocation4 + $0xd0] sm:$0x11] }
 0x369   :  { %20352 = vst [vmem:[#allocation73_spill] sm:$0xff] %v16308_v1  ;;  %20353 = vst [vmem:[#allocation74_spill] sm:$0xff] %v16314_v36  ;;  %v4718_v62 = vshll.u32 %v16288_v12, 16  ;;  %v3210_v25 = vshrl.u32 %v13394_v63, 16  ;;  %v16335_v31 = vsel %vm15127_vm3, %v13234_v56, %v7953_v50  ;;  %v3213_v38 = vshll.u32 %v13394_v63, 16 }
 0x36a   :  { %20354 = vst [vmem:[#allocation75_spill] sm:$0xff] %v16321_v44  ;;  %3364 = vst [vmem:[#allocation4 + $0xb0] sm:$0x11] %v3363_v32  ;;  %v3218_v10 = vshrl.u32 %v16272_v14, 16  ;;  %v3072_v53 = vmax.f32 %v16239_v23, 0.0  ;;  %v4717_v32 = vrot.slane %v4715_v16, 4  ;;  %v13579_v0 = vadd.f32 %v16135_v29, %v15904_v7 }
 0x36b   :  { %20356 = vst [vmem:[#allocation77_spill] sm:$0xff] %v16335_v31  ;;  %v4720_v3 = vrot.slane %v4718_v62, 5  ;;  %v3212_v17 = vrot.slane %v3210_v25, 7  ;;  %v16346_v56 = vadd.f32 %v13575_v19, %v15862_v59  ;;  %v16349_v63 = vadd.f32 %v13577_v49, %v15866_v34  ;;  %v4229_v36 = vld [vmem:[#allocation4 + $0xf8] sm:$0x11] }
 0x36c   :  { %v16341_v22 = vrot.slane %v3218_v10, 7  ;;  %v16343_v33 = vpack.c.bf16 %v3072_v53, %v3071_v6  ;;  %v5202_v23 = vld [vmem:[#allocation4 + $0xa0] sm:$0xee]  ;;  %v3221_v25 = vshll.u32 %v16272_v14, 16  ;;  %v16353_v29 = vadd.f32 %v13579_v0, %v15868_v28 }
 0x36d   :  { %v4721_v50 = vor.u32 %v4720_v3, %v4717_v32  ;;  %v7819_v16 = vld [vmem:[#allocation4 + $0xa0] sm:$0xee]  ;;  %v3215_v62 = vor.u32 %v3213_v38, %v3212_v17  ;;  %v16358_v6 = vsel %vm15311_vm7, %v16267_v15, %v7267_v21  ;;  %v12984_v10 = vrot.slane %v5202_v23, 9 }
 0x36e   :  { %20357 = vst [vmem:[#allocation78_spill] sm:$0xff] %v16358_v6  ;;  %v6510_v59 = vld [vmem:[#allocation4 + $0xa0] sm:$0xee]  ;;  %v3216_v19 = vrot.slane %v3212_v17, 4  ;;  %v13236_v32 = vrot.slane %v7819_v16, 9  ;;  %v3223_v28 = vor.u32 %v3221_v25, %v16341_v22  ;;  %v13581_v38 = vadd.f32 %v16181_v40, %v15901_v13 }
 0x36f   :  { %v3371_v53 = vld [vmem:[#allocation4 + $0xe0] sm:$0xff]  ;;  %v16363_v14 = vsel %vm15968_vm9, %v3215_v62, %v3365_v46  ;;  %v16373_v16 = vrot.slane %v4721_v50, 4  ;;  %v13110_v46 = vrot.slane %v6510_v59, 9 }
 0x370   :  { %20358 = vst [vmem:[#allocation79_spill] sm:$0xff] %v16363_v14  ;;  %3367 = vst [vmem:[#allocation4 + $0xc0] sm:$0xff] %v16363_v14  ;;  %v3369_v17 = vsel %vm14717_vm10, %v3216_v19, %v3368_v41  ;;  %v16379_v25 = vsel %vm15968_vm9, %v3223_v28, %v3371_v53  ;;  %v3224_v53 = vrot.slane %v16341_v22, 4 }
 0x371   :  { %v4532_v3 = vld [vmem:[#allocation4 + $0xb0] sm:$0x11]  ;;  %3370 = vst [vmem:[#allocation4 + $0xd0] sm:$0x11] %v3369_v17  ;;  %20359 = vst [vmem:[#allocation80_spill] sm:$0xff] %v16379_v25  ;;  %v16427_v17 = vcombine.high %v16363_v14, %v16379_v25 }
 0x372   :  { %v5204_v49 = vld [vmem:[#allocation4 + $0xb0] sm:$0x11]  ;;  %v4724_v15 = vshll.u32 %v4532_v3, 16  ;;  %3373 = vst [vmem:[#allocation4 + $0xe0] sm:$0xff] %v16379_v25 }
 0x373   :  { %v5352_v21 = vrot.slane %v5204_v49, 5  ;;  %v5840_v0 = vld [vmem:[#allocation4 + $0xb0] sm:$0x11]  ;;  %20365 = vst [vmem:[#allocation86_spill] sm:$0xff] %v16427_v17 }
 0x374   :  { %v7149_v62 = vld [vmem:[#allocation4 + $0xb0] sm:$0x11]  ;;  %v4726_v3 = vrot.slane %v4724_v15, 5  ;;  %v6008_v23 = vshll.u32 %v5840_v0, 16  ;;  %v4743_v15 = vshrl.u32 %v16363_v14, 16 }
 0x375   :  { %v7821_v34 = vld [vmem:[#allocation4 + $0xb0] sm:$0x11]  ;;  %v16383_v41 = vsel %vm15127_vm3, %v12984_v10, %v5352_v21  ;;  %v7293_v49 = vshll.u32 %v7149_v62, 16 }
 0x376   :  { %20360 = vst [vmem:[#allocation81_spill] sm:$0xff] %v16383_v41  ;;  %v6512_v19 = vld [vmem:[#allocation4 + $0xb0] sm:$0x11]  ;;  %v7961_v50 = vrot.slane %v7821_v34, 5  ;;  %v16394_v28 = vsel %vm15311_vm7, %v16373_v16, %v4726_v3 }
 0x377   :  { %20361 = vst [vmem:[#allocation82_spill] sm:$0xff] %v16394_v28  ;;  %v7295_v10 = vrot.slane %v7293_v49, 5  ;;  %v3374_v21 = vld [vmem:[#allocation4 + $0xf0] sm:$0x11]  ;;  %v6656_v22 = vrot.slane %v6512_v19, 5  ;;  %v4745_v49 = vrot.slane %v4743_v15, 4  ;;  %v16433_v19 = vsel %vm15311_vm7, %v15944_v47, %v15946_v55 }
 0x378   :  { %v16398_v34 = vsel %vm15127_vm3, %v13236_v32, %v7961_v50  ;;  %v4746_v50 = vshll.u32 %v16363_v14, 16  ;;  %v5206_v62 = vld [vmem:[#allocation4 + $0xc0] sm:$0xee]  ;;  %v3375_v40 = vsel %vm14717_vm10, %v3224_v53, %v3374_v21  ;;  %v6010_v32 = vrot.slane %v6008_v23, 5  ;;  %v4536_v15 = vld [vmem:[#allocation4 + $0xd0] sm:$0x11] }
 0x379   :  { %20362 = vst [vmem:[#allocation83_spill] sm:$0xff] %v16398_v34  ;;  %v16410_v3 = vsel %vm15311_vm7, %v16373_v16, %v7295_v10  ;;  %v6514_v0 = vld [vmem:[#allocation4 + $0xc0] sm:$0xee]  ;;  %v16423_v10 = vcombine.low %v16363_v14, %v16379_v25  ;;  %v5208_v31 = vld [vmem:[#allocation4 + $0xd0] sm:$0x11]  ;;  %20366 = vst [vmem:[#allocation87_spill] sm:$0xff] %v16433_v19  ;;  %v16437_v53 = vsel %vm15127_vm3, %v13110_v46, %v6656_v22 }
 0x37a   :  { %20363 = vst [vmem:[#allocation84_spill] sm:$0xff] %v16410_v3  ;;  %v7823_v59 = vld [vmem:[#allocation4 + $0xc0] sm:$0xee]  ;;  %v4748_v34 = vrot.slane %v4746_v50, 5  ;;  %3376 = vst [vmem:[#allocation4 + $0xf0] sm:$0x11] %v3375_v40  ;;  %v16440_v40 = vadd.f32 %v13581_v38, %v15872_v18  ;;  %v13583_v46 = vadd.f32 %v16188_v54, %v15904_v7  ;;  %v16456_v54 = vsel %vm15311_vm7, %v16373_v16, %v6010_v32 }
 0x37b   :  { %20364 = vst [vmem:[#allocation85_spill] sm:$0xff] %v16423_v10  ;;  %20367 = vst [vmem:[#allocation88_spill] sm:$0xff] %v16437_v53  ;;  %v4752_v21 = vshll.u32 %v4536_v15, 16  ;;  %v12986_v23 = vrot.slane %v5206_v62, 9  ;;  %v5844_v3 = vld [vmem:[#allocation4 + $0xd0] sm:$0x11]  ;;  %v13585_v16 = vadd.f32 %v16196_v51, %v15901_v13 }
 0x37c   :  { %v6516_v50 = vld [vmem:[#allocation4 + $0xd0] sm:$0x11]  ;;  %v4749_v6 = vor.u32 %v4748_v34, %v4745_v49  ;;  %v6036_v41 = vshll.u32 %v5844_v3, 16  ;;  %v13112_v35 = vrot.slane %v6514_v0, 9  ;;  %v5360_v44 = vrot.slane %v5208_v31, 5  ;;  %20369 = vst [vmem:[#allocation90_spill] sm:$0xff] %v16456_v54 }
 0x37d   :  { %v6664_v1 = vrot.slane %v6516_v50, 5  ;;  %v7153_v37 = vld [vmem:[#allocation4 + $0xd0] sm:$0x11]  ;;  %v4754_v28 = vrot.slane %v4752_v21, 5  ;;  %v13238_v18 = vrot.slane %v7823_v59, 9  ;;  %v3401_v53 = vld [vmem:[#allocation4 + $0x1c0] sm:$0xff] }
 0x37e   :  { %v7321_v47 = vshll.u32 %v7153_v37, 16  ;;  %v7825_v55 = vld [vmem:[#allocation4 + $0xd0] sm:$0x11]  ;;  %v4750_v22 = vrot.slane %v4749_v6, 4  ;;  %v6038_v15 = vrot.slane %v6036_v41, 5  ;;  %v4771_v37 = vshrl.u32 %v16379_v25, 16 }
 0x37f   :  { %v16446_v62 = vsel %vm15127_vm3, %v13112_v35, %v6664_v1  ;;  %v7969_v0 = vrot.slane %v7825_v55, 5  ;;  %v5210_v31 = vld [vmem:[#allocation4 + $0xe0] sm:$0xee]  ;;  %v4774_v6 = vshll.u32 %v16379_v25, 16  ;;  %v16477_v34 = vsel %vm15127_vm3, %v12986_v23, %v5360_v44 }
 0x380   :  { %20368 = vst [vmem:[#allocation89_spill] sm:$0xff] %v16446_v62  ;;  %v16460_v35 = vsel %vm15311_vm7, %v4750_v22, %v6038_v15  ;;  %v7323_v1 = vrot.slane %v7321_v47, 5  ;;  %v4773_v49 = vrot.slane %v4771_v37, 4  ;;  %v12988_v55 = vrot.slane %v5210_v31, 9  ;;  %20372 = vst [vmem:[#allocation93_spill] sm:$0xff] %v16477_v34 }
 0x381   :  { %20370 = vst [vmem:[#allocation91_spill] sm:$0xff] %v16460_v35  ;;  %v4540_v3 = vld [vmem:[#allocation4 + $0xf0] sm:$0x11]  ;;  %v4776_v32 = vrot.slane %v4774_v6, 5  ;;  %v16473_v47 = vsel %vm15311_vm7, %v4750_v22, %v4754_v28  ;;  %v16481_v37 = vsel %vm15127_vm3, %v13238_v18, %v7969_v0  ;;  %v16483_v41 = vld [vmem:[#allocation4 + $0xe0] sm:$0xee]  ;;  %v13584_v31 = vadd.f32 %v13583_v46, %v15874_v61 }
 0x382   :  { %v5212_v21 = vld [vmem:[#allocation4 + $0xf0] sm:$0x11]  ;;  %v4780_v50 = vshll.u32 %v4540_v3, 16  ;;  %20371 = vst [vmem:[#allocation92_spill] sm:$0xff] %v16473_v47  ;;  %20373 = vst [vmem:[#allocation94_spill] sm:$0xff] %v16481_v37  ;;  %v16488_v3 = vsel %vm15311_vm7, %v4750_v22, %v7323_v1  ;;  %v20379_v0 = vmax.f32 %v16275_v52, 0.0 }
 0x383   :  { %v5368_v15 = vrot.slane %v5212_v21, 5  ;;  %v16469_v38 = vld [vmem:[#allocation4 + $0xf0] sm:$0x11]  ;;  %v7827_v6 = vld [vmem:[#allocation4 + $0xe0] sm:$0xee]  ;;  %20374 = vst [vmem:[#allocation95_spill] sm:$0xff] %v16488_v3  ;;  %v4777_v28 = vor.u32 %v4776_v32, %v4773_v49 }
 0x384   :  { %v7157_v51 = vld [vmem:[#allocation4 + $0xf0] sm:$0x11]  ;;  %v4782_v21 = vrot.slane %v4780_v50, 5  ;;  %v6064_v59 = vshll.u32 %v16469_v38, 16  ;;  %v13240_v1 = vrot.slane %v7827_v6, 9  ;;  %v3226_v50 = vshrl.u32 %v16343_v33, 16 }
 0x385   :  { %v16492_v44 = vsel %vm15127_vm3, %v12988_v55, %v5368_v15  ;;  %v7829_v23 = vld [vmem:[#allocation4 + $0xf0] sm:$0x11]  ;;  %v7349_v61 = vshll.u32 %v7157_v51, 16  ;;  %v16499_v46 = vrot.slane %v4777_v28, 4  ;;  %v3074_v55 = vmax.f32 %v16346_v56, 0.0  ;;  %v20396_v37 = vld [vmem:[#allocation40_spill] sm:$0xff] }
 0x386   :  { %20375 = vst [vmem:[#allocation96_spill] sm:$0xff] %v16492_v44  ;;  %v7977_v49 = vrot.slane %v7829_v23, 5  ;;  %v13587_v15 = vadd.f32 %v16207_v27, %v15904_v7  ;;  %v3229_v51 = vshll.u32 %v16343_v33, 16  ;;  %v3075_v6 = vmax.f32 %v16349_v63, 0.0 }
 0x387   :  { %v7351_v32 = vrot.slane %v7349_v61, 5  ;;  %v16509_v18 = vsel %vm15311_vm7, %v16499_v46, %v4782_v21  ;;  %v3228_v61 = vrot.slane %v3226_v50, 7  ;;  %v13397_v28 = vpack.c.bf16 %v3074_v55, %v20379_v0 }
 0x388   :  { %20376 = vst [vmem:[#allocation97_spill] sm:$0xff] %v16509_v18  ;;  %v16513_v38 = vsel %vm15127_vm3, %v13240_v1, %v7977_v49  ;;  %v3377_v1 = vld [vmem:[#allocation4 + $0x100] sm:$0xff]  ;;  %v3380_v49 = vld [vmem:[#allocation4 + $0x110] sm:$0x11]  ;;  %v3077_v56 = vmax.f32 %v16440_v40, 0.0  ;;  %v3078_v21 = vmax.f32 %v13584_v31, 0.0  ;;  %v13586_v23 = vadd.f32 %v13585_v16, %v15879_v43 }
 0x389   :  { %20377 = vst [vmem:[#allocation98_spill] sm:$0xff] %v16513_v38  ;;  %v16524_v27 = vsel %vm15311_vm7, %v16499_v46, %v7351_v32  ;;  %v3076_v32 = vmax.f32 %v16353_v29, 0.0  ;;  %v3231_v22 = vor.u32 %v3229_v51, %v3228_v61  ;;  %v3232_v62 = vrot.slane %v3228_v61, 4  ;;  %v6520_v38 = vld [vmem:[#allocation4 + $0xf0] sm:$0x11]  ;;  %v3383_v51 = vld [vmem:[#allocation4 + $0x160] sm:$0xff] }
 0x38a   :  { %20378 = vst [vmem:[#allocation99_spill] sm:$0xff] %v16524_v27  ;;  %v13588_v33 = vadd.f32 %v13587_v15, %v15885_v30  ;;  %v3234_v27 = vshrl.u32 %v13397_v28, 16  ;;  %v3237_v3 = vshll.u32 %v13397_v28, 16  ;;  %v16540_v50 = vpack.c.bf16 %v3078_v21, %v3077_v56  ;;  %v3392_v30 = vld [vmem:[#allocation4 + $0x190] sm:$0x11] }
 0x38b   :  { %v13398_v63 = vpack.c.bf16 %v3076_v32, %v3075_v6  ;;  %v16544_v52 = vsel %vm15968_vm9, %v3231_v22, %v3377_v1  ;;  %v3381_v29 = vsel %vm14717_vm10, %v3232_v62, %v3380_v49  ;;  %v3079_v40 = vmax.f32 %v13586_v23, 0.0  ;;  %v16555_v22 = vld [vmem:[#allocation4 + $0x120] sm:$0xff] }
 0x38c   :  { %20380 = vst [vmem:[#allocation100_spill] sm:$0xff] %v16544_v52  ;;  %v3080_v31 = vmax.f32 %v13588_v33, 0.0  ;;  %3379 = vst [vmem:[#allocation4 + $0x100] sm:$0xff] %v16544_v52  ;;  %v6083_v16 = vshrl.u32 %v16544_v52, 16  ;;  %v6086_v0 = vshll.u32 %v16544_v52, 16  ;;  %v3236_v15 = vrot.slane %v3234_v27, 7 }
 0x38d   :  { %3382 = vst [vmem:[#allocation4 + $0x110] sm:$0x11] %v3381_v29  ;;  %20381 = vst [vmem:[#allocation101_spill] sm:$0xff] %v16555_v22  ;;  %v3242_v6 = vshrl.u32 %v13398_v63, 16  ;;  %v6066_v28 = vrot.slane %v6064_v59, 5  ;;  %v6672_v56 = vrot.slane %v6520_v38, 5 }
 0x38e   :  { %v6085_v21 = vrot.slane %v6083_v16, 4  ;;  %v6088_v23 = vrot.slane %v6086_v0, 5  ;;  %v3386_v33 = vld [vmem:[#allocation4 + $0x170] sm:$0x11]  ;;  %v3239_v61 = vor.u32 %v3237_v3, %v3236_v15  ;;  %v3240_v1 = vrot.slane %v3236_v15, 4  ;;  %v3389_v27 = vld [vmem:[#allocation4 + $0x180] sm:$0xff] }
 0x38f   :  { %v3244_v49 = vrot.slane %v3242_v6, 7  ;;  %v3245_v32 = vshll.u32 %v13398_v63, 16  ;;  %v20382_v43 = vrot.slane %v15962_v20, 5  ;;  %v20383_v62 = vrot.slane %v15935_v57, 9  ;;  %v20395_v59 = vld [vmem:[#allocation37_spill] sm:$0xff] }
 0x390   :  { %v6089_v29 = vor.u32 %v6088_v23, %v6085_v21  ;;  %v16570_v38 = vpack.c.bf16 %v3080_v31, %v3079_v40  ;;  %v16574_v3 = vsel %vm15968_vm9, %v3239_v61, %v3383_v51  ;;  %v3387_v63 = vsel %vm14717_vm10, %v3240_v1, %v3386_v33 }
 0x391   :  { %v16567_v55 = vsel %vm15127_vm3, %v20383_v62, %v20382_v43  ;;  %20385 = vst [vmem:[#allocation103_spill] sm:$0xff] %v16574_v3  ;;  %v3247_v20 = vor.u32 %v3245_v32, %v3244_v49  ;;  %v3248_v16 = vrot.slane %v3244_v49, 4  ;;  %3385 = vst [vmem:[#allocation4 + $0x160] sm:$0xff] %v16574_v3  ;;  %v16579_v43 = vld [vmem:[#allocation4 + $0x140] sm:$0xff]  ;;  %v4827_v31 = vshrl.u32 %v16574_v3, 16 }
 0x392   :  { %20384 = vst [vmem:[#allocation102_spill] sm:$0xff] %v16567_v55  ;;  %v6090_v57 = vrot.slane %v6089_v29, 4  ;;  %3388 = vst [vmem:[#allocation4 + $0x170] sm:$0x11] %v3387_v63  ;;  %v16589_v62 = vsel %vm15311_vm7, %v16499_v46, %v6066_v28  ;;  %v20388_v15 = vrot.slane %v16483_v41, 9  ;;  %v4830_v63 = vshll.u32 %v16574_v3, 16 }
 0x393   :  { %20386 = vst [vmem:[#allocation104_spill] sm:$0xff] %v16579_v43  ;;  %20387 = vst [vmem:[#allocation105_spill] sm:$0xff] %v16589_v62  ;;  %v6522_v21 = vld [vmem:[#allocation4 + $0x100] sm:$0xee]  ;;  %v16599_v33 = vsel %vm15968_vm9, %v3247_v20, %v3389_v27  ;;  %v3393_v61 = vsel %vm14717_vm10, %v3248_v16, %v3392_v30  ;;  %v4829_v32 = vrot.slane %v4827_v31, 4  ;;  %v16647_v22 = vsel %vm15311_vm7, %v20396_v37, %v20395_v59 }
 0x394   :  { %v16595_v51 = vsel %vm15127_vm3, %v20388_v15, %v6672_v56  ;;  %v5852_v6 = vld [vmem:[#allocation4 + $0x110] sm:$0x11]  ;;  %20390 = vst [vmem:[#allocation107_spill] sm:$0xff] %v16599_v33  ;;  %v13116_v49 = vrot.slane %v6522_v21, 9  ;;  %3391 = vst [vmem:[#allocation4 + $0x180] sm:$0xff] %v16599_v33  ;;  %v20398_v21 = vshrl.u32 %v16540_v50, 16 }
 0x395   :  { %20389 = vst [vmem:[#allocation106_spill] sm:$0xff] %v16595_v51  ;;  %v6524_v23 = vld [vmem:[#allocation4 + $0x110] sm:$0x11]  ;;  %v6092_v1 = vshll.u32 %v5852_v6, 16  ;;  %3394 = vst [vmem:[#allocation4 + $0x190] sm:$0x11] %v3393_v61 }
 0x396   :  { %v6680_v46 = vrot.slane %v6524_v23, 5  ;;  %v7161_v28 = vld [vmem:[#allocation4 + $0x110] sm:$0x11]  ;;  %v7831_v56 = vld [vmem:[#allocation4 + $0x100] sm:$0xee]  ;;  %v4832_v61 = vrot.slane %v4830_v63, 5 }
 0x397   :  { %v7377_v41 = vshll.u32 %v7161_v28, 16  ;;  %v7833_v29 = vld [vmem:[#allocation4 + $0x110] sm:$0x11]  ;;  %v6094_v30 = vrot.slane %v6092_v1, 5  ;;  %v13242_v31 = vrot.slane %v7831_v56, 9  ;;  %20397 = vst [vmem:[#allocation37_spill] sm:$0xff] %v16647_v22 }
 0x398   :  { %v16611_v16 = vsel %vm15127_vm3, %v13116_v49, %v6680_v46  ;;  %v7985_v15 = vrot.slane %v7833_v29, 5  ;;  %v4855_v49 = vshrl.u32 %v16599_v33, 16  ;;  %v4858_v46 = vshll.u32 %v16599_v33, 16  ;;  %v6526_v20 = vld [vmem:[#allocation4 + $0x160] sm:$0xee] }
 0x399   :  { %20391 = vst [vmem:[#allocation108_spill] sm:$0xff] %v16611_v16  ;;  %v7379_v23 = vrot.slane %v7377_v41, 5  ;;  %v16619_v28 = vsel %vm15311_vm7, %v6090_v57, %v6094_v30  ;;  %v4548_v30 = vld [vmem:[#allocation4 + $0x170] sm:$0x11]  ;;  %v4833_v29 = vor.u32 %v4832_v61, %v4829_v32  ;;  %v3252_v19 = vrot.slane %v20398_v21, 7 }
 0x39a   :  { %20392 = vst [vmem:[#allocation109_spill] sm:$0xff] %v16619_v28  ;;  %v16623_v1 = vsel %vm15127_vm3, %v13242_v31, %v7985_v15  ;;  %v5218_v31 = vld [vmem:[#allocation4 + $0x160] sm:$0xee]  ;;  %v5220_v15 = vld [vmem:[#allocation4 + $0x170] sm:$0x11]  ;;  %v4857_v16 = vrot.slane %v4855_v49, 4 }
 0x39b   :  { %20393 = vst [vmem:[#allocation110_spill] sm:$0xff] %v16623_v1  ;;  %v16633_v41 = vsel %vm15311_vm7, %v6090_v57, %v7379_v23  ;;  %v5856_v27 = vld [vmem:[#allocation4 + $0x170] sm:$0x11]  ;;  %v4836_v57 = vshll.u32 %v4548_v30, 16  ;;  %v12992_v23 = vrot.slane %v5218_v31, 9  ;;  %v5384_v0 = vrot.slane %v5220_v15, 5 }
 0x39c   :  { %20394 = vst [vmem:[#allocation111_spill] sm:$0xff] %v16633_v41  ;;  %v6120_v40 = vshll.u32 %v5856_v27, 16  ;;  %v6528_v63 = vld [vmem:[#allocation4 + $0x170] sm:$0x11]  ;;  %v4834_v6 = vrot.slane %v4833_v29, 4  ;;  %v13118_v61 = vrot.slane %v6526_v20, 9 }
 0x39d   :  { %v4838_v56 = vrot.slane %v4836_v57, 5  ;;  %v16653_v32 = vsel %vm15127_vm3, %v12992_v23, %v5384_v0  ;;  %v4552_v30 = vld [vmem:[#allocation4 + $0x190] sm:$0x11]  ;;  %v4860_v27 = vrot.slane %v4858_v46, 5  ;;  %v6688_v29 = vrot.slane %v6528_v63, 5 }
 0x39e   :  { %20399 = vst [vmem:[#allocation40_spill] sm:$0xff] %v16653_v32  ;;  %v6122_v59 = vrot.slane %v6120_v40, 5  ;;  %v5860_v49 = vld [vmem:[#allocation4 + $0x190] sm:$0x11]  ;;  %v6530_v15 = vld [vmem:[#allocation4 + $0x180] sm:$0xee]  ;;  %v13589_v63 = vadd.f32 %v16224_v26, %v15901_v13  ;;  %v13591_v26 = vadd.f32 %v16230_v5, %v15904_v7 }
 0x39f   :  { %v16661_v21 = vsel %vm15311_vm7, %v4834_v6, %v4838_v56  ;;  %v4861_v57 = vor.u32 %v4860_v27, %v4857_v16  ;;  %v16663_v0 = vld [vmem:[#allocation4 + $0x180] sm:$0xee]  ;;  %v6532_v20 = vld [vmem:[#allocation4 + $0x190] sm:$0x11]  ;;  %v3253_v46 = vshll.u32 %v16540_v50, 16  ;;  %v4864_v40 = vshll.u32 %v4552_v30, 16 }
 0x3a0   :  { %20400 = vst [vmem:[#allocation112_spill] sm:$0xff] %v16661_v21  ;;  %v16672_v37 = vld [vmem:[#allocation4 + $0x190] sm:$0x11]  ;;  %v6148_v56 = vshll.u32 %v5860_v49, 16  ;;  %v13120_v39 = vrot.slane %v6530_v15, 9  ;;  %v6696_v16 = vrot.slane %v6532_v20, 5  ;;  %v16676_v1 = vsel %vm15311_vm7, %v4834_v6, %v6122_v59 }
 0x3a1   :  { %v3255_v27 = vor.u32 %v3253_v46, %v3252_v19  ;;  %20401 = vst [vmem:[#allocation113_spill] sm:$0xff] %v16676_v1  ;;  %v16680_v50 = vsel %vm15127_vm3, %v13118_v61, %v6688_v29  ;;  %v3395_v30 = vld [vmem:[#allocation4 + $0x1a0] sm:$0xff]  ;;  %v3398_v31 = vld [vmem:[#allocation4 + $0x1b0] sm:$0x11]  ;;  %v16685_v41 = vrot.slane %v4861_v57, 4  ;;  %v3256_v59 = vrot.slane %v3252_v19, 4 }
 0x3a2   :  { %20402 = vst [vmem:[#allocation114_spill] sm:$0xff] %v16680_v50  ;;  %v6150_v49 = vrot.slane %v6148_v56, 5  ;;  %v16689_v15 = vsel %vm15127_vm3, %v13120_v39, %v6696_v16  ;;  %v7169_v6 = vld [vmem:[#allocation4 + $0x190] sm:$0x11]  ;;  %v4866_v20 = vrot.slane %v4864_v40, 5  ;;  %v5392_v61 = vrot.slane %v16672_v37, 5 }
 0x3a3   :  { %20403 = vst [vmem:[#allocation115_spill] sm:$0xff] %v16689_v15  ;;  %v16703_v39 = vsel %vm15968_vm9, %v3255_v27, %v3395_v30  ;;  %v3399_v19 = vsel %vm14717_vm10, %v3256_v59, %v3398_v31  ;;  %v3258_v37 = vshrl.u32 %v16570_v38, 16  ;;  %v7433_v56 = vshll.u32 %v7169_v6, 16  ;;  %v3404_v29 = vld [vmem:[#allocation4 + $0x1d0] sm:$0x11]  ;;  %v20409_v57 = vld [vmem:[#allocation67_spill] sm:$0xff] }
 0x3a4   :  { %v16699_v5 = vsel %vm15311_vm7, %v16685_v41, %v6150_v49  ;;  %20405 = vst [vmem:[#allocation117_spill] sm:$0xff] %v16703_v39  ;;  %3397 = vst [vmem:[#allocation4 + $0x1a0] sm:$0xff] %v16703_v39  ;;  %v16715_v16 = vcombine.low %v16599_v33, %v16703_v39  ;;  %v16719_v27 = vcombine.high %v16599_v33, %v16703_v39  ;;  %v4883_v31 = vshrl.u32 %v16703_v39, 16  ;;  %v7839_v23 = vld [vmem:[#allocation4 + $0x180] sm:$0xee] }
 0x3a5   :  { %20404 = vst [vmem:[#allocation116_spill] sm:$0xff] %v16699_v5  ;;  %3400 = vst [vmem:[#allocation4 + $0x1b0] sm:$0x11] %v3399_v19  ;;  %v4886_v30 = vshll.u32 %v16703_v39, 16  ;;  %v3260_v49 = vrot.slane %v3258_v37, 7  ;;  %v3261_v59 = vshll.u32 %v16570_v38, 16  ;;  %v13593_v6 = vadd.f32 %v16251_v42, %v15901_v13 }
 0x3a6   :  { %20406 = vst [vmem:[#allocation118_spill] sm:$0xff] %v16715_v16  ;;  %20407 = vst [vmem:[#allocation119_spill] sm:$0xff] %v16719_v27  ;;  %v20408_v19 = vld [vmem:[#allocation34_spill] sm:$0xff]  ;;  %v13595_v40 = vadd.f32 %v20409_v57, %v15904_v7  ;;  %v4885_v15 = vrot.slane %v4883_v31, 4  ;;  %v20410_v32 = vld [vmem:[#allocation35_spill] sm:$0xff]  ;;  %v13597_v57 = vadd.f32 %v16280_v4, %v15901_v13  ;;  %v13246_v31 = vrot.slane %v7839_v23, 9 }
 0x3a7   :  { %v13590_v46 = vadd.f32 %v13589_v63, %v20408_v19  ;;  %v4888_v50 = vrot.slane %v4886_v30, 5  ;;  %v3264_v51 = vrot.slane %v3260_v49, 4  ;;  %v13592_v55 = vadd.f32 %v13591_v26, %v20410_v32  ;;  %v7841_v44 = vld [vmem:[#allocation4 + $0x190] sm:$0x11]  ;;  %v20412_v1 = vld [vmem:[#allocation39_spill] sm:$0xff] }
 0x3a8   :  { %v3263_v37 = vor.u32 %v3261_v59, %v3260_v49  ;;  %v20411_v38 = vld [vmem:[#allocation38_spill] sm:$0xff]  ;;  %v13596_v28 = vadd.f32 %v13595_v40, %v20412_v1  ;;  %v8001_v49 = vrot.slane %v7841_v44, 5  ;;  %v20414_v44 = vld [vmem:[#allocation51_spill] sm:$0xff]  ;;  %v16755_v40 = vsel %vm15311_vm7, %v16685_v41, %v4866_v20 }
 0x3a9   :  { %v3081_v34 = vmax.f32 %v13590_v46, 0.0  ;;  %v13594_v5 = vadd.f32 %v13593_v6, %v20411_v38  ;;  %v4889_v42 = vor.u32 %v4888_v50, %v4885_v15  ;;  %v3405_v63 = vsel %vm14717_vm10, %v3264_v51, %v3404_v29  ;;  %20415 = vst [vmem:[#allocation67_spill] sm:$0xff] %v16755_v40  ;;  %v4217_v16 = vld [vmem:[#allocation4 + $0xb8] sm:$0x11] }
 0x3aa   :  { %v3082_v19 = vmax.f32 %v13592_v55, 0.0  ;;  %v16738_v30 = vsel %vm15968_vm9, %v3263_v37, %v3401_v53  ;;  %3406 = vst [vmem:[#allocation4 + $0x1d0] sm:$0x11] %v3405_v63  ;;  %v3084_v26 = vmax.f32 %v13596_v28, 0.0  ;;  %v7435_v46 = vrot.slane %v7433_v56, 5  ;;  %v20423_v55 = vld [vmem:[#allocation56_spill] sm:$0xff] }
 0x3ab   :  { %20413 = vst [vmem:[#allocation34_spill] sm:$0xff] %v16738_v30  ;;  %v3083_v32 = vmax.f32 %v13594_v5, 0.0  ;;  %v5226_v1 = vld [vmem:[#allocation4 + $0x1a0] sm:$0xee]  ;;  %3403 = vst [vmem:[#allocation4 + $0x1c0] sm:$0xff] %v16738_v30  ;;  %v4890_v28 = vrot.slane %v4889_v42, 4  ;;  %v16750_v5 = vadd.f32 %v13597_v57, %v20414_v44  ;;  %v16766_v63 = vsel %vm15127_vm3, %v13246_v31, %v8001_v49 }
 0x3ac   :  { %v4556_v59 = vld [vmem:[#allocation4 + $0x1b0] sm:$0x11]  ;;  %v12996_v50 = vrot.slane %v5226_v1, 9  ;;  %v16745_v53 = vpack.c.bf16 %v3082_v19, %v3081_v34  ;;  %v20416_v56 = vrot.slane %v16663_v0, 9  ;;  %v4911_v42 = vshrl.u32 %v16738_v30, 16  ;;  %20418 = vst [vmem:[#allocation38_spill] sm:$0xff] %v16766_v63 }
 0x3ad   :  { %v4892_v51 = vshll.u32 %v4556_v59, 16  ;;  %v5228_v23 = vld [vmem:[#allocation4 + $0x1b0] sm:$0x11]  ;;  %v16747_v15 = vpack.c.bf16 %v3084_v26, %v3083_v32  ;;  %v7843_v57 = vld [vmem:[#allocation4 + $0x1a0] sm:$0xee]  ;;  %v16777_v32 = vsel %vm15311_vm7, %v16685_v41, %v7435_v46  ;;  %v4914_v44 = vshll.u32 %v16738_v30, 16 }
 0x3ae   :  { %v5400_v29 = vrot.slane %v5228_v23, 5  ;;  %v16761_v6 = vsel %vm15127_vm3, %v20416_v56, %v5392_v61  ;;  %v5864_v37 = vld [vmem:[#allocation4 + $0x1b0] sm:$0x11]  ;;  %v13599_v61 = vadd.f32 %v16290_v9, %v15904_v7  ;;  %20420 = vst [vmem:[#allocation51_spill] sm:$0xff] %v16777_v32  ;;  %v6534_v59 = vld [vmem:[#allocation4 + $0x1a0] sm:$0xee] }
 0x3af   :  { %20417 = vst [vmem:[#allocation35_spill] sm:$0xff] %v16761_v6  ;;  %v4894_v34 = vrot.slane %v4892_v51, 5  ;;  %v7173_v38 = vld [vmem:[#allocation4 + $0x1b0] sm:$0x11]  ;;  %v6176_v41 = vshll.u32 %v5864_v37, 16  ;;  %v13248_v23 = vrot.slane %v7843_v57, 9  ;;  %v13601_v37 = vadd.f32 %v16299_v8, %v15901_v13 }
 0x3b0   :  { %v16770_v19 = vsel %vm15127_vm3, %v12996_v50, %v5400_v29  ;;  %v7461_v20 = vshll.u32 %v7173_v38, 16  ;;  %v7845_v0 = vld [vmem:[#allocation4 + $0x1b0] sm:$0x11]  ;;  %v4913_v29 = vrot.slane %v4911_v42, 4  ;;  %v13122_v56 = vrot.slane %v6534_v59, 9 }
 0x3b1   :  { %20419 = vst [vmem:[#allocation39_spill] sm:$0xff] %v16770_v19  ;;  %v16781_v26 = vsel %vm15311_vm7, %v4890_v28, %v4894_v34  ;;  %v6536_v1 = vld [vmem:[#allocation4 + $0x1b0] sm:$0x11]  ;;  %v8009_v50 = vrot.slane %v7845_v0, 5  ;;  %v13600_v9 = vadd.f32 %v13599_v61, %v20423_v55  ;;  %v6178_v0 = vrot.slane %v6176_v41, 5  ;;  %v3419_v19 = vld [vmem:[#allocation4 + $0x220] sm:$0xff] }
 0x3b2   :  { %20421 = vst [vmem:[#allocation120_spill] sm:$0xff] %v16781_v26  ;;  %v7463_v46 = vrot.slane %v7461_v20, 5  ;;  %v6704_v34 = vrot.slane %v6536_v1, 5  ;;  %v5868_v31 = vld [vmem:[#allocation4 + $0x1d0] sm:$0x11]  ;;  %v4916_v20 = vrot.slane %v4914_v44, 5  ;;  %v13603_v8 = vadd.f32 %v16316_v48, %v15904_v7 }
 0x3b3   :  { %v6538_v49 = vld [vmem:[#allocation4 + $0x1c0] sm:$0xee]  ;;  %v16803_v42 = vsel %vm15127_vm3, %v13248_v23, %v8009_v50  ;;  %v6540_v57 = vld [vmem:[#allocation4 + $0x1d0] sm:$0x11]  ;;  %v6204_v61 = vshll.u32 %v5868_v31, 16  ;;  %v3266_v4 = vshrl.u32 %v16745_v53, 16  ;;  %v16824_v31 = vsel %vm15311_vm7, %v4890_v28, %v6178_v0 }
 0x3b4   :  { %v16794_v38 = vsel %vm15311_vm7, %v4890_v28, %v7463_v46  ;;  %20424 = vst [vmem:[#allocation56_spill] sm:$0xff] %v16803_v42  ;;  %v4917_v55 = vor.u32 %v4916_v20, %v4913_v29  ;;  %v13124_v46 = vrot.slane %v6538_v49, 9  ;;  %v6712_v51 = vrot.slane %v6540_v57, 5  ;;  %20427 = vst [vmem:[#allocation124_spill] sm:$0xff] %v16824_v31  ;;  %v4560_v29 = vld [vmem:[#allocation4 + $0x1d0] sm:$0x11] }
 0x3b5   :  { %20422 = vst [vmem:[#allocation121_spill] sm:$0xff] %v16794_v38  ;;  %v16814_v23 = vsel %vm15127_vm3, %v13122_v56, %v6704_v34  ;;  %v6206_v50 = vrot.slane %v6204_v61, 5  ;;  %v3269_v34 = vshll.u32 %v16745_v53, 16  ;;  %v3274_v28 = vshrl.u32 %v16747_v15, 16  ;;  %v3407_v0 = vld [vmem:[#allocation4 + $0x1e0] sm:$0xff]  ;;  %v20429_v13 = vld [vmem:[#allocation58_spill] sm:$0xff] }
 0x3b6   :  { %20425 = vst [vmem:[#allocation122_spill] sm:$0xff] %v16814_v23  ;;  %v16816_v41 = vrot.slane %v4917_v55, 4  ;;  %v16820_v44 = vsel %vm15127_vm3, %v13124_v46, %v6712_v51  ;;  %v3268_v51 = vrot.slane %v3266_v4, 7  ;;  %v3410_v55 = vld [vmem:[#allocation4 + $0x1f0] sm:$0x11]  ;;  %v3277_v7 = vshll.u32 %v16747_v15, 16 }
 0x3b7   :  { %20426 = vst [vmem:[#allocation123_spill] sm:$0xff] %v16820_v44  ;;  %v3276_v46 = vrot.slane %v3274_v28, 7  ;;  %v3085_v4 = vmax.f32 %v16750_v5, 0.0  ;;  %v4920_v59 = vshll.u32 %v4560_v29, 16  ;;  %v7177_v53 = vld [vmem:[#allocation4 + $0x1d0] sm:$0x11]  ;;  %v13602_v42 = vadd.f32 %v13601_v37, %v20429_v13 }
 0x3b8   :  { %v16835_v56 = vsel %vm15311_vm7, %v16816_v41, %v6206_v50  ;;  %v3271_v48 = vor.u32 %v3269_v34, %v3268_v51  ;;  %v3272_v61 = vrot.slane %v3268_v51, 4  ;;  %v3413_v50 = vld [vmem:[#allocation4 + $0x200] sm:$0xff]  ;;  %v3416_v1 = vld [vmem:[#allocation4 + $0x210] sm:$0x11]  ;;  %v3086_v49 = vmax.f32 %v13600_v9, 0.0 }
 0x3b9   :  { %20428 = vst [vmem:[#allocation125_spill] sm:$0xff] %v16835_v56  ;;  %v20430_v20 = vld [vmem:[#allocation59_spill] sm:$0xff]  ;;  %v3279_v51 = vor.u32 %v3277_v7, %v3276_v46  ;;  %v3280_v34 = vrot.slane %v3276_v46, 4  ;;  %v7489_v29 = vshll.u32 %v7177_v53, 16  ;;  %v3087_v38 = vmax.f32 %v13602_v42, 0.0 }
 0x3ba   :  { %v13604_v63 = vadd.f32 %v13603_v8, %v20430_v20  ;;  %v16849_v57 = vsel %vm15968_vm9, %v3271_v48, %v3407_v0  ;;  %v3411_v15 = vsel %vm14717_vm10, %v3272_v61, %v3410_v55  ;;  %v5230_v28 = vld [vmem:[#allocation4 + $0x1c0] sm:$0xee]  ;;  %v5232_v8 = vld [vmem:[#allocation4 + $0x1d0] sm:$0x11]  ;;  %v13403_v7 = vpack.c.bf16 %v3086_v49, %v3085_v4 }
 0x3bb   :  { %20431 = vst [vmem:[#allocation58_spill] sm:$0xff] %v16849_v57  ;;  %3409 = vst [vmem:[#allocation4 + $0x1e0] sm:$0xff] %v16849_v57  ;;  %v16856_v5 = vcombine.low %v16738_v30, %v16849_v57  ;;  %v16860_v9 = vcombine.high %v16738_v30, %v16849_v57  ;;  %v4939_v37 = vshrl.u32 %v16849_v57, 16  ;;  %v4942_v13 = vshll.u32 %v16849_v57, 16  ;;  %v7847_v20 = vld [vmem:[#allocation4 + $0x1c0] sm:$0xee] }
 0x3bc   :  { %3412 = vst [vmem:[#allocation4 + $0x1f0] sm:$0x11] %v3411_v15  ;;  %v16866_v0 = vsel %vm15968_vm9, %v3279_v51, %v3413_v50  ;;  %v3417_v55 = vsel %vm14717_vm10, %v3280_v34, %v3416_v1  ;;  %v7849_v48 = vld [vmem:[#allocation4 + $0x1d0] sm:$0x11]  ;;  %v12998_v32 = vrot.slane %v5230_v28, 9  ;;  %v3282_v51 = vshrl.u32 %v13403_v7, 16 }
 0x3bd   :  { %20432 = vst [vmem:[#allocation59_spill] sm:$0xff] %v16856_v5  ;;  %20433 = vst [vmem:[#allocation126_spill] sm:$0xff] %v16860_v9  ;;  %v4941_v61 = vrot.slane %v4939_v37, 4  ;;  %v4944_v46 = vrot.slane %v4942_v13, 5  ;;  %v4967_v15 = vshrl.u32 %v16866_v0, 16  ;;  %v5408_v44 = vrot.slane %v5232_v8, 5 }
 0x3be   :  { %20434 = vst [vmem:[#allocation127_spill] sm:$0xff] %v16866_v0  ;;  %3415 = vst [vmem:[#allocation4 + $0x200] sm:$0xff] %v16866_v0  ;;  %v13250_v1 = vrot.slane %v7847_v20, 9  ;;  %v4970_v49 = vshll.u32 %v16866_v0, 16  ;;  %v3088_v4 = vmax.f32 %v13604_v63, 0.0  ;;  %v8017_v34 = vrot.slane %v7849_v48, 5 }
 0x3bf   :  { %3418 = vst [vmem:[#allocation4 + $0x210] sm:$0x11] %v3417_v55  ;;  %v4945_v37 = vor.u32 %v4944_v46, %v4941_v61  ;;  %v16877_v13 = vrot.slane %v3282_v51, 7  ;;  %v3285_v55 = vshll.u32 %v13403_v7, 16  ;;  %v4922_v23 = vrot.slane %v4920_v59, 5  ;;  %v4214_v9 = vld [vmem:[#allocation4 + $0xa8] sm:$0xff] }
 0x3c0   :  { %v7491_v42 = vrot.slane %v7489_v29, 5  ;;  %v4969_v28 = vrot.slane %v4967_v15, 4  ;;  %v16879_v6 = vpack.c.bf16 %v3088_v4, %v3087_v38  ;;  %v4972_v48 = vrot.slane %v4970_v49, 5  ;;  %v4211_v5 = vld [vmem:[#allocation4 + $0x98] sm:$0x11] }
 0x3c1   :  { %v3287_v8 = vor.u32 %v3285_v55, %v16877_v13  ;;  %v16884_v61 = vsel %vm15127_vm3, %v12998_v32, %v5408_v44  ;;  %v16888_v59 = vsel %vm15127_vm3, %v13250_v1, %v8017_v34  ;;  %v4946_v38 = vrot.slane %v4945_v37, 4 }
 0x3c2   :  { %v5234_v56 = vld [vmem:[#allocation4 + $0x1e0] sm:$0xee]  ;;  %20435 = vst [vmem:[#allocation128_spill] sm:$0xff] %v16884_v61  ;;  %20436 = vst [vmem:[#allocation129_spill] sm:$0xff] %v16888_v59  ;;  %v4973_v34 = vor.u32 %v4972_v48, %v4969_v28 }
 0x3c3   :  { %v4564_v53 = vld [vmem:[#allocation4 + $0x1f0] sm:$0x11]  ;;  %v13000_v31 = vrot.slane %v5234_v56, 9  ;;  %v6542_v29 = vld [vmem:[#allocation4 + $0x1e0] sm:$0xee]  ;;  %v16892_v7 = vsel %vm15968_vm9, %v3287_v8, %v3419_v19  ;;  %v16897_v56 = vsel %vm15311_vm7, %v16816_v41, %v4922_v23  ;;  %v16907_v19 = vsel %vm15311_vm7, %v16816_v41, %v7491_v42 }
 0x3c4   :  { %v5236_v50 = vld [vmem:[#allocation4 + $0x1f0] sm:$0x11]  ;;  %v4948_v20 = vshll.u32 %v4564_v53, 16  ;;  %20437 = vst [vmem:[#allocation130_spill] sm:$0xff] %v16892_v7  ;;  %20438 = vst [vmem:[#allocation131_spill] sm:$0xff] %v16897_v56  ;;  %v3288_v8 = vrot.slane %v16877_v13, 4 }
 0x3c5   :  { %v5416_v62 = vrot.slane %v5236_v50, 5  ;;  %v5872_v63 = vld [vmem:[#allocation4 + $0x1f0] sm:$0x11]  ;;  %3421 = vst [vmem:[#allocation4 + $0x220] sm:$0xff] %v16892_v7  ;;  %20440 = vst [vmem:[#allocation133_spill] sm:$0xff] %v16907_v19  ;;  %v4974_v48 = vrot.slane %v4973_v34, 4 }
 0x3c6   :  { %v4950_v46 = vrot.slane %v4948_v20, 5  ;;  %v6232_v44 = vshll.u32 %v5872_v63, 16  ;;  %v6544_v15 = vld [vmem:[#allocation4 + $0x1f0] sm:$0x11]  ;;  %v7851_v1 = vld [vmem:[#allocation4 + $0x1e0] sm:$0xee] }
 0x3c7   :  { %v16901_v32 = vsel %vm15127_vm3, %v13000_v31, %v5416_v62  ;;  %v7181_v53 = vld [vmem:[#allocation4 + $0x1f0] sm:$0x11]  ;;  %v13252_v49 = vrot.slane %v7851_v1, 9  ;;  %v6720_v50 = vrot.slane %v6544_v15, 5  ;;  %v6546_v1 = vld [vmem:[#allocation4 + $0x200] sm:$0xee] }
 0x3c8   :  { %20439 = vst [vmem:[#allocation132_spill] sm:$0xff] %v16901_v32  ;;  %v7517_v51 = vshll.u32 %v7181_v53, 16  ;;  %v7853_v62 = vld [vmem:[#allocation4 + $0x1f0] sm:$0x11]  ;;  %v16915_v31 = vsel %vm15311_vm7, %v4946_v38, %v4950_v46  ;;  %v6234_v63 = vrot.slane %v6232_v44, 5  ;;  %v13126_v53 = vrot.slane %v6542_v29, 9 }
 0x3c9   :  { %20441 = vst [vmem:[#allocation134_spill] sm:$0xff] %v16915_v31  ;;  %v8025_v4 = vrot.slane %v7853_v62, 5  ;;  %v5876_v42 = vld [vmem:[#allocation4 + $0x210] sm:$0x11]  ;;  %v16934_v29 = vld [vmem:[#allocation4 + $0x260] sm:$0xff]  ;;  %v13128_v37 = vrot.slane %v6546_v1, 9 }
 0x3ca   :  { %v7519_v55 = vrot.slane %v7517_v51, 5  ;;  %v3422_v20 = vld [vmem:[#allocation4 + $0x230] sm:$0x11]  ;;  %v6260_v62 = vshll.u32 %v5876_v42, 16  ;;  %20444 = vst [vmem:[#allocation137_spill] sm:$0xff] %v16934_v29  ;;  %v7623_v23 = vshll.u32 %v16934_v29, 16  ;;  %v16944_v42 = vsel %vm15311_vm7, %v4946_v38, %v6234_v63 }
 0x3cb   :  { %v16924_v46 = vsel %vm15127_vm3, %v13252_v49, %v8025_v4  ;;  %v4568_v13 = vld [vmem:[#allocation4 + $0x210] sm:$0x11]  ;;  %20445 = vst [vmem:[#allocation138_spill] sm:$0xff] %v16944_v42  ;;  %v3423_v49 = vsel %vm14717_vm10, %v3288_v8, %v3422_v20  ;;  %v5238_v59 = vld [vmem:[#allocation4 + $0x200] sm:$0xee] }
 0x3cc   :  { %20442 = vst [vmem:[#allocation135_spill] sm:$0xff] %v16924_v46  ;;  %v16928_v28 = vsel %vm15311_vm7, %v4946_v38, %v7519_v55  ;;  %v6548_v44 = vld [vmem:[#allocation4 + $0x210] sm:$0x11]  ;;  %v7620_v55 = vshrl.u32 %v16934_v29, 16  ;;  %v6262_v41 = vrot.slane %v6260_v62, 5  ;;  %v16948_v46 = vsel %vm15127_vm3, %v13126_v53, %v6720_v50 }
 0x3cd   :  { %20443 = vst [vmem:[#allocation136_spill] sm:$0xff] %v16928_v28  ;;  %v7185_v4 = vld [vmem:[#allocation4 + $0x210] sm:$0x11]  ;;  %v6728_v51 = vrot.slane %v6548_v44, 5  ;;  %20446 = vst [vmem:[#allocation139_spill] sm:$0xff] %v16948_v46  ;;  %v4976_v15 = vshll.u32 %v4568_v13, 16  ;;  %v16962_v50 = vcombine.low %v16866_v0, %v16892_v7  ;;  %v16976_v13 = vcombine.high %v16866_v0, %v16892_v7 }
 0x3ce   :  { %v5240_v28 = vld [vmem:[#allocation4 + $0x210] sm:$0x11]  ;;  %v16954_v34 = vsel %vm15311_vm7, %v4974_v48, %v6262_v41  ;;  %v7545_v38 = vshll.u32 %v7185_v4, 16  ;;  %3424 = vst [vmem:[#allocation4 + $0x230] sm:$0x11] %v3423_v49  ;;  %v4995_v62 = vshrl.u32 %v16892_v7, 16 }
 0x3cf   :  { %20447 = vst [vmem:[#allocation140_spill] sm:$0xff] %v16954_v34  ;;  %v16958_v1 = vsel %vm15127_vm3, %v13128_v37, %v6728_v51  ;;  %20449 = vst [vmem:[#allocation142_spill] sm:$0xff] %v16962_v50  ;;  %v7855_v37 = vld [vmem:[#allocation4 + $0x200] sm:$0xee]  ;;  %v16972_v53 = vld [vmem:[#allocation4 + $0x270] sm:$0x11] }
 0x3d0   :  { %20448 = vst [vmem:[#allocation141_spill] sm:$0xff] %v16958_v1  ;;  %v7857_v51 = vld [vmem:[#allocation4 + $0x210] sm:$0x11]  ;;  %20450 = vst [vmem:[#allocation143_spill] sm:$0xff] %v16976_v13  ;;  %v16979_v44 = vld [vmem:[#allocation4 + $0x260] sm:$0xee] }
 0x3d1   :  { %v4978_v49 = vrot.slane %v4976_v15, 5  ;;  %v13002_v4 = vrot.slane %v5238_v59, 9  ;;  %v5424_v63 = vrot.slane %v5240_v28, 5  ;;  %v4998_v41 = vshll.u32 %v16892_v7, 16  ;;  %v5242_v8 = vld [vmem:[#allocation4 + $0x220] sm:$0xee] }
 0x3d2   :  { %v13254_v19 = vrot.slane %v7855_v37, 9  ;;  %v4997_v20 = vrot.slane %v4995_v62, 4  ;;  %v3290_v1 = vshrl.u32 %v16879_v6, 16  ;;  %v16983_v46 = vrot.slane %v7620_v55, 4  ;;  %v7859_v42 = vld [vmem:[#allocation4 + $0x220] sm:$0xee] }
 0x3d3   :  { %v7547_v32 = vrot.slane %v7545_v38, 5  ;;  %v8033_v61 = vrot.slane %v7857_v51, 5  ;;  %v5000_v34 = vrot.slane %v4998_v41, 5  ;;  %v16985_v35 = vrot.slane %v7623_v23, 5  ;;  %v16998_v51 = vld [vmem:[#allocation4 + $0x8] sm:$0xff] }
 0x3d4   :  { %v13004_v54 = vrot.slane %v5242_v8, 9  ;;  %v3292_v31 = vrot.slane %v3290_v1, 7  ;;  %v7629_v59 = vshll.u32 %v16972_v53, 16  ;;  %v16991_v15 = vsel %vm15311_vm7, %v4974_v48, %v4978_v49  ;;  %20453 = vst [vmem:[#allocation146_spill] sm:$0xff] %v16998_v51  ;;  %v4196_v7 = vld [vmem:[#allocation4 + $0x48] sm:$0xff] }
 0x3d5   :  { %20451 = vst [vmem:[#allocation144_spill] sm:$0xff] %v16991_v15  ;;  %v16995_v55 = vsel %vm15127_vm3, %v13002_v4, %v5424_v63  ;;  %v4572_v38 = vld [vmem:[#allocation4 + $0x230] sm:$0x11]  ;;  %v5001_v37 = vor.u32 %v5000_v34, %v4997_v20  ;;  %v3293_v23 = vshll.u32 %v16879_v6, 16  ;;  %v13256_v53 = vrot.slane %v7859_v42, 9 }
 0x3d6   :  { %20452 = vst [vmem:[#allocation145_spill] sm:$0xff] %v16995_v55  ;;  %v5244_v41 = vld [vmem:[#allocation4 + $0x230] sm:$0x11]  ;;  %v5004_v1 = vshll.u32 %v4572_v38, 16  ;;  %v4589_v62 = vshrl.u32 %v16998_v51, 16  ;;  %v17003_v49 = vsel %vm15311_vm7, %v4974_v48, %v7547_v32  ;;  %v17007_v63 = vsel %vm15127_vm3, %v13254_v19, %v8033_v61  ;;  %v3425_v48 = vld [vmem:[#allocation4 + $0x240] sm:$0xff] }
 0x3d7   :  { %v5432_v8 = vrot.slane %v5244_v41, 5  ;;  %20454 = vst [vmem:[#allocation147_spill] sm:$0xff] %v17003_v49  ;;  %20455 = vst [vmem:[#allocation148_spill] sm:$0xff] %v17007_v63  ;;  %v5880_v4 = vld [vmem:[#allocation4 + $0x230] sm:$0x11]  ;;  %v3295_v28 = vor.u32 %v3293_v23, %v3292_v31  ;;  %v7626_v6 = vor.u32 %v16985_v35, %v16983_v46  ;;  %v17011_v38 = vrot.slane %v5001_v37, 4 }
 0x3d8   :  { %v7189_v34 = vld [vmem:[#allocation4 + $0x230] sm:$0x11]  ;;  %v5006_v42 = vrot.slane %v5004_v1, 5  ;;  %v4592_v26 = vshll.u32 %v16998_v51, 16  ;;  %v6288_v46 = vshll.u32 %v5880_v4, 16  ;;  %v3296_v37 = vrot.slane %v3292_v31, 4 }
 0x3d9   :  { %v7861_v20 = vld [vmem:[#allocation4 + $0x230] sm:$0x11]  ;;  %v17015_v41 = vsel %vm15127_vm3, %v13004_v54, %v5432_v8  ;;  %v7573_v32 = vshll.u32 %v7189_v34, 16  ;;  %v6550_v61 = vld [vmem:[#allocation4 + $0x220] sm:$0xee]  ;;  %v7631_v8 = vrot.slane %v7629_v59, 5 }
 0x3da   :  { %20456 = vst [vmem:[#allocation149_spill] sm:$0xff] %v17015_v41  ;;  %v8041_v56 = vrot.slane %v7861_v20, 5  ;;  %v3428_v23 = vld [vmem:[#allocation4 + $0x250] sm:$0x11]  ;;  %v17025_v35 = vsel %vm15311_vm7, %v17011_v38, %v5006_v42  ;;  %v17037_v20 = vsel %vm15968_vm9, %v3295_v28, %v3425_v48  ;;  %v3543_v28 = vld [vmem:[#allocation14 + $0x2] sm:$0x3] }
 0x3db   :  { %20457 = vst [vmem:[#allocation150_spill] sm:$0xff] %v17025_v35  ;;  %v7575_v54 = vrot.slane %v7573_v32, 5  ;;  %20459 = vst [vmem:[#allocation152_spill] sm:$0xff] %v17037_v20  ;;  %v6552_v32 = vld [vmem:[#allocation4 + $0x230] sm:$0x11]  ;;  %v6307_v19 = vshrl.u32 %v17037_v20, 16 }
 0x3dc   :  { %v17033_v34 = vsel %vm15127_vm3, %v13256_v53, %v8041_v56  ;;  %3427 = vst [vmem:[#allocation4 + $0x240] sm:$0xff] %v17037_v20  ;;  %v3429_v56 = vsel %vm14717_vm10, %v3296_v37, %v3428_v23  ;;  %v7869_v53 = vld [vmem:[#allocation4 + $0x270] sm:$0x11]  ;;  %v6310_v23 = vshll.u32 %v17037_v20, 16  ;;  %v17065_v1 = vld [vmem:[#allocation4 + $0x18] sm:$0x11] }
 0x3dd   :  { %20458 = vst [vmem:[#allocation151_spill] sm:$0xff] %v17033_v34  ;;  %v17042_v4 = vsel %vm15311_vm7, %v17011_v38, %v7575_v54  ;;  %3430 = vst [vmem:[#allocation4 + $0x250] sm:$0x11] %v3429_v56  ;;  %v17067_v54 = vld [vmem:[#allocation4 + $0x8] sm:$0xee]  ;;  %v13130_v56 = vrot.slane %v6550_v61, 9 }
 0x3de   :  { %20460 = vst [vmem:[#allocation153_spill] sm:$0xff] %v17042_v4  ;;  %v8057_v31 = vrot.slane %v7869_v53, 5  ;;  %v20461_v34 = vld [vmem:[#allocation31_spill] sm:$0xff]  ;;  %v6926_v4 = vld [vmem:[#allocation4 + $0x128] sm:$0xff]  ;;  %v6290_v49 = vrot.slane %v6288_v46, 5  ;;  %v6736_v41 = vrot.slane %v6552_v32, 5 }
 0x3df   :  { %v17070_v63 = vrot.slane %v3543_v28, %v20461_v34  ;;  %v17072_v42 = vld [vmem:[#allocation4 + $0x18] sm:$0x11]  ;;  %v6309_v55 = vrot.slane %v6307_v19, 4  ;;  %v6312_v37 = vrot.slane %v6310_v23, 5  ;;  %v7627_v48 = vrot.slane %v7626_v6, 4  ;;  %v20464_v32 = vld [vmem:[#allocation32_spill] sm:$0xff] }
 0x3e0   :  { %v17074_v35 = vld [vmem:[#allocation4 + $0x138] sm:$0x11]  ;;  %v4591_v29 = vrot.slane %v4589_v62, 4  ;;  %v4594_v15 = vrot.slane %v4592_v26, 5  ;;  %v7410_v40 = vshrl.u32 %v6926_v4, 16  ;;  %v4598_v59 = vshll.u32 %v17065_v1, 16 }
 0x3e1   :  { %v6313_v21 = vor.u32 %v6312_v37, %v6309_v55  ;;  %v12975_v61 = vrot.slane %v17067_v54, 9  ;;  %v5316_v53 = vrot.slane %v17072_v42, 5  ;;  %v20462_v46 = vrot.slane %v16979_v44, 9 }
 0x3e2   :  { %v17086_v6 = vrot.slane %v3543_v28, %v20464_v32  ;;  %v7413_v26 = vshll.u32 %v6926_v4, 16  ;;  %v7419_v55 = vshll.u32 %v17074_v35, 16  ;;  %v17092_v62 = vsel %vm15311_vm7, %v17011_v38, %v6290_v49 }
 0x3e3   :  { %v6554_v34 = vld [vmem:[#allocation4 + $0x240] sm:$0xee]  ;;  %v17083_v19 = vsel %vm15127_vm3, %v20462_v46, %v8057_v31  ;;  %20465 = vst [vmem:[#allocation155_spill] sm:$0xff] %v17092_v62  ;;  %v17096_v1 = vsel %vm15127_vm3, %v13130_v56, %v6736_v41  ;;  %v17098_v31 = vrot.slane %v7410_v40, 4  ;;  %v17102_v35 = vsel %vm15311_vm7, %v7627_v48, %v7631_v8 }
 0x3e4   :  { %v7863_v22 = vld [vmem:[#allocation4 + $0x240] sm:$0xee]  ;;  %20463 = vst [vmem:[#allocation154_spill] sm:$0xff] %v17083_v19  ;;  %20466 = vst [vmem:[#allocation156_spill] sm:$0xff] %v17096_v1  ;;  %v5884_v44 = vld [vmem:[#allocation4 + $0x250] sm:$0x11]  ;;  %v4595_v46 = vor.u32 %v4594_v15, %v4591_v29 }
 0x3e5   :  { %v6556_v42 = vld [vmem:[#allocation4 + $0x250] sm:$0x11]  ;;  %v13132_v54 = vrot.slane %v6554_v34, 9  ;;  %v6316_v23 = vshll.u32 %v5884_v44, 16  ;;  %20467 = vst [vmem:[#allocation157_spill] sm:$0xff] %v17102_v35  ;;  %v6314_v49 = vrot.slane %v6313_v21, 4 }
 0x3e6   :  { %v6744_v28 = vrot.slane %v6556_v42, 5  ;;  %v7193_v37 = vld [vmem:[#allocation4 + $0x250] sm:$0x11]  ;;  %v13258_v32 = vrot.slane %v7863_v22, 9  ;;  %v7415_v42 = vrot.slane %v7413_v26, 5  ;;  %v17142_v8 = vrot.slane %v4598_v59, 5 }
 0x3e7   :  { %v7865_v4 = vld [vmem:[#allocation4 + $0x250] sm:$0x11]  ;;  %v7601_v38 = vshll.u32 %v7193_v37, 16  ;;  %v6318_v56 = vrot.slane %v6316_v23, 5  ;;  %v17157_v19 = vld [vmem:[#allocation4 + $0x148] sm:$0xff] }
 0x3e8   :  { %v8049_v18 = vrot.slane %v7865_v4, 5  ;;  %v17106_v34 = vsel %vm15127_vm3, %v13132_v54, %v6744_v28  ;;  %v7416_v59 = vor.u32 %v7415_v42, %v17098_v31  ;;  %v4193_v1 = vld [vmem:[#allocation4 + $0x38] sm:$0x11] }
 0x3e9   :  { %v3839_v41 = vpop.f32.mrb[32].mxu1  ;;  %20468 = vst [vmem:[#allocation158_spill] sm:$0xff] %v17106_v34  ;;  %v7603_v21 = vrot.slane %v7601_v38, 5  ;;  %v17119_v48 = vsel %vm15311_vm7, %v6314_v49, %v6318_v56  ;;  %v17134_v38 = vld [vmem:[#allocation4 + $0x128] sm:$0xee]  ;;  %v4813_v56 = vshrl.u32 %v17157_v19, 16 }
 0x3ea   :  { %v13605_v40 = vadd.f32 %v3839_v41, %v17070_v63  ;;  %v3841_v44 = vpop.f32.mrb[33].mxu1  ;;  %v17115_v22 = vsel %vm15127_vm3, %v13258_v32, %v8049_v18  ;;  %20470 = vst [vmem:[#allocation160_spill] sm:$0xff] %v17119_v48  ;;  %v17168_v34 = vrot.slane %v7416_v59, 4 }
 0x3eb   :  { %20469 = vst [vmem:[#allocation159_spill] sm:$0xff] %v17115_v22  ;;  %v3843_v15 = vpop.f32.mrb[34].mxu1  ;;  %v17131_v32 = vsel %vm15311_vm7, %v6314_v49, %v7603_v21  ;;  %v13606_v4 = vadd.f32 %v3841_v44, %v17086_v6  ;;  %v17146_v49 = vsel %vm15127_vm3, %v12975_v61, %v5316_v53  ;;  %v17148_v44 = vld [vmem:[#allocation4 + $0x138] sm:$0x11]  ;;  %v17150_v21 = vrot.slane %v4595_v46, 4 }
 0x3ec   :  { %v3918_v23 = vmax.f32 %v13605_v40, 0.0  ;;  %v3845_v28 = vpop.f32.mrb[35].mxu1  ;;  %20471 = vst [vmem:[#allocation161_spill] sm:$0xff] %v17131_v32  ;;  %v13607_v40 = vadd.f32 %v3843_v15, %v17070_v63  ;;  %v17159_v61 = vld [vmem:[#allocation4 + $0x158] sm:$0x11]  ;;  %v17170_v0 = vrot.slane %v4813_v56, 4 }
 0x3ed   :  { %v13608_v54 = vadd.f32 %v3845_v28, %v17086_v6  ;;  %v3919_v26 = vmax.f32 %v13606_v4, 0.0  ;;  %v17155_v4 = vrot.slane %v7419_v55, 5  ;;  %v4816_v55 = vshll.u32 %v17157_v19, 16 }
 0x3ee   :  { %v3920_v29 = vmax.f32 %v13607_v40, 0.0 }
 0x3ef   :  { %v3921_v41 = vmax.f32 %v13608_v54, 0.0  ;;  %v13405_v18 = vpack.c.bf16 %v3919_v26, %v3918_v23  ;;  %v4190_v54 = vld [vmem:[#allocation4 + $0x28] sm:$0xff] }
 0x3f1   :  { %v3849_v37 = vpop.f32.mrb[36].mxu1  ;;  %v13406_v53 = vpack.c.bf16 %v3921_v41, %v3920_v29  ;;  %v4031_v26 = vshrl.u32 %v13405_v18, 16 }
 0x3f2   :  { %v13609_v15 = vadd.f32 %v3849_v37, %v17070_v63  ;;  %v3851_v28 = vpop.f32.mrb[37].mxu1 }
 0x3f3   :  { %v13610_v46 = vadd.f32 %v3851_v28, %v17086_v6  ;;  %v3853_v40 = vpop.f32.mrb[38].mxu1  ;;  %v4039_v31 = vshrl.u32 %v13406_v53, 16  ;;  %v4033_v41 = vrot.slane %v4031_v26, 7  ;;  %v4034_v28 = vshll.u32 %v13405_v18, 16  ;;  %v4199_v26 = vld [vmem:[#allocation4 + $0x58] sm:$0x11] }
 0x3f4   :  { %v3922_v23 = vmax.f32 %v13609_v15, 0.0  ;;  %v13611_v37 = vadd.f32 %v3853_v40, %v17070_v63  ;;  %v3855_v22 = vpop.f32.mrb[39].mxu1  ;;  %v4042_v15 = vshll.u32 %v13406_v53, 16 }
 0x3f5   :  { %v3923_v42 = vmax.f32 %v13610_v46, 0.0  ;;  %v13612_v35 = vadd.f32 %v3855_v22, %v17086_v6  ;;  %v4041_v48 = vrot.slane %v4039_v31, 7  ;;  %v4036_v47 = vor.u32 %v4034_v28, %v4033_v41  ;;  %v4202_v31 = vld [vmem:[#allocation4 + $0x68] sm:$0xff] }
 0x3f6   :  { %v3924_v32 = vmax.f32 %v13611_v37, 0.0  ;;  %v4037_v20 = vrot.slane %v4033_v41, 4  ;;  %v17172_v46 = vrot.slane %v4816_v55, 5 }
 0x3f7   :  { %v13407_v62 = vpack.c.bf16 %v3923_v42, %v3922_v23  ;;  %v3925_v40 = vmax.f32 %v13612_v35, 0.0  ;;  %v4044_v22 = vor.u32 %v4042_v15, %v4041_v48  ;;  %v4045_v29 = vrot.slane %v4041_v48, 4 }
 0x3f8   :  { %v17176_v57 = vsel %vm15968_vm9, %v4036_v47, %v4190_v54  ;;  %v4194_v35 = vsel %vm14717_vm10, %v4037_v20, %v4193_v1 }
 0x3f9   :  { %v4047_v18 = vshrl.u32 %v13407_v62, 16  ;;  %v4050_v37 = vshll.u32 %v13407_v62, 16  ;;  %v3859_v59 = vpop.f32.mrb[40].mxu1  ;;  %20472 = vst [vmem:[#allocation162_spill] sm:$0xff] %v17176_v57  ;;  %v13408_v53 = vpack.c.bf16 %v3925_v40, %v3924_v32  ;;  %4192 = vst [vmem:[#allocation4 + $0x28] sm:$0xff] %v17176_v57  ;;  %v4617_v47 = vshrl.u32 %v17176_v57, 16 }
 0x3fa   :  { %v17181_v23 = vadd.f32 %v3859_v59, %v17070_v63  ;;  %v17183_v56 = vpop.f32.mrb[41].mxu1  ;;  %4195 = vst [vmem:[#allocation4 + $0x38] sm:$0x11] %v4194_v35  ;;  %v4620_v54 = vshll.u32 %v17176_v57, 16  ;;  %v17196_v1 = vsel %vm15968_vm9, %v4044_v22, %v4196_v7  ;;  %v4200_v32 = vsel %vm14717_vm10, %v4045_v29, %v4199_v26  ;;  %v4205_v35 = vld [vmem:[#allocation4 + $0x78] sm:$0x11] }
 0x3fb   :  { %v17192_v20 = vpop.f32.mrb[42].mxu1  ;;  %20473 = vst [vmem:[#allocation163_spill] sm:$0xff] %v17196_v1  ;;  %v4049_v55 = vrot.slane %v4047_v18, 7  ;;  %v4055_v42 = vshrl.u32 %v13408_v53, 16  ;;  %v4619_v28 = vrot.slane %v4617_v47, 4  ;;  %4198 = vst [vmem:[#allocation4 + $0x48] sm:$0xff] %v17196_v1 }
 0x3fc   :  { %v17200_v41 = vpop.f32.mrb[43].mxu1  ;;  %v4622_v15 = vrot.slane %v4620_v54, 5  ;;  %4201 = vst [vmem:[#allocation4 + $0x58] sm:$0x11] %v4200_v32  ;;  %v4645_v40 = vshrl.u32 %v17196_v1, 16  ;;  %v4648_v59 = vshll.u32 %v17196_v1, 16 }
 0x3fd   :  { %v4052_v22 = vor.u32 %v4050_v37, %v4049_v55  ;;  %v4053_v26 = vrot.slane %v4049_v55, 4  ;;  %v17209_v54 = vrot.slane %v4055_v42, 7  ;;  %v4058_v30 = vshll.u32 %v13408_v53, 16 }
 0x3fe   :  { %v4623_v18 = vor.u32 %v4622_v15, %v4619_v28  ;;  %v4647_v62 = vrot.slane %v4645_v40, 4  ;;  %v4650_v47 = vrot.slane %v4648_v59, 5  ;;  %v17242_v40 = vsel %vm15311_vm7, %v17168_v34, %v17155_v4 }
 0x3ff   :  { %v17213_v32 = vsel %vm15968_vm9, %v4052_v22, %v4202_v31  ;;  %v4206_v48 = vsel %vm14717_vm10, %v4053_v26, %v4205_v35  ;;  %v4208_v31 = vld [vmem:[#allocation4 + $0x88] sm:$0xff]  ;;  %v4060_v15 = vor.u32 %v4058_v30, %v17209_v54  ;;  %20478 = vst [vmem:[#allocation168_spill] sm:$0xff] %v17242_v40  ;;  %v20479_v59 = vrot.slane %v17148_v44, 5 }
 0x400   :  { %20474 = vst [vmem:[#allocation164_spill] sm:$0xff] %v17213_v32  ;;  %v17218_v39 = vrot.slane %v4623_v18, 4  ;;  %v4651_v29 = vor.u32 %v4650_v47, %v4647_v62  ;;  %4204 = vst [vmem:[#allocation4 + $0x68] sm:$0xff] %v17213_v32  ;;  %v17223_v37 = vcombine.low %v17196_v1, %v17213_v32  ;;  %v17227_v55 = vcombine.high %v17196_v1, %v17213_v32  ;;  %v5187_v28 = vld [vmem:[#allocation4 + $0x28] sm:$0xee] }
 0x401   :  { %4207 = vst [vmem:[#allocation4 + $0x78] sm:$0x11] %v4206_v48  ;;  %v17229_v42 = vpop.f32.mrb[44].mxu1  ;;  %v4517_v53 = vld [vmem:[#allocation4 + $0x38] sm:$0x11]  ;;  %v17235_v62 = vsel %vm15311_vm7, %v17150_v21, %v17142_v8  ;;  %v20480_v35 = vrot.slane %v17134_v38, 9  ;;  %v17257_v44 = vsel %vm15968_vm9, %v4060_v15, %v4208_v31  ;;  %v17293_v50 = vadd.f32 %v17200_v41, %v17086_v6 }
 0x402   :  { %20475 = vst [vmem:[#allocation165_spill] sm:$0xff] %v17223_v37  ;;  %20476 = vst [vmem:[#allocation166_spill] sm:$0xff] %v17227_v55  ;;  %v5189_v48 = vld [vmem:[#allocation4 + $0x38] sm:$0x11]  ;;  %v4626_v8 = vshll.u32 %v4517_v53, 16  ;;  %v12977_v21 = vrot.slane %v5187_v28, 9  ;;  %v17279_v55 = vadd.f32 %v17183_v56, %v17086_v6 }
 0x403   :  { %20477 = vst [vmem:[#allocation167_spill] sm:$0xff] %v17235_v62  ;;  %v17250_v22 = vsel %vm15127_vm3, %v20480_v35, %v20479_v59  ;;  %v5324_v26 = vrot.slane %v5189_v48, 5  ;;  %v5825_v18 = vld [vmem:[#allocation4 + $0x38] sm:$0x11]  ;;  %v17252_v47 = vrot.slane %v4651_v29, 4  ;;  %v4673_v34 = vshrl.u32 %v17213_v32, 16 }
 0x404   :  { %20481 = vst [vmem:[#allocation169_spill] sm:$0xff] %v17250_v22  ;;  %v5910_v30 = vshll.u32 %v5825_v18, 16  ;;  %v6495_v7 = vld [vmem:[#allocation4 + $0x28] sm:$0xee]  ;;  %v6497_v1 = vld [vmem:[#allocation4 + $0x38] sm:$0x11] }
 0x405   :  { %20482 = vst [vmem:[#allocation170_spill] sm:$0xff] %v17257_v44  ;;  %v4628_v4 = vrot.slane %v4626_v8, 5  ;;  %v17263_v53 = vsel %vm15127_vm3, %v12977_v21, %v5324_v26  ;;  %v13103_v28 = vrot.slane %v6495_v7, 9  ;;  %v6628_v29 = vrot.slane %v6497_v1, 5  ;;  %v4521_v48 = vld [vmem:[#allocation4 + $0x58] sm:$0x11] }
 0x406   :  { %4210 = vst [vmem:[#allocation4 + $0x88] sm:$0xff] %v17257_v44  ;;  %v17266_v59 = vpop.f32.mrb[45].mxu1  ;;  %v5912_v15 = vrot.slane %v5910_v30, 5  ;;  %v4654_v18 = vshll.u32 %v4521_v48, 16  ;;  %v5191_v8 = vld [vmem:[#allocation4 + $0x48] sm:$0xee] }
 0x407   :  { %v5193_v38 = vld [vmem:[#allocation4 + $0x58] sm:$0x11]  ;;  %v17275_v7 = vsel %vm15311_vm7, %v17218_v39, %v4628_v4  ;;  %v12979_v1 = vrot.slane %v5191_v8, 9  ;;  %v6499_v37 = vld [vmem:[#allocation4 + $0x48] sm:$0xee]  ;;  %v17287_v4 = vadd.f32 %v17192_v20, %v17070_v63  ;;  %v4675_v52 = vrot.slane %v4673_v34, 4 }
 0x408   :  { %20483 = vst [vmem:[#allocation171_spill] sm:$0xff] %v17275_v7  ;;  %v5332_v21 = vrot.slane %v5193_v38, 5  ;;  %v5829_v26 = vld [vmem:[#allocation4 + $0x58] sm:$0x11]  ;;  %v4656_v48 = vrot.slane %v4654_v18, 5  ;;  %v17289_v38 = vpop.f32.mrb[46].mxu1  ;;  %v17299_v18 = vsel %vm15127_vm3, %v13103_v28, %v6628_v29 }
 0x409   :  { %v6501_v31 = vld [vmem:[#allocation4 + $0x58] sm:$0x11]  ;;  %v5938_v8 = vshll.u32 %v5829_v26, 16  ;;  %v13105_v57 = vrot.slane %v6499_v37, 9  ;;  %v7808_v56 = vld [vmem:[#allocation4 + $0x48] sm:$0xee] }
 0x40a   :  { %v7138_v33 = vld [vmem:[#allocation4 + $0x58] sm:$0x11]  ;;  %v6636_v51 = vrot.slane %v6501_v31, 5  ;;  %v17295_v35 = vpop.f32.mrb[47].mxu1  ;;  %20484 = vst [vmem:[#allocation172_spill] sm:$0xff] %v17299_v18  ;;  %v13231_v20 = vrot.slane %v7808_v56, 9  ;;  %v17326_v28 = vsel %vm15127_vm3, %v12979_v1, %v5332_v21 }
 0x40b   :  { %v7223_v30 = vshll.u32 %v7138_v33, 16  ;;  %v7810_v7 = vld [vmem:[#allocation4 + $0x58] sm:$0x11]  ;;  %v5940_v37 = vrot.slane %v5938_v8, 5  ;;  %v5195_v25 = vld [vmem:[#allocation4 + $0x68] sm:$0xee] }
 0x40c   :  { %v4525_v62 = vld [vmem:[#allocation4 + $0x78] sm:$0x11]  ;;  %v17305_v31 = vsel %vm15127_vm3, %v13105_v57, %v6636_v51  ;;  %v7941_v41 = vrot.slane %v7810_v7, 5  ;;  %v17307_v13 = vpop.f32.mrb[48].mxu1  ;;  %v4676_v56 = vshll.u32 %v17213_v32, 16  ;;  %v17317_v57 = vsel %vm15311_vm7, %v17218_v39, %v5912_v15  ;;  %v4256_v22 = vld [vmem:[#allocation4 + $0x1c8] sm:$0xff] }
 0x40d   :  { %20485 = vst [vmem:[#allocation173_spill] sm:$0xff] %v17305_v31  ;;  %v7225_v29 = vrot.slane %v7223_v30, 5  ;;  %v5197_v26 = vld [vmem:[#allocation4 + $0x78] sm:$0x11]  ;;  %20486 = vst [vmem:[#allocation174_spill] sm:$0xff] %v17317_v57  ;;  %v17322_v51 = vsel %vm15311_vm7, %v17252_v47, %v5940_v37  ;;  %v4682_v34 = vshll.u32 %v4525_v62, 16 }
 0x40e   :  { %20487 = vst [vmem:[#allocation175_spill] sm:$0xff] %v17322_v51  ;;  %v12981_v7 = vrot.slane %v5195_v25, 9  ;;  %v5833_v8 = vld [vmem:[#allocation4 + $0x78] sm:$0x11]  ;;  %v4678_v39 = vrot.slane %v4676_v56, 5  ;;  %v17332_v18 = vpop.f32.mrb[49].mxu1  ;;  %v17337_v25 = vsel %vm15311_vm7, %v17252_v47, %v4656_v48  ;;  %v17346_v1 = vsel %vm15127_vm3, %v13231_v20, %v7941_v41 }
 0x40f   :  { %v7142_v15 = vld [vmem:[#allocation4 + $0x78] sm:$0x11]  ;;  %v7812_v31 = vld [vmem:[#allocation4 + $0x68] sm:$0xee]  ;;  %20488 = vst [vmem:[#allocation176_spill] sm:$0xff] %v17337_v25  ;;  %v17342_v62 = vsel %vm15311_vm7, %v17252_v47, %v7225_v29  ;;  %20490 = vst [vmem:[#allocation178_spill] sm:$0xff] %v17346_v1 }
 0x410   :  { %20489 = vst [vmem:[#allocation177_spill] sm:$0xff] %v17342_v62  ;;  %v5340_v21 = vrot.slane %v5197_v26, 5  ;;  %v6503_v37 = vld [vmem:[#allocation4 + $0x68] sm:$0xee]  ;;  %v7814_v56 = vld [vmem:[#allocation4 + $0x78] sm:$0x11]  ;;  %v4679_v30 = vor.u32 %v4678_v39, %v4675_v52 }
 0x411   :  { %v4684_v33 = vrot.slane %v4682_v34, 5  ;;  %v7251_v51 = vshll.u32 %v7142_v15, 16  ;;  %v13233_v57 = vrot.slane %v7812_v31, 9  ;;  %v17348_v14 = vpop.f32.mrb[50].mxu1  ;;  %v5966_v47 = vshll.u32 %v5833_v8, 16 }
 0x412   :  { %v17352_v48 = vsel %vm15127_vm3, %v12981_v7, %v5340_v21  ;;  %v6505_v29 = vld [vmem:[#allocation4 + $0x78] sm:$0x11]  ;;  %v7949_v12 = vrot.slane %v7814_v56, 5  ;;  %v4061_v20 = vrot.slane %v17209_v54, 4  ;;  %v17355_v41 = vpop.f32.mrb[51].mxu1  ;;  %v4680_v26 = vrot.slane %v4679_v30, 4 }
 0x413   :  { %v13107_v34 = vrot.slane %v6503_v37, 9  ;;  %v3889_v39 = vpop.f32.mrb[52].mxu1  ;;  %v7253_v15 = vrot.slane %v7251_v51, 5  ;;  %v4701_v54 = vshrl.u32 %v17257_v44, 16  ;;  %v6644_v56 = vrot.slane %v6505_v29, 5 }
 0x414   :  { %v17363_v7 = vsel %vm15127_vm3, %v13233_v57, %v7949_v12  ;;  %v4212_v8 = vsel %vm14717_vm10, %v4061_v20, %v4211_v5  ;;  %v17368_v21 = vpop.f32.mrb[53].mxu1  ;;  %v17372_v30 = vsel %vm15311_vm7, %v4680_v26, %v4684_v33  ;;  %v5968_v20 = vrot.slane %v5966_v47, 5  ;;  %v17395_v5 = vld [vmem:[#allocation4 + $0x148] sm:$0xee] }
 0x415   :  { %20491 = vst [vmem:[#allocation179_spill] sm:$0xff] %v17363_v7  ;;  %20492 = vst [vmem:[#allocation180_spill] sm:$0xff] %v17372_v30  ;;  %v17378_v12 = vpop.f32.mrb[54].mxu1  ;;  %v17386_v33 = vsel %vm15311_vm7, %v4680_v26, %v7253_v15  ;;  %v4703_v51 = vrot.slane %v4701_v54, 4  ;;  %v4704_v52 = vshll.u32 %v17257_v44, 16  ;;  %v3927_v57 = vmax.f32 %v17279_v55, 0.0 }
 0x416   :  { %4213 = vst [vmem:[#allocation4 + $0x98] sm:$0x11] %v4212_v8  ;;  %20493 = vst [vmem:[#allocation181_spill] sm:$0xff] %v17386_v33  ;;  %v17388_v29 = vpop.f32.mrb[55].mxu1  ;;  %v17397_v31 = vld [vmem:[#allocation4 + $0x88] sm:$0xee]  ;;  %v17404_v7 = vadd.f32 %v17229_v42, %v17070_v63  ;;  %v20495_v47 = vor.u32 %v17172_v46, %v17170_v0  ;;  %v17421_v55 = vsel %vm15311_vm7, %v4680_v26, %v5968_v20 }
 0x417   :  { %v6507_v15 = vld [vmem:[#allocation4 + $0x88] sm:$0xee]  ;;  %v20494_v37 = vshll.u32 %v17159_v61, 16  ;;  %v4706_v54 = vrot.slane %v4704_v52, 5  ;;  %v3928_v33 = vmax.f32 %v17287_v4, 0.0  ;;  %v3929_v62 = vmax.f32 %v17293_v50, 0.0 }
 0x418   :  { %v17410_v1 = vld [vmem:[#allocation4 + $0x88] sm:$0xee]  ;;  %v17417_v30 = vrot.slane %v20495_v47, 4  ;;  %20496 = vst [vmem:[#allocation182_spill] sm:$0xff] %v17421_v55  ;;  %v17425_v61 = vsel %vm15127_vm3, %v13107_v34, %v6644_v56  ;;  %v20498_v42 = vmax.f32 %v17181_v23, 0.0  ;;  %v13109_v46 = vrot.slane %v6507_v15, 9 }
 0x419   :  { %v17408_v8 = vrot.slane %v20494_v37, 5  ;;  %20497 = vst [vmem:[#allocation183_spill] sm:$0xff] %v17425_v61  ;;  %v17430_v37 = vpop.f32.mrb[56].mxu1  ;;  %v4707_v50 = vor.u32 %v4706_v54, %v4703_v51  ;;  %v17433_v47 = vpack.c.bf16 %v3929_v62, %v3928_v33  ;;  %v3930_v56 = vmax.f32 %v17404_v7, 0.0 }
 0x41a   :  { %v13409_v52 = vpack.c.bf16 %v3927_v57, %v20498_v42  ;;  %v17435_v25 = vpop.f32.mrb[57].mxu1  ;;  %v13618_v23 = vadd.f32 %v17266_v59, %v17086_v6  ;;  %v13619_v57 = vadd.f32 %v17289_v38, %v17070_v63  ;;  %v13620_v62 = vadd.f32 %v17295_v35, %v17086_v6 }
 0x41b   :  { %v17449_v33 = vadd.f32 %v17307_v13, %v17070_v63  ;;  %v17453_v7 = vadd.f32 %v17332_v18, %v17086_v6  ;;  %v17457_v38 = vadd.f32 %v17348_v14, %v17070_v63  ;;  %v17463_v35 = vadd.f32 %v17355_v41, %v17086_v6  ;;  %v17468_v0 = vpop.f32.mrb[58].mxu1 }
 0x41c   :  { %v4063_v4 = vshrl.u32 %v13409_v52, 16  ;;  %v17466_v13 = vadd.f32 %v3889_v39, %v17070_v63  ;;  %v3931_v61 = vmax.f32 %v13618_v23, 0.0  ;;  %v3932_v27 = vmax.f32 %v13619_v57, 0.0 }
 0x41d   :  { %v4529_v26 = vld [vmem:[#allocation4 + $0x98] sm:$0x11]  ;;  %v3933_v32 = vmax.f32 %v13620_v62, 0.0  ;;  %v4220_v62 = vld [vmem:[#allocation4 + $0xc8] sm:$0xff]  ;;  %v3934_v43 = vmax.f32 %v17449_v33, 0.0 }
 0x41e   :  { %v5837_v20 = vld [vmem:[#allocation4 + $0x98] sm:$0x11]  ;;  %v4710_v42 = vshll.u32 %v4529_v26, 16 }
 0x41f   :  { %v17443_v51 = vld [vmem:[#allocation4 + $0x98] sm:$0x11]  ;;  %v5994_v54 = vshll.u32 %v5837_v20, 16  ;;  %v17459_v20 = vrot.slane %v4707_v50, 4  ;;  %v17477_v50 = vadd.f32 %v17368_v21, %v17086_v6 }
 0x420   :  { %v6509_v15 = vld [vmem:[#allocation4 + $0x98] sm:$0x11]  ;;  %v5348_v18 = vrot.slane %v17443_v51, 5 }
 0x421   :  { %v6652_v59 = vrot.slane %v6509_v15, 5  ;;  %v5996_v34 = vrot.slane %v5994_v54, 5  ;;  %v7146_v14 = vld [vmem:[#allocation4 + $0x98] sm:$0x11]  ;;  %v4065_v15 = vrot.slane %v4063_v4, 7  ;;  %v17479_v54 = vpop.f32.mrb[59].mxu1 }
 0x422   :  { %v17490_v51 = vld [vmem:[#allocation4 + $0x98] sm:$0x11]  ;;  %v4066_v4 = vshll.u32 %v13409_v52, 16  ;;  %v17500_v39 = vpop.f32.mrb[60].mxu1  ;;  %v7279_v24 = vshll.u32 %v7146_v14, 16  ;;  %v4071_v52 = vshrl.u32 %v17433_v47, 16 }
 0x423   :  { %v17473_v26 = vsel %vm15127_vm3, %v13109_v46, %v6652_v59  ;;  %v17484_v41 = vsel %vm15311_vm7, %v17459_v20, %v5996_v34  ;;  %v4712_v59 = vrot.slane %v4710_v42, 5  ;;  %v17498_v34 = vadd.f32 %v17378_v12, %v17070_v63  ;;  %v17503_v42 = vpop.f32.mrb[61].mxu1 }
 0x424   :  { %20499 = vst [vmem:[#allocation184_spill] sm:$0xff] %v17473_v26  ;;  %20500 = vst [vmem:[#allocation185_spill] sm:$0xff] %v17484_v41  ;;  %v4068_v46 = vor.u32 %v4066_v4, %v4065_v15  ;;  %v4069_v26 = vrot.slane %v4065_v15, 4  ;;  %v7957_v21 = vrot.slane %v17490_v51, 5  ;;  %v17506_v41 = vpop.f32.mrb[62].mxu1  ;;  %v4073_v4 = vrot.slane %v4071_v52, 7 }
 0x425   :  { %v4074_v15 = vshll.u32 %v17433_v47, 16  ;;  %v17515_v55 = vpop.f32.mrb[63].mxu1  ;;  %v13411_v51 = vpack.c.bf16 %v3931_v61, %v3930_v56  ;;  %v17528_v52 = vpack.c.bf16 %v3933_v32, %v3932_v27  ;;  %v7281_v10 = vrot.slane %v7279_v24, 5 }
 0x426   :  { %v17510_v12 = vsel %vm15968_vm9, %v4068_v46, %v4214_v9  ;;  %v4218_v14 = vsel %vm14717_vm10, %v4069_v26, %v4217_v16  ;;  %v4223_v26 = vld [vmem:[#allocation4 + $0xd8] sm:$0x11]  ;;  %v4077_v46 = vrot.slane %v4073_v4, 4 }
 0x427   :  { %20501 = vst [vmem:[#allocation186_spill] sm:$0xff] %v17510_v12  ;;  %4216 = vst [vmem:[#allocation4 + $0xa8] sm:$0xff] %v17510_v12  ;;  %v17520_v23 = vcombine.low %v17257_v44, %v17510_v12  ;;  %v17524_v57 = vcombine.high %v17257_v44, %v17510_v12  ;;  %v4729_v9 = vshrl.u32 %v17510_v12, 16  ;;  %v4732_v16 = vshll.u32 %v17510_v12, 16 }
 0x428   :  { %4219 = vst [vmem:[#allocation4 + $0xb8] sm:$0x11] %v4218_v14  ;;  %v4076_v47 = vor.u32 %v4074_v15, %v4073_v4  ;;  %v4079_v17 = vshrl.u32 %v13411_v51, 16  ;;  %v20504_v4 = vrot.slane %v17397_v31, 9  ;;  %v4082_v31 = vshll.u32 %v13411_v51, 16 }
 0x429   :  { %20502 = vst [vmem:[#allocation187_spill] sm:$0xff] %v17520_v23  ;;  %20503 = vst [vmem:[#allocation188_spill] sm:$0xff] %v17524_v57  ;;  %v4731_v14 = vrot.slane %v4729_v9, 4  ;;  %v4734_v3 = vrot.slane %v4732_v16, 5  ;;  %v3935_v23 = vmax.f32 %v17453_v7, 0.0  ;;  %v4224_v57 = vsel %vm14717_vm10, %v4077_v46, %v4223_v26 }
 0x42a   :  { %v17534_v44 = vsel %vm15968_vm9, %v4076_v47, %v4220_v62  ;;  %v17542_v27 = vsel %vm15127_vm3, %v20504_v4, %v5348_v18  ;;  %4225 = vst [vmem:[#allocation4 + $0xd8] sm:$0x11] %v4224_v57  ;;  %v17551_v7 = vrot.slane %v4079_v17, 7  ;;  %v4226_v18 = vld [vmem:[#allocation4 + $0xe8] sm:$0xff]  ;;  %v17562_v62 = vsel %vm15311_vm7, %v17459_v20, %v4712_v59 }
 0x42b   :  { %4222 = vst [vmem:[#allocation4 + $0xc8] sm:$0xff] %v17534_v44  ;;  %v4757_v32 = vshrl.u32 %v17534_v44, 16  ;;  %v4760_v24 = vshll.u32 %v17534_v44, 16  ;;  %v4735_v56 = vor.u32 %v4734_v3, %v4731_v14  ;;  %v17557_v16 = vpack.c.bf16 %v3935_v23, %v3934_v43  ;;  %20505 = vst [vmem:[#allocation189_spill] sm:$0xff] %v17562_v62 }
 0x42c   :  { %v17567_v17 = vsel %vm15311_vm7, %v17459_v20, %v7281_v10  ;;  %v20507_v3 = vrot.slane %v17410_v1, 9  ;;  %v4084_v23 = vor.u32 %v4082_v31, %v17551_v7 }
 0x42d   :  { %v17553_v15 = vrot.slane %v4757_v32, 4  ;;  %20506 = vst [vmem:[#allocation190_spill] sm:$0xff] %v17567_v17  ;;  %v4762_v32 = vrot.slane %v4760_v24, 5  ;;  %v4736_v61 = vrot.slane %v4735_v56, 4  ;;  %v20520_v17 = vshll.u32 %v17528_v52, 16 }
 0x42e   :  { %v17573_v26 = vsel %vm15127_vm3, %v20507_v3, %v7957_v21  ;;  %v5203_v46 = vld [vmem:[#allocation4 + $0xa8] sm:$0xee]  ;;  %v17578_v1 = vsel %vm15968_vm9, %v4084_v23, %v4226_v18  ;;  %v17582_v21 = vadd.f32 %v17388_v29, %v17086_v6 }
 0x42f   :  { %20508 = vst [vmem:[#allocation191_spill] sm:$0xff] %v17573_v26  ;;  %v4533_v47 = vld [vmem:[#allocation4 + $0xb8] sm:$0x11]  ;;  %v12985_v14 = vrot.slane %v5203_v46, 9  ;;  %v6511_v10 = vld [vmem:[#allocation4 + $0xa8] sm:$0xee] }
 0x430   :  { %v5205_v43 = vld [vmem:[#allocation4 + $0xb8] sm:$0x11]  ;;  %v4738_v51 = vshll.u32 %v4533_v47, 16  ;;  %v13111_v47 = vrot.slane %v6511_v10, 9  ;;  %4228 = vst [vmem:[#allocation4 + $0xe8] sm:$0xff] %v17578_v1 }
 0x431   :  { %v5356_v59 = vrot.slane %v5205_v43, 5  ;;  %v5841_v4 = vld [vmem:[#allocation4 + $0xb8] sm:$0x11]  ;;  %v7820_v23 = vld [vmem:[#allocation4 + $0xa8] sm:$0xee] }
 0x432   :  { %v6022_v33 = vshll.u32 %v5841_v4, 16  ;;  %v6513_v20 = vld [vmem:[#allocation4 + $0xb8] sm:$0x11]  ;;  %v4740_v3 = vrot.slane %v4738_v51, 5  ;;  %v4085_v51 = vrot.slane %v17551_v7, 4 }
 0x433   :  { %v17586_v31 = vsel %vm15127_vm3, %v12985_v14, %v5356_v59  ;;  %v6660_v46 = vrot.slane %v6513_v20, 5  ;;  %v7150_v24 = vld [vmem:[#allocation4 + $0xb8] sm:$0x11]  ;;  %v13237_v59 = vrot.slane %v7820_v23, 9  ;;  %v4763_v20 = vor.u32 %v4762_v32, %v17553_v15  ;;  %v5207_v57 = vld [vmem:[#allocation4 + $0xc8] sm:$0xee] }
 0x434   :  { %20509 = vst [vmem:[#allocation192_spill] sm:$0xff] %v17586_v31  ;;  %v7307_v43 = vshll.u32 %v7150_v24, 16  ;;  %v7822_v29 = vld [vmem:[#allocation4 + $0xb8] sm:$0x11]  ;;  %v17596_v14 = vsel %vm15311_vm7, %v4736_v61, %v4740_v3  ;;  %v6024_v18 = vrot.slane %v6022_v33, 5  ;;  %v12987_v32 = vrot.slane %v5207_v57, 9 }
 0x435   :  { %20510 = vst [vmem:[#allocation193_spill] sm:$0xff] %v17596_v14  ;;  %v7965_v4 = vrot.slane %v7822_v29, 5  ;;  %v4537_v10 = vld [vmem:[#allocation4 + $0xd8] sm:$0x11]  ;;  %v17605_v3 = vsel %vm15127_vm3, %v13111_v47, %v6660_v46  ;;  %v6515_v29 = vld [vmem:[#allocation4 + $0xc8] sm:$0xee] }
 0x436   :  { %v7309_v9 = vrot.slane %v7307_v43, 5  ;;  %v5209_v12 = vld [vmem:[#allocation4 + $0xd8] sm:$0x11]  ;;  %20511 = vst [vmem:[#allocation194_spill] sm:$0xff] %v17605_v3  ;;  %v4766_v15 = vshll.u32 %v4537_v10, 16  ;;  %v17625_v62 = vsel %vm15311_vm7, %v4736_v61, %v6024_v18  ;;  %v13113_v33 = vrot.slane %v6515_v29, 9 }
 0x437   :  { %v5845_v7 = vld [vmem:[#allocation4 + $0xd8] sm:$0x11]  ;;  %v17609_v23 = vsel %vm15127_vm3, %v13237_v59, %v7965_v4  ;;  %v5364_v47 = vrot.slane %v5209_v12, 5  ;;  %v7824_v14 = vld [vmem:[#allocation4 + $0xc8] sm:$0xee]  ;;  %20514 = vst [vmem:[#allocation197_spill] sm:$0xff] %v17625_v62 }
 0x438   :  { %20512 = vst [vmem:[#allocation195_spill] sm:$0xff] %v17609_v23  ;;  %v17613_v56 = vsel %vm15311_vm7, %v4736_v61, %v7309_v9  ;;  %v6517_v46 = vld [vmem:[#allocation4 + $0xd8] sm:$0x11]  ;;  %v4768_v4 = vrot.slane %v4766_v15, 5  ;;  %v6050_v10 = vshll.u32 %v5845_v7, 16  ;;  %v4764_v12 = vrot.slane %v4763_v20, 4 }
 0x439   :  { %20513 = vst [vmem:[#allocation196_spill] sm:$0xff] %v17613_v56  ;;  %v7154_v24 = vld [vmem:[#allocation4 + $0xd8] sm:$0x11]  ;;  %v6668_v11 = vrot.slane %v6517_v46, 5  ;;  %v13239_v26 = vrot.slane %v7824_v14, 9  ;;  %v17629_v59 = vsel %vm15127_vm3, %v12987_v32, %v5364_v47  ;;  %v4230_v15 = vsel %vm14717_vm10, %v4085_v51, %v4229_v36 }
 0x43a   :  { %v7826_v9 = vld [vmem:[#allocation4 + $0xd8] sm:$0x11]  ;;  %v7335_v43 = vshll.u32 %v7154_v24, 16  ;;  %v6052_v23 = vrot.slane %v6050_v10, 5  ;;  %v17639_v61 = vcombine.low %v17534_v44, %v17578_v1  ;;  %v5211_v18 = vld [vmem:[#allocation4 + $0xe8] sm:$0xee]  ;;  %v17643_v14 = vsel %vm15311_vm7, %v4764_v12, %v4768_v4 }
 0x43b   :  { %v7973_v31 = vrot.slane %v7826_v9, 5  ;;  %v17633_v7 = vsel %vm15127_vm3, %v13113_v33, %v6668_v11  ;;  %20516 = vst [vmem:[#allocation199_spill] sm:$0xff] %v17643_v14  ;;  %4231 = vst [vmem:[#allocation4 + $0xf8] sm:$0x11] %v4230_v15  ;;  %v6519_v36 = vld [vmem:[#allocation4 + $0xe8] sm:$0xee] }
 0x43c   :  { %20515 = vst [vmem:[#allocation198_spill] sm:$0xff] %v17633_v7  ;;  %v17647_v20 = vsel %vm15311_vm7, %v4764_v12, %v6052_v23  ;;  %v17653_v51 = vld [vmem:[#allocation4 + $0xe8] sm:$0xee]  ;;  %v7337_v33 = vrot.slane %v7335_v43, 5  ;;  %v17661_v23 = vcombine.high %v17534_v44, %v17578_v1  ;;  %v4785_v46 = vshrl.u32 %v17578_v1, 16 }
 0x43d   :  { %20517 = vst [vmem:[#allocation200_spill] sm:$0xff] %v17647_v20  ;;  %v17665_v47 = vsel %vm15127_vm3, %v13239_v26, %v7973_v31  ;;  %v4788_v4 = vshll.u32 %v17578_v1, 16  ;;  %v12989_v10 = vrot.slane %v5211_v18, 9  ;;  %v13115_v9 = vrot.slane %v6519_v36, 9  ;;  %v4232_v43 = vld [vmem:[#allocation4 + $0x108] sm:$0xff] }
 0x43e   :  { %20518 = vst [vmem:[#allocation201_spill] sm:$0xff] %v17665_v47  ;;  %v13241_v15 = vrot.slane %v17653_v51, 9  ;;  %v20519_v57 = vshrl.u32 %v17528_v52, 16  ;;  %v4095_v24 = vshrl.u32 %v17557_v16, 16  ;;  %v4787_v32 = vrot.slane %v4785_v46, 4 }
 0x43f   :  { %v4790_v29 = vrot.slane %v4788_v4, 5  ;;  %v4235_v56 = vld [vmem:[#allocation4 + $0x118] sm:$0x11]  ;;  %v3936_v26 = vmax.f32 %v17457_v38, 0.0  ;;  %v3937_v31 = vmax.f32 %v17463_v35, 0.0  ;;  %v4098_v51 = vshll.u32 %v17557_v16, 16 }
 0x440   :  { %v4089_v11 = vrot.slane %v20519_v57, 7  ;;  %v17677_v36 = vrot.slane %v4095_v24, 7  ;;  %v3938_v20 = vmax.f32 %v17466_v13, 0.0  ;;  %v3939_v46 = vmax.f32 %v17477_v50, 0.0 }
 0x441   :  { %v4791_v3 = vor.u32 %v4790_v29, %v4787_v32  ;;  %v17680_v57 = vpack.c.bf16 %v3937_v31, %v3936_v26  ;;  %v17686_v38 = vsel %vm15311_vm7, %v4764_v12, %v7337_v33 }
 0x442   :  { %v4092_v7 = vor.u32 %v20520_v17, %v4089_v11  ;;  %v4093_v18 = vrot.slane %v4089_v11, 4  ;;  %20521 = vst [vmem:[#allocation202_spill] sm:$0xff] %v17686_v38  ;;  %v4541_v35 = vld [vmem:[#allocation4 + $0xf8] sm:$0x11]  ;;  %v4100_v11 = vor.u32 %v4098_v51, %v17677_v36 }
 0x443   :  { %v5213_v4 = vld [vmem:[#allocation4 + $0xf8] sm:$0x11]  ;;  %v4792_v24 = vrot.slane %v4791_v3, 4  ;;  %v4794_v13 = vshll.u32 %v4541_v35, 16 }
 0x444   :  { %v5849_v52 = vld [vmem:[#allocation4 + $0xf8] sm:$0x11]  ;;  %v17690_v17 = vsel %vm15968_vm9, %v4092_v7, %v4232_v43  ;;  %v4236_v16 = vsel %vm14717_vm10, %v4093_v18, %v4235_v56  ;;  %v5372_v32 = vrot.slane %v5213_v4, 5 }
 0x445   :  { %v6078_v50 = vshll.u32 %v5849_v52, 16  ;;  %v6521_v29 = vld [vmem:[#allocation4 + $0xf8] sm:$0x11]  ;;  %4234 = vst [vmem:[#allocation4 + $0x108] sm:$0xff] %v17690_v17  ;;  %4237 = vst [vmem:[#allocation4 + $0x118] sm:$0x11] %v4236_v16 }
 0x446   :  { %v6676_v12 = vrot.slane %v6521_v29, 5  ;;  %v7158_v33 = vld [vmem:[#allocation4 + $0xf8] sm:$0x11]  ;;  %v6097_v56 = vshrl.u32 %v17690_v17, 16  ;;  %v4796_v31 = vrot.slane %v4794_v13, 5  ;;  %v17703_v3 = vsel %vm15127_vm3, %v12989_v10, %v5372_v32 }
 0x447   :  { %v7830_v26 = vld [vmem:[#allocation4 + $0xf8] sm:$0x11]  ;;  %v6080_v18 = vrot.slane %v6078_v50, 5  ;;  %v7363_v51 = vshll.u32 %v7158_v33, 16 }
 0x448   :  { %v17711_v52 = vsel %vm15127_vm3, %v13115_v9, %v6676_v12  ;;  %v7981_v16 = vrot.slane %v7830_v26, 5  ;;  %v17715_v13 = vsel %vm15311_vm7, %v4792_v24, %v4796_v31  ;;  %v6099_v50 = vrot.slane %v6097_v56, 4  ;;  %v4238_v26 = vld [vmem:[#allocation4 + $0x168] sm:$0xff]  ;;  %v4241_v7 = vld [vmem:[#allocation4 + $0x178] sm:$0x11] }
 0x449   :  { %20522 = vst [vmem:[#allocation203_spill] sm:$0xff] %v17711_v52  ;;  %20523 = vst [vmem:[#allocation204_spill] sm:$0xff] %v17715_v13  ;;  %v17719_v10 = vsel %vm15311_vm7, %v4792_v24, %v6080_v18  ;;  %v7365_v32 = vrot.slane %v7363_v51, 5  ;;  %v6100_v12 = vshll.u32 %v17690_v17, 16  ;;  %v17738_v51 = vld [vmem:[#allocation4 + $0x128] sm:$0xff]  ;;  %v17750_v29 = vsel %vm15968_vm9, %v4100_v11, %v4238_v26 }
 0x44a   :  { %20524 = vst [vmem:[#allocation205_spill] sm:$0xff] %v17719_v10  ;;  %v17727_v9 = vsel %vm15127_vm3, %v13241_v15, %v7981_v16  ;;  %20527 = vst [vmem:[#allocation208_spill] sm:$0xff] %v17738_v51  ;;  %v4101_v51 = vrot.slane %v17677_v36, 4  ;;  %v5217_v26 = vld [vmem:[#allocation4 + $0x158] sm:$0x11] }
 0x44b   :  { %20525 = vst [vmem:[#allocation206_spill] sm:$0xff] %v17727_v9  ;;  %v17732_v31 = vsel %vm15311_vm7, %v4792_v24, %v7365_v32  ;;  %v6102_v24 = vrot.slane %v6100_v12, 5  ;;  %v17752_v9 = vpack.c.bf16 %v3939_v46, %v3938_v20  ;;  %4240 = vst [vmem:[#allocation4 + $0x168] sm:$0xff] %v17750_v29 }
 0x44c   :  { %20526 = vst [vmem:[#allocation207_spill] sm:$0xff] %v17732_v31  ;;  %v5853_v33 = vld [vmem:[#allocation4 + $0x118] sm:$0x11]  ;;  %v6523_v32 = vld [vmem:[#allocation4 + $0x108] sm:$0xee]  ;;  %v4242_v36 = vsel %vm14717_vm10, %v4101_v51, %v4241_v7  ;;  %v17807_v51 = vadd.f32 %v17430_v37, %v17070_v63 }
 0x44d   :  { %v6106_v43 = vshll.u32 %v5853_v33, 16  ;;  %v6525_v18 = vld [vmem:[#allocation4 + $0x118] sm:$0x11]  ;;  %v13117_v35 = vrot.slane %v6523_v32, 9  ;;  %v6103_v15 = vor.u32 %v6102_v24, %v6099_v50  ;;  %v7832_v31 = vld [vmem:[#allocation4 + $0x108] sm:$0xee] }
 0x44e   :  { %v7162_v4 = vld [vmem:[#allocation4 + $0x118] sm:$0x11]  ;;  %v6684_v47 = vrot.slane %v6525_v18, 5  ;;  %v13243_v38 = vrot.slane %v7832_v31, 9  ;;  %4243 = vst [vmem:[#allocation4 + $0x178] sm:$0x11] %v4242_v36  ;;  %v17813_v18 = vadd.f32 %v17468_v0, %v17070_v63 }
 0x44f   :  { %v7391_v16 = vshll.u32 %v7162_v4, 16  ;;  %v7834_v12 = vld [vmem:[#allocation4 + $0x118] sm:$0x11]  ;;  %v6108_v33 = vrot.slane %v6106_v43, 5  ;;  %v6104_v62 = vrot.slane %v6103_v15, 4  ;;  %v4841_v15 = vshrl.u32 %v17750_v29, 16 }
 0x450   :  { %v7989_v32 = vrot.slane %v7834_v12, 5  ;;  %v17760_v20 = vsel %vm15127_vm3, %v13117_v35, %v6684_v47  ;;  %v5380_v24 = vrot.slane %v5217_v26, 5  ;;  %v4103_v12 = vshrl.u32 %v17680_v57, 16 }
 0x451   :  { %20528 = vst [vmem:[#allocation209_spill] sm:$0xff] %v17760_v20  ;;  %v7393_v46 = vrot.slane %v7391_v16, 5  ;;  %v17776_v47 = vsel %vm15311_vm7, %v6104_v62, %v6108_v33  ;;  %v4844_v16 = vshll.u32 %v17750_v29, 16  ;;  %v17801_v33 = vsel %vm15311_vm7, %v17417_v30, %v17408_v8 }
 0x452   :  { %v17770_v43 = vsel %vm15127_vm3, %v13243_v38, %v7989_v32  ;;  %20530 = vst [vmem:[#allocation211_spill] sm:$0xff] %v17776_v47  ;;  %20532 = vst [vmem:[#allocation213_spill] sm:$0xff] %v17801_v33  ;;  %v5219_v32 = vld [vmem:[#allocation4 + $0x168] sm:$0xee]  ;;  %v3940_v36 = vmax.f32 %v17498_v34, 0.0  ;;  %v13630_v26 = vadd.f32 %v17435_v25, %v17086_v6  ;;  %v4105_v30 = vrot.slane %v4103_v12, 7 }
 0x453   :  { %20529 = vst [vmem:[#allocation210_spill] sm:$0xff] %v17770_v43  ;;  %v17780_v35 = vsel %vm15311_vm7, %v6104_v62, %v7393_v46  ;;  %v4111_v46 = vshrl.u32 %v17752_v9, 16  ;;  %v4843_v62 = vrot.slane %v4841_v15, 4  ;;  %v4846_v31 = vrot.slane %v4844_v16, 5  ;;  %v4244_v16 = vld [vmem:[#allocation4 + $0x188] sm:$0xff] }
 0x454   :  { %20531 = vst [vmem:[#allocation212_spill] sm:$0xff] %v17780_v35  ;;  %v4106_v8 = vshll.u32 %v17680_v57, 16  ;;  %v3941_v50 = vmax.f32 %v17582_v21, 0.0  ;;  %v20533_v38 = vrot.slane %v17395_v5, 9  ;;  %v12993_v15 = vrot.slane %v5219_v32, 9 }
 0x455   :  { %v4113_v4 = vrot.slane %v4111_v46, 7  ;;  %v4847_v34 = vor.u32 %v4846_v31, %v4843_v62  ;;  %v4114_v25 = vshll.u32 %v17752_v9, 16  ;;  %v4549_v7 = vld [vmem:[#allocation4 + $0x178] sm:$0x11]  ;;  %v3942_v57 = vmax.f32 %v17807_v51, 0.0 }
 0x456   :  { %v17821_v37 = vsel %vm15127_vm3, %v20533_v38, %v5380_v24  ;;  %v5221_v0 = vld [vmem:[#allocation4 + $0x178] sm:$0x11]  ;;  %v4108_v56 = vor.u32 %v4106_v8, %v4105_v30  ;;  %v13416_v12 = vpack.c.bf16 %v3941_v50, %v3940_v36  ;;  %v13632_v21 = vadd.f32 %v17479_v54, %v17086_v6 }
 0x457   :  { %v4850_v31 = vshll.u32 %v4549_v7, 16  ;;  %v5388_v62 = vrot.slane %v5221_v0, 5  ;;  %v4247_v5 = vld [vmem:[#allocation4 + $0x198] sm:$0x11]  ;;  %v3943_v46 = vmax.f32 %v13630_v26, 0.0  ;;  %v3944_v38 = vmax.f32 %v17813_v18, 0.0 }
 0x458   :  { %v17828_v24 = vrot.slane %v4847_v34, 4  ;;  %v5857_v32 = vld [vmem:[#allocation4 + $0x178] sm:$0x11]  ;;  %v4109_v11 = vrot.slane %v4105_v30, 4  ;;  %v17832_v9 = vsel %vm15968_vm9, %v4108_v56, %v4244_v16  ;;  %v4116_v50 = vor.u32 %v4114_v25, %v4113_v4  ;;  %v4250_v30 = vld [vmem:[#allocation4 + $0x1a8] sm:$0xff] }
 0x459   :  { %v4852_v36 = vrot.slane %v4850_v31, 5  ;;  %v17836_v51 = vsel %vm15127_vm3, %v12993_v15, %v5388_v62  ;;  %4246 = vst [vmem:[#allocation4 + $0x188] sm:$0xff] %v17832_v9  ;;  %v4869_v54 = vshrl.u32 %v17832_v9, 16  ;;  %v4117_v7 = vrot.slane %v4113_v4, 4  ;;  %v4253_v8 = vld [vmem:[#allocation4 + $0x1b8] sm:$0x11] }
 0x45a   :  { %v4248_v56 = vsel %vm14717_vm10, %v4109_v11, %v4247_v5  ;;  %v3945_v34 = vmax.f32 %v13632_v21, 0.0  ;;  %v6134_v16 = vshll.u32 %v5857_v32, 16  ;;  %v6527_v25 = vld [vmem:[#allocation4 + $0x168] sm:$0xee]  ;;  %v4872_v0 = vshll.u32 %v17832_v9, 16 }
 0x45b   :  { %v17849_v15 = vsel %vm15311_vm7, %v17828_v24, %v4852_v36  ;;  %4249 = vst [vmem:[#allocation4 + $0x198] sm:$0x11] %v4248_v56  ;;  %v4871_v4 = vrot.slane %v4869_v54, 4  ;;  %v6529_v62 = vld [vmem:[#allocation4 + $0x178] sm:$0x11]  ;;  %v17862_v32 = vsel %vm15968_vm9, %v4116_v50, %v4250_v30  ;;  %v4254_v54 = vsel %vm14717_vm10, %v4117_v7, %v4253_v8 }
 0x45c   :  { %20534 = vst [vmem:[#allocation214_spill] sm:$0xff] %v17849_v15  ;;  %v4874_v36 = vrot.slane %v4872_v0, 5  ;;  %20535 = vst [vmem:[#allocation215_spill] sm:$0xff] %v17862_v32  ;;  %v4119_v56 = vshrl.u32 %v13416_v12, 16  ;;  %v13119_v31 = vrot.slane %v6527_v25, 9  ;;  %v17869_v11 = vcombine.low %v17832_v9, %v17862_v32 }
 0x45d   :  { %4252 = vst [vmem:[#allocation4 + $0x1a8] sm:$0xff] %v17862_v32  ;;  %4255 = vst [vmem:[#allocation4 + $0x1b8] sm:$0x11] %v4254_v54  ;;  %v17873_v21 = vcombine.high %v17832_v9, %v17862_v32  ;;  %v6692_v0 = vrot.slane %v6529_v62, 5  ;;  %v4897_v50 = vshrl.u32 %v17862_v32, 16  ;;  %v17878_v5 = vpack.c.bf16 %v3943_v46, %v3942_v57 }
 0x45e   :  { %v17876_v30 = vrot.slane %v4119_v56, 7  ;;  %v4875_v7 = vor.u32 %v4874_v36, %v4871_v4  ;;  %v4900_v25 = vshll.u32 %v17862_v32, 16  ;;  %v4122_v54 = vshll.u32 %v13416_v12, 16 }
 0x45f   :  { %v17881_v18 = vpack.c.bf16 %v3945_v34, %v3944_v38  ;;  %v6136_v26 = vrot.slane %v6134_v16, 5  ;;  %v17886_v57 = vadd.f32 %v17500_v39, %v17070_v63  ;;  %v17890_v46 = vsel %vm15127_vm3, %v13119_v31, %v6692_v0 }
 0x460   :  { %v6531_v8 = vld [vmem:[#allocation4 + $0x188] sm:$0xee]  ;;  %v4124_v52 = vor.u32 %v4122_v54, %v17876_v30  ;;  %20536 = vst [vmem:[#allocation216_spill] sm:$0xff] %v17890_v46  ;;  %v4899_v4 = vrot.slane %v4897_v50, 4  ;;  %v4876_v36 = vrot.slane %v4875_v7, 4  ;;  %v4902_v47 = vrot.slane %v4900_v25, 5 }
 0x461   :  { %v5223_v40 = vld [vmem:[#allocation4 + $0x188] sm:$0xee]  ;;  %v13121_v35 = vrot.slane %v6531_v8, 9 }
 0x462   :  { %v4553_v43 = vld [vmem:[#allocation4 + $0x198] sm:$0x11]  ;;  %v7840_v16 = vld [vmem:[#allocation4 + $0x188] sm:$0xee]  ;;  %v17894_v54 = vsel %vm15968_vm9, %v4124_v52, %v4256_v22  ;;  %v12995_v39 = vrot.slane %v5223_v40, 9  ;;  %v4903_v0 = vor.u32 %v4902_v47, %v4899_v4  ;;  %v17904_v22 = vsel %vm15311_vm7, %v17828_v24, %v6136_v26 }
 0x463   :  { %v5225_v20 = vld [vmem:[#allocation4 + $0x198] sm:$0x11]  ;;  %v4878_v12 = vshll.u32 %v4553_v43, 16  ;;  %20537 = vst [vmem:[#allocation217_spill] sm:$0xff] %v17894_v54  ;;  %4258 = vst [vmem:[#allocation4 + $0x1c8] sm:$0xff] %v17894_v54 }
 0x464   :  { %v5861_v62 = vld [vmem:[#allocation4 + $0x198] sm:$0x11]  ;;  %v5396_v15 = vrot.slane %v5225_v20, 5  ;;  %v5227_v7 = vld [vmem:[#allocation4 + $0x1a8] sm:$0xee]  ;;  %20539 = vst [vmem:[#allocation219_spill] sm:$0xff] %v17904_v22 }
 0x465   :  { %v6162_v38 = vshll.u32 %v5861_v62, 16  ;;  %v6533_v34 = vld [vmem:[#allocation4 + $0x198] sm:$0x11]  ;;  %v4880_v10 = vrot.slane %v4878_v12, 5  ;;  %v13247_v62 = vrot.slane %v7840_v16, 9  ;;  %v17922_v12 = vrot.slane %v4903_v0, 4 }
 0x466   :  { %v6700_v56 = vrot.slane %v6533_v34, 5  ;;  %v7170_v8 = vld [vmem:[#allocation4 + $0x198] sm:$0x11]  ;;  %v7844_v26 = vld [vmem:[#allocation4 + $0x1a8] sm:$0xee]  ;;  %v12997_v34 = vrot.slane %v5227_v7, 9 }
 0x467   :  { %v6164_v33 = vrot.slane %v6162_v38, 5  ;;  %v4557_v13 = vld [vmem:[#allocation4 + $0x1b8] sm:$0x11]  ;;  %v7447_v31 = vshll.u32 %v7170_v8, 16  ;;  %v17930_v8 = vsel %vm15127_vm3, %v12995_v39, %v5396_v15  ;;  %v13249_v7 = vrot.slane %v7844_v26, 9 }
 0x468   :  { %v17899_v43 = vsel %vm15127_vm3, %v13121_v35, %v6700_v56  ;;  %v4906_v50 = vshll.u32 %v4557_v13, 16  ;;  %v5229_v25 = vld [vmem:[#allocation4 + $0x1b8] sm:$0x11]  ;;  %v17926_v56 = vsel %vm15311_vm7, %v4876_v36, %v4880_v10  ;;  %v4125_v13 = vrot.slane %v17876_v30, 4 }
 0x469   :  { %20538 = vst [vmem:[#allocation218_spill] sm:$0xff] %v17899_v43  ;;  %v17908_v40 = vsel %vm15311_vm7, %v4876_v36, %v6164_v33  ;;  %v7842_v35 = vld [vmem:[#allocation4 + $0x198] sm:$0x11]  ;;  %v17920_v33 = vadd.f32 %v17503_v42, %v17086_v6  ;;  %v5404_v4 = vrot.slane %v5229_v25, 5  ;;  %20541 = vst [vmem:[#allocation221_spill] sm:$0xff] %v17926_v56  ;;  %v7449_v16 = vrot.slane %v7447_v31, 5 }
 0x46a   :  { %20540 = vst [vmem:[#allocation220_spill] sm:$0xff] %v17908_v40  ;;  %v7174_v24 = vld [vmem:[#allocation4 + $0x1b8] sm:$0x11]  ;;  %v4908_v38 = vrot.slane %v4906_v50, 5  ;;  %v8005_v52 = vrot.slane %v7842_v35, 5  ;;  %v4130_v39 = vshll.u32 %v17878_v5, 16 }
 0x46b   :  { %v7846_v20 = vld [vmem:[#allocation4 + $0x1b8] sm:$0x11]  ;;  %v17939_v0 = vsel %vm15127_vm3, %v12997_v34, %v5404_v4  ;;  %v7475_v50 = vshll.u32 %v7174_v24, 16  ;;  %v13636_v24 = vadd.f32 %v17515_v55, %v17086_v6  ;;  %v17955_v26 = vsel %vm15311_vm7, %v4876_v36, %v7449_v16  ;;  %v4262_v31 = vld [vmem:[#allocation4 + $0x1e8] sm:$0xff] }
 0x46c   :  { %v17935_v42 = vsel %vm15311_vm7, %v17922_v12, %v4908_v38  ;;  %v8013_v35 = vrot.slane %v7846_v20, 5  ;;  %v13635_v38 = vadd.f32 %v17506_v41, %v17070_v63  ;;  %20543 = vst [vmem:[#allocation223_spill] sm:$0xff] %v17955_v26  ;;  %v17959_v34 = vsel %vm15127_vm3, %v13247_v62, %v8005_v52  ;;  %v5865_v4 = vld [vmem:[#allocation4 + $0x1b8] sm:$0x11]  ;;  %v18001_v46 = vld [vmem:[#allocation4 + $0x1c8] sm:$0xee] }
 0x46d   :  { %20542 = vst [vmem:[#allocation222_spill] sm:$0xff] %v17935_v42  ;;  %v7477_v25 = vrot.slane %v7475_v50, 5  ;;  %20544 = vst [vmem:[#allocation224_spill] sm:$0xff] %v17959_v34  ;;  %v4259_v47 = vld [vmem:[#allocation4 + $0x1d8] sm:$0x11]  ;;  %v4925_v20 = vshrl.u32 %v17894_v54, 16 }
 0x46e   :  { %v6535_v50 = vld [vmem:[#allocation4 + $0x1a8] sm:$0xee]  ;;  %v6537_v10 = vld [vmem:[#allocation4 + $0x1b8] sm:$0x11]  ;;  %v17970_v6 = vsel %vm15127_vm3, %v13249_v7, %v8013_v35  ;;  %v4928_v55 = vshll.u32 %v17894_v54, 16  ;;  %v6190_v16 = vshll.u32 %v5865_v4, 16  ;;  %v4260_v7 = vsel %vm14717_vm10, %v4125_v13, %v4259_v47 }
 0x46f   :  { %v17966_v63 = vsel %vm15311_vm7, %v17922_v12, %v7477_v25  ;;  %20546 = vst [vmem:[#allocation226_spill] sm:$0xff] %v17970_v6  ;;  %v13123_v35 = vrot.slane %v6535_v50, 9  ;;  %v6708_v15 = vrot.slane %v6537_v10, 5  ;;  %4261 = vst [vmem:[#allocation4 + $0x1d8] sm:$0x11] %v4260_v7  ;;  %v4927_v30 = vrot.slane %v4925_v20, 4 }
 0x470   :  { %20545 = vst [vmem:[#allocation225_spill] sm:$0xff] %v17966_v63  ;;  %v4127_v41 = vshrl.u32 %v17878_v5, 16  ;;  %v4930_v36 = vrot.slane %v4928_v55, 5  ;;  %v4135_v52 = vshrl.u32 %v17881_v18, 16  ;;  %v3946_v62 = vmax.f32 %v17886_v57, 0.0  ;;  %v4268_v55 = vld [vmem:[#allocation4 + $0x208] sm:$0xff] }
 0x471   :  { %v3947_v13 = vmax.f32 %v17920_v33, 0.0  ;;  %v3948_v47 = vmax.f32 %v13635_v38, 0.0  ;;  %v3949_v63 = vmax.f32 %v13636_v24, 0.0  ;;  %v6539_v25 = vld [vmem:[#allocation4 + $0x1c8] sm:$0xee]  ;;  %v4138_v20 = vshll.u32 %v17881_v18, 16 }
 0x472   :  { %v4129_v4 = vrot.slane %v4127_v41, 7  ;;  %v4265_v50 = vld [vmem:[#allocation4 + $0x1f8] sm:$0x11]  ;;  %v4137_v10 = vrot.slane %v4135_v52, 7  ;;  %v6192_v57 = vrot.slane %v6190_v16, 5  ;;  %v17999_v41 = vsel %vm15127_vm3, %v13123_v35, %v6708_v15 }
 0x473   :  { %v4271_v6 = vld [vmem:[#allocation4 + $0x218] sm:$0x11]  ;;  %v17993_v5 = vpack.c.bf16 %v3947_v13, %v3946_v62  ;;  %v17995_v34 = vpack.c.bf16 %v3949_v63, %v3948_v47  ;;  %20547 = vst [vmem:[#allocation227_spill] sm:$0xff] %v17999_v41  ;;  %v5231_v33 = vld [vmem:[#allocation4 + $0x1c8] sm:$0xee]  ;;  %v4931_v43 = vor.u32 %v4930_v36, %v4927_v30  ;;  %v13125_v52 = vrot.slane %v6539_v25, 9 }
 0x474   :  { %v4132_v7 = vor.u32 %v4130_v39, %v4129_v4  ;;  %v4133_v26 = vrot.slane %v4129_v4, 4  ;;  %v4140_v38 = vor.u32 %v4138_v20, %v4137_v10  ;;  %v4141_v24 = vrot.slane %v4137_v10, 4 }
 0x475   :  { %v12999_v25 = vrot.slane %v5231_v33, 9 }
 0x476   :  { %v18005_v18 = vsel %vm15968_vm9, %v4132_v7, %v4262_v31  ;;  %v4266_v39 = vsel %vm14717_vm10, %v4133_v26, %v4265_v50  ;;  %v4561_v63 = vld [vmem:[#allocation4 + $0x1d8] sm:$0x11]  ;;  %v18020_v31 = vsel %vm15968_vm9, %v4140_v38, %v4268_v55  ;;  %v4272_v26 = vsel %vm14717_vm10, %v4141_v24, %v4271_v6 }
 0x477   :  { %20548 = vst [vmem:[#allocation228_spill] sm:$0xff] %v18005_v18  ;;  %v5233_v62 = vld [vmem:[#allocation4 + $0x1d8] sm:$0x11]  ;;  %4264 = vst [vmem:[#allocation4 + $0x1e8] sm:$0xff] %v18005_v18  ;;  %v18012_v15 = vcombine.low %v17894_v54, %v18005_v18  ;;  %v18016_v30 = vcombine.high %v17894_v54, %v18005_v18  ;;  %v4934_v36 = vshll.u32 %v4561_v63, 16  ;;  %v4953_v13 = vshrl.u32 %v18005_v18, 16 }
 0x478   :  { %v5869_v16 = vld [vmem:[#allocation4 + $0x1d8] sm:$0x11]  ;;  %4267 = vst [vmem:[#allocation4 + $0x1f8] sm:$0x11] %v4266_v39  ;;  %4270 = vst [vmem:[#allocation4 + $0x208] sm:$0xff] %v18020_v31  ;;  %v4956_v10 = vshll.u32 %v18005_v18, 16  ;;  %v18034_v6 = vsel %vm15311_vm7, %v17922_v12, %v6192_v57 }
 0x479   :  { %v6218_v35 = vshll.u32 %v5869_v16, 16  ;;  %v6541_v4 = vld [vmem:[#allocation4 + $0x1d8] sm:$0x11]  ;;  %4273 = vst [vmem:[#allocation4 + $0x218] sm:$0x11] %v4272_v26  ;;  %20549 = vst [vmem:[#allocation229_spill] sm:$0xff] %v18034_v6 }
 0x47a   :  { %v6716_v47 = vrot.slane %v6541_v4, 5  ;;  %v7178_v50 = vld [vmem:[#allocation4 + $0x1d8] sm:$0x11]  ;;  %v4932_v55 = vrot.slane %v4931_v43, 4  ;;  %v13251_v24 = vrot.slane %v18001_v46, 9  ;;  %v5412_v39 = vrot.slane %v5233_v62, 5 }
 0x47b   :  { %v6220_v33 = vrot.slane %v6218_v35, 5  ;;  %v7850_v38 = vld [vmem:[#allocation4 + $0x1d8] sm:$0x11]  ;;  %v4955_v16 = vrot.slane %v4953_v13, 4  ;;  %v4958_v26 = vrot.slane %v4956_v10, 5  ;;  %v7503_v57 = vshll.u32 %v7178_v50, 16 }
 0x47c   :  { %v18039_v63 = vsel %vm15127_vm3, %v13125_v52, %v6716_v47  ;;  %v4936_v35 = vrot.slane %v4934_v36, 5  ;;  %v8021_v62 = vrot.slane %v7850_v38, 5  ;;  %v18053_v13 = vld [vmem:[#allocation4 + $0x268] sm:$0xff]  ;;  %v18058_v36 = vsel %vm15127_vm3, %v12999_v25, %v5412_v39 }
 0x47d   :  { %20550 = vst [vmem:[#allocation230_spill] sm:$0xff] %v18039_v63  ;;  %v18043_v4 = vsel %vm15311_vm7, %v4932_v55, %v6220_v33  ;;  %20552 = vst [vmem:[#allocation232_spill] sm:$0xff] %v18053_v13  ;;  %v4959_v10 = vor.u32 %v4958_v26, %v4955_v16  ;;  %v7634_v43 = vshrl.u32 %v18053_v13, 16  ;;  %v7505_v50 = vrot.slane %v7503_v57, 5 }
 0x47e   :  { %20551 = vst [vmem:[#allocation231_spill] sm:$0xff] %v18043_v4  ;;  %v5235_v33 = vld [vmem:[#allocation4 + $0x1e8] sm:$0xee]  ;;  %v4143_v52 = vshrl.u32 %v17993_v5, 16  ;;  %v7637_v38 = vshll.u32 %v18053_v13, 16  ;;  %v18064_v16 = vsel %vm15311_vm7, %v4932_v55, %v4936_v35  ;;  %v18072_v25 = vsel %vm15127_vm3, %v13251_v24, %v8021_v62 }
 0x47f   :  { %v4565_v47 = vld [vmem:[#allocation4 + $0x1f8] sm:$0x11]  ;;  %v13001_v12 = vrot.slane %v5235_v33, 9  ;;  %20553 = vst [vmem:[#allocation233_spill] sm:$0xff] %v18064_v16  ;;  %v4960_v26 = vrot.slane %v4959_v10, 4  ;;  %20554 = vst [vmem:[#allocation234_spill] sm:$0xff] %v18072_v25 }
 0x480   :  { %v5237_v20 = vld [vmem:[#allocation4 + $0x1f8] sm:$0x11]  ;;  %v4962_v7 = vshll.u32 %v4565_v47, 16  ;;  %v6543_v33 = vld [vmem:[#allocation4 + $0x1e8] sm:$0xee]  ;;  %v7636_v42 = vrot.slane %v7634_v43, 4 }
 0x481   :  { %v5420_v40 = vrot.slane %v5237_v20, 5  ;;  %v5873_v46 = vld [vmem:[#allocation4 + $0x1f8] sm:$0x11]  ;;  %v7852_v41 = vld [vmem:[#allocation4 + $0x1e8] sm:$0xee]  ;;  %v13127_v39 = vrot.slane %v6543_v33, 9 }
 0x482   :  { %v4964_v47 = vrot.slane %v4962_v7, 5  ;;  %v7182_v63 = vld [vmem:[#allocation4 + $0x1f8] sm:$0x11]  ;;  %v13253_v4 = vrot.slane %v7852_v41, 9  ;;  %v4984_v41 = vshll.u32 %v18020_v31, 16  ;;  %v4145_v32 = vrot.slane %v4143_v52, 7 }
 0x483   :  { %v18068_v20 = vsel %vm15127_vm3, %v13001_v12, %v5420_v40  ;;  %v7531_v35 = vshll.u32 %v7182_v63, 16  ;;  %v7854_v10 = vld [vmem:[#allocation4 + $0x1f8] sm:$0x11]  ;;  %v6246_v40 = vshll.u32 %v5873_v46, 16  ;;  %v18088_v63 = vsel %vm15311_vm7, %v4932_v55, %v7505_v50  ;;  %v6547_v57 = vld [vmem:[#allocation4 + $0x208] sm:$0xee] }
 0x484   :  { %v18080_v7 = vsel %vm15311_vm7, %v4960_v26, %v4964_v47  ;;  %v6545_v12 = vld [vmem:[#allocation4 + $0x1f8] sm:$0x11]  ;;  %v8029_v6 = vrot.slane %v7854_v10, 5  ;;  %20556 = vst [vmem:[#allocation236_spill] sm:$0xff] %v18088_v63  ;;  %v4981_v46 = vshrl.u32 %v18020_v31, 16  ;;  %v13129_v16 = vrot.slane %v6547_v57, 9 }
 0x485   :  { %20555 = vst [vmem:[#allocation235_spill] sm:$0xff] %v18080_v7  ;;  %v7533_v22 = vrot.slane %v7531_v35, 5  ;;  %v5877_v10 = vld [vmem:[#allocation4 + $0x218] sm:$0x11]  ;;  %v6724_v24 = vrot.slane %v6545_v12, 5  ;;  %v4986_v7 = vrot.slane %v4984_v41, 5 }
 0x486   :  { %v18092_v47 = vsel %vm15127_vm3, %v13253_v4, %v8029_v6  ;;  %v6549_v50 = vld [vmem:[#allocation4 + $0x218] sm:$0x11]  ;;  %v4983_v35 = vrot.slane %v4981_v46, 4  ;;  %v6274_v12 = vshll.u32 %v5877_v10, 16  ;;  %v6248_v56 = vrot.slane %v6246_v40, 5  ;;  %v4274_v43 = vld [vmem:[#allocation4 + $0x228] sm:$0xff] }
 0x487   :  { %20557 = vst [vmem:[#allocation237_spill] sm:$0xff] %v18092_v47  ;;  %v18098_v62 = vsel %vm15311_vm7, %v4960_v26, %v7533_v22  ;;  %v7639_v22 = vrot.slane %v7637_v38, 5  ;;  %v6732_v18 = vrot.slane %v6549_v50, 5  ;;  %v4569_v33 = vld [vmem:[#allocation4 + $0x218] sm:$0x11]  ;;  %v4146_v55 = vshll.u32 %v17993_v5, 16 }
 0x488   :  { %20558 = vst [vmem:[#allocation238_spill] sm:$0xff] %v18098_v62  ;;  %v4987_v14 = vor.u32 %v4986_v7, %v4983_v35  ;;  %v6276_v54 = vrot.slane %v6274_v12, 5  ;;  %v18111_v6 = vsel %vm15127_vm3, %v13127_v39, %v6724_v24  ;;  %v4151_v38 = vshrl.u32 %v17995_v34, 16  ;;  %v4277_v7 = vld [vmem:[#allocation4 + $0x238] sm:$0x11] }
 0x489   :  { %20559 = vst [vmem:[#allocation239_spill] sm:$0xff] %v18111_v6  ;;  %v18117_v46 = vsel %vm15127_vm3, %v13129_v16, %v6732_v18  ;;  %v4148_v5 = vor.u32 %v4146_v55, %v4145_v32  ;;  %v7640_v40 = vor.u32 %v7639_v22, %v7636_v42  ;;  %v4990_v39 = vshll.u32 %v4569_v33, 16  ;;  %v7186_v16 = vld [vmem:[#allocation4 + $0x218] sm:$0x11]  ;;  %v5239_v10 = vld [vmem:[#allocation4 + $0x208] sm:$0xee] }
 0x48a   :  { %v18113_v47 = vrot.slane %v4987_v14, 4  ;;  %20560 = vst [vmem:[#allocation240_spill] sm:$0xff] %v18117_v46  ;;  %v18126_v14 = vsel %vm15311_vm7, %v4960_v26, %v6248_v56  ;;  %v4149_v24 = vrot.slane %v4145_v32, 4  ;;  %v4283_v41 = vld [vmem:[#allocation4 + $0x258] sm:$0x11]  ;;  %v4153_v26 = vrot.slane %v4151_v38, 7 }
 0x48b   :  { %20561 = vst [vmem:[#allocation241_spill] sm:$0xff] %v18126_v14  ;;  %v18139_v56 = vsel %vm15968_vm9, %v4148_v5, %v4274_v43  ;;  %v7198_v33 = vld [vmem:[#allocation4 + $0x278] sm:$0x11]  ;;  %v7856_v35 = vld [vmem:[#allocation4 + $0x208] sm:$0xee]  ;;  %v7559_v43 = vshll.u32 %v7186_v16, 16 }
 0x48c   :  { %v18131_v18 = vsel %vm15311_vm7, %v18113_v47, %v6276_v54  ;;  %v5241_v55 = vld [vmem:[#allocation4 + $0x218] sm:$0x11]  ;;  %4276 = vst [vmem:[#allocation4 + $0x228] sm:$0xff] %v18139_v56  ;;  %v4278_v32 = vsel %vm14717_vm10, %v4149_v24, %v4277_v7  ;;  %v18146_v54 = vcombine.low %v18020_v31, %v18139_v56  ;;  %v18150_v12 = vcombine.high %v18020_v31, %v18139_v56  ;;  %v4280_v24 = vld [vmem:[#allocation4 + $0x248] sm:$0xff] }
 0x48d   :  { %20562 = vst [vmem:[#allocation242_spill] sm:$0xff] %v18131_v18  ;;  %v5009_v22 = vshrl.u32 %v18139_v56, 16  ;;  %v7858_v38 = vld [vmem:[#allocation4 + $0x218] sm:$0x11]  ;;  %4279 = vst [vmem:[#allocation4 + $0x238] sm:$0x11] %v4278_v32 }
 0x48e   :  { %v5012_v5 = vshll.u32 %v18139_v56, 16  ;;  %v4154_v4 = vshll.u32 %v17995_v34, 16  ;;  %v4157_v57 = vrot.slane %v4153_v26, 4  ;;  %v13003_v52 = vrot.slane %v5239_v10, 9  ;;  %v18155_v50 = vld [vmem:[#allocation4 + $0x268] sm:$0xee] }
 0x48f   :  { %v5011_v7 = vrot.slane %v5009_v22, 4  ;;  %v7643_v25 = vshll.u32 %v7198_v33, 16  ;;  %v18159_v46 = vld [vmem:[#allocation4 + $0x278] sm:$0x11]  ;;  %v4992_v16 = vrot.slane %v4990_v39, 5  ;;  %v5428_v32 = vrot.slane %v5241_v55, 5 }
 0x490   :  { %v5014_v42 = vrot.slane %v5012_v5, 5  ;;  %v4156_v62 = vor.u32 %v4154_v4, %v4153_v26  ;;  %v4284_v63 = vsel %vm14717_vm10, %v4157_v57, %v4283_v41  ;;  %v13255_v6 = vrot.slane %v7856_v35, 9 }
 0x491   :  { %v8037_v18 = vrot.slane %v7858_v38, 5  ;;  %4285 = vst [vmem:[#allocation4 + $0x258] sm:$0x11] %v4284_v63  ;;  %v7561_v34 = vrot.slane %v7559_v43, 5  ;;  %v18165_v22 = vrot.slane %v7640_v40, 4  ;;  %v8061_v63 = vrot.slane %v18159_v46, 5 }
 0x492   :  { %v18163_v10 = vsel %vm15968_vm9, %v4156_v62, %v4280_v24  ;;  %v5015_v26 = vor.u32 %v5014_v42, %v5011_v7  ;;  %v7645_v42 = vrot.slane %v7643_v25, 5  ;;  %v18182_v38 = vsel %vm15127_vm3, %v13003_v52, %v5428_v32 }
 0x493   :  { %20563 = vst [vmem:[#allocation243_spill] sm:$0xff] %v18163_v10  ;;  %4282 = vst [vmem:[#allocation4 + $0x248] sm:$0xff] %v18163_v10  ;;  %v5243_v39 = vld [vmem:[#allocation4 + $0x228] sm:$0xee]  ;;  %v6321_v45 = vshrl.u32 %v18163_v10, 16  ;;  %v6324_v43 = vshll.u32 %v18163_v10, 16  ;;  %v18186_v46 = vsel %vm15127_vm3, %v13255_v6, %v8037_v18  ;;  %v18191_v25 = vsel %vm15311_vm7, %v18113_v47, %v4992_v16 }
 0x494   :  { %v6551_v41 = vld [vmem:[#allocation4 + $0x228] sm:$0xee]  ;;  %v4573_v33 = vld [vmem:[#allocation4 + $0x238] sm:$0x11]  ;;  %v13005_v35 = vrot.slane %v5243_v39, 9  ;;  %20564 = vst [vmem:[#allocation244_spill] sm:$0xff] %v18191_v25  ;;  %v18196_v39 = vsel %vm15311_vm7, %v18113_v47, %v7561_v34 }
 0x495   :  { %v5245_v55 = vld [vmem:[#allocation4 + $0x238] sm:$0x11]  ;;  %v5018_v5 = vshll.u32 %v4573_v33, 16  ;;  %v5016_v52 = vrot.slane %v5015_v26, 4  ;;  %v7860_v2 = vld [vmem:[#allocation4 + $0x228] sm:$0xee] }
 0x496   :  { %v5436_v7 = vrot.slane %v5245_v55, 5  ;;  %v5881_v24 = vld [vmem:[#allocation4 + $0x238] sm:$0x11]  ;;  %v13257_v57 = vrot.slane %v7860_v2, 9  ;;  %v13131_v47 = vrot.slane %v6551_v41, 9  ;;  %v6326_v14 = vrot.slane %v6324_v43, 5 }
 0x497   :  { %v6553_v62 = vld [vmem:[#allocation4 + $0x238] sm:$0x11]  ;;  %v6302_v32 = vshll.u32 %v5881_v24, 16  ;;  %v5020_v6 = vrot.slane %v5018_v5, 5  ;;  %v20566_v25 = vrot.slane %v18155_v50, 9 }
 0x498   :  { %v7190_v40 = vld [vmem:[#allocation4 + $0x238] sm:$0x11]  ;;  %v18200_v18 = vsel %vm15127_vm3, %v13005_v35, %v5436_v7  ;;  %v6740_v34 = vrot.slane %v6553_v62, 5  ;;  %v6323_v35 = vrot.slane %v6321_v45, 4 }
 0x499   :  { %v7587_v33 = vshll.u32 %v7190_v40, 16  ;;  %v7862_v55 = vld [vmem:[#allocation4 + $0x238] sm:$0x11]  ;;  %v18208_v24 = vsel %vm15311_vm7, %v5016_v52, %v5020_v6  ;;  %v6304_v16 = vrot.slane %v6302_v32, 5  ;;  %v18239_v43 = vsel %vm15127_vm3, %v20566_v25, %v8061_v63 }
 0x49a   :  { %v5885_v26 = vld [vmem:[#allocation4 + $0x258] sm:$0x11]  ;;  %20565 = vst [vmem:[#allocation245_spill] sm:$0xff] %v18208_v24  ;;  %v8045_v13 = vrot.slane %v7862_v55, 5  ;;  %v6555_v7 = vld [vmem:[#allocation4 + $0x248] sm:$0xee]  ;;  %v6327_v40 = vor.u32 %v6326_v14, %v6323_v35  ;;  %v18243_v32 = vsel %vm15127_vm3, %v13131_v47, %v6740_v34 }
 0x49b   :  { %v7589_v5 = vrot.slane %v7587_v33, 5  ;;  %v6557_v4 = vld [vmem:[#allocation4 + $0x258] sm:$0x11]  ;;  %v6330_v45 = vshll.u32 %v5885_v26, 16  ;;  %v13133_v33 = vrot.slane %v6555_v7, 9  ;;  %v18233_v26 = vsel %vm15311_vm7, %v18165_v22, %v7645_v42 }
 0x49c   :  { %v7194_v41 = vld [vmem:[#allocation4 + $0x258] sm:$0x11]  ;;  %v18220_v6 = vsel %vm15127_vm3, %v13257_v57, %v8045_v13  ;;  %v7864_v55 = vld [vmem:[#allocation4 + $0x248] sm:$0xee]  ;;  %v6748_v13 = vrot.slane %v6557_v4, 5  ;;  %v6328_v14 = vrot.slane %v6327_v40, 4  ;;  %v18251_v22 = vsel %vm15311_vm7, %v5016_v52, %v6304_v16 }
 0x49d   :  { %v18216_v62 = vsel %vm15311_vm7, %v5016_v52, %v7589_v5  ;;  %v7866_v10 = vld [vmem:[#allocation4 + $0x258] sm:$0x11]  ;;  %v6332_v24 = vrot.slane %v6330_v45, 5  ;;  %v7615_v57 = vshll.u32 %v7194_v41, 16  ;;  %v13259_v7 = vrot.slane %v7864_v55, 9 }
 0x49e   :  { %v8053_v2 = vrot.slane %v7866_v10, 5  ;;  %v18247_v4 = vsel %vm15127_vm3, %v13133_v33, %v6748_v13 }
 0x49f   :  { %v7617_v35 = vrot.slane %v7615_v57, 5  ;;  %v13165_v10 = vcombine.high %v18243_v32, %v18247_v4  ;;  %v18263_v42 = vsel %vm15311_vm7, %v6328_v14, %v6332_v24 }
 0x4a0   :  { %v18259_v63 = vsel %vm15127_vm3, %v13259_v7, %v8053_v2  ;;  %v13100_v47 = vcombine.low %v18251_v22, %v18263_v42  ;;  %v13101_v60 = vcombine.high %v18251_v22, %v18263_v42 }
 0x4a1   :  { %v18267_v25 = vsel %vm15311_vm7, %v6328_v14, %v7617_v35 }
 0x4a2   :  { %14540 = dma.done.wait [#allocation10 + $0x1], 73728 }
 0x4a3   :  { %14541 = vsyncadd [#allocation10 + $0x1], 4294893568  ;;  %v20567_v24 = vcombine.high %v17146_v49, %v17263_v53  ;;  %v20568_v2 = vld [vmem:[#allocation33_spill] sm:$0xff]  ;;  %v8675_v33 = vld [vmem:[#allocation8 + $0x500] sm:$0xff]  ;;  %vm11345_vm10 = vcmask 1041409   ;;  %vm12690_vm11 = vcmask 254976  }
 0x4a4   :  { %v20569_v40 = vld [vmem:[#allocation41_spill] sm:$0xff]  ;;  %v8678_v55 = vld [vmem:[#allocation8 + $0x518] sm:$0xff]  ;;  %v8679_v7 = vld [vmem:[#allocation8 + $0x520] sm:$0xff] }
 0x4a5   :  { %9700 = vmatprep.mubr.bf16.mxu0 %v20567_v24  ;;  %v20570_v41 = vcombine.high %v20568_v2, %v20569_v40  ;;  %v8676_v45 = vld [vmem:[#allocation8 + $0x508] sm:$0xff]  ;;  %v8677_v13 = vld [vmem:[#allocation8 + $0x510] sm:$0xff]  ;;  %v8682_v14 = vld [vmem:[#allocation8 + $0x538] sm:$0xff] }
 0x4a6   :  { %9668 = vmatprep.subr.bf16.mxu0 %v8676_v45  ;;  %v8680_v57 = vld [vmem:[#allocation8 + $0x528] sm:$0xff]  ;;  %v8681_v35 = vld [vmem:[#allocation8 + $0x530] sm:$0xff]  ;;  %v8683_v34 = vld [vmem:[#allocation8 + $0x540] sm:$0xff] }
 0x4a7   :  { %9135 = vmatprep.mubr.bf16.mxu1 %v20570_v41  ;;  %9669 = vmatpush1.bf16.msra.mxu0 %v8675_v33  ;;  %v8684_v24 = vld [vmem:[#allocation8 + $0x548] sm:$0xff]  ;;  %v8686_v41 = vld [vmem:[#allocation8 + $0x558] sm:$0xff]  ;;  %v8685_v58 = vld [vmem:[#allocation8 + $0x550] sm:$0xff] }
 0x4a8   :  { %9670 = vmatprep.subr.bf16.mxu0 %v8678_v55  ;;  %v8688_v45 = vld [vmem:[#allocation8 + $0x568] sm:$0xff]  ;;  %v8687_v33 = vld [vmem:[#allocation8 + $0x560] sm:$0xff]  ;;  %v8690_v55 = vld [vmem:[#allocation8 + $0x578] sm:$0xff] }
 0x4a9   :  { %v8518_v52 = vld [vmem:[#allocation8 + $0x18] sm:$0xff]  ;;  %v8693_v16 = vld [vmem:[#allocation8 + $0x590] sm:$0xff]  ;;  %v8867_v22 = vld [vmem:[#allocation8 + $0xb00] sm:$0xff] }
 0x4aa   :  { %v8590_v5 = vld [vmem:[#allocation8 + $0x258] sm:$0xff] }
 0x4ab   :  { %9671 = vmatpush1.bf16.msra.mxu0 %v8677_v13  ;;  %v8516_v13 = vld [vmem:[#allocation8 + $0x8] sm:$0xff]  ;;  %v8594_v50 = vld [vmem:[#allocation8 + $0x278] sm:$0xff] }
 0x4ac   :  { %9672 = vmatprep.subr.bf16.mxu0 %v8680_v57  ;;  %v8515_v57 = vld [vmem:[#allocation8] sm:$0xff]  ;;  %9103 = vmatprep.subr.bf16.mxu1 %v8516_v13  ;;  %v8696_v13 = vld [vmem:[#allocation8 + $0x5a8] sm:$0xff]  ;;  %v8870_v42 = vld [vmem:[#allocation8 + $0xb18] sm:$0xff] }
 0x4ad   :  { %9104 = vmatpush1.bf16.msra.mxu1 %v8515_v57  ;;  %v8523_v57 = vld [vmem:[#allocation8 + $0x40] sm:$0xff] }
 0x4ae   :  { %9105 = vmatprep.subr.bf16.mxu1 %v8518_v52  ;;  %v8695_v52 = vld [vmem:[#allocation8 + $0x5a0] sm:$0xff] }
 0x4af   :  { %9673 = vmatpush1.bf16.msra.mxu0 %v8679_v7  ;;  %v8689_v7 = vld [vmem:[#allocation8 + $0x570] sm:$0xff] }
 0x4b0   :  { %9674 = vmatprep.subr.bf16.mxu0 %v8682_v14  ;;  %v8517_v14 = vld [vmem:[#allocation8 + $0x10] sm:$0xff] }
 0x4b1   :  { %9106 = vmatpush1.bf16.msra.mxu1 %v8517_v14  ;;  %v8526_v14 = vld [vmem:[#allocation8 + $0x58] sm:$0xff] }
 0x4b3   :  { %9675 = vmatpush1.bf16.msra.mxu0 %v8681_v35  ;;  %v8692_v35 = vld [vmem:[#allocation8 + $0x588] sm:$0xff] }
 0x4b4   :  { %9676 = vmatprep.subr.bf16.mxu0 %v8684_v24  ;;  %v8520_v24 = vld [vmem:[#allocation8 + $0x28] sm:$0xff] }
 0x4b5   :  { %9107 = vmatprep.subr.bf16.mxu1 %v8520_v24  ;;  %v8700_v24 = vld [vmem:[#allocation8 + $0x5c8] sm:$0xff] }
 0x4b7   :  { %9677 = vmatpush1.bf16.msra.mxu0 %v8683_v34  ;;  %v8691_v34 = vld [vmem:[#allocation8 + $0x580] sm:$0xff] }
 0x4b8   :  { %9678 = vmatprep.subr.bf16.mxu0 %v8686_v41  ;;  %v8519_v41 = vld [vmem:[#allocation8 + $0x20] sm:$0xff] }
 0x4b9   :  { %9108 = vmatpush1.bf16.msra.mxu1 %v8519_v41  ;;  %v8528_v41 = vld [vmem:[#allocation8 + $0x68] sm:$0xff] }
 0x4bb   :  { %9679 = vmatpush1.bf16.msra.mxu0 %v8685_v58  ;;  %v8694_v58 = vld [vmem:[#allocation8 + $0x598] sm:$0xff] }
 0x4bc   :  { %9680 = vmatprep.subr.bf16.mxu0 %v8688_v45  ;;  %v8522_v45 = vld [vmem:[#allocation8 + $0x38] sm:$0xff] }
 0x4bd   :  { %9109 = vmatprep.subr.bf16.mxu1 %v8522_v45  ;;  %v8527_v45 = vld [vmem:[#allocation8 + $0x60] sm:$0xff] }
 0x4bf   :  { %9681 = vmatpush1.bf16.msra.mxu0 %v8687_v33  ;;  %v8521_v33 = vld [vmem:[#allocation8 + $0x30] sm:$0xff] }
 0x4c0   :  { %9682 = vmatprep.subr.bf16.mxu0 %v8690_v55  ;;  %v8524_v55 = vld [vmem:[#allocation8 + $0x48] sm:$0xff]  ;;  %9110 = vmatpush1.bf16.msra.mxu1 %v8521_v33  ;;  %v8530_v33 = vld [vmem:[#allocation8 + $0x78] sm:$0xff] }
 0x4c1   :  { %9111 = vmatprep.subr.bf16.mxu1 %v8524_v55  ;;  %v8704_v55 = vld [vmem:[#allocation8 + $0x5e8] sm:$0xff] }
 0x4c3   :  { %9683 = vmatpush1.bf16.msra.mxu0 %v8689_v7  ;;  %v8698_v7 = vld [vmem:[#allocation8 + $0x5b8] sm:$0xff] }
 0x4c4   :  { %9684 = vmatprep.subr.bf16.mxu0 %v8692_v35  ;;  %v8697_v35 = vld [vmem:[#allocation8 + $0x5b0] sm:$0xff]  ;;  %9112 = vmatpush1.bf16.msra.mxu1 %v8523_v57  ;;  %v8532_v57 = vld [vmem:[#allocation8 + $0x88] sm:$0xff] }
 0x4c5   :  { %9113 = vmatprep.subr.bf16.mxu1 %v8526_v14  ;;  %v8531_v14 = vld [vmem:[#allocation8 + $0x80] sm:$0xff] }
 0x4c7   :  { %9685 = vmatpush1.bf16.msra.mxu0 %v8691_v34  ;;  %v8525_v34 = vld [vmem:[#allocation8 + $0x50] sm:$0xff] }
 0x4c8   :  { %9686 = vmatprep.subr.bf16.mxu0 %v8694_v58  ;;  %v8699_v58 = vld [vmem:[#allocation8 + $0x5c0] sm:$0xff]  ;;  %9114 = vmatpush1.bf16.msra.mxu1 %v8525_v34  ;;  %v8534_v34 = vld [vmem:[#allocation8 + $0x98] sm:$0xff] }
 0x4c9   :  { %9115 = vmatprep.subr.bf16.mxu1 %v8528_v41  ;;  %v8708_v41 = vld [vmem:[#allocation8 + $0x608] sm:$0xff] }
 0x4cb   :  { %9687 = vmatpush1.bf16.msra.mxu0 %v8693_v16  ;;  %v8702_v16 = vld [vmem:[#allocation8 + $0x5d8] sm:$0xff] }
 0x4cc   :  { %9688 = vmatprep.subr.bf16.mxu0 %v8696_v13  ;;  %v8701_v13 = vld [vmem:[#allocation8 + $0x5d0] sm:$0xff]  ;;  %9116 = vmatpush1.bf16.msra.mxu1 %v8527_v45  ;;  %v8536_v45 = vld [vmem:[#allocation8 + $0xa8] sm:$0xff] }
 0x4cd   :  { %9117 = vmatprep.subr.bf16.mxu1 %v8530_v33  ;;  %v8710_v33 = vld [vmem:[#allocation8 + $0x618] sm:$0xff] }
 0x4cf   :  { %9689 = vmatpush1.bf16.msra.mxu0 %v8695_v52  ;;  %v8529_v52 = vld [vmem:[#allocation8 + $0x70] sm:$0xff] }
 0x4d0   :  { %9690 = vmatprep.subr.bf16.mxu0 %v8698_v7  ;;  %v8703_v7 = vld [vmem:[#allocation8 + $0x5e0] sm:$0xff]  ;;  %9118 = vmatpush1.bf16.msra.mxu1 %v8529_v52  ;;  %v8538_v52 = vld [vmem:[#allocation8 + $0xb8] sm:$0xff] }
 0x4d1   :  { %9119 = vmatprep.subr.bf16.mxu1 %v8532_v57  ;;  %v8709_v57 = vld [vmem:[#allocation8 + $0x610] sm:$0xff] }
 0x4d3   :  { %9691 = vmatpush1.bf16.msra.mxu0 %v8697_v35  ;;  %v8706_v35 = vld [vmem:[#allocation8 + $0x5f8] sm:$0xff] }
 0x4d4   :  { %9692 = vmatprep.subr.bf16.mxu0 %v8700_v24  ;;  %v8705_v24 = vld [vmem:[#allocation8 + $0x5f0] sm:$0xff]  ;;  %9120 = vmatpush1.bf16.msra.mxu1 %v8531_v14  ;;  %v8712_v14 = vld [vmem:[#allocation8 + $0x628] sm:$0xff] }
 0x4d5   :  { %9121 = vmatprep.subr.bf16.mxu1 %v8534_v34  ;;  %v8540_v34 = vld [vmem:[#allocation8 + $0xc8] sm:$0xff] }
 0x4d7   :  { %9693 = vmatpush1.bf16.msra.mxu0 %v8699_v58  ;;  %v8533_v58 = vld [vmem:[#allocation8 + $0x90] sm:$0xff] }
 0x4d8   :  { %9694 = vmatprep.subr.bf16.mxu0 %v8702_v16  ;;  %v8707_v16 = vld [vmem:[#allocation8 + $0x600] sm:$0xff]  ;;  %9122 = vmatpush1.bf16.msra.mxu1 %v8533_v58  ;;  %v8542_v58 = vld [vmem:[#allocation8 + $0xd8] sm:$0xff] }
 0x4d9   :  { %9123 = vmatprep.subr.bf16.mxu1 %v8536_v45  ;;  %v8713_v45 = vld [vmem:[#allocation8 + $0x630] sm:$0xff] }
 0x4db   :  { %9695 = vmatpush1.bf16.msra.mxu0 %v8701_v13  ;;  %v8535_v13 = vld [vmem:[#allocation8 + $0xa0] sm:$0xff] }
 0x4dc   :  { %9696 = vmatprep.subr.bf16.mxu0 %v8704_v55  ;;  %v20571_v55 = vcombine.low %v17146_v49, %v17263_v53  ;;  %9124 = vmatpush1.bf16.msra.mxu1 %v8535_v13  ;;  %v8539_v49 = vld [vmem:[#allocation8 + $0xc0] sm:$0xff]  ;;  %v20573_v53 = vcombine.low %v17326_v28, %v17352_v48  ;;  %v8716_v13 = vld [vmem:[#allocation8 + $0x648] sm:$0xff] }
 0x4dd   :  { %9125 = vmatprep.subr.bf16.mxu1 %v8538_v52  ;;  %v8544_v52 = vld [vmem:[#allocation8 + $0xe8] sm:$0xff] }
 0x4df   :  { %9697 = vmatpush1.bf16.msra.mxu0 %v8703_v7  ;;  %v20572_v7 = vcombine.high %v17326_v28, %v17352_v48  ;;  %v8543_v28 = vld [vmem:[#allocation8 + $0xe0] sm:$0xff] }
 0x4e0   :  { %9698 = vmatprep.subr.bf16.mxu0 %v8706_v35  ;;  %v8537_v35 = vld [vmem:[#allocation8 + $0xb0] sm:$0xff] }
 0x4e1   :  { %9126 = vmatpush1.bf16.msra.mxu1 %v8537_v35  ;;  %v8717_v35 = vld [vmem:[#allocation8 + $0x650] sm:$0xff] }
 0x4e2   :  { %9127 = vmatprep.subr.bf16.mxu1 %v8540_v34  ;;  %v20577_v34 = vcombine.high %v17629_v59, %v17703_v3 }
 0x4e3   :  { %9699 = vmatpush1.bf16.msra.mxu0 %v8705_v24  ;;  %v8711_v24 = vld [vmem:[#allocation8 + $0x620] sm:$0xff] }
 0x4e4   :  { %9781 = vmatprep.subr.bf16.mxu0 %v8708_v41  ;;  %v8714_v41 = vld [vmem:[#allocation8 + $0x638] sm:$0xff] }
 0x4e5   :  { %9128 = vmatpush1.bf16.msra.mxu1 %v8539_v49  ;;  %v8548_v49 = vld [vmem:[#allocation8 + $0x108] sm:$0xff] }
 0x4e6   :  { %9701 = vmatmul.mubr.bf16.vlgmr.msra.gmra.mrb[32].mxu0 %v20571_v55  ;;  %v8541_v55 = vld [vmem:[#allocation8 + $0xd0] sm:$0xff]  ;;  %9129 = vmatprep.subr.bf16.mxu1 %v8542_v58  ;;  %v8722_v58 = vld [vmem:[#allocation8 + $0x678] sm:$0xff] }
 0x4e7   :  { %9782 = vmatpush1.bf16.msra.mxu0 %v8707_v16  ;;  %9710 = vmatprep.mubr.bf16.mxu0 %v20572_v7  ;;  %v20574_v16 = vld [vmem:[#allocation192_spill] sm:$0xff]  ;;  %v8718_v7 = vld [vmem:[#allocation8 + $0x658] sm:$0xff] }
 0x4e8   :  { %9783 = vmatprep.subr.bf16.mxu0 %v8710_v33  ;;  %v20575_v33 = vcombine.high %v17542_v27, %v20574_v16  ;;  %v20576_v48 = vcombine.low %v17542_v27, %v20574_v16  ;;  %v20578_v27 = vcombine.low %v17629_v59, %v17703_v3  ;;  %v20579_v16 = vcombine.high %v17821_v37, %v17836_v51  ;;  %v8549_v59 = vld [vmem:[#allocation8 + $0x110] sm:$0xff]  ;;  %v8552_v3 = vld [vmem:[#allocation8 + $0x128] sm:$0xff] }
 0x4e9   :  { %9130 = vmatpush1.bf16.msra.mxu1 %v8541_v55  ;;  %v8724_v55 = vld [vmem:[#allocation8 + $0x688] sm:$0xff] }
 0x4ea   :  { %9131 = vmatprep.subr.bf16.mxu1 %v8544_v52  ;;  %v20580_v52 = vcombine.low %v20568_v2, %v20569_v40  ;;  %v20583_v2 = vcombine.high %v17930_v8, %v17939_v0 }
 0x4eb   :  { %9784 = vmatpush1.bf16.msra.mxu0 %v8709_v57  ;;  %v8715_v57 = vld [vmem:[#allocation8 + $0x640] sm:$0xff] }
 0x4ec   :  { %9785 = vmatprep.subr.bf16.mxu0 %v8712_v14  ;;  %v8546_v14 = vld [vmem:[#allocation8 + $0xf8] sm:$0xff] }
 0x4ed   :  { %9132 = vmatpush1.bf16.msra.mxu1 %v8543_v28  ;;  %v8726_v28 = vld [vmem:[#allocation8 + $0x698] sm:$0xff] }
 0x4ee   :  { %9711 = vmatmul.mubr.bf16.gmra.mrb[36].mxu0 %v20573_v53  ;;  %9133 = vmatprep.subr.bf16.mxu1 %v8546_v14  ;;  %v8719_v53 = vld [vmem:[#allocation8 + $0x660] sm:$0xff] }
 0x4ef   :  { %9786 = vmatpush1.bf16.msra.mxu0 %v8711_v24  ;;  %9720 = vmatprep.mubr.bf16.mxu0 %v20575_v33  ;;  %v8720_v24 = vld [vmem:[#allocation8 + $0x668] sm:$0xff]  ;;  %v8550_v33 = vld [vmem:[#allocation8 + $0x118] sm:$0xff]  ;;  %v8551_v14 = vld [vmem:[#allocation8 + $0x120] sm:$0xff] }
 0x4f0   :  { %9787 = vmatprep.subr.bf16.mxu0 %v8714_v41  ;;  %v8545_v41 = vld [vmem:[#allocation8 + $0xf0] sm:$0xff] }
 0x4f1   :  { %9134 = vmatpush1.bf16.msra.mxu1 %v8545_v41  ;;  %v8728_v41 = vld [vmem:[#allocation8 + $0x6a8] sm:$0xff] }
 0x4f2   :  { %9216 = vmatprep.subr.bf16.mxu1 %v8548_v49  ;;  %v20585_v49 = vld [vmem:[#allocation76_spill] sm:$0xff] }
 0x4f3   :  { %9788 = vmatpush1.bf16.msra.mxu0 %v8713_v45  ;;  %v8547_v45 = vld [vmem:[#allocation8 + $0x100] sm:$0xff] }
 0x4f4   :  { %9789 = vmatprep.subr.bf16.mxu0 %v8716_v13  ;;  %v8721_v13 = vld [vmem:[#allocation8 + $0x670] sm:$0xff]  ;;  %9136 = vmatmul.mubr.bf16.vlgmr.msra.gmra.mrb[64].mxu1 %v20580_v52  ;;  %v8732_v52 = vld [vmem:[#allocation8 + $0x6c8] sm:$0xff] }
 0x4f5   :  { %9217 = vmatpush1.bf16.msra.mxu1 %v8547_v45  ;;  %v8555_v45 = vld [vmem:[#allocation8 + $0x140] sm:$0xff] }
 0x4f6   :  { %9721 = vmatmul.mubr.bf16.gmra.mrb[40].mxu0 %v20576_v48  ;;  %9218 = vmatprep.subr.bf16.mxu1 %v8550_v33  ;;  %v20582_v48 = vcombine.low %v17821_v37, %v17836_v51  ;;  %v8556_v37 = vld [vmem:[#allocation8 + $0x148] sm:$0xff]  ;;  %v8727_v51 = vld [vmem:[#allocation8 + $0x6a0] sm:$0xff]  ;;  %v8558_v33 = vld [vmem:[#allocation8 + $0x158] sm:$0xff] }
 0x4f7   :  { %9790 = vmatpush1.bf16.msra.mxu0 %v8715_v57  ;;  %9730 = vmatprep.mubr.bf16.mxu0 %v20577_v34  ;;  %v20581_v57 = vld [vmem:[#allocation53_spill] sm:$0xff] }
 0x4f8   :  { %9791 = vmatprep.subr.bf16.mxu0 %v8718_v7  ;;  %9145 = vmatprep.mubr.bf16.mxu1 %v20581_v57  ;;  %v8723_v7 = vld [vmem:[#allocation8 + $0x680] sm:$0xff]  ;;  %v8725_v34 = vld [vmem:[#allocation8 + $0x690] sm:$0xff] }
 0x4f9   :  { %9219 = vmatpush1.bf16.msra.mxu1 %v8549_v59  ;;  %v20589_v59 = vld [vmem:[#allocation86_spill] sm:$0xff] }
 0x4fa   :  { %9220 = vmatprep.subr.bf16.mxu1 %v8552_v3  ;;  %v8557_v3 = vld [vmem:[#allocation8 + $0x150] sm:$0xff] }
 0x4fb   :  { %9792 = vmatpush1.bf16.msra.mxu0 %v8717_v35  ;;  %v8554_v35 = vld [vmem:[#allocation8 + $0x138] sm:$0xff] }
 0x4fc   :  { %9793 = vmatprep.subr.bf16.mxu0 %v8720_v24  ;;  %v20584_v24 = vld [vmem:[#allocation50_spill] sm:$0xff] }
 0x4fd   :  { %9146 = vmatmul.mubr.bf16.gmra.mrb[68].mxu1 %v20584_v24 }
 0x4fe   :  { %9731 = vmatmul.mubr.bf16.gmra.mrb[44].mxu0 %v20578_v27  ;;  %9221 = vmatpush1.bf16.msra.mxu1 %v8551_v14  ;;  %v20586_v27 = vcombine.low %v17930_v8, %v17939_v0  ;;  %v8560_v8 = vld [vmem:[#allocation8 + $0x168] sm:$0xff]  ;;  %v8731_v0 = vld [vmem:[#allocation8 + $0x6c0] sm:$0xff]  ;;  %v20591_v14 = vcombine.high %v18182_v38, %v18200_v18 }
 0x4ff   :  { %9794 = vmatpush1.bf16.msra.mxu0 %v8719_v53  ;;  %9740 = vmatprep.mubr.bf16.mxu0 %v20579_v16  ;;  %v8553_v53 = vld [vmem:[#allocation8 + $0x130] sm:$0xff]  ;;  %v20587_v16 = vcombine.high %v18058_v36, %v18068_v20 }
 0x500   :  { %9795 = vmatprep.subr.bf16.mxu0 %v8722_v58  ;;  %9155 = vmatprep.mubr.bf16.mxu1 %v20585_v49  ;;  %v8730_v58 = vld [vmem:[#allocation8 + $0x6b8] sm:$0xff] }
 0x501   :  { %9222 = vmatprep.subr.bf16.mxu1 %v8554_v35  ;;  %v8733_v35 = vld [vmem:[#allocation8 + $0x6d0] sm:$0xff] }
 0x502   :  { %9223 = vmatpush1.bf16.msra.mxu1 %v8553_v53  ;;  %v20593_v53 = vld [vmem:[#allocation104_spill] sm:$0xff] }
 0x503   :  { %9796 = vmatpush1.bf16.msra.mxu0 %v8721_v13  ;;  %9224 = vmatprep.subr.bf16.mxu1 %v8556_v37  ;;  %v8729_v13 = vld [vmem:[#allocation8 + $0x6b0] sm:$0xff]  ;;  %v20594_v37 = vld [vmem:[#allocation103_spill] sm:$0xff] }
 0x504   :  { %9797 = vmatprep.subr.bf16.mxu0 %v8724_v55  ;;  %v20588_v55 = vld [vmem:[#allocation74_spill] sm:$0xff] }
 0x505   :  { %9156 = vmatmul.mubr.bf16.gmra.mrb[72].mxu1 %v20588_v55 }
 0x506   :  { %9741 = vmatmul.mubr.bf16.gmra.mrb[48].mxu0 %v20582_v48  ;;  %9225 = vmatpush1.bf16.msra.mxu1 %v8555_v45  ;;  %v8559_v48 = vld [vmem:[#allocation8 + $0x160] sm:$0xff]  ;;  %v20596_v45 = vcombine.low %v18182_v38, %v18200_v18  ;;  %v8565_v38 = vld [vmem:[#allocation8 + $0x190] sm:$0xff]  ;;  %v8568_v18 = vld [vmem:[#allocation8 + $0x1a8] sm:$0xff] }
 0x507   :  { %9798 = vmatpush1.bf16.msra.mxu0 %v8723_v7  ;;  %9750 = vmatprep.mubr.bf16.mxu0 %v20583_v2  ;;  %v8734_v7 = vld [vmem:[#allocation8 + $0x6d8] sm:$0xff] }
 0x508   :  { %9799 = vmatprep.subr.bf16.mxu0 %v8726_v28  ;;  %9165 = vmatprep.mubr.bf16.mxu1 %v20589_v59  ;;  %v20590_v28 = vcombine.low %v18058_v36, %v18068_v20  ;;  %v8562_v2 = vld [vmem:[#allocation8 + $0x178] sm:$0xff]  ;;  %v8561_v36 = vld [vmem:[#allocation8 + $0x170] sm:$0xff]  ;;  %v8564_v20 = vld [vmem:[#allocation8 + $0x188] sm:$0xff] }
 0x509   :  { %9226 = vmatprep.subr.bf16.mxu1 %v8558_v33  ;;  %v20597_v33 = vld [vmem:[#allocation42_spill] sm:$0xff] }
 0x50a   :  { %9227 = vmatpush1.bf16.msra.mxu1 %v8557_v3  ;;  %v8737_v3 = vld [vmem:[#allocation8 + $0x6f0] sm:$0xff] }
 0x50b   :  { %9800 = vmatpush1.bf16.msra.mxu0 %v8725_v34  ;;  %9228 = vmatprep.subr.bf16.mxu1 %v8560_v8  ;;  %v20592_v34 = vld [vmem:[#allocation85_spill] sm:$0xff]  ;;  %v20599_v8 = vcombine.low %v20593_v53, %v20594_v37 }
 0x50c   :  { %9801 = vmatprep.subr.bf16.mxu0 %v8728_v41  ;;  %v8736_v41 = vld [vmem:[#allocation8 + $0x6e8] sm:$0xff] }
 0x50d   :  { %9166 = vmatmul.mubr.bf16.gmra.mrb[76].mxu1 %v20592_v34 }
 0x50e   :  { %9751 = vmatmul.mubr.bf16.gmra.mrb[52].mxu0 %v20586_v27  ;;  %9229 = vmatpush1.bf16.msra.mxu1 %v8559_v48  ;;  %v8738_v27 = vld [vmem:[#allocation8 + $0x6f8] sm:$0xff] }
 0x50f   :  { %9802 = vmatpush1.bf16.msra.mxu0 %v8727_v51  ;;  %9760 = vmatprep.mubr.bf16.mxu0 %v20587_v16  ;;  %v20595_v51 = vcombine.high %v20593_v53, %v20594_v37  ;;  %v8563_v16 = vld [vmem:[#allocation8 + $0x180] sm:$0xff]  ;;  %v8742_v48 = vld [vmem:[#allocation8 + $0x718] sm:$0xff] }
 0x510   :  { %9803 = vmatprep.subr.bf16.mxu0 %v8730_v58  ;;  %9230 = vmatprep.subr.bf16.mxu1 %v8562_v2  ;;  %v8735_v58 = vld [vmem:[#allocation8 + $0x6e0] sm:$0xff] }
 0x511   :  { %9175 = vmatprep.mubr.bf16.mxu1 %v20595_v51  ;;  %v8567_v2 = vld [vmem:[#allocation8 + $0x1a0] sm:$0xff]  ;;  %v8570_v51 = vld [vmem:[#allocation8 + $0x1b8] sm:$0xff] }
 0x512   :  { %9231 = vmatpush1.bf16.msra.mxu1 %v8561_v36  ;;  %v8741_v36 = vld [vmem:[#allocation8 + $0x710] sm:$0xff] }
 0x513   :  { %9804 = vmatpush1.bf16.msra.mxu0 %v8729_v13  ;;  %9232 = vmatprep.subr.bf16.mxu1 %v8564_v20  ;;  %v20598_v13 = vcombine.high %v20569_v40, %v20597_v33  ;;  %v20605_v20 = vld [vmem:[#allocation118_spill] sm:$0xff] }
 0x514   :  { %9805 = vmatprep.subr.bf16.mxu0 %v8732_v52  ;;  %v8566_v52 = vld [vmem:[#allocation8 + $0x198] sm:$0xff] }
 0x515   :  { %9176 = vmatmul.mubr.bf16.gmra.mrb[80].mxu1 %v20599_v8  ;;  %v20609_v8 = vld [vmem:[#allocation79_spill] sm:$0xff] }
 0x516   :  { %9761 = vmatmul.mubr.bf16.gmra.mrb[56].mxu0 %v20590_v28  ;;  %9233 = vmatpush1.bf16.msra.mxu1 %v8563_v16  ;;  %v8739_v28 = vld [vmem:[#allocation8 + $0x700] sm:$0xff] }
 0x517   :  { %9806 = vmatpush1.bf16.msra.mxu0 %v8731_v0  ;;  %9770 = vmatprep.mubr.bf16.mxu0 %v20591_v14  ;;  %v8740_v0 = vld [vmem:[#allocation8 + $0x708] sm:$0xff]  ;;  %v20601_v14 = vcombine.low %v20569_v40, %v20597_v33  ;;  %v8743_v16 = vld [vmem:[#allocation8 + $0x720] sm:$0xff]  ;;  %v8746_v33 = vld [vmem:[#allocation8 + $0x738] sm:$0xff] }
 0x518   :  { %9807 = vmatprep.subr.bf16.mxu0 %v8734_v7  ;;  %v20600_v7 = vld [vmem:[#allocation119_spill] sm:$0xff]  ;;  %9234 = vmatprep.subr.bf16.mxu1 %v8566_v52  ;;  %v8572_v40 = vld [vmem:[#allocation8 + $0x1c8] sm:$0xff] }
 0x519   :  { %9185 = vmatprep.mubr.bf16.mxu1 %v20600_v7  ;;  %v8571_v52 = vld [vmem:[#allocation8 + $0x1c0] sm:$0xff] }
 0x51a   :  { %9235 = vmatpush1.bf16.msra.mxu1 %v8565_v38  ;;  %v8574_v38 = vld [vmem:[#allocation8 + $0x1d8] sm:$0xff] }
 0x51b   :  { %9808 = vmatpush1.bf16.msra.mxu0 %v8733_v35  ;;  %9236 = vmatprep.subr.bf16.mxu1 %v8568_v18  ;;  %v20602_v35 = vld [vmem:[#allocation44_spill] sm:$0xff]  ;;  %v8745_v18 = vld [vmem:[#allocation8 + $0x730] sm:$0xff] }
 0x51c   :  { %9809 = vmatprep.subr.bf16.mxu0 %v8736_v41  ;;  %v20603_v41 = vld [vmem:[#allocation61_spill] sm:$0xff] }
 0x51d   :  { %v20604_v53 = vcombine.high %v20602_v35, %v20603_v41  ;;  %9186 = vmatmul.mubr.bf16.gmra.mrb[84].mxu1 %v20605_v20 }
 0x51e   :  { %9771 = vmatmul.mubr.bf16.gmra.mrb[60].mxu0 %v20596_v45  ;;  %9237 = vmatpush1.bf16.msra.mxu1 %v8567_v2  ;;  %v8569_v45 = vld [vmem:[#allocation8 + $0x1b0] sm:$0xff] }
 0x51f   :  { %9810 = vmatpush1.bf16.msra.mxu0 %v8735_v58  ;;  %9813 = vmatprep.mubr.bf16.mxu0 %v20598_v13  ;;  %v8744_v58 = vld [vmem:[#allocation8 + $0x728] sm:$0xff]  ;;  %v20607_v13 = vcombine.low %v20602_v35, %v20603_v41  ;;  %v8573_v2 = vld [vmem:[#allocation8 + $0x1d0] sm:$0xff]  ;;  %v8747_v41 = vld [vmem:[#allocation8 + $0x740] sm:$0xff] }
 0x520   :  { %9811 = vmatprep.subr.bf16.mxu0 %v8738_v27  ;;  %v20606_v27 = vld [vmem:[#allocation126_spill] sm:$0xff]  ;;  %9238 = vmatprep.subr.bf16.mxu1 %v8570_v51  ;;  %v8576_v35 = vld [vmem:[#allocation8 + $0x1e8] sm:$0xff] }
 0x521   :  { %9195 = vmatprep.mubr.bf16.mxu1 %v20606_v27 }
 0x522   :  { %9239 = vmatpush1.bf16.msra.mxu1 %v8569_v45  ;;  %v20615_v45 = vld [vmem:[#allocation100_spill] sm:$0xff] }
 0x523   :  { %9812 = vmatpush1.bf16.msra.mxu0 %v8737_v3  ;;  %9240 = vmatprep.subr.bf16.mxu1 %v8572_v40  ;;  %v20608_v3 = vld [vmem:[#allocation71_spill] sm:$0xff] }
 0x524   :  { %9894 = vmatprep.subr.bf16.mxu0 %v8740_v0  ;;  %v20610_v0 = vcombine.high %v20608_v3, %v20609_v8  ;;  %v20613_v51 = vcombine.low %v20608_v3, %v20609_v8  ;;  %v8577_v3 = vld [vmem:[#allocation8 + $0x1f0] sm:$0xff]  ;;  %v8580_v8 = vld [vmem:[#allocation8 + $0x208] sm:$0xff] }
 0x526   :  { %9814 = vmatmul.mubr.bf16.vlgmr.msra.gmra.mrb[32].mxu0 %v20601_v14  ;;  %9241 = vmatpush1.bf16.msra.mxu1 %v8571_v52  ;;  %v20612_v14 = vld [vmem:[#allocation143_spill] sm:$0xff]  ;;  %v8752_v52 = vld [vmem:[#allocation8 + $0x768] sm:$0xff] }
 0x527   :  { %9895 = vmatpush1.bf16.msra.mxu0 %v8739_v28  ;;  %9823 = vmatprep.mubr.bf16.mxu0 %v20604_v53  ;;  %v20611_v28 = vld [vmem:[#allocation59_spill] sm:$0xff] }
 0x528   :  { %9896 = vmatprep.subr.bf16.mxu0 %v8742_v48  ;;  %9196 = vmatmul.mubr.bf16.gmra.mrb[88].mxu1 %v20611_v28  ;;  %v8748_v48 = vld [vmem:[#allocation8 + $0x748] sm:$0xff]  ;;  %v8750_v53 = vld [vmem:[#allocation8 + $0x758] sm:$0xff] }
 0x529   :  { %9205 = vmatprep.mubr.bf16.mxu1 %v20612_v14  ;;  %9242 = vmatprep.subr.bf16.mxu1 %v8574_v38  ;;  %v20619_v38 = vld [vmem:[#allocation162_spill] sm:$0xff] }
 0x52a   :  { %9243 = vmatpush1.bf16.msra.mxu1 %v8573_v2  ;;  %v8754_v2 = vld [vmem:[#allocation8 + $0x778] sm:$0xff] }
 0x52b   :  { %9897 = vmatpush1.bf16.msra.mxu0 %v8741_v36  ;;  %9244 = vmatprep.subr.bf16.mxu1 %v8576_v35  ;;  %v8575_v36 = vld [vmem:[#allocation8 + $0x1e0] sm:$0xff] }
 0x52c   :  { %9898 = vmatprep.subr.bf16.mxu0 %v8744_v58  ;;  %v20614_v58 = vld [vmem:[#allocation80_spill] sm:$0xff] }
 0x52d   :  { %v20616_v40 = vcombine.high %v20614_v58, %v20615_v45  ;;  %v20621_v35 = vcombine.low %v20614_v58, %v20615_v45  ;;  %v8581_v58 = vld [vmem:[#allocation8 + $0x210] sm:$0xff] }
 0x52e   :  { %9824 = vmatmul.mubr.bf16.gmra.mrb[36].mxu0 %v20607_v13  ;;  %v20617_v13 = vld [vmem:[#allocation142_spill] sm:$0xff]  ;;  %9245 = vmatpush1.bf16.msra.mxu1 %v8575_v36 }
 0x52f   :  { %9899 = vmatpush1.bf16.msra.mxu0 %v8743_v16  ;;  %9833 = vmatprep.mubr.bf16.mxu0 %v20610_v0  ;;  %v8578_v16 = vld [vmem:[#allocation8 + $0x1f8] sm:$0xff] }
 0x530   :  { %9900 = vmatprep.subr.bf16.mxu0 %v8746_v33  ;;  %v8749_v33 = vld [vmem:[#allocation8 + $0x750] sm:$0xff]  ;;  %9206 = vmatmul.mubr.bf16.gmra.mrb[92].mxu1 %v20617_v13  ;;  %v8582_v36 = vld [vmem:[#allocation8 + $0x218] sm:$0xff] }
 0x531   :  { %v20618_v0 = vld [vmem:[#allocation146_spill] sm:$0xff]  ;;  %9246 = vmatprep.subr.bf16.mxu1 %v8578_v16 }
 0x532   :  { %9247 = vmatpush1.bf16.msra.mxu1 %v8577_v3  ;;  %v20624_v16 = vcombine.low %v20618_v0, %v20619_v38  ;;  %v8755_v3 = vld [vmem:[#allocation8 + $0x780] sm:$0xff] }
 0x533   :  { %9901 = vmatpush1.bf16.msra.mxu0 %v8745_v18  ;;  %v20620_v18 = vcombine.high %v20618_v0, %v20619_v38  ;;  %9329 = vmatprep.subr.bf16.mxu1 %v8580_v8  ;;  %v8758_v8 = vld [vmem:[#allocation8 + $0x798] sm:$0xff]  ;;  %v20627_v0 = vld [vmem:[#allocation117_spill] sm:$0xff] }
 0x534   :  { %9902 = vmatprep.subr.bf16.mxu0 %v8748_v48  ;;  %v8751_v48 = vld [vmem:[#allocation8 + $0x760] sm:$0xff] }
 0x535   :  { %9248 = vmatprep.mubr.bf16.mxu1 %v20620_v18  ;;  %v8584_v18 = vld [vmem:[#allocation8 + $0x228] sm:$0xff] }
 0x536   :  { %9834 = vmatmul.mubr.bf16.gmra.mrb[40].mxu0 %v20613_v51 }
 0x537   :  { %9903 = vmatpush1.bf16.msra.mxu0 %v8747_v41  ;;  %9843 = vmatprep.mubr.bf16.mxu0 %v20616_v40  ;;  %v8579_v41 = vld [vmem:[#allocation8 + $0x200] sm:$0xff]  ;;  %v8753_v40 = vld [vmem:[#allocation8 + $0x770] sm:$0xff] }
 0x538   :  { %9904 = vmatprep.subr.bf16.mxu0 %v8750_v53  ;;  %v20622_v53 = vld [vmem:[#allocation107_spill] sm:$0xff]  ;;  %9249 = vmatmul.mubr.bf16.vlgmr.msra.gmra.mrb[64].mxu1 %v20624_v16  ;;  %v8760_v16 = vld [vmem:[#allocation8 + $0x7a8] sm:$0xff] }
 0x539   :  { %v20623_v51 = vcombine.high %v20594_v37, %v20622_v53  ;;  %9330 = vmatpush1.bf16.msra.mxu1 %v8579_v41 }
 0x53a   :  { %9331 = vmatprep.subr.bf16.mxu1 %v8582_v36  ;;  %v8757_v36 = vld [vmem:[#allocation8 + $0x790] sm:$0xff] }
 0x53b   :  { %9905 = vmatpush1.bf16.msra.mxu0 %v8749_v33  ;;  %v8756_v33 = vld [vmem:[#allocation8 + $0x788] sm:$0xff] }
 0x53c   :  { %9906 = vmatprep.subr.bf16.mxu0 %v8752_v52  ;;  %v20625_v52 = vld [vmem:[#allocation166_spill] sm:$0xff] }
 0x53d   :  { %9258 = vmatprep.mubr.bf16.mxu1 %v20625_v52  ;;  %9332 = vmatpush1.bf16.msra.mxu1 %v8581_v58  ;;  %v8585_v58 = vld [vmem:[#allocation8 + $0x230] sm:$0xff] }
 0x53e   :  { %9844 = vmatmul.mubr.bf16.gmra.mrb[44].mxu0 %v20621_v35  ;;  %9333 = vmatprep.subr.bf16.mxu1 %v8584_v18  ;;  %v20628_v35 = vld [vmem:[#allocation34_spill] sm:$0xff] }
 0x53f   :  { %9907 = vmatpush1.bf16.msra.mxu0 %v8751_v48  ;;  %9853 = vmatprep.mubr.bf16.mxu0 %v20623_v51  ;;  %v20626_v48 = vcombine.low %v20594_v37, %v20622_v53  ;;  %v20629_v41 = vcombine.high %v20627_v0, %v20628_v35  ;;  %v8586_v51 = vld [vmem:[#allocation8 + $0x238] sm:$0xff]  ;;  %v8588_v37 = vld [vmem:[#allocation8 + $0x248] sm:$0xff]  ;;  %v8759_v53 = vld [vmem:[#allocation8 + $0x7a0] sm:$0xff] }
 0x540   :  { %9908 = vmatprep.subr.bf16.mxu0 %v8754_v2  ;;  %v8583_v2 = vld [vmem:[#allocation8 + $0x220] sm:$0xff]  ;;  %v8762_v18 = vld [vmem:[#allocation8 + $0x7b8] sm:$0xff] }
 0x541   :  { %9334 = vmatpush1.bf16.msra.mxu1 %v8583_v2 }
 0x542   :  { %9335 = vmatprep.subr.bf16.mxu1 %v8586_v51  ;;  %v8761_v51 = vld [vmem:[#allocation8 + $0x7b0] sm:$0xff] }
 0x543   :  { %9909 = vmatpush1.bf16.msra.mxu0 %v8753_v40  ;;  %v20630_v40 = vld [vmem:[#allocation165_spill] sm:$0xff] }
 0x544   :  { %9910 = vmatprep.subr.bf16.mxu0 %v8756_v33  ;;  %9259 = vmatmul.mubr.bf16.gmra.mrb[68].mxu1 %v20630_v40  ;;  %v20631_v33 = vld [vmem:[#allocation188_spill] sm:$0xff] }
 0x545   :  { %9268 = vmatprep.mubr.bf16.mxu1 %v20631_v33  ;;  %9336 = vmatpush1.bf16.msra.mxu1 %v8585_v58  ;;  %v8589_v58 = vld [vmem:[#allocation8 + $0x250] sm:$0xff] }
 0x546   :  { %9854 = vmatmul.mubr.bf16.gmra.mrb[48].mxu0 %v20626_v48  ;;  %9337 = vmatprep.subr.bf16.mxu1 %v8588_v37  ;;  %v20633_v48 = vld [vmem:[#allocation58_spill] sm:$0xff] }
 0x547   :  { %9911 = vmatpush1.bf16.msra.mxu0 %v8755_v3  ;;  %9863 = vmatprep.mubr.bf16.mxu0 %v20629_v41  ;;  %v20632_v3 = vcombine.low %v20627_v0, %v20628_v35  ;;  %v20634_v41 = vld [vmem:[#allocation127_spill] sm:$0xff]  ;;  %v8592_v0 = vld [vmem:[#allocation8 + $0x268] sm:$0xff] }
 0x548   :  { %9912 = vmatprep.subr.bf16.mxu0 %v8758_v8  ;;  %v8587_v8 = vld [vmem:[#allocation8 + $0x240] sm:$0xff]  ;;  %v20635_v2 = vcombine.high %v20633_v48, %v20634_v41  ;;  %v8766_v37 = vld [vmem:[#allocation8 + $0x7d8] sm:$0xff] }
 0x549   :  { %9338 = vmatpush1.bf16.msra.mxu1 %v8587_v8  ;;  %v8763_v35 = vld [vmem:[#allocation8 + $0x7c0] sm:$0xff] }
 0x54a   :  { %9339 = vmatprep.subr.bf16.mxu1 %v8590_v5  ;;  %v8765_v5 = vld [vmem:[#allocation8 + $0x7d0] sm:$0xff] }
 0x54b   :  { %9913 = vmatpush1.bf16.msra.mxu0 %v8757_v36  ;;  %v20636_v36 = vld [vmem:[#allocation187_spill] sm:$0xff] }
 0x54c   :  { %9914 = vmatprep.subr.bf16.mxu0 %v8760_v16  ;;  %9269 = vmatmul.mubr.bf16.gmra.mrb[72].mxu1 %v20636_v36  ;;  %v8764_v16 = vld [vmem:[#allocation8 + $0x7c8] sm:$0xff] }
 0x54d   :  { %9278 = vmatprep.mubr.bf16.mxu1 %v17661_v23  ;;  %9340 = vmatpush1.bf16.msra.mxu1 %v8589_v58  ;;  %v8767_v58 = vld [vmem:[#allocation8 + $0x7e0] sm:$0xff] }
 0x54e   :  { %9864 = vmatmul.mubr.bf16.gmra.mrb[52].mxu0 %v20632_v3  ;;  %9341 = vmatprep.subr.bf16.mxu1 %v8592_v0  ;;  %v20638_v3 = vld [vmem:[#allocation130_spill] sm:$0xff] }
 0x54f   :  { %9915 = vmatpush1.bf16.msra.mxu0 %v8759_v53  ;;  %9873 = vmatprep.mubr.bf16.mxu0 %v20635_v2  ;;  %v20637_v53 = vcombine.low %v20633_v48, %v20634_v41  ;;  %v20639_v2 = vld [vmem:[#allocation152_spill] sm:$0xff]  ;;  %v8593_v48 = vld [vmem:[#allocation8 + $0x270] sm:$0xff]  ;;  %v8770_v0 = vld [vmem:[#allocation8 + $0x7f8] sm:$0xff] }
 0x550   :  { %9916 = vmatprep.subr.bf16.mxu0 %v8762_v18  ;;  %v8591_v18 = vld [vmem:[#allocation8 + $0x260] sm:$0xff]  ;;  %v20640_v8 = vcombine.high %v20638_v3, %v20639_v2  ;;  %v8596_v41 = vld [vmem:[#allocation8 + $0x288] sm:$0xff] }
 0x551   :  { %9342 = vmatpush1.bf16.msra.mxu1 %v8591_v18 }
 0x552   :  { %9343 = vmatprep.subr.bf16.mxu1 %v8594_v50  ;;  %v8769_v50 = vld [vmem:[#allocation8 + $0x7f0] sm:$0xff] }
 0x553   :  { %9917 = vmatpush1.bf16.msra.mxu0 %v8761_v51  ;;  %v8768_v51 = vld [vmem:[#allocation8 + $0x7e8] sm:$0xff] }
 0x554   :  { %9918 = vmatprep.subr.bf16.mxu0 %v8764_v16  ;;  %9279 = vmatmul.mubr.bf16.gmra.mrb[76].mxu1 %v17639_v61  ;;  %v20641_v16 = vcombine.high %v17157_v19, %v17750_v29 }
 0x555   :  { %9344 = vmatpush1.bf16.msra.mxu1 %v8593_v48  ;;  %v8771_v48 = vld [vmem:[#allocation8 + $0x800] sm:$0xff] }
 0x556   :  { %9874 = vmatmul.mubr.bf16.gmra.mrb[56].mxu0 %v20637_v53  ;;  %9288 = vmatprep.mubr.bf16.mxu1 %v20641_v16  ;;  %v20643_v53 = vld [vmem:[#allocation163_spill] sm:$0xff]  ;;  %v8600_v16 = vld [vmem:[#allocation8 + $0x2a8] sm:$0xff] }
 0x557   :  { %9919 = vmatpush1.bf16.msra.mxu0 %v8763_v35  ;;  %9883 = vmatprep.mubr.bf16.mxu0 %v20640_v8  ;;  %v20642_v35 = vcombine.low %v20638_v3, %v20639_v2  ;;  %v20644_v18 = vcombine.high %v20619_v38, %v20643_v53  ;;  %v8598_v8 = vld [vmem:[#allocation8 + $0x298] sm:$0xff]  ;;  %v8597_v3 = vld [vmem:[#allocation8 + $0x290] sm:$0xff] }
 0x558   :  { %9920 = vmatprep.subr.bf16.mxu0 %v8766_v37  ;;  %9345 = vmatprep.subr.bf16.mxu1 %v8596_v41  ;;  %v8595_v37 = vld [vmem:[#allocation8 + $0x280] sm:$0xff]  ;;  %v8774_v41 = vld [vmem:[#allocation8 + $0x818] sm:$0xff] }
 0x559   :  { %9346 = vmatpush1.bf16.msra.mxu1 %v8595_v37 }
 0x55a   :  { %9347 = vmatprep.subr.bf16.mxu1 %v8598_v8  ;;  %v8773_v8 = vld [vmem:[#allocation8 + $0x810] sm:$0xff] }
 0x55b   :  { %9921 = vmatpush1.bf16.msra.mxu0 %v8765_v5  ;;  %v20645_v5 = vcombine.low %v17157_v19, %v17750_v29  ;;  %v20647_v19 = vld [vmem:[#allocation164_spill] sm:$0xff] }
 0x55c   :  { %9922 = vmatprep.subr.bf16.mxu0 %v8768_v51  ;;  %v8772_v51 = vld [vmem:[#allocation8 + $0x808] sm:$0xff] }
 0x55d   :  { %9289 = vmatmul.mubr.bf16.gmra.mrb[80].mxu1 %v20645_v5  ;;  %v8601_v5 = vld [vmem:[#allocation8 + $0x2b0] sm:$0xff] }
 0x55e   :  { %9884 = vmatmul.mubr.bf16.gmra.mrb[60].mxu0 %v20642_v35  ;;  %9298 = vmatprep.mubr.bf16.mxu1 %v17873_v21  ;;  %v20648_v35 = vld [vmem:[#allocation170_spill] sm:$0xff] }
 0x55f   :  { %9923 = vmatpush1.bf16.msra.mxu0 %v8767_v58  ;;  %9926 = vmatprep.mubr.bf16.mxu0 %v20644_v18  ;;  %v20646_v58 = vcombine.low %v20619_v38, %v20643_v53  ;;  %v20649_v37 = vcombine.high %v20647_v19, %v20648_v35  ;;  %v8602_v18 = vld [vmem:[#allocation8 + $0x2b8] sm:$0xff]  ;;  %v8604_v38 = vld [vmem:[#allocation8 + $0x2c8] sm:$0xff]  ;;  %v8775_v53 = vld [vmem:[#allocation8 + $0x820] sm:$0xff] }
 0x560   :  { %9924 = vmatprep.subr.bf16.mxu0 %v8770_v0  ;;  %9348 = vmatpush1.bf16.msra.mxu1 %v8597_v3  ;;  %v8599_v0 = vld [vmem:[#allocation8 + $0x2a0] sm:$0xff]  ;;  %v20650_v3 = vcombine.low %v20647_v19, %v20648_v35  ;;  %v8608_v19 = vld [vmem:[#allocation8 + $0x2e8] sm:$0xff] }
 0x561   :  { %9349 = vmatprep.subr.bf16.mxu1 %v8600_v16  ;;  %v8603_v16 = vld [vmem:[#allocation8 + $0x2c0] sm:$0xff] }
 0x562   :  { %v8779_v35 = vld [vmem:[#allocation8 + $0x840] sm:$0xff] }
 0x563   :  { %9925 = vmatpush1.bf16.msra.mxu0 %v8769_v50  ;;  %v8776_v50 = vld [vmem:[#allocation8 + $0x828] sm:$0xff] }
 0x564   :  { %10007 = vmatprep.subr.bf16.mxu0 %v8772_v51  ;;  %9350 = vmatpush1.bf16.msra.mxu1 %v8599_v0  ;;  %v8778_v51 = vld [vmem:[#allocation8 + $0x838] sm:$0xff]  ;;  %v8777_v0 = vld [vmem:[#allocation8 + $0x830] sm:$0xff] }
 0x565   :  { %9299 = vmatmul.mubr.bf16.gmra.mrb[84].mxu1 %v17869_v11  ;;  %9351 = vmatprep.subr.bf16.mxu1 %v8602_v18  ;;  %v8605_v18 = vld [vmem:[#allocation8 + $0x2d0] sm:$0xff] }
 0x566   :  { %9927 = vmatmul.mubr.bf16.vlgmr.msra.gmra.mrb[32].mxu0 %v20646_v58  ;;  %9308 = vmatprep.mubr.bf16.mxu1 %v18016_v30  ;;  %v8606_v58 = vld [vmem:[#allocation8 + $0x2d8] sm:$0xff] }
 0x567   :  { %10008 = vmatpush1.bf16.msra.mxu0 %v8771_v48  ;;  %9936 = vmatprep.mubr.bf16.mxu0 %v20649_v37  ;;  %v20651_v48 = vld [vmem:[#allocation186_spill] sm:$0xff]  ;;  %v8780_v37 = vld [vmem:[#allocation8 + $0x848] sm:$0xff] }
 0x568   :  { %10009 = vmatprep.subr.bf16.mxu0 %v8774_v41  ;;  %9352 = vmatpush1.bf16.msra.mxu1 %v8601_v5  ;;  %v20652_v41 = vcombine.high %v20651_v48, %v17534_v44  ;;  %v8607_v5 = vld [vmem:[#allocation8 + $0x2e0] sm:$0xff] }
 0x569   :  { %9353 = vmatprep.subr.bf16.mxu1 %v8604_v38  ;;  %v20654_v38 = vcombine.high %v17578_v1, %v17690_v17 }
 0x56b   :  { %10010 = vmatpush1.bf16.msra.mxu0 %v8773_v8  ;;  %v8782_v8 = vld [vmem:[#allocation8 + $0x858] sm:$0xff] }
 0x56c   :  { %10011 = vmatprep.subr.bf16.mxu0 %v8776_v50  ;;  %9354 = vmatpush1.bf16.msra.mxu1 %v8603_v16  ;;  %v20653_v50 = vcombine.low %v20651_v48, %v17534_v44  ;;  %v20655_v16 = vld [vmem:[#allocation43_spill] sm:$0xff]  ;;  %v8609_v44 = vld [vmem:[#allocation8 + $0x2f0] sm:$0xff]  ;;  %v8612_v48 = vld [vmem:[#allocation8 + $0x308] sm:$0xff] }
 0x56d   :  { %9309 = vmatmul.mubr.bf16.gmra.mrb[88].mxu1 %v18012_v15  ;;  %9355 = vmatprep.subr.bf16.mxu1 %v8606_v58 }
 0x56e   :  { %9937 = vmatmul.mubr.bf16.gmra.mrb[36].mxu0 %v20650_v3  ;;  %9318 = vmatprep.mubr.bf16.mxu1 %v18150_v12  ;;  %v8784_v3 = vld [vmem:[#allocation8 + $0x868] sm:$0xff] }
 0x56f   :  { %10012 = vmatpush1.bf16.msra.mxu0 %v8775_v53  ;;  %9946 = vmatprep.mubr.bf16.mxu0 %v20652_v41  ;;  %v8610_v53 = vld [vmem:[#allocation8 + $0x2f8] sm:$0xff] }
 0x570   :  { %10013 = vmatprep.subr.bf16.mxu0 %v8778_v51  ;;  %9356 = vmatpush1.bf16.msra.mxu1 %v8605_v18  ;;  %v8781_v51 = vld [vmem:[#allocation8 + $0x850] sm:$0xff]  ;;  %v20658_v18 = vcombine.low %v17578_v1, %v17690_v17 }
 0x571   :  { %9357 = vmatprep.subr.bf16.mxu1 %v8608_v19  ;;  %v20656_v41 = vld [vmem:[#allocation46_spill] sm:$0xff]  ;;  %v8611_v19 = vld [vmem:[#allocation8 + $0x300] sm:$0xff] }
 0x572   :  { %v20657_v58 = vcombine.high %v20655_v16, %v20656_v41 }
 0x573   :  { %10014 = vmatpush1.bf16.msra.mxu0 %v8777_v0  ;;  %v8783_v0 = vld [vmem:[#allocation8 + $0x860] sm:$0xff] }
 0x574   :  { %10015 = vmatprep.subr.bf16.mxu0 %v8780_v37  ;;  %9358 = vmatpush1.bf16.msra.mxu1 %v8607_v5  ;;  %v8786_v37 = vld [vmem:[#allocation8 + $0x878] sm:$0xff]  ;;  %v20660_v5 = vcombine.low %v20655_v16, %v20656_v41  ;;  %v8615_v16 = vld [vmem:[#allocation8 + $0x320] sm:$0xff] }
 0x575   :  { %9319 = vmatmul.mubr.bf16.gmra.mrb[92].mxu1 %v18146_v54  ;;  %9359 = vmatprep.subr.bf16.mxu1 %v8610_v53  ;;  %v20661_v53 = vld [vmem:[#allocation54_spill] sm:$0xff]  ;;  %v20665_v41 = vld [vmem:[#allocation215_spill] sm:$0xff] }
 0x576   :  { %9947 = vmatmul.mubr.bf16.gmra.mrb[40].mxu0 %v20653_v50  ;;  %9361 = vmatprep.mubr.bf16.mxu1 %v20657_v58  ;;  %v8785_v50 = vld [vmem:[#allocation8 + $0x870] sm:$0xff]  ;;  %v8616_v58 = vld [vmem:[#allocation8 + $0x328] sm:$0xff] }
 0x577   :  { %10016 = vmatpush1.bf16.msra.mxu0 %v8779_v35  ;;  %9956 = vmatprep.mubr.bf16.mxu0 %v20654_v38  ;;  %v20659_v35 = vcombine.high %v17750_v29, %v17832_v9  ;;  %v8788_v38 = vld [vmem:[#allocation8 + $0x888] sm:$0xff] }
 0x578   :  { %10017 = vmatprep.subr.bf16.mxu0 %v8782_v8  ;;  %9360 = vmatpush1.bf16.msra.mxu1 %v8609_v44  ;;  %v8614_v8 = vld [vmem:[#allocation8 + $0x318] sm:$0xff]  ;;  %v8787_v44 = vld [vmem:[#allocation8 + $0x880] sm:$0xff] }
 0x579   :  { %9442 = vmatprep.subr.bf16.mxu1 %v8612_v48  ;;  %v8790_v48 = vld [vmem:[#allocation8 + $0x898] sm:$0xff] }
 0x57b   :  { %10018 = vmatpush1.bf16.msra.mxu0 %v8781_v51  ;;  %v20662_v51 = vld [vmem:[#allocation63_spill] sm:$0xff] }
 0x57c   :  { %10019 = vmatprep.subr.bf16.mxu0 %v8784_v3  ;;  %v20663_v1 = vcombine.high %v20661_v53, %v20662_v51  ;;  %v8613_v3 = vld [vmem:[#allocation8 + $0x310] sm:$0xff] }
 0x57d   :  { %9362 = vmatmul.mubr.bf16.vlgmr.msra.gmra.mrb[64].mxu1 %v20660_v5  ;;  %v20669_v5 = vld [vmem:[#allocation75_spill] sm:$0xff] }
 0x57e   :  { %9957 = vmatmul.mubr.bf16.gmra.mrb[44].mxu0 %v20658_v18  ;;  %9443 = vmatpush1.bf16.msra.mxu1 %v8611_v19  ;;  %v8618_v19 = vld [vmem:[#allocation8 + $0x338] sm:$0xff] }
 0x57f   :  { %10020 = vmatpush1.bf16.msra.mxu0 %v8783_v0  ;;  %9966 = vmatprep.mubr.bf16.mxu0 %v20659_v35  ;;  %v20664_v0 = vcombine.low %v17750_v29, %v17832_v9  ;;  %v8789_v35 = vld [vmem:[#allocation8 + $0x890] sm:$0xff] }
 0x580   :  { %10021 = vmatprep.subr.bf16.mxu0 %v8786_v37  ;;  %9371 = vmatprep.mubr.bf16.mxu1 %v20663_v1  ;;  %v20666_v37 = vld [vmem:[#allocation217_spill] sm:$0xff] }
 0x581   :  { %9444 = vmatprep.subr.bf16.mxu1 %v8614_v8  ;;  %v20667_v18 = vcombine.high %v20665_v41, %v20666_v37  ;;  %v20668_v8 = vcombine.low %v20661_v53, %v20662_v51  ;;  %v8617_v9 = vld [vmem:[#allocation8 + $0x330] sm:$0xff]  ;;  %v8620_v1 = vld [vmem:[#allocation8 + $0x348] sm:$0xff]  ;;  %v8619_v53 = vld [vmem:[#allocation8 + $0x340] sm:$0xff] }
 0x582   :  { %9445 = vmatpush1.bf16.msra.mxu1 %v8613_v3  ;;  %v8791_v3 = vld [vmem:[#allocation8 + $0x8a0] sm:$0xff] }
 0x583   :  { %10022 = vmatpush1.bf16.msra.mxu0 %v8785_v50  ;;  %9446 = vmatprep.subr.bf16.mxu1 %v8616_v58  ;;  %v8792_v50 = vld [vmem:[#allocation8 + $0x8a8] sm:$0xff]  ;;  %v8794_v58 = vld [vmem:[#allocation8 + $0x8b8] sm:$0xff] }
 0x584   :  { %10023 = vmatprep.subr.bf16.mxu0 %v8788_v38  ;;  %v20670_v38 = vld [vmem:[#allocation82_spill] sm:$0xff]  ;;  %v20673_v51 = vld [vmem:[#allocation228_spill] sm:$0xff] }
 0x585   :  { %9372 = vmatmul.mubr.bf16.gmra.mrb[68].mxu1 %v20668_v8  ;;  %v20671_v29 = vcombine.high %v20669_v5, %v20670_v38  ;;  %v20677_v8 = vld [vmem:[#allocation97_spill] sm:$0xff] }
 0x586   :  { %9967 = vmatmul.mubr.bf16.gmra.mrb[48].mxu0 %v20664_v0  ;;  %9447 = vmatpush1.bf16.msra.mxu1 %v8615_v16  ;;  %v8622_v0 = vld [vmem:[#allocation8 + $0x358] sm:$0xff]  ;;  %v8793_v16 = vld [vmem:[#allocation8 + $0x8b0] sm:$0xff] }
 0x587   :  { %10024 = vmatpush1.bf16.msra.mxu0 %v8787_v44  ;;  %9976 = vmatprep.mubr.bf16.mxu0 %v20667_v18  ;;  %v20672_v44 = vcombine.low %v20665_v41, %v20666_v37  ;;  %v20675_v18 = vcombine.low %v20669_v5, %v20670_v38  ;;  %v8621_v37 = vld [vmem:[#allocation8 + $0x350] sm:$0xff]  ;;  %v8623_v5 = vld [vmem:[#allocation8 + $0x360] sm:$0xff] }
 0x588   :  { %10025 = vmatprep.subr.bf16.mxu0 %v8790_v48  ;;  %9381 = vmatprep.mubr.bf16.mxu1 %v20671_v29  ;;  %v20674_v48 = vcombine.high %v20673_v51, %v18020_v31  ;;  %v8795_v29 = vld [vmem:[#allocation8 + $0x8c0] sm:$0xff] }
 0x589   :  { %9448 = vmatprep.subr.bf16.mxu1 %v8618_v19  ;;  %v8796_v19 = vld [vmem:[#allocation8 + $0x8c8] sm:$0xff]  ;;  %v20680_v38 = vld [vmem:[#allocation243_spill] sm:$0xff] }
 0x58a   :  { %9449 = vmatpush1.bf16.msra.mxu1 %v8617_v9  ;;  %v8798_v9 = vld [vmem:[#allocation8 + $0x8d8] sm:$0xff] }
 0x58b   :  { %10026 = vmatpush1.bf16.msra.mxu0 %v8789_v35  ;;  %9450 = vmatprep.subr.bf16.mxu1 %v8620_v1  ;;  %v20676_v35 = vld [vmem:[#allocation92_spill] sm:$0xff]  ;;  %v20679_v1 = vcombine.low %v20673_v51, %v18020_v31  ;;  %v8625_v51 = vld [vmem:[#allocation8 + $0x370] sm:$0xff] }
 0x58c   :  { %10027 = vmatprep.subr.bf16.mxu0 %v8792_v50  ;;  %v20678_v41 = vcombine.high %v20676_v35, %v20677_v8  ;;  %v8624_v50 = vld [vmem:[#allocation8 + $0x368] sm:$0xff] }
 0x58d   :  { %9382 = vmatmul.mubr.bf16.gmra.mrb[72].mxu1 %v20675_v18  ;;  %v8628_v18 = vld [vmem:[#allocation8 + $0x388] sm:$0xff] }
 0x58e   :  { %9977 = vmatmul.mubr.bf16.gmra.mrb[52].mxu0 %v20672_v44  ;;  %9451 = vmatpush1.bf16.msra.mxu1 %v8619_v53  ;;  %v8797_v44 = vld [vmem:[#allocation8 + $0x8d0] sm:$0xff]  ;;  %v20682_v53 = vcombine.low %v20676_v35, %v20677_v8  ;;  %v8627_v35 = vld [vmem:[#allocation8 + $0x380] sm:$0xff] }
 0x58f   :  { %10028 = vmatpush1.bf16.msra.mxu0 %v8791_v3  ;;  %9986 = vmatprep.mubr.bf16.mxu0 %v20674_v48  ;;  %v20681_v3 = vcombine.high %v18139_v56, %v20680_v38  ;;  %v8800_v48 = vld [vmem:[#allocation8 + $0x8e8] sm:$0xff] }
 0x590   :  { %10029 = vmatprep.subr.bf16.mxu0 %v8794_v58  ;;  %9391 = vmatprep.mubr.bf16.mxu1 %v20678_v41  ;;  %v8626_v58 = vld [vmem:[#allocation8 + $0x378] sm:$0xff]  ;;  %v20687_v8 = vld [vmem:[#allocation48_spill] sm:$0xff] }
 0x591   :  { %9452 = vmatprep.subr.bf16.mxu1 %v8622_v0  ;;  %v20683_v0 = vld [vmem:[#allocation37_spill] sm:$0xff]  ;;  %v8802_v41 = vld [vmem:[#allocation8 + $0x8f8] sm:$0xff] }
 0x592   :  { %9453 = vmatpush1.bf16.msra.mxu1 %v8621_v37  ;;  %v20686_v37 = vcombine.low %v18139_v56, %v20680_v38 }
 0x593   :  { %10030 = vmatpush1.bf16.msra.mxu0 %v8793_v16  ;;  %9454 = vmatprep.subr.bf16.mxu1 %v8624_v50  ;;  %v20684_v16 = vld [vmem:[#allocation112_spill] sm:$0xff]  ;;  %v20688_v50 = vld [vmem:[#allocation55_spill] sm:$0xff] }
 0x594   :  { %10031 = vmatprep.subr.bf16.mxu0 %v8796_v19  ;;  %v20685_v31 = vcombine.high %v20683_v0, %v20684_v16  ;;  %v8799_v19 = vld [vmem:[#allocation8 + $0x8e0] sm:$0xff] }
 0x595   :  { %9392 = vmatmul.mubr.bf16.gmra.mrb[76].mxu1 %v20682_v53  ;;  %v8629_v53 = vld [vmem:[#allocation8 + $0x390] sm:$0xff] }
 0x596   :  { %9987 = vmatmul.mubr.bf16.gmra.mrb[56].mxu0 %v20679_v1  ;;  %9455 = vmatpush1.bf16.msra.mxu1 %v8623_v5  ;;  %v8801_v1 = vld [vmem:[#allocation8 + $0x8f0] sm:$0xff]  ;;  %v20690_v5 = vcombine.low %v20683_v0, %v20684_v16  ;;  %v8631_v0 = vld [vmem:[#allocation8 + $0x3a0] sm:$0xff] }
 0x597   :  { %10032 = vmatpush1.bf16.msra.mxu0 %v8795_v29  ;;  %9996 = vmatprep.mubr.bf16.mxu0 %v20681_v3  ;;  %v20689_v29 = vcombine.high %v20687_v8, %v20688_v50  ;;  %v8804_v3 = vld [vmem:[#allocation8 + $0x908] sm:$0xff] }
 0x598   :  { %10033 = vmatprep.subr.bf16.mxu0 %v8798_v9  ;;  %9401 = vmatprep.mubr.bf16.mxu1 %v20685_v31  ;;  %v8630_v9 = vld [vmem:[#allocation8 + $0x398] sm:$0xff]  ;;  %v8803_v31 = vld [vmem:[#allocation8 + $0x900] sm:$0xff] }
 0x599   :  { %9456 = vmatprep.subr.bf16.mxu1 %v8626_v58  ;;  %v20691_v58 = vld [vmem:[#allocation67_spill] sm:$0xff]  ;;  %v20695_v16 = vld [vmem:[#allocation68_spill] sm:$0xff] }
 0x59a   :  { %9457 = vmatpush1.bf16.msra.mxu1 %v8625_v51  ;;  %v8806_v51 = vld [vmem:[#allocation8 + $0x918] sm:$0xff] }
 0x59b   :  { %10034 = vmatpush1.bf16.msra.mxu0 %v8797_v44  ;;  %9458 = vmatprep.subr.bf16.mxu1 %v8628_v18  ;;  %v20692_v44 = vld [vmem:[#allocation120_spill] sm:$0xff]  ;;  %v20694_v18 = vcombine.low %v20687_v8, %v20688_v50  ;;  %v8633_v50 = vld [vmem:[#allocation8 + $0x3b0] sm:$0xff] }
 0x59c   :  { %10035 = vmatprep.subr.bf16.mxu0 %v8800_v48  ;;  %v20693_v56 = vcombine.high %v20691_v58, %v20692_v44  ;;  %v8632_v48 = vld [vmem:[#allocation8 + $0x3a8] sm:$0xff] }
 0x59d   :  { %9402 = vmatmul.mubr.bf16.gmra.mrb[80].mxu1 %v20690_v5  ;;  %v20700_v5 = vld [vmem:[#allocation134_spill] sm:$0xff] }
 0x59e   :  { %9997 = vmatmul.mubr.bf16.gmra.mrb[60].mxu0 %v20686_v37  ;;  %9459 = vmatpush1.bf16.msra.mxu1 %v8627_v35  ;;  %v8634_v37 = vld [vmem:[#allocation8 + $0x3b8] sm:$0xff]  ;;  %v8805_v35 = vld [vmem:[#allocation8 + $0x910] sm:$0xff] }
 0x59f   :  { %10036 = vmatpush1.bf16.msra.mxu0 %v8799_v19  ;;  %10039 = vmatprep.mubr.bf16.mxu0 %v20689_v29  ;;  %v20696_v19 = vld [vmem:[#allocation73_spill] sm:$0xff]  ;;  %v20698_v29 = vcombine.low %v20691_v58, %v20692_v44  ;;  %v8635_v58 = vld [vmem:[#allocation8 + $0x3c0] sm:$0xff]  ;;  %v20703_v44 = vld [vmem:[#allocation90_spill] sm:$0xff] }
 0x5a0   :  { %10037 = vmatprep.subr.bf16.mxu0 %v8802_v41  ;;  %9411 = vmatprep.mubr.bf16.mxu1 %v20693_v56  ;;  %v20697_v41 = vcombine.high %v20695_v16, %v20696_v19  ;;  %v8807_v56 = vld [vmem:[#allocation8 + $0x920] sm:$0xff] }
 0x5a1   :  { %9460 = vmatprep.subr.bf16.mxu1 %v8630_v9  ;;  %v8808_v9 = vld [vmem:[#allocation8 + $0x928] sm:$0xff] }
 0x5a2   :  { %9461 = vmatpush1.bf16.msra.mxu1 %v8629_v53  ;;  %v8810_v53 = vld [vmem:[#allocation8 + $0x938] sm:$0xff] }
 0x5a3   :  { %10038 = vmatpush1.bf16.msra.mxu0 %v8801_v1  ;;  %9462 = vmatprep.subr.bf16.mxu1 %v8632_v48  ;;  %v20699_v1 = vld [vmem:[#allocation131_spill] sm:$0xff]  ;;  %v20702_v48 = vcombine.low %v20695_v16, %v20696_v19  ;;  %v8637_v19 = vld [vmem:[#allocation8 + $0x3d0] sm:$0xff] }
 0x5a4   :  { %10120 = vmatprep.subr.bf16.mxu0 %v8804_v3  ;;  %v20701_v8 = vcombine.high %v20699_v1, %v20700_v5  ;;  %v8636_v3 = vld [vmem:[#allocation8 + $0x3c8] sm:$0xff] }
 0x5a5   :  { %9412 = vmatmul.mubr.bf16.gmra.mrb[84].mxu1 %v20698_v29  ;;  %v20708_v29 = vld [vmem:[#allocation150_spill] sm:$0xff] }
 0x5a6   :  { %10040 = vmatmul.mubr.bf16.vlgmr.msra.gmra.mrb[32].mxu0 %v20694_v18  ;;  %9463 = vmatpush1.bf16.msra.mxu1 %v8631_v0  ;;  %v8638_v18 = vld [vmem:[#allocation8 + $0x3d8] sm:$0xff]  ;;  %v8809_v0 = vld [vmem:[#allocation8 + $0x930] sm:$0xff] }
 0x5a7   :  { %10121 = vmatpush1.bf16.msra.mxu0 %v8803_v31  ;;  %10049 = vmatprep.mubr.bf16.mxu0 %v20697_v41  ;;  %v20704_v31 = vld [vmem:[#allocation91_spill] sm:$0xff]  ;;  %v20706_v41 = vcombine.low %v20699_v1, %v20700_v5  ;;  %v20711_v5 = vld [vmem:[#allocation105_spill] sm:$0xff] }
 0x5a8   :  { %10122 = vmatprep.subr.bf16.mxu0 %v8806_v51  ;;  %9421 = vmatprep.mubr.bf16.mxu1 %v20701_v8  ;;  %v20705_v51 = vcombine.high %v20703_v44, %v20704_v31  ;;  %v8811_v8 = vld [vmem:[#allocation8 + $0x940] sm:$0xff] }
 0x5a9   :  { %9464 = vmatprep.subr.bf16.mxu1 %v8634_v37  ;;  %v8812_v37 = vld [vmem:[#allocation8 + $0x948] sm:$0xff]  ;;  %v8639_v1 = vld [vmem:[#allocation8 + $0x3e0] sm:$0xff] }
 0x5aa   :  { %9465 = vmatpush1.bf16.msra.mxu1 %v8633_v50  ;;  %v8814_v50 = vld [vmem:[#allocation8 + $0x958] sm:$0xff] }
 0x5ab   :  { %10123 = vmatpush1.bf16.msra.mxu0 %v8805_v35  ;;  %9466 = vmatprep.subr.bf16.mxu1 %v8636_v3  ;;  %v20707_v35 = vld [vmem:[#allocation144_spill] sm:$0xff]  ;;  %v20710_v3 = vcombine.low %v20703_v44, %v20704_v31  ;;  %v8641_v31 = vld [vmem:[#allocation8 + $0x3f0] sm:$0xff] }
 0x5ac   :  { %10124 = vmatprep.subr.bf16.mxu0 %v8808_v9  ;;  %v20709_v16 = vcombine.high %v20707_v35, %v20708_v29  ;;  %v8640_v9 = vld [vmem:[#allocation8 + $0x3e8] sm:$0xff] }
 0x5ad   :  { %9422 = vmatmul.mubr.bf16.gmra.mrb[88].mxu1 %v20706_v41  ;;  %v20716_v41 = vld [vmem:[#allocation171_spill] sm:$0xff] }
 0x5ae   :  { %10050 = vmatmul.mubr.bf16.gmra.mrb[36].mxu0 %v20702_v48  ;;  %9467 = vmatpush1.bf16.msra.mxu1 %v8635_v58  ;;  %v8642_v48 = vld [vmem:[#allocation8 + $0x3f8] sm:$0xff]  ;;  %v8813_v58 = vld [vmem:[#allocation8 + $0x950] sm:$0xff] }
 0x5af   :  { %10125 = vmatpush1.bf16.msra.mxu0 %v8807_v56  ;;  %10059 = vmatprep.mubr.bf16.mxu0 %v20705_v51  ;;  %v20712_v56 = vld [vmem:[#allocation109_spill] sm:$0xff]  ;;  %v20714_v51 = vcombine.low %v20707_v35, %v20708_v29  ;;  %v8643_v35 = vld [vmem:[#allocation8 + $0x400] sm:$0xff] }
 0x5b0   :  { %10126 = vmatprep.subr.bf16.mxu0 %v8810_v53  ;;  %9431 = vmatprep.mubr.bf16.mxu1 %v20709_v16  ;;  %v20713_v53 = vcombine.high %v20711_v5, %v20712_v56  ;;  %v8815_v16 = vld [vmem:[#allocation8 + $0x960] sm:$0xff]  ;;  %v20719_v29 = vld [vmem:[#allocation113_spill] sm:$0xff] }
 0x5b1   :  { %9468 = vmatprep.subr.bf16.mxu1 %v8638_v18  ;;  %v8816_v18 = vld [vmem:[#allocation8 + $0x968] sm:$0xff] }
 0x5b2   :  { %9469 = vmatpush1.bf16.msra.mxu1 %v8637_v19  ;;  %v8818_v19 = vld [vmem:[#allocation8 + $0x978] sm:$0xff] }
 0x5b3   :  { %10127 = vmatpush1.bf16.msra.mxu0 %v8809_v0  ;;  %9470 = vmatprep.subr.bf16.mxu1 %v8640_v9  ;;  %v20715_v0 = vld [vmem:[#allocation167_spill] sm:$0xff]  ;;  %v20718_v9 = vcombine.low %v20711_v5, %v20712_v56  ;;  %v8645_v56 = vld [vmem:[#allocation8 + $0x410] sm:$0xff] }
 0x5b4   :  { %10128 = vmatprep.subr.bf16.mxu0 %v8812_v37  ;;  %v20717_v44 = vcombine.high %v20715_v0, %v20716_v41  ;;  %v8644_v37 = vld [vmem:[#allocation8 + $0x408] sm:$0xff] }
 0x5b5   :  { %9432 = vmatmul.mubr.bf16.gmra.mrb[92].mxu1 %v20714_v51  ;;  %v20724_v51 = vld [vmem:[#allocation180_spill] sm:$0xff] }
 0x5b6   :  { %10060 = vmatmul.mubr.bf16.gmra.mrb[40].mxu0 %v20710_v3  ;;  %9471 = vmatpush1.bf16.msra.mxu1 %v8639_v1  ;;  %v8646_v3 = vld [vmem:[#allocation8 + $0x418] sm:$0xff]  ;;  %v8817_v1 = vld [vmem:[#allocation8 + $0x970] sm:$0xff] }
 0x5b7   :  { %10129 = vmatpush1.bf16.msra.mxu0 %v8811_v8  ;;  %10069 = vmatprep.mubr.bf16.mxu0 %v20713_v53  ;;  %v20720_v8 = vld [vmem:[#allocation116_spill] sm:$0xff]  ;;  %v20722_v53 = vcombine.low %v20715_v0, %v20716_v41 }
 0x5b8   :  { %10130 = vmatprep.subr.bf16.mxu0 %v8814_v50  ;;  %9474 = vmatprep.mubr.bf16.mxu1 %v20717_v44  ;;  %v20721_v50 = vcombine.high %v20719_v29, %v20720_v8  ;;  %v8819_v44 = vld [vmem:[#allocation8 + $0x980] sm:$0xff] }
 0x5b9   :  { %9472 = vmatprep.subr.bf16.mxu1 %v8642_v48  ;;  %v8820_v48 = vld [vmem:[#allocation8 + $0x988] sm:$0xff]  ;;  %v8647_v0 = vld [vmem:[#allocation8 + $0x420] sm:$0xff] }
 0x5ba   :  { %9473 = vmatpush1.bf16.msra.mxu1 %v8641_v31  ;;  %v8822_v31 = vld [vmem:[#allocation8 + $0x998] sm:$0xff]  ;;  %v20727_v41 = vld [vmem:[#allocation124_spill] sm:$0xff] }
 0x5bb   :  { %10131 = vmatpush1.bf16.msra.mxu0 %v8813_v58  ;;  %9555 = vmatprep.subr.bf16.mxu1 %v8644_v37  ;;  %v20723_v58 = vld [vmem:[#allocation176_spill] sm:$0xff]  ;;  %v20726_v37 = vcombine.low %v20719_v29, %v20720_v8  ;;  %v8649_v8 = vld [vmem:[#allocation8 + $0x430] sm:$0xff] }
 0x5bc   :  { %10132 = vmatprep.subr.bf16.mxu0 %v8816_v18  ;;  %v20725_v5 = vcombine.high %v20723_v58, %v20724_v51  ;;  %v8648_v18 = vld [vmem:[#allocation8 + $0x428] sm:$0xff] }
 0x5bd   :  { %9475 = vmatmul.mubr.bf16.vlgmr.msra.gmra.mrb[64].mxu1 %v20722_v53  ;;  %v20732_v53 = vld [vmem:[#allocation193_spill] sm:$0xff] }
 0x5be   :  { %10070 = vmatmul.mubr.bf16.gmra.mrb[44].mxu0 %v20718_v9  ;;  %9556 = vmatpush1.bf16.msra.mxu1 %v8643_v35  ;;  %v8650_v9 = vld [vmem:[#allocation8 + $0x438] sm:$0xff]  ;;  %v8821_v35 = vld [vmem:[#allocation8 + $0x990] sm:$0xff] }
 0x5bf   :  { %10133 = vmatpush1.bf16.msra.mxu0 %v8815_v16  ;;  %10079 = vmatprep.mubr.bf16.mxu0 %v20721_v50  ;;  %v20728_v16 = vld [vmem:[#allocation125_spill] sm:$0xff]  ;;  %v20730_v50 = vcombine.low %v20723_v58, %v20724_v51  ;;  %v8651_v58 = vld [vmem:[#allocation8 + $0x440] sm:$0xff]  ;;  %v20735_v51 = vld [vmem:[#allocation138_spill] sm:$0xff] }
 0x5c0   :  { %10134 = vmatprep.subr.bf16.mxu0 %v8818_v19  ;;  %9484 = vmatprep.mubr.bf16.mxu1 %v20725_v5  ;;  %v20729_v19 = vcombine.high %v20727_v41, %v20728_v16  ;;  %v8823_v5 = vld [vmem:[#allocation8 + $0x9a0] sm:$0xff] }
 0x5c1   :  { %9557 = vmatprep.subr.bf16.mxu1 %v8646_v3  ;;  %v8824_v3 = vld [vmem:[#allocation8 + $0x9a8] sm:$0xff] }
 0x5c2   :  { %9558 = vmatpush1.bf16.msra.mxu1 %v8645_v56  ;;  %v8826_v56 = vld [vmem:[#allocation8 + $0x9b8] sm:$0xff] }
 0x5c3   :  { %10135 = vmatpush1.bf16.msra.mxu0 %v8817_v1  ;;  %9559 = vmatprep.subr.bf16.mxu1 %v8648_v18  ;;  %v20731_v1 = vld [vmem:[#allocation189_spill] sm:$0xff]  ;;  %v20734_v18 = vcombine.low %v20727_v41, %v20728_v16 }
 0x5c4   :  { %10136 = vmatprep.subr.bf16.mxu0 %v8820_v48  ;;  %v20733_v29 = vcombine.high %v20731_v1, %v20732_v53  ;;  %v8652_v48 = vld [vmem:[#allocation8 + $0x448] sm:$0xff]  ;;  %v8653_v16 = vld [vmem:[#allocation8 + $0x450] sm:$0xff] }
 0x5c5   :  { %9485 = vmatmul.mubr.bf16.gmra.mrb[68].mxu1 %v20730_v50  ;;  %v20740_v50 = vld [vmem:[#allocation204_spill] sm:$0xff] }
 0x5c6   :  { %10080 = vmatmul.mubr.bf16.gmra.mrb[48].mxu0 %v20726_v37  ;;  %9560 = vmatpush1.bf16.msra.mxu1 %v8647_v0  ;;  %v8654_v37 = vld [vmem:[#allocation8 + $0x458] sm:$0xff]  ;;  %v8825_v0 = vld [vmem:[#allocation8 + $0x9b0] sm:$0xff] }
 0x5c7   :  { %10137 = vmatpush1.bf16.msra.mxu0 %v8819_v44  ;;  %10089 = vmatprep.mubr.bf16.mxu0 %v20729_v19  ;;  %v20736_v44 = vld [vmem:[#allocation140_spill] sm:$0xff]  ;;  %v20738_v19 = vcombine.low %v20731_v1, %v20732_v53  ;;  %v20743_v53 = vld [vmem:[#allocation155_spill] sm:$0xff] }
 0x5c8   :  { %10138 = vmatprep.subr.bf16.mxu0 %v8822_v31  ;;  %9494 = vmatprep.mubr.bf16.mxu1 %v20733_v29  ;;  %v20737_v31 = vcombine.high %v20735_v51, %v20736_v44  ;;  %v8827_v29 = vld [vmem:[#allocation8 + $0x9c0] sm:$0xff] }
 0x5c9   :  { %9561 = vmatprep.subr.bf16.mxu1 %v8650_v9  ;;  %v8828_v9 = vld [vmem:[#allocation8 + $0x9c8] sm:$0xff]  ;;  %v8655_v1 = vld [vmem:[#allocation8 + $0x460] sm:$0xff] }
 0x5ca   :  { %9562 = vmatpush1.bf16.msra.mxu1 %v8649_v8  ;;  %v8830_v8 = vld [vmem:[#allocation8 + $0x9d8] sm:$0xff] }
 0x5cb   :  { %10139 = vmatpush1.bf16.msra.mxu0 %v8821_v35  ;;  %9563 = vmatprep.subr.bf16.mxu1 %v8652_v48  ;;  %v20739_v35 = vld [vmem:[#allocation199_spill] sm:$0xff]  ;;  %v20742_v48 = vcombine.low %v20735_v51, %v20736_v44  ;;  %v8657_v44 = vld [vmem:[#allocation8 + $0x470] sm:$0xff] }
 0x5cc   :  { %10140 = vmatprep.subr.bf16.mxu0 %v8824_v3  ;;  %v20741_v41 = vcombine.high %v20739_v35, %v20740_v50  ;;  %v8656_v3 = vld [vmem:[#allocation8 + $0x468] sm:$0xff] }
 0x5cd   :  { %9495 = vmatmul.mubr.bf16.gmra.mrb[72].mxu1 %v20738_v19  ;;  %v20748_v19 = vld [vmem:[#allocation214_spill] sm:$0xff] }
 0x5ce   :  { %10090 = vmatmul.mubr.bf16.gmra.mrb[52].mxu0 %v20734_v18  ;;  %9564 = vmatpush1.bf16.msra.mxu1 %v8651_v58  ;;  %v8658_v18 = vld [vmem:[#allocation8 + $0x478] sm:$0xff]  ;;  %v8829_v58 = vld [vmem:[#allocation8 + $0x9d0] sm:$0xff] }
 0x5cf   :  { %10141 = vmatpush1.bf16.msra.mxu0 %v8823_v5  ;;  %10099 = vmatprep.mubr.bf16.mxu0 %v20737_v31  ;;  %v20744_v5 = vld [vmem:[#allocation160_spill] sm:$0xff]  ;;  %v20746_v31 = vcombine.low %v20739_v35, %v20740_v50  ;;  %v20751_v50 = vld [vmem:[#allocation174_spill] sm:$0xff] }
 0x5d0   :  { %10142 = vmatprep.subr.bf16.mxu0 %v8826_v56  ;;  %9504 = vmatprep.mubr.bf16.mxu1 %v20741_v41  ;;  %v20745_v56 = vcombine.high %v20743_v53, %v20744_v5  ;;  %v8831_v41 = vld [vmem:[#allocation8 + $0x9e0] sm:$0xff] }
 0x5d1   :  { %9565 = vmatprep.subr.bf16.mxu1 %v8654_v37  ;;  %v8832_v37 = vld [vmem:[#allocation8 + $0x9e8] sm:$0xff]  ;;  %v8659_v35 = vld [vmem:[#allocation8 + $0x480] sm:$0xff] }
 0x5d2   :  { %9566 = vmatpush1.bf16.msra.mxu1 %v8653_v16  ;;  %v8834_v16 = vld [vmem:[#allocation8 + $0x9f8] sm:$0xff] }
 0x5d3   :  { %10143 = vmatpush1.bf16.msra.mxu0 %v8825_v0  ;;  %9567 = vmatprep.subr.bf16.mxu1 %v8656_v3  ;;  %v20747_v0 = vld [vmem:[#allocation213_spill] sm:$0xff]  ;;  %v20750_v3 = vcombine.low %v20743_v53, %v20744_v5 }
 0x5d4   :  { %10144 = vmatprep.subr.bf16.mxu0 %v8828_v9  ;;  %v20749_v51 = vcombine.high %v20747_v0, %v20748_v19  ;;  %v8660_v9 = vld [vmem:[#allocation8 + $0x488] sm:$0xff]  ;;  %v8661_v5 = vld [vmem:[#allocation8 + $0x490] sm:$0xff] }
 0x5d5   :  { %9505 = vmatmul.mubr.bf16.gmra.mrb[76].mxu1 %v20746_v31  ;;  %v20756_v31 = vld [vmem:[#allocation222_spill] sm:$0xff] }
 0x5d6   :  { %10100 = vmatmul.mubr.bf16.gmra.mrb[56].mxu0 %v20742_v48  ;;  %9568 = vmatpush1.bf16.msra.mxu1 %v8655_v1  ;;  %v8662_v48 = vld [vmem:[#allocation8 + $0x498] sm:$0xff]  ;;  %v8833_v1 = vld [vmem:[#allocation8 + $0x9f0] sm:$0xff] }
 0x5d7   :  { %10145 = vmatpush1.bf16.msra.mxu0 %v8827_v29  ;;  %10109 = vmatprep.mubr.bf16.mxu0 %v20745_v56  ;;  %v20752_v29 = vld [vmem:[#allocation175_spill] sm:$0xff]  ;;  %v20754_v56 = vcombine.low %v20747_v0, %v20748_v19  ;;  %v20759_v19 = vld [vmem:[#allocation182_spill] sm:$0xff] }
 0x5d8   :  { %10146 = vmatprep.subr.bf16.mxu0 %v8830_v8  ;;  %9514 = vmatprep.mubr.bf16.mxu1 %v20749_v51  ;;  %v20753_v8 = vcombine.high %v20751_v50, %v20752_v29  ;;  %v8835_v51 = vld [vmem:[#allocation8 + $0xa00] sm:$0xff] }
 0x5d9   :  { %9569 = vmatprep.subr.bf16.mxu1 %v8658_v18  ;;  %v8836_v18 = vld [vmem:[#allocation8 + $0xa08] sm:$0xff]  ;;  %v8663_v0 = vld [vmem:[#allocation8 + $0x4a0] sm:$0xff] }
 0x5da   :  { %9570 = vmatpush1.bf16.msra.mxu1 %v8657_v44  ;;  %v8838_v44 = vld [vmem:[#allocation8 + $0xa18] sm:$0xff] }
 0x5db   :  { %10147 = vmatpush1.bf16.msra.mxu0 %v8829_v58  ;;  %9571 = vmatprep.subr.bf16.mxu1 %v8660_v9  ;;  %v20755_v58 = vld [vmem:[#allocation221_spill] sm:$0xff]  ;;  %v20758_v9 = vcombine.low %v20751_v50, %v20752_v29 }
 0x5dc   :  { %10148 = vmatprep.subr.bf16.mxu0 %v8832_v37  ;;  %v20757_v53 = vcombine.high %v20755_v58, %v20756_v31  ;;  %v8664_v37 = vld [vmem:[#allocation8 + $0x4a8] sm:$0xff]  ;;  %v8665_v29 = vld [vmem:[#allocation8 + $0x4b0] sm:$0xff] }
 0x5dd   :  { %9515 = vmatmul.mubr.bf16.gmra.mrb[80].mxu1 %v20754_v56  ;;  %v20764_v56 = vld [vmem:[#allocation235_spill] sm:$0xff] }
 0x5de   :  { %10110 = vmatmul.mubr.bf16.gmra.mrb[60].mxu0 %v20750_v3  ;;  %9572 = vmatpush1.bf16.msra.mxu1 %v8659_v35  ;;  %v8666_v3 = vld [vmem:[#allocation8 + $0x4b8] sm:$0xff]  ;;  %v8837_v35 = vld [vmem:[#allocation8 + $0xa10] sm:$0xff] }
 0x5df   :  { %10149 = vmatpush1.bf16.msra.mxu0 %v8831_v41  ;;  %10152 = vmatprep.mubr.bf16.mxu0 %v20753_v8  ;;  %v20760_v41 = vld [vmem:[#allocation185_spill] sm:$0xff]  ;;  %v20762_v8 = vcombine.low %v20755_v58, %v20756_v31  ;;  %v8667_v58 = vld [vmem:[#allocation8 + $0x4c0] sm:$0xff] }
 0x5e0   :  { %10150 = vmatprep.subr.bf16.mxu0 %v8834_v16  ;;  %9524 = vmatprep.mubr.bf16.mxu1 %v20757_v53  ;;  %v20761_v16 = vcombine.high %v20759_v19, %v20760_v41  ;;  %v8839_v53 = vld [vmem:[#allocation8 + $0xa20] sm:$0xff]  ;;  %v20767_v31 = vld [vmem:[#allocation197_spill] sm:$0xff] }
 0x5e1   :  { %9573 = vmatprep.subr.bf16.mxu1 %v8662_v48  ;;  %v8840_v48 = vld [vmem:[#allocation8 + $0xa28] sm:$0xff] }
 0x5e2   :  { %9574 = vmatpush1.bf16.msra.mxu1 %v8661_v5  ;;  %v8842_v5 = vld [vmem:[#allocation8 + $0xa38] sm:$0xff] }
 0x5e3   :  { %10151 = vmatpush1.bf16.msra.mxu0 %v8833_v1  ;;  %9575 = vmatprep.subr.bf16.mxu1 %v8664_v37  ;;  %v20763_v1 = vld [vmem:[#allocation233_spill] sm:$0xff]  ;;  %v20766_v37 = vcombine.low %v20759_v19, %v20760_v41 }
 0x5e4   :  { %10233 = vmatprep.subr.bf16.mxu0 %v8836_v18  ;;  %v20765_v50 = vcombine.high %v20763_v1, %v20764_v56  ;;  %v8668_v18 = vld [vmem:[#allocation8 + $0x4c8] sm:$0xff]  ;;  %v8669_v41 = vld [vmem:[#allocation8 + $0x4d0] sm:$0xff] }
 0x5e5   :  { %9525 = vmatmul.mubr.bf16.gmra.mrb[84].mxu1 %v20762_v8  ;;  %v20772_v8 = vld [vmem:[#allocation245_spill] sm:$0xff] }
 0x5e6   :  { %10153 = vmatmul.mubr.bf16.vlgmr.msra.gmra.mrb[32].mxu0 %v20758_v9  ;;  %9576 = vmatpush1.bf16.msra.mxu1 %v8663_v0  ;;  %v8670_v9 = vld [vmem:[#allocation8 + $0x4d8] sm:$0xff]  ;;  %v8841_v0 = vld [vmem:[#allocation8 + $0xa30] sm:$0xff] }
 0x5e7   :  { %10234 = vmatpush1.bf16.msra.mxu0 %v8835_v51  ;;  %10162 = vmatprep.mubr.bf16.mxu0 %v20761_v16  ;;  %v20768_v51 = vld [vmem:[#allocation200_spill] sm:$0xff]  ;;  %v20770_v16 = vcombine.low %v20763_v1, %v20764_v56  ;;  %v20775_v56 = vld [vmem:[#allocation205_spill] sm:$0xff] }
 0x5e8   :  { %10235 = vmatprep.subr.bf16.mxu0 %v8838_v44  ;;  %9534 = vmatprep.mubr.bf16.mxu1 %v20765_v50  ;;  %v20769_v44 = vcombine.high %v20767_v31, %v20768_v51  ;;  %v8843_v50 = vld [vmem:[#allocation8 + $0xa40] sm:$0xff] }
 0x5e9   :  { %9577 = vmatprep.subr.bf16.mxu1 %v8666_v3  ;;  %v8844_v3 = vld [vmem:[#allocation8 + $0xa48] sm:$0xff]  ;;  %v8671_v1 = vld [vmem:[#allocation8 + $0x4e0] sm:$0xff] }
 0x5ea   :  { %9578 = vmatpush1.bf16.msra.mxu1 %v8665_v29  ;;  %v8846_v29 = vld [vmem:[#allocation8 + $0xa58] sm:$0xff] }
 0x5eb   :  { %10236 = vmatpush1.bf16.msra.mxu0 %v8837_v35  ;;  %9579 = vmatprep.subr.bf16.mxu1 %v8668_v18  ;;  %v20771_v35 = vld [vmem:[#allocation244_spill] sm:$0xff]  ;;  %v20774_v18 = vcombine.low %v20767_v31, %v20768_v51  ;;  %v8673_v51 = vld [vmem:[#allocation8 + $0x4f0] sm:$0xff] }
 0x5ec   :  { %10237 = vmatprep.subr.bf16.mxu0 %v8840_v48  ;;  %v20773_v19 = vcombine.high %v20771_v35, %v20772_v8  ;;  %v8672_v48 = vld [vmem:[#allocation8 + $0x4e8] sm:$0xff] }
 0x5ed   :  { %9535 = vmatmul.mubr.bf16.gmra.mrb[88].mxu1 %v20770_v16  ;;  %v20780_v16 = vld [vmem:[#allocation45_spill] sm:$0xff] }
 0x5ee   :  { %10163 = vmatmul.mubr.bf16.gmra.mrb[36].mxu0 %v20766_v37  ;;  %9580 = vmatpush1.bf16.msra.mxu1 %v8667_v58  ;;  %v8674_v37 = vld [vmem:[#allocation8 + $0x4f8] sm:$0xff]  ;;  %v8845_v58 = vld [vmem:[#allocation8 + $0xa50] sm:$0xff] }
 0x5ef   :  { %10238 = vmatpush1.bf16.msra.mxu0 %v8839_v53  ;;  %10172 = vmatprep.mubr.bf16.mxu0 %v20769_v44  ;;  %v20776_v53 = vld [vmem:[#allocation211_spill] sm:$0xff]  ;;  %v20778_v44 = vcombine.low %v20771_v35, %v20772_v8  ;;  %v20784_v8 = vld [vmem:[#allocation220_spill] sm:$0xff] }
 0x5f0   :  { %10239 = vmatprep.subr.bf16.mxu0 %v8842_v5  ;;  %9544 = vmatprep.mubr.bf16.mxu1 %v20773_v19  ;;  %v20777_v5 = vcombine.high %v20775_v56, %v20776_v53  ;;  %v8850_v19 = vld [vmem:[#allocation8 + $0xa78] sm:$0xff] }
 0x5f1   :  { %9581 = vmatprep.subr.bf16.mxu1 %v8670_v9  ;;  %v8848_v9 = vld [vmem:[#allocation8 + $0xa68] sm:$0xff]  ;;  %v20783_v35 = vld [vmem:[#allocation219_spill] sm:$0xff] }
 0x5f2   :  { %9582 = vmatpush1.bf16.msra.mxu1 %v8669_v41  ;;  %v20782_v41 = vcombine.low %v20775_v56, %v20776_v53  ;;  %v8851_v56 = vld [vmem:[#allocation8 + $0xa80] sm:$0xff]  ;;  %v8854_v53 = vld [vmem:[#allocation8 + $0xa98] sm:$0xff] }
 0x5f3   :  { %10240 = vmatpush1.bf16.msra.mxu0 %v8841_v0  ;;  %9583 = vmatprep.subr.bf16.mxu1 %v8672_v48  ;;  %v20779_v0 = vld [vmem:[#allocation36_spill] sm:$0xff]  ;;  %v20785_v48 = vcombine.high %v20783_v35, %v20784_v8 }
 0x5f4   :  { %10241 = vmatprep.subr.bf16.mxu0 %v8844_v3  ;;  %v20781_v31 = vcombine.high %v20779_v0, %v20780_v16  ;;  %v8847_v3 = vld [vmem:[#allocation8 + $0xa60] sm:$0xff] }
 0x5f5   :  { %9545 = vmatmul.mubr.bf16.gmra.mrb[92].mxu1 %v20778_v44  ;;  %v20791_v44 = vld [vmem:[#allocation229_spill] sm:$0xff] }
 0x5f6   :  { %10173 = vmatmul.mubr.bf16.gmra.mrb[40].mxu0 %v20774_v18  ;;  %9584 = vmatpush1.bf16.msra.mxu1 %v8671_v1  ;;  %v8852_v18 = vld [vmem:[#allocation8 + $0xa88] sm:$0xff] }
 0x5f7   :  { %10242 = vmatpush1.bf16.msra.mxu0 %v8843_v50  ;;  %10182 = vmatprep.mubr.bf16.mxu0 %v20777_v5  ;;  %v8849_v50 = vld [vmem:[#allocation8 + $0xa70] sm:$0xff]  ;;  %v20787_v1 = vld [vmem:[#allocation52_spill] sm:$0xff] }
 0x5f8   :  { %10243 = vmatprep.subr.bf16.mxu0 %v8846_v29  ;;  %9587 = vmatprep.mubr.bf16.mxu1 %v20781_v31  ;;  %v20786_v29 = vcombine.low %v20779_v0, %v20780_v16  ;;  %v20788_v5 = vld [vmem:[#allocation62_spill] sm:$0xff] }
 0x5f9   :  { %9585 = vmatprep.subr.bf16.mxu1 %v8674_v37  ;;  %v20789_v37 = vcombine.high %v20787_v1, %v20788_v5  ;;  %v8853_v0 = vld [vmem:[#allocation8 + $0xa90] sm:$0xff]  ;;  %v20794_v16 = vcombine.low %v20787_v1, %v20788_v5 }
 0x5fa   :  { %9586 = vmatpush1.bf16.msra.mxu1 %v8673_v51  ;;  %v8856_v51 = vld [vmem:[#allocation8 + $0xaa8] sm:$0xff]  ;;  %v8857_v1 = vld [vmem:[#allocation8 + $0xab0] sm:$0xff] }
 0x5fb   :  { %10244 = vmatpush1.bf16.msra.mxu0 %v8845_v58  ;;  %v20790_v58 = vcombine.low %v20783_v35, %v20784_v8  ;;  %v8855_v35 = vld [vmem:[#allocation8 + $0xaa0] sm:$0xff]  ;;  %v8858_v8 = vld [vmem:[#allocation8 + $0xab8] sm:$0xff] }
 0x5fc   :  { %10245 = vmatprep.subr.bf16.mxu0 %v8848_v9  ;;  %v20792_v9 = vld [vmem:[#allocation231_spill] sm:$0xff] }
 0x5fd   :  { %9588 = vmatmul.mubr.bf16.vlgmr.msra.gmra.mrb[64].mxu1 %v20786_v29  ;;  %v20793_v31 = vcombine.high %v20791_v44, %v20792_v9  ;;  %v20800_v29 = vld [vmem:[#allocation242_spill] sm:$0xff] }
 0x5fe   :  { %10183 = vmatmul.mubr.bf16.gmra.mrb[44].mxu0 %v20782_v41  ;;  %9597 = vmatprep.mubr.bf16.mxu1 %v20789_v37  ;;  %v8860_v37 = vld [vmem:[#allocation8 + $0xac8] sm:$0xff] }
 0x5ff   :  { %10246 = vmatpush1.bf16.msra.mxu0 %v8847_v3  ;;  %10192 = vmatprep.mubr.bf16.mxu0 %v20785_v48  ;;  %v20795_v3 = vld [vmem:[#allocation72_spill] sm:$0xff]  ;;  %v20798_v48 = vcombine.low %v20791_v44, %v20792_v9  ;;  %v8862_v9 = vld [vmem:[#allocation8 + $0xad8] sm:$0xff] }
 0x600   :  { %10247 = vmatprep.subr.bf16.mxu0 %v8850_v19  ;;  %v20796_v19 = vld [vmem:[#allocation81_spill] sm:$0xff]  ;;  %v8859_v44 = vld [vmem:[#allocation8 + $0xac0] sm:$0xff] }
 0x601   :  { %v20797_v41 = vcombine.high %v20795_v3, %v20796_v19  ;;  %v20802_v5 = vcombine.low %v20795_v3, %v20796_v19  ;;  %v20808_v3 = vld [vmem:[#allocation102_spill] sm:$0xff]  ;;  %v20809_v19 = vld [vmem:[#allocation40_spill] sm:$0xff] }
 0x603   :  { %10248 = vmatpush1.bf16.msra.mxu0 %v8849_v50  ;;  %v20799_v50 = vld [vmem:[#allocation241_spill] sm:$0xff] }
 0x604   :  { %10249 = vmatprep.subr.bf16.mxu0 %v8852_v18  ;;  %v20801_v18 = vcombine.high %v20799_v50, %v20800_v29 }
 0x605   :  { %9598 = vmatmul.mubr.bf16.gmra.mrb[68].mxu1 %v20794_v16 }
 0x606   :  { %10193 = vmatmul.mubr.bf16.gmra.mrb[48].mxu0 %v20790_v58  ;;  %9607 = vmatprep.mubr.bf16.mxu1 %v20797_v41  ;;  %v20810_v41 = vcombine.high %v20808_v3, %v20809_v19 }
 0x607   :  { %10250 = vmatpush1.bf16.msra.mxu0 %v8851_v56  ;;  %10202 = vmatprep.mubr.bf16.mxu0 %v20793_v31  ;;  %v20803_v56 = vld [vmem:[#allocation93_spill] sm:$0xff]  ;;  %v20806_v31 = vcombine.low %v20799_v50, %v20800_v29 }
 0x608   :  { %10251 = vmatprep.subr.bf16.mxu0 %v8854_v53  ;;  %v20804_v53 = vld [vmem:[#allocation96_spill] sm:$0xff]  ;;  %v8865_v29 = vld [vmem:[#allocation8 + $0xaf0] sm:$0xff] }
 0x609   :  { %v20805_v58 = vcombine.high %v20803_v56, %v20804_v53  ;;  %v20807_v16 = vcombine.low %v20803_v56, %v20804_v53  ;;  %v20819_v53 = vld [vmem:[#allocation69_spill] sm:$0xff] }
 0x60b   :  { %10252 = vmatpush1.bf16.msra.mxu0 %v8853_v0  ;;  %v8861_v0 = vld [vmem:[#allocation8 + $0xad0] sm:$0xff] }
 0x60c   :  { %10253 = vmatprep.subr.bf16.mxu0 %v8856_v51  ;;  %v8864_v51 = vld [vmem:[#allocation8 + $0xae8] sm:$0xff] }
 0x60d   :  { %9608 = vmatmul.mubr.bf16.gmra.mrb[72].mxu1 %v20802_v5  ;;  %v20815_v5 = vld [vmem:[#allocation35_spill] sm:$0xff] }
 0x60e   :  { %10203 = vmatmul.mubr.bf16.gmra.mrb[52].mxu0 %v20798_v48  ;;  %9617 = vmatprep.mubr.bf16.mxu1 %v20805_v58  ;;  %v20812_v48 = vld [vmem:[#allocation49_spill] sm:$0xff]  ;;  %v20820_v58 = vld [vmem:[#allocation70_spill] sm:$0xff] }
 0x60f   :  { %10254 = vmatpush1.bf16.msra.mxu0 %v8855_v35  ;;  %10212 = vmatprep.mubr.bf16.mxu0 %v20801_v18  ;;  %v8863_v35 = vld [vmem:[#allocation8 + $0xae0] sm:$0xff]  ;;  %v20814_v18 = vcombine.low %v20808_v3, %v20809_v19 }
 0x610   :  { %10255 = vmatprep.subr.bf16.mxu0 %v8858_v8  ;;  %v8866_v8 = vld [vmem:[#allocation8 + $0xaf8] sm:$0xff]  ;;  %v8871_v19 = vld [vmem:[#allocation8 + $0xb20] sm:$0xff] }
 0x613   :  { %10256 = vmatpush1.bf16.msra.mxu0 %v8857_v1  ;;  %v8868_v1 = vld [vmem:[#allocation8 + $0xb08] sm:$0xff] }
 0x614   :  { %10257 = vmatprep.subr.bf16.mxu0 %v8860_v37  ;;  %v20816_v37 = vld [vmem:[#allocation39_spill] sm:$0xff] }
 0x615   :  { %9618 = vmatmul.mubr.bf16.gmra.mrb[76].mxu1 %v20807_v16  ;;  %v20817_v56 = vcombine.high %v20815_v5, %v20816_v37  ;;  %v20823_v16 = vld [vmem:[#allocation128_spill] sm:$0xff] }
 0x616   :  { %10213 = vmatmul.mubr.bf16.gmra.mrb[56].mxu0 %v20806_v31  ;;  %9627 = vmatprep.mubr.bf16.mxu1 %v20810_v41  ;;  %v20822_v31 = vcombine.low %v20815_v5, %v20816_v37  ;;  %v8874_v41 = vld [vmem:[#allocation8 + $0xb38] sm:$0xff]  ;;  %v20832_v5 = vld [vmem:[#allocation149_spill] sm:$0xff] }
 0x617   :  { %10258 = vmatpush1.bf16.msra.mxu0 %v8859_v44  ;;  %10222 = vmatprep.mubr.bf16.mxu0 %v13101_v60  ;;  %v20811_v60 = vld [vmem:[#allocation47_spill] sm:$0xff]  ;;  %v20821_v44 = vcombine.high %v20819_v53, %v20820_v58 }
 0x618   :  { %10259 = vmatprep.subr.bf16.mxu0 %v8862_v9  ;;  %v20813_v50 = vcombine.high %v20811_v60, %v20812_v48  ;;  %v8869_v9 = vld [vmem:[#allocation8 + $0xb10] sm:$0xff] }
 0x61b   :  { %10260 = vmatpush1.bf16.msra.mxu0 %v8861_v0  ;;  %v8872_v0 = vld [vmem:[#allocation8 + $0xb28] sm:$0xff] }
 0x61c   :  { %10261 = vmatprep.subr.bf16.mxu0 %v8864_v51  ;;  %v20824_v51 = vld [vmem:[#allocation132_spill] sm:$0xff] }
 0x61d   :  { %9628 = vmatmul.mubr.bf16.gmra.mrb[80].mxu1 %v20814_v18  ;;  %v20825_v3 = vcombine.high %v20823_v16, %v20824_v51  ;;  %v8876_v18 = vld [vmem:[#allocation8 + $0xb48] sm:$0xff] }
 0x61e   :  { %10223 = vmatmul.mubr.bf16.gmra.mrb[60].mxu0 %v13100_v47  ;;  %9637 = vmatprep.mubr.bf16.mxu1 %v20817_v56  ;;  %v20818_v47 = vcombine.low %v20811_v60, %v20812_v48  ;;  %v20828_v60 = vld [vmem:[#allocation89_spill] sm:$0xff]  ;;  %v8875_v56 = vld [vmem:[#allocation8 + $0xb40] sm:$0xff] }
 0x61f   :  { %10262 = vmatpush1.bf16.msra.mxu0 %v8863_v35  ;;  %10265 = vmatprep.mubr.bf16.mxu0 %v20813_v50  ;;  %v20826_v35 = vcombine.low %v20819_v53, %v20820_v58  ;;  %v8873_v50 = vld [vmem:[#allocation8 + $0xb30] sm:$0xff]  ;;  %v20836_v53 = vld [vmem:[#allocation108_spill] sm:$0xff] }
 0x620   :  { %10263 = vmatprep.subr.bf16.mxu0 %v8866_v8  ;;  %v20827_v8 = vld [vmem:[#allocation88_spill] sm:$0xff] }
 0x621   :  { %v20829_v48 = vcombine.high %v20827_v8, %v20828_v60 }
 0x623   :  { %10264 = vmatpush1.bf16.msra.mxu0 %v8865_v29  ;;  %v20830_v29 = vcombine.low %v20823_v16, %v20824_v51  ;;  %v20840_v16 = vld [vmem:[#allocation195_spill] sm:$0xff] }
 0x624   :  { %10346 = vmatprep.subr.bf16.mxu0 %v8868_v1  ;;  %v20831_v1 = vld [vmem:[#allocation145_spill] sm:$0xff] }
 0x625   :  { %9638 = vmatmul.mubr.bf16.gmra.mrb[84].mxu1 %v20822_v31  ;;  %v20833_v37 = vcombine.high %v20831_v1, %v20832_v5  ;;  %v8880_v31 = vld [vmem:[#allocation8 + $0xb68] sm:$0xff] }
 0x626   :  { %10266 = vmatmul.mubr.bf16.vlgmr.msra.gmra.mrb[32].mxu0 %v20818_v47  ;;  %9647 = vmatprep.mubr.bf16.mxu1 %v20825_v3  ;;  %v20835_v47 = vld [vmem:[#allocation106_spill] sm:$0xff]  ;;  %v8879_v3 = vld [vmem:[#allocation8 + $0xb60] sm:$0xff] }
 0x627   :  { %10347 = vmatpush1.bf16.msra.mxu0 %v8867_v22  ;;  %10275 = vmatprep.mubr.bf16.mxu0 %v20821_v44  ;;  %v8878_v22 = vld [vmem:[#allocation8 + $0xb58] sm:$0xff]  ;;  %v20837_v58 = vcombine.high %v20835_v47, %v20836_v53  ;;  %v8877_v44 = vld [vmem:[#allocation8 + $0xb50] sm:$0xff] }
 0x628   :  { %10348 = vmatprep.subr.bf16.mxu0 %v8870_v42  ;;  %v20834_v42 = vcombine.low %v20827_v8, %v20828_v60  ;;  %v20844_v8 = vld [vmem:[#allocation115_spill] sm:$0xff] }
 0x62b   :  { %10349 = vmatpush1.bf16.msra.mxu0 %v8869_v9  ;;  %v20838_v9 = vcombine.low %v20831_v1, %v20832_v5  ;;  %v20847_v5 = vld [vmem:[#allocation122_spill] sm:$0xff] }
 0x62c   :  { %10350 = vmatprep.subr.bf16.mxu0 %v8872_v0  ;;  %v20839_v0 = vld [vmem:[#allocation191_spill] sm:$0xff] }
 0x62d   :  { %9648 = vmatmul.mubr.bf16.gmra.mrb[88].mxu1 %v20830_v29  ;;  %v20841_v51 = vcombine.high %v20839_v0, %v20840_v16  ;;  %v8883_v29 = vld [vmem:[#allocation8 + $0xb80] sm:$0xff] }
 0x62e   :  { %10276 = vmatmul.mubr.bf16.gmra.mrb[36].mxu0 %v20826_v35  ;;  %9657 = vmatprep.mubr.bf16.mxu1 %v20833_v37  ;;  %v20843_v35 = vld [vmem:[#allocation114_spill] sm:$0xff]  ;;  %v20848_v37 = vld [vmem:[#allocation123_spill] sm:$0xff] }
 0x62f   :  { %10351 = vmatpush1.bf16.msra.mxu0 %v8871_v19  ;;  %10285 = vmatprep.mubr.bf16.mxu0 %v20829_v48  ;;  %v8882_v19 = vld [vmem:[#allocation8 + $0xb78] sm:$0xff]  ;;  %v20845_v60 = vcombine.high %v20843_v35, %v20844_v8  ;;  %v8881_v48 = vld [vmem:[#allocation8 + $0xb70] sm:$0xff]  ;;  %v20846_v1 = vcombine.low %v20843_v35, %v20844_v8  ;;  %v20855_v8 = vld [vmem:[#allocation156_spill] sm:$0xff] }
 0x630   :  { %10352 = vmatprep.subr.bf16.mxu0 %v8874_v41  ;;  %v20842_v41 = vcombine.low %v20835_v47, %v20836_v53  ;;  %v8887_v47 = vld [vmem:[#allocation8 + $0xba0] sm:$0xff]  ;;  %v8890_v53 = vld [vmem:[#allocation8 + $0xbb8] sm:$0xff] }
 0x633   :  { %10353 = vmatpush1.bf16.msra.mxu0 %v8873_v50  ;;  %v8884_v50 = vld [vmem:[#allocation8 + $0xb88] sm:$0xff] }
 0x634   :  { %10354 = vmatprep.subr.bf16.mxu0 %v8876_v18  ;;  %v8886_v18 = vld [vmem:[#allocation8 + $0xb98] sm:$0xff] }
 0x635   :  { %9658 = vmatmul.mubr.bf16.gmra.mrb[92].mxu1 %v20838_v9  ;;  %v20852_v9 = vld [vmem:[#allocation141_spill] sm:$0xff] }
 0x636   :  { %10286 = vmatmul.mubr.bf16.gmra.mrb[40].mxu0 %v20834_v42  ;;  %11066 = vmatprep.mubr.bf16.mxu1 %v20841_v51  ;;  %v8888_v42 = vld [vmem:[#allocation8 + $0xba8] sm:$0xff]  ;;  %v8889_v51 = vld [vmem:[#allocation8 + $0xbb0] sm:$0xff] }
 0x637   :  { %10355 = vmatpush1.bf16.msra.mxu0 %v8875_v56  ;;  %10295 = vmatprep.mubr.bf16.mxu0 %v20837_v58  ;;  %v20849_v56 = vcombine.high %v20847_v5, %v20848_v37  ;;  %v20850_v58 = vcombine.low %v20847_v5, %v20848_v37  ;;  %v20859_v37 = vld [vmem:[#allocation172_spill] sm:$0xff] }
 0x638   :  { %10356 = vmatprep.subr.bf16.mxu0 %v8878_v22  ;;  %v8885_v22 = vld [vmem:[#allocation8 + $0xb90] sm:$0xff] }
 0x63b   :  { %10357 = vmatpush1.bf16.msra.mxu0 %v8877_v44  ;;  %v20851_v44 = vld [vmem:[#allocation139_spill] sm:$0xff] }
 0x63c   :  { %10358 = vmatprep.subr.bf16.mxu0 %v8880_v31  ;;  %v20853_v31 = vcombine.high %v20851_v44, %v20852_v9  ;;  %v20854_v35 = vcombine.low %v20851_v44, %v20852_v9  ;;  %v20863_v9 = vld [vmem:[#allocation183_spill] sm:$0xff] }
 0x63e   :  { %10296 = vmatmul.mubr.bf16.gmra.mrb[44].mxu0 %v20842_v41  ;;  %v8894_v41 = vld [vmem:[#allocation8 + $0xbd8] sm:$0xff] }
 0x63f   :  { %10359 = vmatpush1.bf16.msra.mxu0 %v8879_v3  ;;  %10305 = vmatprep.mubr.bf16.mxu0 %v20845_v60  ;;  %v8892_v3 = vld [vmem:[#allocation8 + $0xbc8] sm:$0xff]  ;;  %v20856_v60 = vld [vmem:[#allocation158_spill] sm:$0xff] }
 0x640   :  { %10360 = vmatprep.subr.bf16.mxu0 %v8882_v19  ;;  %v8891_v19 = vld [vmem:[#allocation8 + $0xbc0] sm:$0xff]  ;;  %v20858_v5 = vcombine.low %v20855_v8, %v20856_v60 }
 0x643   :  { %10361 = vmatpush1.bf16.msra.mxu0 %v8881_v48  ;;  %v20857_v48 = vcombine.high %v20855_v8, %v20856_v60  ;;  %v20867_v60 = vld [vmem:[#allocation194_spill] sm:$0xff] }
 0x644   :  { %10362 = vmatprep.subr.bf16.mxu0 %v8884_v50  ;;  %v8893_v50 = vld [vmem:[#allocation8 + $0xbd0] sm:$0xff] }
 0x646   :  { %10306 = vmatmul.mubr.bf16.gmra.mrb[48].mxu0 %v20846_v1  ;;  %v8898_v1 = vld [vmem:[#allocation8 + $0xbf8] sm:$0xff] }
 0x647   :  { %10363 = vmatpush1.bf16.msra.mxu0 %v8883_v29  ;;  %10315 = vmatprep.mubr.bf16.mxu0 %v20849_v56  ;;  %v8896_v29 = vld [vmem:[#allocation8 + $0xbe8] sm:$0xff] }
 0x648   :  { %10364 = vmatprep.subr.bf16.mxu0 %v8886_v18  ;;  %v8895_v18 = vld [vmem:[#allocation8 + $0xbe0] sm:$0xff]  ;;  %v20860_v56 = vld [vmem:[#allocation173_spill] sm:$0xff] }
 0x649   :  { %v20862_v44 = vcombine.low %v20859_v37, %v20860_v56 }
 0x64b   :  { %10365 = vmatpush1.bf16.msra.mxu0 %v8885_v22  ;;  %v20861_v22 = vcombine.high %v20859_v37, %v20860_v56  ;;  %v20871_v56 = vld [vmem:[#allocation203_spill] sm:$0xff] }
 0x64c   :  { %10366 = vmatprep.subr.bf16.mxu0 %v8888_v42  ;;  %v8897_v42 = vld [vmem:[#allocation8 + $0xbf0] sm:$0xff] }
 0x64e   :  { %10316 = vmatmul.mubr.bf16.gmra.mrb[52].mxu0 %v20850_v58  ;;  %v8902_v58 = vld [vmem:[#allocation8 + $0xc18] sm:$0xff] }
 0x64f   :  { %10367 = vmatpush1.bf16.msra.mxu0 %v8887_v47  ;;  %10325 = vmatprep.mubr.bf16.mxu0 %v20853_v31  ;;  %v8900_v47 = vld [vmem:[#allocation8 + $0xc08] sm:$0xff] }
 0x650   :  { %10368 = vmatprep.subr.bf16.mxu0 %v8890_v53  ;;  %v8899_v53 = vld [vmem:[#allocation8 + $0xc00] sm:$0xff] }
 0x651   :  { %v20864_v31 = vld [vmem:[#allocation184_spill] sm:$0xff] }
 0x652   :  { %v20866_v8 = vcombine.low %v20863_v9, %v20864_v31 }
 0x653   :  { %10369 = vmatpush1.bf16.msra.mxu0 %v8889_v51  ;;  %v20865_v51 = vcombine.high %v20863_v9, %v20864_v31  ;;  %v20875_v31 = vld [vmem:[#allocation216_spill] sm:$0xff] }
 0x654   :  { %10370 = vmatprep.subr.bf16.mxu0 %v8892_v3  ;;  %v8901_v3 = vld [vmem:[#allocation8 + $0xc10] sm:$0xff] }
 0x656   :  { %10326 = vmatmul.mubr.bf16.gmra.mrb[56].mxu0 %v20854_v35  ;;  %v8906_v35 = vld [vmem:[#allocation8 + $0xc38] sm:$0xff] }
 0x657   :  { %10371 = vmatpush1.bf16.msra.mxu0 %v8891_v19  ;;  %10335 = vmatprep.mubr.bf16.mxu0 %v20857_v48  ;;  %v8904_v19 = vld [vmem:[#allocation8 + $0xc28] sm:$0xff]  ;;  %v20868_v48 = vld [vmem:[#allocation198_spill] sm:$0xff] }
 0x658   :  { %10372 = vmatprep.subr.bf16.mxu0 %v8894_v41  ;;  %v8903_v41 = vld [vmem:[#allocation8 + $0xc20] sm:$0xff]  ;;  %v20870_v37 = vcombine.low %v20867_v60, %v20868_v48 }
 0x65b   :  { %10373 = vmatpush1.bf16.msra.mxu0 %v8893_v50  ;;  %v20869_v50 = vcombine.high %v20867_v60, %v20868_v48  ;;  %v20879_v48 = vld [vmem:[#allocation227_spill] sm:$0xff] }
 0x65c   :  { %10374 = vmatprep.subr.bf16.mxu0 %v8896_v29  ;;  %v8905_v29 = vld [vmem:[#allocation8 + $0xc30] sm:$0xff] }
 0x65e   :  { %10336 = vmatmul.mubr.bf16.gmra.mrb[60].mxu0 %v20858_v5  ;;  %v8910_v5 = vld [vmem:[#allocation8 + $0xc58] sm:$0xff] }
 0x65f   :  { %10375 = vmatpush1.bf16.msra.mxu0 %v8895_v18  ;;  %10378 = vmatprep.mubr.bf16.mxu0 %v20861_v22  ;;  %v8908_v18 = vld [vmem:[#allocation8 + $0xc48] sm:$0xff] }
 0x660   :  { %10376 = vmatprep.subr.bf16.mxu0 %v8898_v1  ;;  %v8907_v1 = vld [vmem:[#allocation8 + $0xc40] sm:$0xff]  ;;  %v20872_v22 = vld [vmem:[#allocation209_spill] sm:$0xff] }
 0x661   :  { %v20874_v9 = vcombine.low %v20871_v56, %v20872_v22 }
 0x663   :  { %10377 = vmatpush1.bf16.msra.mxu0 %v8897_v42  ;;  %v20873_v42 = vcombine.high %v20871_v56, %v20872_v22  ;;  %v20883_v22 = vld [vmem:[#allocation239_spill] sm:$0xff] }
 0x664   :  { %10459 = vmatprep.subr.bf16.mxu0 %v8900_v47  ;;  %v8909_v47 = vld [vmem:[#allocation8 + $0xc50] sm:$0xff] }
 0x666   :  { %10379 = vmatmul.mubr.bf16.vlgmr.msra.gmra.mrb[32].mxu0 %v20862_v44  ;;  %v8914_v44 = vld [vmem:[#allocation8 + $0xc78] sm:$0xff] }
 0x667   :  { %10460 = vmatpush1.bf16.msra.mxu0 %v8899_v53  ;;  %10388 = vmatprep.mubr.bf16.mxu0 %v20865_v51  ;;  %v8912_v53 = vld [vmem:[#allocation8 + $0xc68] sm:$0xff]  ;;  %v20876_v51 = vld [vmem:[#allocation218_spill] sm:$0xff] }
 0x668   :  { %10461 = vmatprep.subr.bf16.mxu0 %v8902_v58  ;;  %v8911_v58 = vld [vmem:[#allocation8 + $0xc60] sm:$0xff]  ;;  %v20878_v60 = vcombine.low %v20875_v31, %v20876_v51 }
 0x66b   :  { %10462 = vmatpush1.bf16.msra.mxu0 %v8901_v3  ;;  %v20877_v3 = vcombine.high %v20875_v31, %v20876_v51  ;;  %v8925_v51 = vld [vmem:[#allocation8 + $0xcd0] sm:$0xff] }
 0x66c   :  { %10463 = vmatprep.subr.bf16.mxu0 %v8904_v19  ;;  %v8913_v19 = vld [vmem:[#allocation8 + $0xc70] sm:$0xff] }
 0x66e   :  { %10389 = vmatmul.mubr.bf16.gmra.mrb[36].mxu0 %v20866_v8  ;;  %v8918_v8 = vld [vmem:[#allocation8 + $0xc98] sm:$0xff] }
 0x66f   :  { %10464 = vmatpush1.bf16.msra.mxu0 %v8903_v41  ;;  %10398 = vmatprep.mubr.bf16.mxu0 %v20869_v50  ;;  %v8916_v41 = vld [vmem:[#allocation8 + $0xc88] sm:$0xff]  ;;  %v20880_v50 = vld [vmem:[#allocation230_spill] sm:$0xff] }
 0x670   :  { %10465 = vmatprep.subr.bf16.mxu0 %v8906_v35  ;;  %v8915_v35 = vld [vmem:[#allocation8 + $0xc80] sm:$0xff]  ;;  %v20882_v56 = vcombine.low %v20879_v48, %v20880_v50 }
 0x673   :  { %10466 = vmatpush1.bf16.msra.mxu0 %v8905_v29  ;;  %v20881_v29 = vcombine.high %v20879_v48, %v20880_v50  ;;  %v8934_v48 = vld [vmem:[#allocation8 + $0xd18] sm:$0xff]  ;;  %v8933_v50 = vld [vmem:[#allocation8 + $0xd10] sm:$0xff] }
 0x674   :  { %10467 = vmatprep.subr.bf16.mxu0 %v8908_v18  ;;  %v8917_v18 = vld [vmem:[#allocation8 + $0xc90] sm:$0xff] }
 0x676   :  { %10399 = vmatmul.mubr.bf16.gmra.mrb[40].mxu0 %v20870_v37  ;;  %v8922_v37 = vld [vmem:[#allocation8 + $0xcb8] sm:$0xff] }
 0x677   :  { %10468 = vmatpush1.bf16.msra.mxu0 %v8907_v1  ;;  %10408 = vmatprep.mubr.bf16.mxu0 %v20873_v42  ;;  %v8920_v1 = vld [vmem:[#allocation8 + $0xca8] sm:$0xff] }
 0x678   :  { %10469 = vmatprep.subr.bf16.mxu0 %v8910_v5  ;;  %v8919_v5 = vld [vmem:[#allocation8 + $0xca0] sm:$0xff] }
 0x679   :  { %v20884_v42 = vld [vmem:[#allocation240_spill] sm:$0xff] }
 0x67a   :  { %v20886_v31 = vcombine.low %v20883_v22, %v20884_v42 }
 0x67b   :  { %10470 = vmatpush1.bf16.msra.mxu0 %v8909_v47  ;;  %v20885_v47 = vcombine.high %v20883_v22, %v20884_v42  ;;  %v8948_v42 = vld [vmem:[#allocation8 + $0xd88] sm:$0xff] }
 0x67c   :  { %10471 = vmatprep.subr.bf16.mxu0 %v8912_v53  ;;  %v8921_v53 = vld [vmem:[#allocation8 + $0xcb0] sm:$0xff] }
 0x67e   :  { %10409 = vmatmul.mubr.bf16.gmra.mrb[44].mxu0 %v20874_v9  ;;  %v8926_v9 = vld [vmem:[#allocation8 + $0xcd8] sm:$0xff] }
 0x67f   :  { %10472 = vmatpush1.bf16.msra.mxu0 %v8911_v58  ;;  %10418 = vmatprep.mubr.bf16.mxu0 %v20877_v3  ;;  %v8924_v58 = vld [vmem:[#allocation8 + $0xcc8] sm:$0xff] }
 0x680   :  { %10473 = vmatprep.subr.bf16.mxu0 %v8914_v44  ;;  %v8923_v44 = vld [vmem:[#allocation8 + $0xcc0] sm:$0xff]  ;;  %v8928_v3 = vld [vmem:[#allocation8 + $0xce8] sm:$0xff] }
 0x683   :  { %10474 = vmatpush1.bf16.msra.mxu0 %v8913_v19  ;;  %v8927_v19 = vld [vmem:[#allocation8 + $0xce0] sm:$0xff] }
 0x684   :  { %10475 = vmatprep.subr.bf16.mxu0 %v8916_v41  ;;  %v8930_v41 = vld [vmem:[#allocation8 + $0xcf8] sm:$0xff] }
 0x686   :  { %10419 = vmatmul.mubr.bf16.gmra.mrb[48].mxu0 %v20878_v60  ;;  %v8932_v60 = vld [vmem:[#allocation8 + $0xd08] sm:$0xff] }
 0x687   :  { %10476 = vmatpush1.bf16.msra.mxu0 %v8915_v35  ;;  %10428 = vmatprep.mubr.bf16.mxu0 %v20881_v29  ;;  %v20887_v35 = vcombine.low %v18243_v32, %v18247_v4  ;;  %v8936_v29 = vld [vmem:[#allocation8 + $0xd28] sm:$0xff]  ;;  %v8935_v32 = vld [vmem:[#allocation8 + $0xd20] sm:$0xff]  ;;  %v8938_v4 = vld [vmem:[#allocation8 + $0xd38] sm:$0xff] }
 0x688   :  { %10477 = vmatprep.subr.bf16.mxu0 %v8918_v8  ;;  %v8929_v8 = vld [vmem:[#allocation8 + $0xcf0] sm:$0xff] }
 0x68b   :  { %10478 = vmatpush1.bf16.msra.mxu0 %v8917_v18  ;;  %v8940_v18 = vld [vmem:[#allocation8 + $0xd48] sm:$0xff] }
 0x68c   :  { %10479 = vmatprep.subr.bf16.mxu0 %v8920_v1  ;;  %v8942_v1 = vld [vmem:[#allocation8 + $0xd58] sm:$0xff] }
 0x68e   :  { %10429 = vmatmul.mubr.bf16.gmra.mrb[52].mxu0 %v20882_v56  ;;  %v8946_v56 = vld [vmem:[#allocation8 + $0xd78] sm:$0xff] }
 0x68f   :  { %10480 = vmatpush1.bf16.msra.mxu0 %v8919_v5  ;;  %10438 = vmatprep.mubr.bf16.mxu0 %v20885_v47  ;;  %v8947_v47 = vld [vmem:[#allocation8 + $0xd80] sm:$0xff] }
 0x690   :  { %10481 = vmatprep.subr.bf16.mxu0 %v8922_v37  ;;  %v8941_v37 = vld [vmem:[#allocation8 + $0xd50] sm:$0xff] }
 0x693   :  { %10482 = vmatpush1.bf16.msra.mxu0 %v8921_v53  ;;  %v8950_v53 = vld [vmem:[#allocation8 + $0xd98] sm:$0xff] }
 0x694   :  { %10483 = vmatprep.subr.bf16.mxu0 %v8924_v58  ;;  %v8949_v58 = vld [vmem:[#allocation8 + $0xd90] sm:$0xff] }
 0x696   :  { %10439 = vmatmul.mubr.bf16.gmra.mrb[56].mxu0 %v20886_v31  ;;  %v8953_v31 = vld [vmem:[#allocation8 + $0xdb0] sm:$0xff] }
 0x697   :  { %10484 = vmatpush1.bf16.msra.mxu0 %v8923_v44  ;;  %10448 = vmatprep.mubr.bf16.mxu0 %v13165_v10  ;;  %v8931_v10 = vld [vmem:[#allocation8 + $0xd00] sm:$0xff]  ;;  %v8952_v44 = vld [vmem:[#allocation8 + $0xda8] sm:$0xff] }
 0x698   :  { %10485 = vmatprep.subr.bf16.mxu0 %v8926_v9  ;;  %v8954_v9 = vld [vmem:[#allocation8 + $0xdb8] sm:$0xff] }
 0x69b   :  { %10486 = vmatpush1.bf16.msra.mxu0 %v8925_v51  ;;  %v20891_v51 = vld [vmem:[#allocation31_spill] sm:$0xff] }
 0x69c   :  { %10487 = vmatprep.subr.bf16.mxu0 %v8928_v3  ;;  %v8956_v3 = vld [vmem:[#allocation8 + $0xdc8] sm:$0xff] }
 0x69e   :  { %10449 = vmatmul.mubr.bf16.gmra.mrb[60].mxu0 %v20887_v35  ;;  %v8955_v35 = vld [vmem:[#allocation8 + $0xdc0] sm:$0xff] }
 0x69f   :  { %10488 = vmatpush1.bf16.msra.mxu0 %v8927_v19  ;;  %10491 = vmatprep.mubr.bf16.mxu0 %v20581_v57  ;;  %v8937_v57 = vld [vmem:[#allocation8 + $0xd30] sm:$0xff] }
 0x6a0   :  { %10489 = vmatprep.subr.bf16.mxu0 %v8930_v41 }
 0x6a3   :  { %10490 = vmatpush1.bf16.msra.mxu0 %v8929_v8 }
 0x6a4   :  { %10572 = vmatprep.subr.bf16.mxu0 %v8932_v60  ;;  %v8958_v60 = vld [vmem:[#allocation8 + $0xdd8] sm:$0xff] }
 0x6a6   :  { %10492 = vmatmul.mubr.bf16.vlgmr.msra.gmra.mrb[32].mxu0 %v20584_v24  ;;  %v8939_v24 = vld [vmem:[#allocation8 + $0xd40] sm:$0xff] }
 0x6a7   :  { %10573 = vmatpush1.bf16.msra.mxu0 %v8931_v10  ;;  %10501 = vmatprep.mubr.bf16.mxu0 %v20585_v49  ;;  %v20888_v49 = vld [vmem:[#allocation101_spill] sm:$0xff] }
 0x6a8   :  { %10574 = vmatprep.subr.bf16.mxu0 %v8934_v48  ;;  %v20889_v5 = vcombine.high %v20615_v45, %v20888_v49  ;;  %v20890_v22 = vcombine.low %v20615_v45, %v20888_v49  ;;  %v8951_v45 = vld [vmem:[#allocation8 + $0xda0] sm:$0xff]  ;;  %v8962_v49 = vld [vmem:[#allocation8 + $0xdf8] sm:$0xff] }
 0x6ab   :  { %10575 = vmatpush1.bf16.msra.mxu0 %v8933_v50 }
 0x6ac   :  { %10576 = vmatprep.subr.bf16.mxu0 %v8936_v29  ;;  %v20896_v29 = vld [vmem:[#allocation137_spill] sm:$0xff] }
 0x6ae   :  { %10502 = vmatmul.mubr.bf16.gmra.mrb[36].mxu0 %v20588_v55  ;;  %v8944_v55 = vld [vmem:[#allocation8 + $0xd68] sm:$0xff] }
 0x6af   :  { %10577 = vmatpush1.bf16.msra.mxu0 %v8935_v32  ;;  %10511 = vmatprep.mubr.bf16.mxu0 %v20589_v59  ;;  %v8943_v59 = vld [vmem:[#allocation8 + $0xd60] sm:$0xff]  ;;  %v20897_v32 = vcombine.high %v20639_v2, %v20896_v29 }
 0x6b0   :  { %10578 = vmatprep.subr.bf16.mxu0 %v8938_v4 }
 0x6b3   :  { %10579 = vmatpush1.bf16.msra.mxu0 %v8937_v57  ;;  %v8957_v57 = vld [vmem:[#allocation8 + $0xdd0] sm:$0xff] }
 0x6b4   :  { %10580 = vmatprep.subr.bf16.mxu0 %v8940_v18  ;;  %v8960_v18 = vld [vmem:[#allocation8 + $0xde8] sm:$0xff] }
 0x6b6   :  { %10512 = vmatmul.mubr.bf16.gmra.mrb[40].mxu0 %v20592_v34  ;;  %v8945_v34 = vld [vmem:[#allocation8 + $0xd70] sm:$0xff] }
 0x6b7   :  { %10581 = vmatpush1.bf16.msra.mxu0 %v8939_v24  ;;  %10521 = vmatprep.mubr.bf16.mxu0 %v20889_v5 }
 0x6b8   :  { %10582 = vmatprep.subr.bf16.mxu0 %v8942_v1 }
 0x6bb   :  { %10583 = vmatpush1.bf16.msra.mxu0 %v8941_v37  ;;  %v20899_v37 = vcombine.low %v20639_v2, %v20896_v29  ;;  %v20910_v29 = vld [vmem:[#allocation208_spill] sm:$0xff] }
 0x6bc   :  { %10584 = vmatprep.subr.bf16.mxu0 %v8944_v55 }
 0x6be   :  { %10522 = vmatmul.mubr.bf16.gmra.mrb[44].mxu0 %v20890_v22 }
 0x6bf   :  { %10585 = vmatpush1.bf16.msra.mxu0 %v8943_v59  ;;  %10531 = vmatprep.mubr.bf16.mxu0 %v20600_v7  ;;  %v9091_v7 = vld [vmem:[#allocation16] sm:$0x3]  ;;  %v8961_v59 = vld [vmem:[#allocation8 + $0xdf0] sm:$0xff] }
 0x6c0   :  { %10586 = vmatprep.subr.bf16.mxu0 %v8946_v56  ;;  %v8964_v56 = vld [vmem:[#allocation8 + $0xe08] sm:$0xff] }
 0x6c3   :  { %10587 = vmatpush1.bf16.msra.mxu0 %v8945_v34  ;;  %v8963_v34 = vld [vmem:[#allocation8 + $0xe00] sm:$0xff] }
 0x6c4   :  { %10588 = vmatprep.subr.bf16.mxu0 %v8948_v42 }
 0x6c6   :  { %10532 = vmatmul.mubr.bf16.gmra.mrb[48].mxu0 %v20605_v20  ;;  %v18830_v20 = vrot.slane %v9091_v7, %v20891_v51  ;;  %v18885_v51 = vld [vmem:[#allocation8 + $0x1100] sm:$0xff] }
 0x6c7   :  { %10589 = vmatpush1.bf16.msra.mxu0 %v8947_v47  ;;  %10541 = vmatprep.mubr.bf16.mxu0 %v20606_v27  ;;  %v20892_v27 = vld [vmem:[#allocation32_spill] sm:$0xff]  ;;  %v8966_v47 = vld [vmem:[#allocation8 + $0xe18] sm:$0xff] }
 0x6c8   :  { %10590 = vmatprep.subr.bf16.mxu0 %v8950_v53  ;;  %v18833_v19 = vrot.slane %v9091_v7, %v20892_v27  ;;  %v8970_v7 = vld [vmem:[#allocation8 + $0xe38] sm:$0xff]  ;;  %v8972_v27 = vld [vmem:[#allocation8 + $0xe48] sm:$0xff] }
 0x6cb   :  { %10591 = vmatpush1.bf16.msra.mxu0 %v8949_v58  ;;  %v8968_v58 = vld [vmem:[#allocation8 + $0xe28] sm:$0xff] }
 0x6cc   :  { %10592 = vmatprep.subr.bf16.mxu0 %v8952_v44 }
 0x6ce   :  { %10542 = vmatmul.mubr.bf16.gmra.mrb[52].mxu0 %v20611_v28 }
 0x6cf   :  { %10593 = vmatpush1.bf16.msra.mxu0 %v8951_v45  ;;  %10551 = vmatprep.mubr.bf16.mxu0 %v20612_v14  ;;  %v8967_v45 = vld [vmem:[#allocation8 + $0xe20] sm:$0xff] }
 0x6d0   :  { %10594 = vmatprep.subr.bf16.mxu0 %v8954_v9  ;;  %v9589_v41 = vpop.f32.mrb[64].mxu1 }
 0x6d1   :  { %v18836_v8 = vadd.f32 %v9589_v41, %v18830_v20  ;;  %v9591_v28 = vpop.f32.mrb[65].mxu1 }
 0x6d2   :  { %v18839_v14 = vadd.f32 %v9591_v28, %v18833_v19  ;;  %v9593_v10 = vpop.f32.mrb[66].mxu1 }
 0x6d3   :  { %10595 = vmatpush1.bf16.msra.mxu0 %v8953_v31  ;;  %20893 = vst [vmem:[#allocation33_spill] sm:$0xff] %v18836_v8  ;;  %v18843_v48 = vadd.f32 %v9593_v10, %v18830_v20  ;;  %v9595_v50 = vpop.f32.mrb[67].mxu1  ;;  %v18975_v8 = vld [vmem:[#allocation8 + $0x1188] sm:$0xff] }
 0x6d4   :  { %10596 = vmatprep.subr.bf16.mxu0 %v8956_v3  ;;  %20894 = vst [vmem:[#allocation41_spill] sm:$0xff] %v18839_v14  ;;  %v18849_v4 = vadd.f32 %v9595_v50, %v18833_v19  ;;  %v8969_v3 = vld [vmem:[#allocation8 + $0xe30] sm:$0xff] }
 0x6d5   :  { %20895 = vst [vmem:[#allocation192_spill] sm:$0xff] %v18843_v48  ;;  %v18963_v48 = vld [vmem:[#allocation8 + $0x1170] sm:$0xff] }
 0x6d6   :  { %10552 = vmatmul.mubr.bf16.gmra.mrb[56].mxu0 %v20617_v13  ;;  %20898 = vst [vmem:[#allocation53_spill] sm:$0xff] %v18849_v4  ;;  %v8959_v13 = vld [vmem:[#allocation8 + $0xde0] sm:$0xff] }
 0x6d7   :  { %10597 = vmatpush1.bf16.msra.mxu0 %v8955_v35  ;;  %10561 = vmatprep.mubr.bf16.mxu0 %v20897_v32  ;;  %v18893_v35 = vld [vmem:[#allocation8 + $0x1110] sm:$0xff]  ;;  %v20911_v32 = vcombine.high %v17690_v17, %v20910_v29 }
 0x6d8   :  { %10598 = vmatprep.subr.bf16.mxu0 %v8958_v60  ;;  %v18851_v24 = vpop.f32.mrb[68].mxu1  ;;  %v8974_v60 = vld [vmem:[#allocation8 + $0xe58] sm:$0xff] }
 0x6d9   :  { %v18853_v1 = vpop.f32.mrb[69].mxu1 }
 0x6da   :  { %v18855_v5 = vpop.f32.mrb[70].mxu1 }
 0x6db   :  { %10599 = vmatpush1.bf16.msra.mxu0 %v8957_v57  ;;  %v18860_v55 = vpop.f32.mrb[71].mxu1  ;;  %v18907_v57 = vld [vmem:[#allocation8 + $0x1128] sm:$0xff] }
 0x6dc   :  { %10600 = vmatprep.subr.bf16.mxu0 %v8960_v18  ;;  %v18909_v18 = vld [vmem:[#allocation8 + $0x1120] sm:$0xff] }
 0x6de   :  { %10562 = vmatmul.mubr.bf16.gmra.mrb[60].mxu0 %v20899_v37  ;;  %v18915_v37 = vld [vmem:[#allocation8 + $0x1138] sm:$0xff] }
 0x6df   :  { %10601 = vmatpush1.bf16.msra.mxu0 %v8959_v13  ;;  %10604 = vmatprep.mubr.bf16.mxu0 %v20625_v52  ;;  %v8965_v52 = vld [vmem:[#allocation8 + $0xe10] sm:$0xff] }
 0x6e0   :  { %10602 = vmatprep.subr.bf16.mxu0 %v8962_v49  ;;  %v18863_v22 = vpop.f32.mrb[72].mxu1  ;;  %v8973_v13 = vld [vmem:[#allocation8 + $0xe50] sm:$0xff]  ;;  %v8976_v49 = vld [vmem:[#allocation8 + $0xe68] sm:$0xff] }
 0x6e1   :  { %v18865_v42 = vpop.f32.mrb[73].mxu1 }
 0x6e2   :  { %v18867_v53 = vpop.f32.mrb[74].mxu1 }
 0x6e3   :  { %10603 = vmatpush1.bf16.msra.mxu0 %v8961_v59  ;;  %20900 = vst [vmem:[#allocation50_spill] sm:$0xff] %v18867_v53  ;;  %v18870_v2 = vpop.f32.mrb[75].mxu1  ;;  %v18917_v59 = vld [vmem:[#allocation8 + $0x1130] sm:$0xff] }
 0x6e4   :  { %10685 = vmatprep.subr.bf16.mxu0 %v8964_v56  ;;  %20901 = vst [vmem:[#allocation76_spill] sm:$0xff] %v18870_v2  ;;  %v8975_v56 = vld [vmem:[#allocation8 + $0xe60] sm:$0xff]  ;;  %v20941_v2 = vld [vmem:[#allocation206_spill] sm:$0xff] }
 0x6e6   :  { %10605 = vmatmul.mubr.bf16.vlgmr.msra.gmra.mrb[32].mxu0 %v20630_v40 }
 0x6e7   :  { %10686 = vmatpush1.bf16.msra.mxu0 %v8963_v34  ;;  %10614 = vmatprep.mubr.bf16.mxu0 %v20631_v33  ;;  %v18883_v33 = vld [vmem:[#allocation8 + $0x1108] sm:$0xff] }
 0x6e8   :  { %10687 = vmatprep.subr.bf16.mxu0 %v8966_v47  ;;  %v18873_v44 = vpop.f32.mrb[76].mxu1  ;;  %13509 = vmatprep.subr.bf16.mxu1 %v18883_v33  ;;  %v8978_v47 = vld [vmem:[#allocation8 + $0xe78] sm:$0xff] }
 0x6e9   :  { %20902 = vst [vmem:[#allocation74_spill] sm:$0xff] %v18873_v44  ;;  %v18875_v9 = vpop.f32.mrb[77].mxu1  ;;  %13525 = vmatpush1.bf16.msra.mxu1 %v18885_v51  ;;  %v20940_v44 = vld [vmem:[#allocation201_spill] sm:$0xff] }
 0x6ea   :  { %20903 = vst [vmem:[#allocation86_spill] sm:$0xff] %v18875_v9  ;;  %v18877_v31 = vpop.f32.mrb[78].mxu1  ;;  %v9004_v9 = vld [vmem:[#allocation8 + $0xf48] sm:$0xff]  ;;  %v20942_v53 = vcombine.high %v20940_v44, %v20941_v2 }
 0x6eb   :  { %10688 = vmatpush1.bf16.msra.mxu0 %v8965_v52  ;;  %20904 = vst [vmem:[#allocation85_spill] sm:$0xff] %v18877_v31  ;;  %v18880_v40 = vpop.f32.mrb[79].mxu1 }
 0x6ec   :  { %10689 = vmatprep.subr.bf16.mxu0 %v8968_v58  ;;  %20905 = vst [vmem:[#allocation104_spill] sm:$0xff] %v18880_v40  ;;  %v20915_v58 = vcombine.low %v17690_v17, %v20910_v29  ;;  %v18939_v17 = vld [vmem:[#allocation8 + $0x1158] sm:$0xff]  ;;  %v18941_v29 = vld [vmem:[#allocation8 + $0x1150] sm:$0xff] }
 0x6ed   :  { %v19033_v40 = vld [vmem:[#allocation8 + $0x11f8] sm:$0xff] }
 0x6ee   :  { %10615 = vmatmul.mubr.bf16.gmra.mrb[36].mxu0 %v20636_v36  ;;  %v18891_v36 = vld [vmem:[#allocation8 + $0x1118] sm:$0xff] }
 0x6ef   :  { %10690 = vmatpush1.bf16.msra.mxu0 %v8967_v45  ;;  %10624 = vmatprep.mubr.bf16.mxu0 %v17661_v23  ;;  %v8971_v23 = vld [vmem:[#allocation8 + $0xe40] sm:$0xff] }
 0x6f0   :  { %10691 = vmatprep.subr.bf16.mxu0 %v8970_v7  ;;  %v18889_v41 = vpop.f32.mrb[80].mxu1  ;;  %13510 = vmatprep.subr.bf16.mxu1 %v18891_v36  ;;  %v18931_v7 = vld [vmem:[#allocation8 + $0x1148] sm:$0xff] }
 0x6f1   :  { %20906 = vst [vmem:[#allocation103_spill] sm:$0xff] %v18889_v41  ;;  %v18895_v28 = vpop.f32.mrb[81].mxu1  ;;  %13526 = vmatpush1.bf16.msra.mxu1 %v18893_v35  ;;  %v9000_v41 = vld [vmem:[#allocation8 + $0xf28] sm:$0xff] }
 0x6f2   :  { %20907 = vst [vmem:[#allocation42_spill] sm:$0xff] %v18895_v28  ;;  %v18898_v10 = vpop.f32.mrb[82].mxu1  ;;  %13511 = vmatprep.subr.bf16.mxu1 %v18907_v57  ;;  %v19029_v28 = vld [vmem:[#allocation8 + $0x11e0] sm:$0xff] }
 0x6f3   :  { %10692 = vmatpush1.bf16.msra.mxu0 %v8969_v3  ;;  %20908 = vst [vmem:[#allocation119_spill] sm:$0xff] %v18898_v10  ;;  %v18902_v50 = vpop.f32.mrb[83].mxu1  ;;  %v18933_v3 = vld [vmem:[#allocation8 + $0x1140] sm:$0xff] }
 0x6f4   :  { %10693 = vmatprep.subr.bf16.mxu0 %v8972_v27  ;;  %20909 = vst [vmem:[#allocation44_spill] sm:$0xff] %v18902_v50  ;;  %v8977_v27 = vld [vmem:[#allocation8 + $0xe70] sm:$0xff]  ;;  %v19015_v50 = vld [vmem:[#allocation8 + $0x11d8] sm:$0xff] }
 0x6f5   :  { %13527 = vmatpush1.bf16.msra.mxu1 %v18909_v18 }
 0x6f6   :  { %10625 = vmatmul.mubr.bf16.gmra.mrb[40].mxu0 %v17639_v61  ;;  %13512 = vmatprep.subr.bf16.mxu1 %v18915_v37 }
 0x6f7   :  { %10694 = vmatpush1.bf16.msra.mxu0 %v8971_v23  ;;  %10634 = vmatprep.mubr.bf16.mxu0 %v20911_v32  ;;  %v8980_v23 = vld [vmem:[#allocation8 + $0xe88] sm:$0xff] }
 0x6f8   :  { %10695 = vmatprep.subr.bf16.mxu0 %v8974_v60  ;;  %v18913_v61 = vpop.f32.mrb[84].mxu1 }
 0x6f9   :  { %20912 = vst [vmem:[#allocation61_spill] sm:$0xff] %v18913_v61  ;;  %v18919_v34 = vpop.f32.mrb[85].mxu1  ;;  %13528 = vmatpush1.bf16.msra.mxu1 %v18917_v59  ;;  %v8996_v61 = vld [vmem:[#allocation8 + $0xf08] sm:$0xff] }
 0x6fa   :  { %20913 = vst [vmem:[#allocation118_spill] sm:$0xff] %v18919_v34  ;;  %v18922_v52 = vpop.f32.mrb[86].mxu1  ;;  %13513 = vmatprep.subr.bf16.mxu1 %v18931_v7  ;;  %v19011_v34 = vld [vmem:[#allocation8 + $0x11c0] sm:$0xff] }
 0x6fb   :  { %10696 = vmatpush1.bf16.msra.mxu0 %v8973_v13  ;;  %20914 = vst [vmem:[#allocation126_spill] sm:$0xff] %v18922_v52  ;;  %v18928_v45 = vpop.f32.mrb[87].mxu1  ;;  %v8982_v13 = vld [vmem:[#allocation8 + $0xe98] sm:$0xff] }
 0x6fc   :  { %10697 = vmatprep.subr.bf16.mxu0 %v8976_v49  ;;  %20916 = vst [vmem:[#allocation71_spill] sm:$0xff] %v18928_v45  ;;  %v20929_v45 = vld [vmem:[#allocation65_spill] sm:$0xff] }
 0x6fd   :  { %13529 = vmatpush1.bf16.msra.mxu1 %v18933_v3 }
 0x6fe   :  { %10635 = vmatmul.mubr.bf16.gmra.mrb[44].mxu0 %v20915_v58  ;;  %13514 = vmatprep.subr.bf16.mxu1 %v18939_v17  ;;  %v18955_v58 = vld [vmem:[#allocation8 + $0x1160] sm:$0xff] }
 0x6ff   :  { %10698 = vmatpush1.bf16.msra.mxu0 %v8975_v56  ;;  %10644 = vmatprep.mubr.bf16.mxu0 %v17873_v21  ;;  %v8979_v21 = vld [vmem:[#allocation8 + $0xe80] sm:$0xff] }
 0x700   :  { %10699 = vmatprep.subr.bf16.mxu0 %v8978_v47  ;;  %v18937_v60 = vpop.f32.mrb[88].mxu1  ;;  %v18953_v47 = vld [vmem:[#allocation8 + $0x1168] sm:$0xff] }
 0x701   :  { %20917 = vst [vmem:[#allocation79_spill] sm:$0xff] %v18937_v60  ;;  %v18943_v32 = vpop.f32.mrb[89].mxu1  ;;  %13530 = vmatpush1.bf16.msra.mxu1 %v18941_v29  ;;  %v20928_v60 = vld [vmem:[#allocation60_spill] sm:$0xff] }
 0x702   :  { %20918 = vst [vmem:[#allocation59_spill] sm:$0xff] %v18943_v32  ;;  %v18946_v49 = vpop.f32.mrb[90].mxu1  ;;  %13515 = vmatprep.subr.bf16.mxu1 %v18953_v47  ;;  %v18997_v32 = vld [vmem:[#allocation8 + $0x11b8] sm:$0xff]  ;;  %v20930_v52 = vcombine.high %v20928_v60, %v20929_v45 }
 0x703   :  { %10700 = vmatpush1.bf16.msra.mxu0 %v8977_v27  ;;  %20919 = vst [vmem:[#allocation143_spill] sm:$0xff] %v18946_v49  ;;  %v18950_v56 = vpop.f32.mrb[91].mxu1  ;;  %v8981_v27 = vld [vmem:[#allocation8 + $0xe90] sm:$0xff] }
 0x704   :  { %10701 = vmatprep.subr.bf16.mxu0 %v8980_v23  ;;  %20920 = vst [vmem:[#allocation80_spill] sm:$0xff] %v18950_v56  ;;  %v8984_v23 = vld [vmem:[#allocation8 + $0xea8] sm:$0xff]  ;;  %v8989_v49 = vld [vmem:[#allocation8 + $0xed0] sm:$0xff] }
 0x705   :  { %13531 = vmatpush1.bf16.msra.mxu1 %v18955_v58  ;;  %v18991_v56 = vld [vmem:[#allocation8 + $0x11a8] sm:$0xff] }
 0x706   :  { %10645 = vmatmul.mubr.bf16.gmra.mrb[48].mxu0 %v17869_v11  ;;  %v18961_v11 = vld [vmem:[#allocation8 + $0x1178] sm:$0xff] }
 0x707   :  { %10702 = vmatpush1.bf16.msra.mxu0 %v8979_v21  ;;  %10654 = vmatprep.mubr.bf16.mxu0 %v18016_v30  ;;  %v8983_v30 = vld [vmem:[#allocation8 + $0xea0] sm:$0xff] }
 0x708   :  { %10703 = vmatprep.subr.bf16.mxu0 %v8982_v13  ;;  %v18959_v4 = vpop.f32.mrb[92].mxu1  ;;  %13516 = vmatprep.subr.bf16.mxu1 %v18961_v11  ;;  %v8986_v13 = vld [vmem:[#allocation8 + $0xeb8] sm:$0xff] }
 0x709   :  { %20921 = vst [vmem:[#allocation100_spill] sm:$0xff] %v18959_v4  ;;  %v18965_v21 = vpop.f32.mrb[93].mxu1  ;;  %13532 = vmatpush1.bf16.msra.mxu1 %v18963_v48  ;;  %v8988_v4 = vld [vmem:[#allocation8 + $0xec8] sm:$0xff] }
 0x70a   :  { %20922 = vst [vmem:[#allocation142_spill] sm:$0xff] %v18965_v21  ;;  %v18968_v14 = vpop.f32.mrb[94].mxu1  ;;  %v8985_v21 = vld [vmem:[#allocation8 + $0xeb0] sm:$0xff]  ;;  %13517 = vmatprep.subr.bf16.mxu1 %v18975_v8 }
 0x70b   :  { %10704 = vmatpush1.bf16.msra.mxu0 %v8981_v27  ;;  %20923 = vst [vmem:[#allocation146_spill] sm:$0xff] %v18968_v14  ;;  %v18972_v27 = vpop.f32.mrb[95].mxu1  ;;  %v18981_v14 = vld [vmem:[#allocation8 + $0x1198] sm:$0xff] }
 0x70c   :  { %10705 = vmatprep.subr.bf16.mxu0 %v8984_v23  ;;  %20924 = vst [vmem:[#allocation162_spill] sm:$0xff] %v18972_v27  ;;  %v18977_v23 = vld [vmem:[#allocation8 + $0x1180] sm:$0xff] }
 0x70d   :  { %13533 = vmatpush1.bf16.msra.mxu1 %v18977_v23 }
 0x70e   :  { %10655 = vmatmul.mubr.bf16.gmra.mrb[52].mxu0 %v18012_v15  ;;  %v18983_v15 = vld [vmem:[#allocation8 + $0x1190] sm:$0xff]  ;;  %13518 = vmatprep.subr.bf16.mxu1 %v18981_v14 }
 0x70f   :  { %10706 = vmatpush1.bf16.msra.mxu0 %v8983_v30  ;;  %10664 = vmatprep.mubr.bf16.mxu0 %v18150_v12  ;;  %v8987_v30 = vld [vmem:[#allocation8 + $0xec0] sm:$0xff]  ;;  %v8990_v12 = vld [vmem:[#allocation8 + $0xed8] sm:$0xff] }
 0x710   :  { %10707 = vmatprep.subr.bf16.mxu0 %v8986_v13  ;;  %v20925_v13 = vld [vmem:[#allocation232_spill] sm:$0xff] }
 0x711   :  { %13534 = vmatpush1.bf16.msra.mxu1 %v18983_v15  ;;  %v20926_v27 = vcombine.high %v20680_v38, %v20925_v13 }
 0x712   :  { %13519 = vmatprep.subr.bf16.mxu1 %v18991_v56 }
 0x713   :  { %10708 = vmatpush1.bf16.msra.mxu0 %v8985_v21  ;;  %v18993_v21 = vld [vmem:[#allocation8 + $0x11a0] sm:$0xff] }
 0x714   :  { %10709 = vmatprep.subr.bf16.mxu0 %v8988_v4  ;;  %v8992_v4 = vld [vmem:[#allocation8 + $0xee8] sm:$0xff] }
 0x715   :  { %13535 = vmatpush1.bf16.msra.mxu1 %v18993_v21 }
 0x716   :  { %10665 = vmatmul.mubr.bf16.gmra.mrb[56].mxu0 %v18146_v54  ;;  %v18999_v54 = vld [vmem:[#allocation8 + $0x11b0] sm:$0xff]  ;;  %13520 = vmatprep.subr.bf16.mxu1 %v18997_v32 }
 0x717   :  { %10710 = vmatpush1.bf16.msra.mxu0 %v8987_v30  ;;  %10674 = vmatprep.mubr.bf16.mxu0 %v20926_v27  ;;  %v8991_v30 = vld [vmem:[#allocation8 + $0xee0] sm:$0xff]  ;;  %v8994_v27 = vld [vmem:[#allocation8 + $0xef8] sm:$0xff] }
 0x718   :  { %10711 = vmatprep.subr.bf16.mxu0 %v8990_v12  ;;  %v20927_v12 = vcombine.low %v20680_v38, %v20925_v13  ;;  %v19017_v38 = vld [vmem:[#allocation8 + $0x11d0] sm:$0xff]  ;;  %v8995_v13 = vld [vmem:[#allocation8 + $0xf00] sm:$0xff] }
 0x719   :  { %13536 = vmatpush1.bf16.msra.mxu1 %v18999_v54 }
 0x71b   :  { %10712 = vmatpush1.bf16.msra.mxu0 %v8989_v49  ;;  %v19009_v49 = vld [vmem:[#allocation8 + $0x11c8] sm:$0xff] }
 0x71c   :  { %10713 = vmatprep.subr.bf16.mxu0 %v8992_v4  ;;  %v8993_v4 = vld [vmem:[#allocation8 + $0xef0] sm:$0xff]  ;;  %13521 = vmatprep.subr.bf16.mxu1 %v19009_v49 }
 0x71d   :  { %13537 = vmatpush1.bf16.msra.mxu1 %v19011_v34 }
 0x71e   :  { %10675 = vmatmul.mubr.bf16.gmra.mrb[60].mxu0 %v20927_v12  ;;  %13522 = vmatprep.subr.bf16.mxu1 %v19015_v50  ;;  %v20933_v12 = vld [vmem:[#allocation84_spill] sm:$0xff] }
 0x71f   :  { %10714 = vmatpush1.bf16.msra.mxu0 %v8991_v30  ;;  %10717 = vmatprep.mubr.bf16.mxu0 %v20930_v52  ;;  %v8998_v52 = vld [vmem:[#allocation8 + $0xf18] sm:$0xff]  ;;  %v20931_v30 = vcombine.low %v20928_v60, %v20929_v45  ;;  %v19035_v45 = vld [vmem:[#allocation8 + $0x11f0] sm:$0xff]  ;;  %v8999_v60 = vld [vmem:[#allocation8 + $0xf20] sm:$0xff] }
 0x720   :  { %10715 = vmatprep.subr.bf16.mxu0 %v8994_v27  ;;  %v20932_v27 = vld [vmem:[#allocation78_spill] sm:$0xff] }
 0x721   :  { %13538 = vmatpush1.bf16.msra.mxu1 %v19017_v38  ;;  %v20934_v10 = vcombine.high %v20932_v27, %v20933_v12 }
 0x723   :  { %10716 = vmatpush1.bf16.msra.mxu0 %v8993_v4  ;;  %v19027_v4 = vld [vmem:[#allocation8 + $0x11e8] sm:$0xff] }
 0x724   :  { %10798 = vmatprep.subr.bf16.mxu0 %v8996_v61  ;;  %v8997_v61 = vld [vmem:[#allocation8 + $0xf10] sm:$0xff]  ;;  %13523 = vmatprep.subr.bf16.mxu1 %v19027_v4 }
 0x725   :  { %13539 = vmatpush1.bf16.msra.mxu1 %v19029_v28 }
 0x726   :  { %10718 = vmatmul.mubr.bf16.vlgmr.msra.gmra.mrb[32].mxu0 %v20931_v30  ;;  %13524 = vmatprep.subr.bf16.mxu1 %v19033_v40  ;;  %v20937_v30 = vld [vmem:[#allocation99_spill] sm:$0xff] }
 0x727   :  { %10799 = vmatpush1.bf16.msra.mxu0 %v8995_v13  ;;  %10727 = vmatprep.mubr.bf16.mxu0 %v20934_v10  ;;  %v9002_v10 = vld [vmem:[#allocation8 + $0xf38] sm:$0xff]  ;;  %v20935_v13 = vcombine.low %v20932_v27, %v20933_v12  ;;  %v9003_v27 = vld [vmem:[#allocation8 + $0xf40] sm:$0xff] }
 0x728   :  { %10800 = vmatprep.subr.bf16.mxu0 %v8998_v52  ;;  %v20936_v52 = vld [vmem:[#allocation95_spill] sm:$0xff] }
 0x729   :  { %13540 = vmatpush1.bf16.msra.mxu1 %v19035_v45  ;;  %v20938_v31 = vcombine.high %v20936_v52, %v20937_v30  ;;  %v9006_v12 = vld [vmem:[#allocation8 + $0xf58] sm:$0xff] }
 0x72b   :  { %10801 = vmatpush1.bf16.msra.mxu0 %v8997_v61  ;;  %v9001_v61 = vld [vmem:[#allocation8 + $0xf30] sm:$0xff] }
 0x72c   :  { %10802 = vmatprep.subr.bf16.mxu0 %v9000_v41  ;;  %v20939_v41 = vcombine.low %v20839_v0, %v20840_v16  ;;  %v9005_v0 = vld [vmem:[#allocation8 + $0xf50] sm:$0xff]  ;;  %v20947_v16 = vcombine.low %v20940_v44, %v20941_v2 }
 0x72d   :  { %v9009_v2 = vld [vmem:[#allocation8 + $0xf70] sm:$0xff] }
 0x72e   :  { %10728 = vmatmul.mubr.bf16.gmra.mrb[36].mxu0 %v20935_v13  ;;  %11067 = vmatmul.mubr.bf16.vlgmr.msra.gmra.mrb[96].mxu1 %v20939_v41 }
 0x72f   :  { %10803 = vmatpush1.bf16.msra.mxu0 %v8999_v60  ;;  %10737 = vmatprep.mubr.bf16.mxu0 %v20938_v31  ;;  %v20943_v60 = vcombine.low %v20936_v52, %v20937_v30  ;;  %v20944_v31 = vld [vmem:[#allocation111_spill] sm:$0xff] }
 0x730   :  { %10804 = vmatprep.subr.bf16.mxu0 %v9002_v10  ;;  %11076 = vmatprep.mubr.bf16.mxu1 %v20942_v53  ;;  %v20945_v10 = vld [vmem:[#allocation87_spill] sm:$0xff]  ;;  %v9008_v53 = vld [vmem:[#allocation8 + $0xf68] sm:$0xff] }
 0x731   :  { %v20946_v13 = vcombine.high %v20944_v31, %v20945_v10  ;;  %v9007_v52 = vld [vmem:[#allocation8 + $0xf60] sm:$0xff]  ;;  %v9010_v30 = vld [vmem:[#allocation8 + $0xf78] sm:$0xff] }
 0x733   :  { %10805 = vmatpush1.bf16.msra.mxu0 %v9001_v61  ;;  %v20948_v61 = vld [vmem:[#allocation210_spill] sm:$0xff] }
 0x734   :  { %10806 = vmatprep.subr.bf16.mxu0 %v9004_v9  ;;  %v20949_v9 = vld [vmem:[#allocation169_spill] sm:$0xff] }
 0x735   :  { %v20950_v41 = vcombine.high %v20948_v61, %v20949_v9  ;;  %v20955_v44 = vcombine.low %v20948_v61, %v20949_v9  ;;  %v9013_v61 = vld [vmem:[#allocation8 + $0xf90] sm:$0xff] }
 0x736   :  { %10738 = vmatmul.mubr.bf16.gmra.mrb[40].mxu0 %v20943_v60  ;;  %11077 = vmatmul.mubr.bf16.gmra.mrb[100].mxu1 %v20947_v16  ;;  %v20953_v60 = vld [vmem:[#allocation121_spill] sm:$0xff] }
 0x737   :  { %10807 = vmatpush1.bf16.msra.mxu0 %v9003_v27  ;;  %10747 = vmatprep.mubr.bf16.mxu0 %v20946_v13  ;;  %v20951_v27 = vcombine.low %v20944_v31, %v20945_v10  ;;  %v9012_v16 = vld [vmem:[#allocation8 + $0xf88] sm:$0xff]  ;;  %v9011_v31 = vld [vmem:[#allocation8 + $0xf80] sm:$0xff]  ;;  %v9014_v10 = vld [vmem:[#allocation8 + $0xf98] sm:$0xff] }
 0x738   :  { %10808 = vmatprep.subr.bf16.mxu0 %v9006_v12  ;;  %11086 = vmatprep.mubr.bf16.mxu1 %v20950_v41  ;;  %v20952_v12 = vld [vmem:[#allocation51_spill] sm:$0xff] }
 0x739   :  { %v20954_v13 = vcombine.high %v20952_v12, %v20953_v60 }
 0x73b   :  { %10809 = vmatpush1.bf16.msra.mxu0 %v9005_v0  ;;  %v20956_v0 = vld [vmem:[#allocation224_spill] sm:$0xff] }
 0x73c   :  { %10810 = vmatprep.subr.bf16.mxu0 %v9008_v53  ;;  %v20957_v53 = vld [vmem:[#allocation226_spill] sm:$0xff] }
 0x73d   :  { %v20958_v41 = vcombine.high %v20956_v0, %v20957_v53  ;;  %v20963_v9 = vcombine.low %v20956_v0, %v20957_v53  ;;  %v9017_v0 = vld [vmem:[#allocation8 + $0xfb0] sm:$0xff] }
 0x73e   :  { %10748 = vmatmul.mubr.bf16.gmra.mrb[44].mxu0 %v20951_v27  ;;  %11087 = vmatmul.mubr.bf16.gmra.mrb[104].mxu1 %v20955_v44  ;;  %v20961_v27 = vld [vmem:[#allocation136_spill] sm:$0xff] }
 0x73f   :  { %10811 = vmatpush1.bf16.msra.mxu0 %v9007_v52  ;;  %10757 = vmatprep.mubr.bf16.mxu0 %v20954_v13  ;;  %v20959_v52 = vcombine.low %v20952_v12, %v20953_v60  ;;  %v9016_v44 = vld [vmem:[#allocation8 + $0xfa8] sm:$0xff]  ;;  %v9015_v12 = vld [vmem:[#allocation8 + $0xfa0] sm:$0xff]  ;;  %v9018_v60 = vld [vmem:[#allocation8 + $0xfb8] sm:$0xff] }
 0x740   :  { %10812 = vmatprep.subr.bf16.mxu0 %v9010_v30  ;;  %11096 = vmatprep.mubr.bf16.mxu1 %v20958_v41  ;;  %v20960_v30 = vld [vmem:[#allocation133_spill] sm:$0xff] }
 0x741   :  { %v20962_v13 = vcombine.high %v20960_v30, %v20961_v27 }
 0x743   :  { %10813 = vmatpush1.bf16.msra.mxu0 %v9009_v2  ;;  %v20964_v2 = vld [vmem:[#allocation234_spill] sm:$0xff] }
 0x744   :  { %10814 = vmatprep.subr.bf16.mxu0 %v9012_v16  ;;  %v20965_v16 = vld [vmem:[#allocation237_spill] sm:$0xff] }
 0x745   :  { %v20966_v41 = vcombine.high %v20964_v2, %v20965_v16  ;;  %v20971_v53 = vcombine.low %v20964_v2, %v20965_v16  ;;  %v9021_v2 = vld [vmem:[#allocation8 + $0xfd0] sm:$0xff]  ;;  %v20977_v16 = vcombine.low %v18186_v46, %v18220_v6 }
 0x746   :  { %10758 = vmatmul.mubr.bf16.gmra.mrb[48].mxu0 %v20959_v52  ;;  %11097 = vmatmul.mubr.bf16.gmra.mrb[108].mxu1 %v20963_v9  ;;  %v20969_v52 = vld [vmem:[#allocation153_spill] sm:$0xff] }
 0x747   :  { %10815 = vmatpush1.bf16.msra.mxu0 %v9011_v31  ;;  %10767 = vmatprep.mubr.bf16.mxu0 %v20962_v13  ;;  %v20967_v31 = vcombine.low %v20960_v30, %v20961_v27  ;;  %v9020_v9 = vld [vmem:[#allocation8 + $0xfc8] sm:$0xff]  ;;  %v9019_v30 = vld [vmem:[#allocation8 + $0xfc0] sm:$0xff]  ;;  %v9022_v27 = vld [vmem:[#allocation8 + $0xfd8] sm:$0xff] }
 0x748   :  { %10816 = vmatprep.subr.bf16.mxu0 %v9014_v10  ;;  %11106 = vmatprep.mubr.bf16.mxu1 %v20966_v41  ;;  %v20968_v10 = vld [vmem:[#allocation147_spill] sm:$0xff]  ;;  %v20974_v41 = vld [vmem:[#allocation161_spill] sm:$0xff] }
 0x749   :  { %v20970_v13 = vcombine.high %v20968_v10, %v20969_v52 }
 0x74b   :  { %10817 = vmatpush1.bf16.msra.mxu0 %v9013_v61  ;;  %v20972_v61 = vcombine.high %v18186_v46, %v18220_v6  ;;  %v9025_v46 = vld [vmem:[#allocation8 + $0xff0] sm:$0xff]  ;;  %v20983_v6 = vcombine.low %v18259_v63, %v18239_v43 }
 0x74c   :  { %10818 = vmatprep.subr.bf16.mxu0 %v9016_v44  ;;  %v20973_v44 = vcombine.low %v20968_v10, %v20969_v52  ;;  %v9023_v10 = vld [vmem:[#allocation8 + $0xfe0] sm:$0xff]  ;;  %v9026_v52 = vld [vmem:[#allocation8 + $0xff8] sm:$0xff] }
 0x74e   :  { %10768 = vmatmul.mubr.bf16.gmra.mrb[52].mxu0 %v20967_v31  ;;  %11107 = vmatmul.mubr.bf16.gmra.mrb[112].mxu1 %v20971_v53  ;;  %v9024_v31 = vld [vmem:[#allocation8 + $0xfe8] sm:$0xff] }
 0x74f   :  { %10819 = vmatpush1.bf16.msra.mxu0 %v9015_v12  ;;  %10777 = vmatprep.mubr.bf16.mxu0 %v20970_v13  ;;  %v20975_v12 = vld [vmem:[#allocation157_spill] sm:$0xff]  ;;  %v20978_v13 = vcombine.high %v18259_v63, %v18239_v43  ;;  %v9031_v43 = vld [vmem:[#allocation8 + $0x1020] sm:$0xff]  ;;  %v9034_v63 = vld [vmem:[#allocation8 + $0x1038] sm:$0xff] }
 0x750   :  { %10820 = vmatprep.subr.bf16.mxu0 %v9018_v60  ;;  %11116 = vmatprep.mubr.bf16.mxu1 %v20972_v61  ;;  %v20976_v60 = vcombine.high %v20974_v41, %v20975_v12  ;;  %v20980_v53 = vld [vmem:[#allocation177_spill] sm:$0xff] }
 0x753   :  { %10821 = vmatpush1.bf16.msra.mxu0 %v9017_v0  ;;  %v20979_v0 = vcombine.low %v20974_v41, %v20975_v12  ;;  %v20985_v12 = vld [vmem:[#allocation190_spill] sm:$0xff] }
 0x754   :  { %10822 = vmatprep.subr.bf16.mxu0 %v9020_v9  ;;  %v20981_v9 = vld [vmem:[#allocation181_spill] sm:$0xff] }
 0x755   :  { %v20982_v61 = vcombine.high %v20980_v53, %v20981_v9  ;;  %v20984_v41 = vcombine.low %v20980_v53, %v20981_v9  ;;  %v9033_v53 = vld [vmem:[#allocation8 + $0x1030] sm:$0xff]  ;;  %v9036_v9 = vld [vmem:[#allocation8 + $0x1048] sm:$0xff] }
 0x756   :  { %10778 = vmatmul.mubr.bf16.gmra.mrb[56].mxu0 %v20973_v44  ;;  %11117 = vmatmul.mubr.bf16.gmra.mrb[116].mxu1 %v20977_v16  ;;  %v9030_v44 = vld [vmem:[#allocation8 + $0x1018] sm:$0xff]  ;;  %v9029_v16 = vld [vmem:[#allocation8 + $0x1010] sm:$0xff] }
 0x757   :  { %10823 = vmatpush1.bf16.msra.mxu0 %v9019_v30  ;;  %10787 = vmatprep.mubr.bf16.mxu0 %v20976_v60  ;;  %v9028_v30 = vld [vmem:[#allocation8 + $0x1008] sm:$0xff] }
 0x758   :  { %10824 = vmatprep.subr.bf16.mxu0 %v9022_v27  ;;  %11126 = vmatprep.mubr.bf16.mxu1 %v20978_v13  ;;  %v9027_v27 = vld [vmem:[#allocation8 + $0x1000] sm:$0xff] }
 0x759   :  { %v20986_v60 = vld [vmem:[#allocation196_spill] sm:$0xff] }
 0x75a   :  { %v20988_v13 = vcombine.low %v20985_v12, %v20986_v60 }
 0x75b   :  { %10825 = vmatpush1.bf16.msra.mxu0 %v9021_v2  ;;  %v20987_v2 = vcombine.high %v20985_v12, %v20986_v60  ;;  %v9040_v12 = vld [vmem:[#allocation8 + $0x1068] sm:$0xff]  ;;  %v9039_v60 = vld [vmem:[#allocation8 + $0x1060] sm:$0xff] }
 0x75c   :  { %10826 = vmatprep.subr.bf16.mxu0 %v9024_v31  ;;  %v9032_v31 = vld [vmem:[#allocation8 + $0x1028] sm:$0xff] }
 0x75e   :  { %10788 = vmatmul.mubr.bf16.gmra.mrb[60].mxu0 %v20979_v0  ;;  %11127 = vmatmul.mubr.bf16.gmra.mrb[120].mxu1 %v20983_v6 }
 0x75f   :  { %10827 = vmatpush1.bf16.msra.mxu0 %v9023_v10  ;;  %10830 = vmatprep.mubr.bf16.mxu0 %v20982_v61  ;;  %v20989_v10 = vld [vmem:[#allocation202_spill] sm:$0xff]  ;;  %v9035_v61 = vld [vmem:[#allocation8 + $0x1040] sm:$0xff] }
 0x760   :  { %10828 = vmatprep.subr.bf16.mxu0 %v9026_v52  ;;  %v20990_v52 = vld [vmem:[#allocation207_spill] sm:$0xff] }
 0x761   :  { %v20991_v0 = vcombine.high %v20989_v10, %v20990_v52  ;;  %v20992_v6 = vcombine.low %v20989_v10, %v20990_v52  ;;  %v9044_v10 = vld [vmem:[#allocation8 + $0x1088] sm:$0xff]  ;;  %v9043_v52 = vld [vmem:[#allocation8 + $0x1080] sm:$0xff] }
 0x763   :  { %10829 = vmatpush1.bf16.msra.mxu0 %v9025_v46  ;;  %v9038_v46 = vld [vmem:[#allocation8 + $0x1058] sm:$0xff] }
 0x764   :  { %10911 = vmatprep.subr.bf16.mxu0 %v9028_v30  ;;  %v20993_v30 = vld [vmem:[#allocation212_spill] sm:$0xff] }
 0x766   :  { %10831 = vmatmul.mubr.bf16.vlgmr.msra.gmra.mrb[32].mxu0 %v20984_v41  ;;  %v9037_v41 = vld [vmem:[#allocation8 + $0x1050] sm:$0xff] }
 0x767   :  { %10912 = vmatpush1.bf16.msra.mxu0 %v9027_v27  ;;  %10840 = vmatprep.mubr.bf16.mxu0 %v20987_v2  ;;  %v20994_v27 = vld [vmem:[#allocation168_spill] sm:$0xff]  ;;  %v9042_v2 = vld [vmem:[#allocation8 + $0x1078] sm:$0xff] }
 0x768   :  { %10913 = vmatprep.subr.bf16.mxu0 %v9030_v44  ;;  %v20995_v44 = vcombine.high %v20993_v30, %v20994_v27 }
 0x76b   :  { %10914 = vmatpush1.bf16.msra.mxu0 %v9029_v16  ;;  %v20996_v16 = vcombine.low %v20993_v30, %v20994_v27  ;;  %v9048_v30 = vld [vmem:[#allocation8 + $0x10a8] sm:$0xff]  ;;  %v9047_v27 = vld [vmem:[#allocation8 + $0x10a0] sm:$0xff] }
 0x76c   :  { %10915 = vmatprep.subr.bf16.mxu0 %v9032_v31  ;;  %v20997_v31 = vld [vmem:[#allocation223_spill] sm:$0xff] }
 0x76e   :  { %10841 = vmatmul.mubr.bf16.gmra.mrb[36].mxu0 %v20988_v13  ;;  %v9041_v13 = vld [vmem:[#allocation8 + $0x1070] sm:$0xff] }
 0x76f   :  { %10916 = vmatpush1.bf16.msra.mxu0 %v9031_v43  ;;  %10850 = vmatprep.mubr.bf16.mxu0 %v20991_v0  ;;  %v20998_v43 = vld [vmem:[#allocation225_spill] sm:$0xff]  ;;  %v9046_v0 = vld [vmem:[#allocation8 + $0x1098] sm:$0xff] }
 0x770   :  { %10917 = vmatprep.subr.bf16.mxu0 %v9034_v63  ;;  %v20999_v63 = vcombine.high %v20997_v31, %v20998_v43 }
 0x773   :  { %10918 = vmatpush1.bf16.msra.mxu0 %v9033_v53  ;;  %v21000_v53 = vcombine.low %v20997_v31, %v20998_v43  ;;  %v9054_v31 = vld [vmem:[#allocation8 + $0x10d8] sm:$0xff]  ;;  %v21006_v43 = vcombine.low %v18196_v39, %v18216_v62 }
 0x774   :  { %10919 = vmatprep.subr.bf16.mxu0 %v9036_v9  ;;  %v21001_v9 = vld [vmem:[#allocation236_spill] sm:$0xff] }
 0x776   :  { %10851 = vmatmul.mubr.bf16.gmra.mrb[40].mxu0 %v20992_v6  ;;  %v9045_v6 = vld [vmem:[#allocation8 + $0x1090] sm:$0xff] }
 0x777   :  { %10920 = vmatpush1.bf16.msra.mxu0 %v9035_v61  ;;  %10860 = vmatprep.mubr.bf16.mxu0 %v20995_v44  ;;  %v21002_v61 = vld [vmem:[#allocation238_spill] sm:$0xff] }
 0x778   :  { %10921 = vmatprep.subr.bf16.mxu0 %v9038_v46  ;;  %v21003_v46 = vcombine.high %v21001_v9, %v21002_v61  ;;  %v9050_v44 = vld [vmem:[#allocation8 + $0x10b8] sm:$0xff] }
 0x77b   :  { %10922 = vmatpush1.bf16.msra.mxu0 %v9037_v41  ;;  %v21004_v41 = vcombine.low %v21001_v9, %v21002_v61  ;;  %v21009_v9 = vld [vmem:[#allocation57_spill] sm:$0xff] }
 0x77c   :  { %10923 = vmatprep.subr.bf16.mxu0 %v9040_v12  ;;  %v21005_v12 = vcombine.high %v18196_v39, %v18216_v62  ;;  %v21010_v39 = vld [vmem:[#allocation64_spill] sm:$0xff]  ;;  %v9057_v61 = vld [vmem:[#allocation8 + $0x10f0] sm:$0xff] }
 0x77d   :  { %v21011_v62 = vcombine.high %v21009_v9, %v21010_v39 }
 0x77e   :  { %10861 = vmatmul.mubr.bf16.gmra.mrb[44].mxu0 %v20996_v16  ;;  %v9051_v16 = vld [vmem:[#allocation8 + $0x10c0] sm:$0xff] }
 0x77f   :  { %10924 = vmatpush1.bf16.msra.mxu0 %v9039_v60  ;;  %10870 = vmatprep.mubr.bf16.mxu0 %v20999_v63  ;;  %v9049_v60 = vld [vmem:[#allocation8 + $0x10b0] sm:$0xff]  ;;  %v21007_v63 = vcombine.high %v18267_v25, %v18233_v26 }
 0x780   :  { %10925 = vmatprep.subr.bf16.mxu0 %v9042_v2  ;;  %v9052_v2 = vld [vmem:[#allocation8 + $0x10c8] sm:$0xff] }
 0x783   :  { %10926 = vmatpush1.bf16.msra.mxu0 %v9041_v13  ;;  %v9053_v13 = vld [vmem:[#allocation8 + $0x10d0] sm:$0xff] }
 0x784   :  { %10927 = vmatprep.subr.bf16.mxu0 %v9044_v10  ;;  %v9056_v10 = vld [vmem:[#allocation8 + $0x10e8] sm:$0xff] }
 0x786   :  { %10871 = vmatmul.mubr.bf16.gmra.mrb[48].mxu0 %v21000_v53  ;;  %v21008_v53 = vcombine.low %v18267_v25, %v18233_v26 }
 0x787   :  { %10928 = vmatpush1.bf16.msra.mxu0 %v9043_v52  ;;  %10880 = vmatprep.mubr.bf16.mxu0 %v21003_v46  ;;  %v9055_v52 = vld [vmem:[#allocation8 + $0x10e0] sm:$0xff]  ;;  %v21012_v46 = vcombine.low %v21009_v9, %v21010_v39 }
 0x788   :  { %10929 = vmatprep.subr.bf16.mxu0 %v9046_v0  ;;  %v9058_v0 = vld [vmem:[#allocation8 + $0x10f8] sm:$0xff] }
 0x78b   :  { %10930 = vmatpush1.bf16.msra.mxu0 %v9045_v6  ;;  %v21013_v6 = vld [vmem:[#allocation77_spill] sm:$0xff] }
 0x78c   :  { %10931 = vmatprep.subr.bf16.mxu0 %v9048_v30  ;;  %v21014_v30 = vld [vmem:[#allocation83_spill] sm:$0xff] }
 0x78d   :  { %v21015_v26 = vcombine.high %v21013_v6, %v21014_v30  ;;  %v21016_v25 = vcombine.low %v21013_v6, %v21014_v30 }
 0x78e   :  { %10881 = vmatmul.mubr.bf16.gmra.mrb[52].mxu0 %v21004_v41 }
 0x78f   :  { %10932 = vmatpush1.bf16.msra.mxu0 %v9047_v27  ;;  %10890 = vmatprep.mubr.bf16.mxu0 %v21005_v12  ;;  %v21018_v27 = vld [vmem:[#allocation98_spill] sm:$0xff] }
 0x790   :  { %10933 = vmatprep.subr.bf16.mxu0 %v9050_v44 }
 0x793   :  { %10934 = vmatpush1.bf16.msra.mxu0 %v9049_v60 }
 0x794   :  { %10935 = vmatprep.subr.bf16.mxu0 %v9052_v2 }
 0x796   :  { %10891 = vmatmul.mubr.bf16.gmra.mrb[56].mxu0 %v21006_v43 }
 0x797   :  { %10936 = vmatpush1.bf16.msra.mxu0 %v9051_v16  ;;  %10900 = vmatprep.mubr.bf16.mxu0 %v21007_v63 }
 0x798   :  { %10937 = vmatprep.subr.bf16.mxu0 %v9054_v31 }
 0x79b   :  { %10938 = vmatpush1.bf16.msra.mxu0 %v9053_v13 }
 0x79c   :  { %10939 = vmatprep.subr.bf16.mxu0 %v9056_v10 }
 0x79e   :  { %10901 = vmatmul.mubr.bf16.gmra.mrb[60].mxu0 %v21008_v53 }
 0x79f   :  { %10940 = vmatpush1.bf16.msra.mxu0 %v9055_v52  ;;  %10943 = vmatprep.mubr.bf16.mxu0 %v21011_v62 }
 0x7a0   :  { %10941 = vmatprep.subr.bf16.mxu0 %v9058_v0 }
 0x7a3   :  { %10942 = vmatpush1.bf16.msra.mxu0 %v9057_v61 }
 0x7a4   :  { %11024 = vmatprep.subr.bf16.mxu0 %v18883_v33  ;;  %v21017_v33 = vld [vmem:[#allocation94_spill] sm:$0xff] }
 0x7a5   :  { %v21019_v44 = vcombine.high %v21017_v33, %v21018_v27 }
 0x7a6   :  { %10944 = vmatmul.mubr.bf16.vlgmr.msra.gmra.mrb[32].mxu0 %v21012_v46 }
 0x7a7   :  { %11025 = vmatpush1.bf16.msra.mxu0 %v18885_v51  ;;  %10953 = vmatprep.mubr.bf16.mxu0 %v21015_v26  ;;  %v21020_v51 = vcombine.low %v21017_v33, %v21018_v27  ;;  %v14357_v33 = vld [vmem:[%s19841_s5 + $0x40] sm:$0xff]  }
 0x7a8   :  { %11026 = vmatprep.subr.bf16.mxu0 %v18891_v36  ;;  %v21021_v36 = vld [vmem:[#allocation110_spill] sm:$0xff]  ;;  %v14358_v27 = vld [vmem:[%s19841_s5] sm:$0xff]   ;;  %13421 = vmatprep.subr.bf16.mxu1 %v14357_v33 }
 0x7a9   :  { %13422 = vmatpush3.bf16.msra.mxu1 %v14358_v27 }
 0x7ab   :  { %11027 = vmatpush1.bf16.msra.mxu0 %v18893_v35  ;;  %v21022_v35 = vld [vmem:[#allocation66_spill] sm:$0xff] }
 0x7ac   :  { %11028 = vmatprep.subr.bf16.mxu0 %v18907_v57  ;;  %v21023_v57 = vcombine.high %v21021_v36, %v21022_v35 }
 0x7ae   :  { %10954 = vmatmul.mubr.bf16.gmra.mrb[36].mxu0 %v21016_v25 }
 0x7af   :  { %11029 = vmatpush1.bf16.msra.mxu0 %v18909_v18  ;;  %10963 = vmatprep.mubr.bf16.mxu0 %v21019_v44  ;;  %v21024_v18 = vcombine.low %v21021_v36, %v21022_v35  ;;  %v14359_v44 = vld [vmem:[%s19841_s5 + $0x48] sm:$0xff]   ;;  %v13645_v36 = vadd.f32 %v18851_v24, %v18830_v20  ;;  %v13648_v35 = vadd.f32 %v18853_v1, %v18833_v19  ;;  %v14363_v24 = vld [vmem:[%s19841_s5 + $0x58] sm:$0xff]  }
 0x7b0   :  { %11030 = vmatprep.subr.bf16.mxu0 %v18915_v37  ;;  %v21025_v37 = vld [vmem:[#allocation38_spill] sm:$0xff]  ;;  %13423 = vmatprep.subr.bf16.mxu1 %v14359_v44  ;;  %v13654_v1 = vadd.f32 %v18860_v55, %v18833_v19  ;;  %v14365_v55 = vld [vmem:[%s19841_s5 + $0x60] sm:$0xff]  }
 0x7b3   :  { %11031 = vmatpush1.bf16.msra.mxu0 %v18917_v59  ;;  %v21026_v59 = vld [vmem:[#allocation56_spill] sm:$0xff] }
 0x7b4   :  { %11032 = vmatprep.subr.bf16.mxu0 %v18931_v7  ;;  %v21027_v7 = vcombine.high %v21025_v37, %v21026_v59 }
 0x7b6   :  { %10964 = vmatmul.mubr.bf16.gmra.mrb[40].mxu0 %v21020_v51  ;;  %v14360_v51 = vld [vmem:[%s19841_s5 + $0x8] sm:$0xff]  }
 0x7b7   :  { %11033 = vmatpush1.bf16.msra.mxu0 %v18933_v3  ;;  %10973 = vmatprep.mubr.bf16.mxu0 %v21023_v57  ;;  %v21028_v3 = vcombine.low %v21025_v37, %v21026_v59  ;;  %v14362_v37 = vld [vmem:[%s19841_s5 + $0x10] sm:$0xff]   ;;  %v13651_v59 = vadd.f32 %v18855_v5, %v18830_v20  ;;  %v14364_v5 = vld [vmem:[%s19841_s5 + $0x18] sm:$0xff]  }
 0x7b8   :  { %11034 = vmatprep.subr.bf16.mxu0 %v18939_v17  ;;  %v21029_v17 = vld [vmem:[#allocation129_spill] sm:$0xff]  ;;  %13424 = vmatpush3.bf16.msra.mxu1 %v14360_v51 }
 0x7bb   :  { %11035 = vmatpush1.bf16.msra.mxu0 %v18941_v29  ;;  %v21030_v29 = vld [vmem:[#allocation135_spill] sm:$0xff] }
 0x7bc   :  { %11036 = vmatprep.subr.bf16.mxu0 %v18953_v47  ;;  %v21031_v47 = vcombine.high %v21029_v17, %v21030_v29 }
 0x7be   :  { %10974 = vmatmul.mubr.bf16.gmra.mrb[44].mxu0 %v21024_v18  ;;  %v14361_v18 = vld [vmem:[%s19841_s5 + $0x50] sm:$0xff]  }
 0x7bf   :  { %11037 = vmatpush1.bf16.msra.mxu0 %v18955_v58  ;;  %10983 = vmatprep.mubr.bf16.mxu0 %v21027_v7  ;;  %v21034_v58 = vld [vmem:[#allocation151_spill] sm:$0xff] }
 0x7c0   :  { %11038 = vmatprep.subr.bf16.mxu0 %v18961_v11  ;;  %13425 = vmatprep.subr.bf16.mxu1 %v14361_v18 }
 0x7c1   :  { %13426 = vmatpush3.bf16.msra.mxu1 %v14362_v37 }
 0x7c2   :  { %13427 = vmatprep.subr.bf16.mxu1 %v14363_v24  ;;  %v14369_v24 = vld [vmem:[%s19841_s5 + $0x70] sm:$0xff]  }
 0x7c3   :  { %11039 = vmatpush1.bf16.msra.mxu0 %v18963_v48  ;;  %v21032_v48 = vcombine.low %v21029_v17, %v21030_v29 }
 0x7c4   :  { %11040 = vmatprep.subr.bf16.mxu0 %v18975_v8  ;;  %v21033_v8 = vld [vmem:[#allocation148_spill] sm:$0xff] }
 0x7c5   :  { %v21035_v11 = vcombine.high %v21033_v8, %v21034_v58  ;;  %13428 = vmatpush3.bf16.msra.mxu1 %v14364_v5 }
 0x7c6   :  { %10984 = vmatmul.mubr.bf16.gmra.mrb[48].mxu0 %v21028_v3  ;;  %13429 = vmatprep.subr.bf16.mxu1 %v14365_v55  ;;  %v21051_v55 = vld [vmem:[#allocation103_spill] sm:$0xff] }
 0x7c7   :  { %11041 = vmatpush1.bf16.msra.mxu0 %v18977_v23  ;;  %10993 = vmatprep.mubr.bf16.mxu0 %v21031_v47  ;;  %v21038_v23 = vld [vmem:[#allocation154_spill] sm:$0xff] }
 0x7c8   :  { %11042 = vmatprep.subr.bf16.mxu0 %v18981_v14  ;;  %v21036_v14 = vcombine.low %v21033_v8, %v21034_v58 }
 0x7cb   :  { %11043 = vmatpush1.bf16.msra.mxu0 %v18983_v15 }
 0x7cc   :  { %11044 = vmatprep.subr.bf16.mxu0 %v18991_v56  ;;  %v21037_v56 = vld [vmem:[#allocation159_spill] sm:$0xff] }
 0x7cd   :  { %v21039_v15 = vcombine.high %v21037_v56, %v21038_v23 }
 0x7ce   :  { %10994 = vmatmul.mubr.bf16.gmra.mrb[52].mxu0 %v21032_v48 }
 0x7cf   :  { %11045 = vmatpush1.bf16.msra.mxu0 %v18993_v21  ;;  %11003 = vmatprep.mubr.bf16.mxu0 %v21035_v11  ;;  %v21041_v21 = vld [vmem:[#allocation178_spill] sm:$0xff] }
 0x7d0   :  { %11046 = vmatprep.subr.bf16.mxu0 %v18997_v32  ;;  %v21040_v32 = vcombine.low %v21037_v56, %v21038_v23 }
 0x7d3   :  { %11047 = vmatpush1.bf16.msra.mxu0 %v18999_v54  ;;  %v21042_v54 = vld [vmem:[#allocation179_spill] sm:$0xff] }
 0x7d4   :  { %11048 = vmatprep.subr.bf16.mxu0 %v19009_v49  ;;  %v21043_v49 = vcombine.high %v21041_v21, %v21042_v54 }
 0x7d6   :  { %11004 = vmatmul.mubr.bf16.gmra.mrb[56].mxu0 %v21036_v14 }
 0x7d7   :  { %11049 = vmatpush1.bf16.msra.mxu0 %v19011_v34  ;;  %11013 = vmatprep.mubr.bf16.mxu0 %v21039_v15 }
 0x7d8   :  { %11050 = vmatprep.subr.bf16.mxu0 %v19015_v50  ;;  %v21044_v50 = vcombine.low %v21041_v21, %v21042_v54  ;;  %v13660_v54 = vadd.f32 %v18865_v42, %v18833_v19  ;;  %v21046_v42 = vld [vmem:[#allocation76_spill] sm:$0xff] }
 0x7d9   :  { %v13666_v27 = vadd.f32 %v21046_v42, %v18833_v19 }
 0x7db   :  { %11051 = vmatpush1.bf16.msra.mxu0 %v19017_v38 }
 0x7dc   :  { %11052 = vmatprep.subr.bf16.mxu0 %v19027_v4 }
 0x7de   :  { %11014 = vmatmul.mubr.bf16.gmra.mrb[60].mxu0 %v21040_v32  ;;  %v13657_v32 = vadd.f32 %v18863_v22, %v18830_v20  ;;  %v14367_v22 = vld [vmem:[%s19841_s5 + $0x68] sm:$0xff]  }
 0x7df   :  { %11053 = vmatpush1.bf16.msra.mxu0 %v19029_v28  ;;  %11056 = vmatprep.mubr.bf16.mxu0 %v21043_v49 }
 0x7e0   :  { %11054 = vmatprep.subr.bf16.mxu0 %v19033_v40 }
 0x7e3   :  { %11055 = vmatpush1.bf16.msra.mxu0 %v19035_v45 }
 0x7e6   :  { %11057 = vmatmul.mubr.bf16.vlgmr.msra.gmra.mrb[32].mxu0 %v21044_v50 }
 0x801   :  { %v11068_v34 = vpop.f32.mrb[96].mxu1 }
 0x802   :  { %v11070_v38 = vpop.f32.mrb[97].mxu1 }
 0x803   :  { %v11072_v4 = vpop.f32.mrb[98].mxu1 }
 0x804   :  { %v11074_v41 = vpop.f32.mrb[99].mxu1 }
 0x809   :  { %v19251_v12 = vpop.f32.mrb[100].mxu1 }
 0x80a   :  { %v19253_v60 = vpop.f32.mrb[101].mxu1 }
 0x80b   :  { %v19255_v28 = vpop.f32.mrb[102].mxu1 }
 0x80c   :  { %v19257_v2 = vpop.f32.mrb[103].mxu1 }
 0x811   :  { %v19259_v16 = vpop.f32.mrb[104].mxu1 }
 0x812   :  { %v19261_v40 = vpop.f32.mrb[105].mxu1 }
 0x813   :  { %v19263_v45 = vpop.f32.mrb[106].mxu1 }
 0x814   :  { %v19265_v31 = vpop.f32.mrb[107].mxu1 }
 0x819   :  { %v19267_v43 = vpop.f32.mrb[108].mxu1 }
 0x81a   :  { %v19269_v63 = vpop.f32.mrb[109].mxu1 }
 0x81b   :  { %v19271_v13 = vpop.f32.mrb[110].mxu1 }
 0x81c   :  { %v19273_v10 = vpop.f32.mrb[111].mxu1 }
 0x821   :  { %v19275_v52 = vpop.f32.mrb[112].mxu1 }
 0x822   :  { %v19277_v0 = vpop.f32.mrb[113].mxu1 }
 0x823   :  { %v19279_v53 = vpop.f32.mrb[114].mxu1 }
 0x824   :  { %v19281_v9 = vpop.f32.mrb[115].mxu1 }
 0x829   :  { %v19283_v39 = vpop.f32.mrb[116].mxu1 }
 0x82a   :  { %v19285_v62 = vpop.f32.mrb[117].mxu1 }
 0x82b   :  { %v19287_v61 = vpop.f32.mrb[118].mxu1 }
 0x82c   :  { %v19289_v46 = vpop.f32.mrb[119].mxu1 }
 0x831   :  { %v19291_v6 = vpop.f32.mrb[120].mxu1 }
 0x832   :  { %v19293_v30 = vpop.f32.mrb[121].mxu1 }
 0x833   :  { %v19295_v26 = vpop.f32.mrb[122].mxu1 }
 0x834   :  { %v19297_v25 = vpop.f32.mrb[123].mxu1 }
 0x881   :  { %v10955_v57 = vpop.f32.mrb[36].mxu0 }
 0x882   :  { %v13646_v7 = vadd.f32 %v13645_v36, %v10955_v57  ;;  %v10957_v3 = vpop.f32.mrb[37].mxu0 }
 0x883   :  { %v13649_v17 = vadd.f32 %v13648_v35, %v10957_v3  ;;  %v10959_v29 = vpop.f32.mrb[38].mxu0 }
 0x884   :  { %v13652_v47 = vadd.f32 %v13651_v59, %v10959_v29  ;;  %v13647_v48 = vadd.f32 %v13646_v7, %v11068_v34  ;;  %v10961_v8 = vpop.f32.mrb[39].mxu0  ;;  %v14366_v34 = vld [vmem:[%s19841_s5 + $0x20] sm:$0xff]   ;;  %v14368_v59 = vld [vmem:[%s19841_s5 + $0x28] sm:$0xff]  }
 0x885   :  { %v13655_v58 = vadd.f32 %v13654_v1, %v10961_v8  ;;  %v13650_v11 = vadd.f32 %v13649_v17, %v11070_v38  ;;  %v21045_v38 = vld [vmem:[#allocation50_spill] sm:$0xff]  ;;  %13430 = vmatpush3.bf16.msra.mxu1 %v14366_v34  ;;  %v21054_v34 = vld [vmem:[#allocation44_spill] sm:$0xff] }
 0x886   :  { %v11141_v14 = vmax.f32 %v13647_v48, 0.0  ;;  %v13653_v56 = vadd.f32 %v13652_v47, %v11072_v4  ;;  %v13663_v4 = vadd.f32 %v21045_v38, %v18830_v20  ;;  %13431 = vmatprep.subr.bf16.mxu1 %v14367_v22  ;;  %v21047_v17 = vld [vmem:[#allocation74_spill] sm:$0xff]  ;;  %v13690_v38 = vadd.f32 %v21054_v34, %v18833_v19  ;;  %v21055_v22 = vld [vmem:[#allocation61_spill] sm:$0xff] }
 0x887   :  { %v11142_v23 = vmax.f32 %v13650_v11, 0.0  ;;  %v13656_v15 = vadd.f32 %v13655_v58, %v11074_v41  ;;  %v13669_v29 = vadd.f32 %v21047_v17, %v18830_v20  ;;  %v21048_v48 = vld [vmem:[#allocation86_spill] sm:$0xff]  ;;  %v21049_v11 = vld [vmem:[#allocation85_spill] sm:$0xff]  ;;  %v19385_v42 = vadd.f32 %v21055_v22, %v18830_v20  ;;  %v21061_v17 = vld [vmem:[#allocation143_spill] sm:$0xff] }
 0x888   :  { %11173 = vst [vmem:[#allocation6 + $0x20] sm:$0xff] %v11141_v14  ;;  %v11143_v21 = vmax.f32 %v13653_v56, 0.0  ;;  %v13672_v8 = vadd.f32 %v21048_v48, %v18833_v19  ;;  %v13675_v5 = vadd.f32 %v21049_v11, %v18830_v20  ;;  %v21050_v14 = vld [vmem:[#allocation104_spill] sm:$0xff]  ;;  %v14562_v48 = vmov 1966171168  }
 0x889   :  { %11174 = vst [vmem:[#allocation6 + $0x28] sm:$0xff] %v11142_v23  ;;  %v11144_v49 = vmax.f32 %v13656_v15, 0.0  ;;  %v10965_v50 = vpop.f32.mrb[40].mxu0  ;;  %13432 = vmatpush3.bf16.msra.mxu1 %v14368_v59  ;;  %v13678_v56 = vadd.f32 %v21050_v14, %v18833_v19  ;;  %v13681_v23 = vadd.f32 %v21051_v55, %v18830_v20 }
 0x88a   :  { %11175 = vst [vmem:[#allocation6 + $0x30] sm:$0xff] %v11143_v21  ;;  %v13658_v41 = vadd.f32 %v13657_v32, %v10965_v50  ;;  %v10967_v33 = vpop.f32.mrb[41].mxu0  ;;  %13433 = vmatprep.subr.bf16.mxu1 %v14369_v24  ;;  %v21052_v21 = vld [vmem:[#allocation42_spill] sm:$0xff]  ;;  %v21059_v24 = vld [vmem:[#allocation79_spill] sm:$0xff] }
 0x88b   :  { %11176 = vst [vmem:[#allocation6 + $0x38] sm:$0xff] %v11144_v49  ;;  %v13661_v44 = vadd.f32 %v13660_v54, %v10967_v33  ;;  %v10969_v51 = vpop.f32.mrb[42].mxu0  ;;  %v13684_v54 = vadd.f32 %v21052_v21, %v18833_v19  ;;  %v21053_v49 = vld [vmem:[#allocation119_spill] sm:$0xff]  ;;  %v21064_v21 = vld [vmem:[#allocation142_spill] sm:$0xff] }
 0x88c   :  { %v13664_v36 = vadd.f32 %v13663_v4, %v10969_v51  ;;  %v13659_v35 = vadd.f32 %v13658_v41, %v19251_v12  ;;  %v10971_v57 = vpop.f32.mrb[43].mxu0  ;;  %v13687_v50 = vadd.f32 %v21053_v49, %v18830_v20  ;;  %v14372_v33 = vld [vmem:[%s19841_s5 + $0x38] sm:$0xff]   ;;  %v19427_v49 = vadd.f32 %v21064_v21, %v18833_v19 }
 0x88d   :  { %v13667_v18 = vadd.f32 %v13666_v27, %v10971_v57  ;;  %v13662_v37 = vadd.f32 %v13661_v44, %v19253_v60  ;;  %v14370_v60 = vld [vmem:[%s19841_s5 + $0x30] sm:$0xff]  }
 0x88e   :  { %v11145_v7 = vmax.f32 %v13659_v35, 0.0  ;;  %v13665_v3 = vadd.f32 %v13664_v36, %v19255_v28  ;;  %v14371_v28 = vld [vmem:[%s19841_s5 + $0x78] sm:$0xff]   ;;  %13434 = vmatpush3.bf16.msra.mxu1 %v14370_v60 }
 0x88f   :  { %v11146_v1 = vmax.f32 %v13662_v37, 0.0  ;;  %v13668_v12 = vadd.f32 %v13667_v18, %v19257_v2  ;;  %13435 = vmatprep.subr.bf16.mxu1 %v14371_v28  ;;  %v21056_v36 = vld [vmem:[#allocation118_spill] sm:$0xff] }
 0x890   :  { %11177 = vst [vmem:[#allocation6 + $0x40] sm:$0xff] %v11145_v7  ;;  %v11147_v47 = vmax.f32 %v13665_v3, 0.0  ;;  %v19390_v35 = vadd.f32 %v21056_v36, %v18833_v19  ;;  %v21057_v57 = vld [vmem:[#allocation126_spill] sm:$0xff]  ;;  %v21058_v7 = vld [vmem:[#allocation71_spill] sm:$0xff] }
 0x891   :  { %11178 = vst [vmem:[#allocation6 + $0x48] sm:$0xff] %v11146_v1  ;;  %v11148_v2 = vmax.f32 %v13668_v12, 0.0  ;;  %v10975_v58 = vpop.f32.mrb[44].mxu0  ;;  %v19394_v18 = vadd.f32 %v21057_v57, %v18830_v20  ;;  %v19399_v3 = vadd.f32 %v21058_v7, %v18833_v19  ;;  %v21060_v1 = vld [vmem:[#allocation59_spill] sm:$0xff] }
 0x892   :  { %11179 = vst [vmem:[#allocation6 + $0x50] sm:$0xff] %v11147_v47  ;;  %v13670_v15 = vadd.f32 %v13669_v29, %v10975_v58  ;;  %v10977_v32 = vpop.f32.mrb[45].mxu0  ;;  %v19407_v12 = vadd.f32 %v21060_v1, %v18833_v19  ;;  %v19412_v29 = vadd.f32 %v21061_v17, %v18830_v20  ;;  %13436 = vmatpush3.bf16.msra.mxu1 %v14372_v33 }
 0x893   :  { %11180 = vst [vmem:[#allocation6 + $0x58] sm:$0xff] %v11148_v2  ;;  %v13673_v4 = vadd.f32 %v13672_v8, %v10977_v32  ;;  %v10979_v41 = vpop.f32.mrb[46].mxu0  ;;  %v19414_v8 = vunpack.c.l.s4 %v14562_v48 }
 0x894   :  { %v13676_v27 = vadd.f32 %v13675_v5, %v10979_v41  ;;  %v13671_v44 = vadd.f32 %v13670_v15, %v19259_v16  ;;  %v10981_v51 = vpop.f32.mrb[47].mxu0  ;;  %v19403_v16 = vadd.f32 %v21059_v24, %v18830_v20  ;;  %v21063_v15 = vld [vmem:[#allocation100_spill] sm:$0xff] }
 0x895   :  { %v13679_v37 = vadd.f32 %v13678_v56, %v10981_v51  ;;  %v13674_v59 = vadd.f32 %v13673_v4, %v19261_v40  ;;  %v19423_v32 = vadd.f32 %v21063_v15, %v18830_v20  ;;  %v11285_v24 = vunpack.c.0.s8 %v19414_v8 }
 0x896   :  { %v13677_v60 = vadd.f32 %v13676_v27, %v19263_v45  ;;  %v11149_v40 = vmax.f32 %v13671_v44, 0.0  ;;  %v21062_v45 = vld [vmem:[#allocation80_spill] sm:$0xff] }
 0x897   :  { %v11741_v47 = vld [vmem:[#allocation6 + $0x40] sm:$0xf0]  ;;  %v11150_v28 = vmax.f32 %v13674_v59, 0.0  ;;  %v13680_v5 = vadd.f32 %v13679_v37, %v19265_v31  ;;  %v19419_v55 = vadd.f32 %v21062_v45, %v18833_v19  ;;  %v11578_v34 = vld [vmem:[#allocation6 + $0x40] sm:$0xf] }
 0x898   :  { %v11742_v58 = vld [vmem:[#allocation6 + $0x48] sm:$0xf0]  ;;  %v11151_v11 = vmax.f32 %v13677_v60, 0.0  ;;  %v11579_v4 = vld [vmem:[#allocation6 + $0x48] sm:$0xf]  ;;  %11181 = vst [vmem:[#allocation6 + $0x60] sm:$0xff] %v11149_v40 }
 0x899   :  { %v10985_v2 = vpop.f32.mrb[48].mxu0  ;;  %v11580_v41 = vld [vmem:[#allocation6 + $0x50] sm:$0xf]  ;;  %v11743_v33 = vld [vmem:[#allocation6 + $0x50] sm:$0xf0]  ;;  %11182 = vst [vmem:[#allocation6 + $0x68] sm:$0xff] %v11150_v28 }
 0x89a   :  { %v13682_v14 = vadd.f32 %v13681_v23, %v10985_v2  ;;  %v10987_v56 = vpop.f32.mrb[49].mxu0  ;;  %v11773_v22 = vrot.slane %v11741_v47, 4  ;;  %v11775_v27 = vrot.slane %v11743_v33, 4  ;;  %v11581_v44 = vld [vmem:[#allocation6 + $0x58] sm:$0xf]  ;;  %11183 = vst [vmem:[#allocation6 + $0x70] sm:$0xff] %v11151_v11 }
 0x89b   :  { %v13685_v31 = vadd.f32 %v13684_v54, %v10987_v56  ;;  %v10989_v23 = vpop.f32.mrb[50].mxu0  ;;  %v11744_v51 = vld [vmem:[#allocation6 + $0x58] sm:$0xf0]  ;;  %v11774_v37 = vrot.slane %v11742_v58, 4  ;;  %v11152_v7 = vmax.f32 %v13680_v5, 0.0  ;;  %v14373_v60 = vld [vmem:[%s19841_s5 + $0xc0] sm:$0xff]  }
 0x89c   :  { %v13688_v36 = vadd.f32 %v13687_v50, %v10989_v23  ;;  %v13683_v57 = vadd.f32 %v13682_v14, %v19267_v43  ;;  %v11776_v59 = vrot.slane %v11744_v51, 4  ;;  %v10991_v1 = vpop.f32.mrb[51].mxu0  ;;  %v11595_v54 = vsel %vm3330_vm12, %v11580_v41, 0.0  ;;  %13443 = vmatprep.subr.bf16.mxu1 %v14373_v60  ;;  %v11205_v23 = vld [vmem:[#allocation6 + $0x20] sm:$0xf] }
 0x89d   :  { %v11608_v17 = vsel %vm3330_vm12, %v11581_v44, 0.0  ;;  %v13691_v40 = vadd.f32 %v13690_v38, %v10991_v1  ;;  %v11806_v50 = vsel %vm3330_vm12, %v11775_v27, 0.0  ;;  %11184 = vst [vmem:[#allocation6 + $0x78] sm:$0xff] %v11152_v7  ;;  %v13686_v28 = vadd.f32 %v13685_v31, %v19269_v63  ;;  %v11370_v60 = vld [vmem:[#allocation6 + $0x20] sm:$0xf0] }
 0x89e   :  { %v11153_v47 = vmax.f32 %v13683_v57, 0.0  ;;  %v11819_v43 = vsel %vm3330_vm12, %v11776_v59, 0.0  ;;  %v13689_v48 = vadd.f32 %v13688_v36, %v19271_v13  ;;  %v11594_v2 = vsel %vm3330_vm12, %v11578_v34, 0.0 }
 0x89f   :  { %v11805_v58 = vsel %vm3330_vm12, %v11773_v22, 0.0  ;;  %v11607_v11 = vsel %vm3330_vm12, %v11579_v4, 0.0  ;;  %v13692_v5 = vadd.f32 %v13691_v40, %v19273_v10  ;;  %v11818_v38 = vsel %vm3330_vm12, %v11774_v37, 0.0  ;;  %v11582_v13 = vld [vmem:[#allocation6 + $0x60] sm:$0xf] }
 0x8a0   :  { %11185 = vst [vmem:[#allocation6 + $0x80] sm:$0xff] %v11153_v47  ;;  %v11596_v14 = vadd.f32 %v11595_v54, %v11594_v2  ;;  %v11154_v56 = vmax.f32 %v13686_v28, 0.0  ;;  %v11155_v45 = vmax.f32 %v13689_v48, 0.0  ;;  %v11807_v21 = vadd.f32 %v11806_v50, %v11805_v58  ;;  %v11745_v33 = vld [vmem:[#allocation6 + $0x60] sm:$0xf0] }
 0x8a1   :  { %v10995_v15 = vpop.f32.mrb[52].mxu0  ;;  %v11609_v63 = vadd.f32 %v11608_v17, %v11607_v11  ;;  %v11820_v41 = vadd.f32 %v11819_v43, %v11818_v38  ;;  %v11583_v31 = vld [vmem:[#allocation6 + $0x68] sm:$0xf]  ;;  %v11597_v4 = vsel %vm3330_vm12, %v11582_v13, 0.0  ;;  %v11777_v22 = vrot.slane %v11745_v33, 4 }
 0x8a2   :  { %v13694_v34 = vadd.f32 %v19385_v42, %v10995_v15  ;;  %v11610_v10 = vsel %vm3330_vm12, %v11583_v31, 0.0  ;;  %v11746_v27 = vld [vmem:[#allocation6 + $0x68] sm:$0xf0]  ;;  %11186 = vst [vmem:[#allocation6 + $0x88] sm:$0xff] %v11154_v56  ;;  %11187 = vst [vmem:[#allocation6 + $0x90] sm:$0xff] %v11155_v45  ;;  %v11156_v44 = vmax.f32 %v13692_v5, 0.0  ;;  %v11598_v51 = vadd.f32 %v11597_v4, %v11596_v14 }
 0x8a3   :  { %v11611_v36 = vadd.f32 %v11610_v10, %v11609_v63  ;;  %v11778_v57 = vrot.slane %v11746_v27, 4  ;;  %v11584_v37 = vld [vmem:[#allocation6 + $0x70] sm:$0xf]  ;;  %v11747_v59 = vld [vmem:[#allocation6 + $0x70] sm:$0xf0]  ;;  %v10997_v7 = vpop.f32.mrb[53].mxu0 }
 0x8a4   :  { %v13695_v1 = vadd.f32 %v13694_v34, %v19275_v52  ;;  %v11808_v42 = vsel %vm3330_vm12, %v11777_v22, 0.0  ;;  %v11599_v54 = vsel %vm3330_vm12, %v11584_v37, 0.0  ;;  %v11779_v17 = vrot.slane %v11747_v59, 4  ;;  %11188 = vst [vmem:[#allocation6 + $0x98] sm:$0xff] %v11156_v44  ;;  %v10999_v40 = vpop.f32.mrb[54].mxu0  ;;  %v21066_v44 = vld [vmem:[#allocation162_spill] sm:$0xff] }
 0x8a5   :  { %v13697_v47 = vadd.f32 %v19390_v35, %v10997_v7  ;;  %v11809_v50 = vadd.f32 %v11808_v42, %v11807_v21  ;;  %v11821_v43 = vsel %vm3330_vm12, %v11778_v57, 0.0  ;;  %v11600_v28 = vadd.f32 %v11599_v54, %v11598_v51  ;;  %v11585_v48 = vld [vmem:[#allocation6 + $0x78] sm:$0xf]  ;;  %v11748_v2 = vld [vmem:[#allocation6 + $0x78] sm:$0xf0]  ;;  %v11001_v11 = vpop.f32.mrb[55].mxu0 }
 0x8a6   :  { %v13700_v58 = vadd.f32 %v19394_v18, %v10999_v40  ;;  %v11822_v52 = vadd.f32 %v11821_v43, %v11820_v41  ;;  %v11810_v5 = vsel %vm3330_vm12, %v11779_v17, 0.0  ;;  %v11612_v38 = vsel %vm3330_vm12, %v11585_v48, 0.0  ;;  %v11206_v31 = vld [vmem:[#allocation6 + $0x28] sm:$0xf] }
 0x8a7   :  { %v11780_v14 = vrot.slane %v11748_v2, 4  ;;  %v19457_v56 = vsel %vm3330_vm12, %v11205_v23, 0.0  ;;  %v11601_v35 = vrot.slane %v11600_v28, 4  ;;  %v11811_v45 = vadd.f32 %v11810_v5, %v11809_v50  ;;  %v11374_v21 = vld [vmem:[#allocation6 + $0x80] sm:$0xf0]  ;;  %v21065_v23 = vld [vmem:[#allocation146_spill] sm:$0xff] }
 0x8a8   :  { %v11613_v15 = vadd.f32 %v11612_v38, %v11611_v36  ;;  %v11402_v63 = vrot.slane %v11370_v60, 4  ;;  %v11157_v33 = vmax.f32 %v13695_v1, 0.0  ;;  %v19461_v18 = vadd.f32 %v19399_v3, %v11001_v11  ;;  %v19473_v36 = vld [vmem:[#allocation6 + $0x28] sm:$0xf0]  ;;  %v11209_v57 = vld [vmem:[#allocation6 + $0x80] sm:$0xf] }
 0x8a9   :  { %v11823_v13 = vsel %vm3330_vm12, %v11780_v14, 0.0  ;;  %v19463_v41 = vpop.f32.mrb[56].mxu0  ;;  %v11602_v34 = vadd.f32 %v11601_v35, %v11600_v28  ;;  %v11812_v4 = vrot.slane %v11811_v45, 4  ;;  %v19467_v27 = vadd.f32 %v21065_v23, %v18830_v20  ;;  %v11375_v54 = vld [vmem:[#allocation6 + $0x88] sm:$0xf0] }
 0x8aa   :  { %v11614_v22 = vrot.slane %v11613_v15, 4  ;;  %v11824_v10 = vadd.f32 %v11823_v13, %v11822_v52  ;;  %v19471_v51 = vadd.f32 %v21066_v44, %v18833_v19  ;;  %v11406_v3 = vrot.slane %v11374_v21, 4  ;;  %11189 = vst [vmem:[#allocation6 + $0xa0] sm:$0xff] %v11157_v33  ;;  %v19476_v59 = vpop.f32.mrb[57].mxu0  ;;  %v11376_v20 = vld [vmem:[#allocation6 + $0x90] sm:$0xf0] }
 0x8ab   :  { %v13698_v37 = vadd.f32 %v13697_v47, %v19277_v0  ;;  %v11603_v7 = vrot.slane %v11602_v34, 2  ;;  %v11813_v1 = vadd.f32 %v11812_v4, %v11811_v45  ;;  %v19479_v17 = vsel %vm3330_vm12, %v11206_v31, 0.0  ;;  %v21067_v19 = vld [vmem:[#allocation30_spill] sm:$0xff]  ;;  %v11377_v5 = vld [vmem:[#allocation6 + $0x98] sm:$0xf0]  ;;  %v11009_v38 = vpop.f32.mrb[58].mxu0 }
 0x8ac   :  { %v11615_v60 = vadd.f32 %v11614_v22, %v11613_v15  ;;  %v11825_v42 = vrot.slane %v11824_v10, 4  ;;  %v19484_v40 = vsub.s32 %v11285_v24, %v21067_v19  ;;  %v14563_v50 = vmov 1935823168   ;;  %v11211_v0 = vld [vmem:[#allocation6 + $0x90] sm:$0xf]  ;;  %v11011_v45 = vpop.f32.mrb[59].mxu0 }
 0x8ad   :  { %v19486_v43 = vunpack.c.l.s4 %v14563_v50  ;;  %v11408_v47 = vrot.slane %v11376_v20, 4  ;;  %v11212_v28 = vld [vmem:[#allocation6 + $0x98] sm:$0xf]  ;;  %v11604_v48 = vadd.f32 %v11603_v7, %v11602_v34  ;;  %v11814_v2 = vrot.slane %v11813_v1, 2  ;;  %v11210_v33 = vld [vmem:[#allocation6 + $0x88] sm:$0xf] }
 0x8ae   :  { %v11616_v11 = vrot.slane %v11615_v60, 2  ;;  %v11826_v52 = vadd.f32 %v11825_v42, %v11824_v10  ;;  %v19489_v14 = vsel %vm3330_vm12, %v11402_v63, 0.0  ;;  %v11403_v35 = vrot.slane %v19473_v36, 4 }
 0x8af   :  { %v11244_v8 = vsel %vm3330_vm12, %v11209_v57, 0.0  ;;  %v11407_v24 = vrot.slane %v11375_v54, 4  ;;  %v11605_v15 = vrot.slane %v11604_v48, 1  ;;  %v11456_v13 = vsel %vm3330_vm12, %v11406_v3, 0.0 }
 0x8b0   :  { %v11617_v21 = vadd.f32 %v11616_v11, %v11615_v60  ;;  %v11245_v31 = vsel %vm3330_vm12, %v11211_v0, 0.0  ;;  %v11258_v34 = vsel %vm3330_vm12, %v11212_v28, 0.0  ;;  %v11409_v4 = vrot.slane %v11377_v5, 4 }
 0x8b1   :  { %v11158_v22 = vmax.f32 %v13698_v37, 0.0  ;;  %v13701_v63 = vadd.f32 %v13700_v58, %v19279_v53  ;;  %v11015_v10 = vpop.f32.mrb[60].mxu0  ;;  %v11606_v23 = vadd.f32 %v11605_v15, %v11604_v48  ;;  %v11815_v44 = vadd.f32 %v11814_v2, %v11813_v1  ;;  %v11378_v42 = vld [vmem:[#allocation6 + $0xa0] sm:$0xf0]  ;;  %v11213_v20 = vld [vmem:[#allocation6 + $0xa0] sm:$0xf] }
 0x8b2   :  { %v11827_v7 = vrot.slane %v11826_v52, 2  ;;  %v11457_v57 = vsel %vm3330_vm12, %v11408_v47, 0.0  ;;  %v11314_v60 = vunpack.c.0.s8 %v19486_v43  ;;  %v11257_v3 = vsel %vm3330_vm12, %v11210_v33, 0.0  ;;  %v11017_v0 = vpop.f32.mrb[61].mxu0 }
 0x8b3   :  { %v11469_v54 = vsel %vm3330_vm12, %v11407_v24, 0.0  ;;  %11190 = vst [vmem:[#allocation6 + $0xa8] sm:$0xff] %v11158_v22  ;;  %v11159_v50 = vmax.f32 %v13701_v63, 0.0  ;;  %v11618_v37 = vrot.slane %v11617_v21, 1  ;;  %v11246_v28 = vadd.f32 %v11245_v31, %v11244_v8  ;;  %v11019_v48 = vpop.f32.mrb[62].mxu0 }
 0x8b4   :  { %v11259_v53 = vadd.f32 %v11258_v34, %v11257_v3  ;;  %v11410_v58 = vrot.slane %v11378_v42, 4  ;;  %v11458_v1 = vadd.f32 %v11457_v57, %v11456_v13  ;;  %v11470_v2 = vsel %vm3330_vm12, %v11409_v4, 0.0  ;;  %v11021_v5 = vpop.f32.mrb[63].mxu0 }
 0x8b5   :  { %11191 = vst [vmem:[#allocation6 + $0xb0] sm:$0xff] %v11159_v50  ;;  %v13704_v47 = vadd.f32 %v19461_v18, %v19281_v9  ;;  %v13706_v11 = vadd.f32 %v19403_v16, %v19463_v41  ;;  %v19506_v24 = vmul.f32 0.0625, %v11606_v23  ;;  %v11816_v15 = vrot.slane %v11815_v44, 1 }
 0x8b6   :  { %v11828_v33 = vadd.f32 %v11827_v7, %v11826_v52  ;;  %v11247_v8 = vsel %vm3330_vm12, %v11213_v20, 0.0  ;;  %v13709_v13 = vadd.f32 %v19407_v12, %v19476_v59  ;;  %v13712_v34 = vadd.f32 %v19412_v29, %v11009_v38 }
 0x8b7   :  { %v11160_v31 = vmax.f32 %v13704_v47, 0.0  ;;  %v13707_v4 = vadd.f32 %v13706_v11, %v19283_v39  ;;  %v11619_v22 = vadd.f32 %v11618_v37, %v11617_v21  ;;  %v11459_v9 = vsel %vm3330_vm12, %v11410_v58, 0.0 }
 0x8b8   :  { %v13715_v16 = vadd.f32 %v19419_v55, %v11011_v45  ;;  %v13718_v18 = vadd.f32 %v19423_v32, %v11015_v10  ;;  %v13710_v52 = vadd.f32 %v13709_v13, %v19285_v62  ;;  %v13713_v63 = vadd.f32 %v13712_v34, %v19287_v61 }
 0x8b9   :  { %11192 = vst [vmem:[#allocation6 + $0xb8] sm:$0xff] %v11160_v31  ;;  %v11161_v41 = vmax.f32 %v13707_v4, 0.0  ;;  %v13721_v23 = vadd.f32 %v19427_v49, %v11017_v0  ;;  %v19519_v12 = vpop.f32.mrb[32].mxu0  ;;  %v11829_v29 = vrot.slane %v11828_v33, 1  ;;  %v11248_v59 = vadd.f32 %v11247_v8, %v11246_v28 }
 0x8ba   :  { %v11214_v39 = vld [vmem:[#allocation6 + $0xa8] sm:$0xf]  ;;  %v11379_v38 = vld [vmem:[#allocation6 + $0xa8] sm:$0xf0]  ;;  %v13716_v21 = vadd.f32 %v13715_v16, %v19289_v46  ;;  %v13724_v55 = vadd.f32 %v19467_v27, %v11019_v48  ;;  %v19523_v45 = vpop.f32.mrb[33].mxu0  ;;  %v11162_v62 = vmax.f32 %v13710_v52, 0.0  ;;  %v11817_v49 = vadd.f32 %v11816_v15, %v11815_v44 }
 0x8bb   :  { %v11260_v32 = vsel %vm3330_vm12, %v11214_v39, 0.0  ;;  %v11411_v10 = vrot.slane %v11379_v38, 4  ;;  %11193 = vst [vmem:[#allocation6 + $0xc0] sm:$0xff] %v11161_v41  ;;  %v11163_v61 = vmax.f32 %v13713_v63, 0.0  ;;  %v19526_v7 = vpop.f32.mrb[34].mxu0  ;;  %v11471_v57 = vadd.f32 %v11470_v2, %v11469_v54 }
 0x8bc   :  { %v11460_v42 = vadd.f32 %v11459_v9, %v11458_v1  ;;  %v11215_v3 = vld [vmem:[#allocation6 + $0xb0] sm:$0xf]  ;;  %v11380_v20 = vld [vmem:[#allocation6 + $0xb0] sm:$0xf0]  ;;  %v11164_v50 = vmax.f32 %v13716_v21, 0.0  ;;  %v19528_v0 = vpop.f32.mrb[35].mxu0  ;;  %v13719_v28 = vadd.f32 %v13718_v18, %v19291_v6  ;;  %v11830_v48 = vadd.f32 %v11829_v29, %v11828_v33 }
 0x8bd   :  { %v11472_v46 = vsel %vm3330_vm12, %v11411_v10, 0.0  ;;  %v11249_v27 = vsel %vm3330_vm12, %v11215_v3, 0.0  ;;  %v11412_v37 = vrot.slane %v11380_v20, 4  ;;  %11194 = vst [vmem:[#allocation6 + $0xc8] sm:$0xff] %v11162_v62  ;;  %11195 = vst [vmem:[#allocation6 + $0xd0] sm:$0xff] %v11163_v61  ;;  %v11647_v58 = vmul.f32 0.0625, %v11619_v22 }
 0x8be   :  { %v11261_v47 = vadd.f32 %v11260_v32, %v11259_v53  ;;  %v11250_v44 = vadd.f32 %v11249_v27, %v11248_v59  ;;  %11196 = vst [vmem:[#allocation6 + $0xd8] sm:$0xff] %v11164_v50  ;;  %v11207_v54 = vld [vmem:[#allocation6 + $0x30] sm:$0xf]  ;;  %v11165_v2 = vmax.f32 %v13719_v28, 0.0  ;;  %v13727_v11 = vadd.f32 %v19471_v51, %v11021_v5  ;;  %v19542_v51 = vld [vmem:[#allocation6 + $0x30] sm:$0xf0] }
 0x8bf   :  { %v11461_v1 = vsel %vm3330_vm12, %v11412_v37, 0.0  ;;  %v13722_v15 = vadd.f32 %v13721_v23, %v19293_v30  ;;  %v11473_v8 = vadd.f32 %v11472_v46, %v11471_v57  ;;  %v13725_v6 = vadd.f32 %v13724_v55, %v19295_v26  ;;  %v21068_v62 = vld [vmem:[#allocation33_spill] sm:$0xff] }
 0x8c0   :  { %v11251_v31 = vrot.slane %v11250_v44, 4  ;;  %v11462_v13 = vadd.f32 %v11461_v1, %v11460_v42  ;;  %v11216_v34 = vld [vmem:[#allocation6 + $0xb8] sm:$0xf]  ;;  %v11381_v4 = vld [vmem:[#allocation6 + $0xb8] sm:$0xf0]  ;;  %11197 = vst [vmem:[#allocation6 + $0xe0] sm:$0xff] %v11165_v2  ;;  %v13728_v9 = vadd.f32 %v13727_v11, %v19297_v25  ;;  %v13300_v29 = vpack.c.bf16 %v11647_v58, %v19506_v24 }
 0x8c1   :  { %v11262_v33 = vsel %vm3330_vm12, %v11216_v34, 0.0  ;;  %v11413_v53 = vrot.slane %v11381_v4, 4  ;;  %v11166_v22 = vmax.f32 %v13722_v15, 0.0  ;;  %v19540_v16 = vsel %vm3330_vm12, %v11207_v54, 0.0 }
 0x8c2   :  { %v11252_v30 = vadd.f32 %v11251_v31, %v11250_v44  ;;  %v11263_v5 = vadd.f32 %v11262_v33, %v11261_v47  ;;  %v11749_v18 = vld [vmem:[#allocation6 + $0xc0] sm:$0xf0]  ;;  %v11167_v41 = vmax.f32 %v13725_v6, 0.0  ;;  %v19544_v52 = vmul.f32 0.0625, %v11817_v49  ;;  %v11586_v38 = vld [vmem:[#allocation6 + $0xc0] sm:$0xf] }
 0x8c3   :  { %v11463_v63 = vrot.slane %v11462_v13, 4  ;;  %v11474_v26 = vsel %vm3330_vm12, %v11413_v53, 0.0  ;;  %11198 = vst [vmem:[#allocation6 + $0xe8] sm:$0xff] %v11166_v22  ;;  %v11168_v23 = vmax.f32 %v13728_v9, 0.0  ;;  %v19548_v59 = vmul.f32 0.0625, %v11830_v48 }
 0x8c4   :  { %v11264_v25 = vrot.slane %v11263_v5, 4  ;;  %v11475_v39 = vadd.f32 %v11474_v26, %v11473_v8  ;;  %11199 = vst [vmem:[#allocation6 + $0xf0] sm:$0xff] %v11167_v41  ;;  %v11404_v21 = vrot.slane %v19542_v51, 4  ;;  %v11781_v55 = vrot.slane %v11749_v18, 4  ;;  %v11587_v32 = vld [vmem:[#allocation6 + $0xc8] sm:$0xf] }
 0x8c5   :  { %v11588_v10 = vld [vmem:[#allocation6 + $0xd0] sm:$0xf]  ;;  %11200 = vst [vmem:[#allocation6 + $0xf8] sm:$0xff] %v11168_v23  ;;  %v19553_v61 = vadd.f32 %v21068_v62, %v19519_v12  ;;  %v11253_v49 = vrot.slane %v11252_v30, 2  ;;  %v11751_v24 = vld [vmem:[#allocation6 + $0xd0] sm:$0xf0]  ;;  %v19558_v20 = vsub.s32 %v11314_v60, %v21067_v19  ;;  %v11464_v50 = vadd.f32 %v11463_v63, %v11462_v13 }
 0x8c6   :  { %v11265_v57 = vadd.f32 %v11264_v25, %v11263_v5  ;;  %v11476_v42 = vrot.slane %v11475_v39, 4  ;;  %v11589_v3 = vld [vmem:[#allocation6 + $0xd8] sm:$0xf]  ;;  %v11620_v46 = vsel %vm3330_vm12, %v11586_v38, 0.0  ;;  %v11750_v27 = vld [vmem:[#allocation6 + $0xc8] sm:$0xf0]  ;;  %v19562_v58 = vrot.slane %v13300_v29, %v19484_v40 }
 0x8c7   :  { %v11783_v37 = vrot.slane %v11751_v24, 4  ;;  %v11752_v28 = vld [vmem:[#allocation6 + $0xd8] sm:$0xf0]  ;;  %v13303_v12 = vpack.c.bf16 %v19548_v59, %v19544_v52  ;;  %v11621_v47 = vsel %vm3330_vm12, %v11588_v10, 0.0  ;;  %v11590_v44 = vld [vmem:[#allocation6 + $0xe0] sm:$0xf]  ;;  %v11254_v2 = vadd.f32 %v11253_v49, %v11252_v30 }
 0x8c8   :  { %v11266_v48 = vrot.slane %v11265_v57, 2  ;;  %v11753_v54 = vld [vmem:[#allocation6 + $0xe0] sm:$0xf0]  ;;  %v11831_v19 = vsel %vm3330_vm12, %v11781_v55, 0.0  ;;  %v11634_v60 = vsel %vm3330_vm12, %v11589_v3, 0.0  ;;  %v11784_v1 = vrot.slane %v11752_v28, 4 }
 0x8c9   :  { %v11832_v43 = vsel %vm3330_vm12, %v11783_v37, 0.0  ;;  %v11477_v11 = vadd.f32 %v11476_v42, %v11475_v39  ;;  %v11633_v15 = vsel %vm3330_vm12, %v11587_v32, 0.0  ;;  %v11782_v8 = vrot.slane %v11750_v27, 4  ;;  %v21071_v52 = vld [vmem:[#allocation53_spill] sm:$0xff] }
 0x8ca   :  { %v11591_v31 = vld [vmem:[#allocation6 + $0xe8] sm:$0xf]  ;;  %v11465_v13 = vrot.slane %v11464_v50, 2  ;;  %v11622_v34 = vadd.f32 %v11621_v47, %v11620_v46  ;;  %v11623_v4 = vsel %vm3330_vm12, %v11590_v44, 0.0  ;;  %v11785_v6 = vrot.slane %v11753_v54, 4 }
 0x8cb   :  { %v11672_v33 = vrot.slane %v19562_v58, %v19484_v40  ;;  %v11267_v53 = vadd.f32 %v11266_v48, %v11265_v57  ;;  %v11833_v22 = vadd.f32 %v11832_v43, %v11831_v19  ;;  %v11635_v9 = vadd.f32 %v11634_v60, %v11633_v15  ;;  %v11754_v5 = vld [vmem:[#allocation6 + $0xe8] sm:$0xf0]  ;;  %v11592_v18 = vld [vmem:[#allocation6 + $0xf0] sm:$0xf]  ;;  %v11755_v41 = vld [vmem:[#allocation6 + $0xf0] sm:$0xf0] }
 0x8cc   :  { %v11845_v30 = vsel %vm3330_vm12, %v11784_v1, 0.0  ;;  %v11624_v63 = vadd.f32 %v11623_v4, %v11622_v34  ;;  %v11834_v26 = vsel %vm3330_vm12, %v11785_v6, 0.0  ;;  %v11636_v23 = vsel %vm3330_vm12, %v11591_v31, 0.0  ;;  %v11593_v29 = vld [vmem:[#allocation6 + $0xf8] sm:$0xf] }
 0x8cd   :  { %v11255_v25 = vrot.slane %v11254_v2, 1  ;;  %v11478_v39 = vrot.slane %v11477_v11, 2  ;;  %v11844_v38 = vsel %vm3330_vm12, %v11782_v8, 0.0  ;;  %v11835_v55 = vadd.f32 %v11834_v26, %v11833_v22  ;;  %v11756_v32 = vld [vmem:[#allocation6 + $0xf8] sm:$0xf0] }
 0x8ce   :  { %v11637_v10 = vadd.f32 %v11636_v23, %v11635_v9  ;;  %v11786_v62 = vrot.slane %v11754_v5, 4  ;;  %v11625_v49 = vsel %vm3330_vm12, %v11592_v18, 0.0  ;;  %v11787_v57 = vrot.slane %v11755_v41, 4  ;;  %v21069_v9 = vld [vmem:[#allocation41_spill] sm:$0xff] }
 0x8cf   :  { %v11268_v42 = vrot.slane %v11267_v53, 1  ;;  %v11846_v24 = vadd.f32 %v11845_v30, %v11844_v38  ;;  %v11626_v3 = vadd.f32 %v11625_v49, %v11624_v63  ;;  %v11638_v46 = vsel %vm3330_vm12, %v11593_v29, 0.0 }
 0x8d0   :  { %v11847_v27 = vsel %vm3330_vm12, %v11786_v62, 0.0  ;;  %v11836_v37 = vsel %vm3330_vm12, %v11787_v57, 0.0  ;;  %v11639_v28 = vadd.f32 %v11638_v46, %v11637_v10  ;;  %v11788_v48 = vrot.slane %v11756_v32, 4  ;;  %v11208_v62 = vld [vmem:[#allocation6 + $0x38] sm:$0xf] }
 0x8d1   :  { %v11256_v47 = vadd.f32 %v11255_v25, %v11254_v2  ;;  %v11466_v44 = vadd.f32 %v11465_v13, %v11464_v50  ;;  %v11848_v54 = vadd.f32 %v11847_v27, %v11846_v24  ;;  %v11627_v19 = vrot.slane %v11626_v3, 4  ;;  %v21070_v50 = vld [vmem:[#allocation192_spill] sm:$0xff] }
 0x8d2   :  { %v11837_v43 = vadd.f32 %v11836_v37, %v11835_v55  ;;  %v11640_v60 = vrot.slane %v11639_v28, 4  ;;  %v11849_v1 = vsel %vm3330_vm12, %v11788_v48, 0.0  ;;  %v11137_v15 = vmax.f32 %v19553_v61, 0.0 }
 0x8d3   :  { %v11269_v8 = vadd.f32 %v11268_v42, %v11267_v53  ;;  %v11479_v31 = vadd.f32 %v11478_v39, %v11477_v11  ;;  %v11628_v34 = vadd.f32 %v11627_v19, %v11626_v3  ;;  %v11850_v4 = vadd.f32 %v11849_v1, %v11848_v54  ;;  %v11373_v11 = vld [vmem:[#allocation6 + $0x38] sm:$0xf0] }
 0x8d4   :  { %v11838_v6 = vrot.slane %v11837_v43, 4  ;;  %v11641_v22 = vadd.f32 %v11640_v60, %v11639_v28  ;;  %11169 = vst [vmem:[#allocation6] sm:$0xff] %v11137_v15  ;;  %v13640_v5 = vadd.f32 %v21069_v9, %v19523_v45  ;;  %v13642_v2 = vadd.f32 %v21070_v50, %v19526_v7 }
 0x8d5   :  { %v11876_v13 = vrot.slane %v13303_v12, %v19484_v40  ;;  %v11467_v18 = vrot.slane %v11466_v44, 1  ;;  %v11629_v61 = vrot.slane %v11628_v34, 2  ;;  %v11851_v53 = vrot.slane %v11850_v4, 4 }
 0x8d6   :  { %v11839_v41 = vadd.f32 %v11838_v6, %v11837_v43  ;;  %v11642_v30 = vrot.slane %v11641_v22, 2  ;;  %v11138_v63 = vmax.f32 %v13640_v5, 0.0  ;;  %v11139_v26 = vmax.f32 %v13642_v2, 0.0 }
 0x8d7   :  { %v11272_v23 = vmul.f32 0.0625, %v11256_v47  ;;  %v11480_v29 = vrot.slane %v11479_v31, 1  ;;  %v11630_v25 = vadd.f32 %v11629_v61, %v11628_v34  ;;  %v11852_v45 = vadd.f32 %v11851_v53, %v11850_v4 }
 0x8d8   :  { %v11273_v39 = vmul.f32 0.0625, %v11269_v8  ;;  %v11840_v38 = vrot.slane %v11839_v41, 2  ;;  %v11643_v7 = vadd.f32 %v11642_v30, %v11641_v22  ;;  %11170 = vst [vmem:[#allocation6 + $0x8] sm:$0xff] %v11138_v63  ;;  %11171 = vst [vmem:[#allocation6 + $0x10] sm:$0xff] %v11139_v26  ;;  %v13644_v59 = vadd.f32 %v21071_v52, %v19528_v0 }
 0x8d9   :  { %v19597_v12 = vsel %vm3330_vm12, %v11403_v35, 0.0  ;;  %v11405_v55 = vrot.slane %v11373_v11, 4  ;;  %v11631_v32 = vrot.slane %v11630_v25, 1  ;;  %v11853_v10 = vrot.slane %v11852_v45, 2 }
 0x8da   :  { %v11883_v49 = vrot.slane %v11876_v13, %v19484_v40  ;;  %v11841_v57 = vadd.f32 %v11840_v38, %v11839_v41  ;;  %v11644_v42 = vrot.slane %v11643_v7, 1  ;;  %v11140_v24 = vmax.f32 %v13644_v59, 0.0 }
 0x8db   :  { %v11468_v3 = vadd.f32 %v11467_v18, %v11466_v44  ;;  %v11481_v46 = vadd.f32 %v11480_v29, %v11479_v31  ;;  %v11632_v27 = vadd.f32 %v11631_v32, %v11630_v25  ;;  %v11854_v37 = vadd.f32 %v11853_v10, %v11852_v45  ;;  %v11366_v28 = vld [vmem:[#allocation6] sm:$0xf0]  ;;  %v11201_v15 = vld [vmem:[#allocation6] sm:$0xf] }
 0x8dc   :  { %v11694_v36 = vrot.slane %v11672_v33, %v19558_v20  ;;  %v13295_v35 = vpack.c.bf16 %v11273_v39, %v11272_v23  ;;  %v11842_v0 = vrot.slane %v11841_v57, 1  ;;  %v11645_v48 = vadd.f32 %v11644_v42, %v11643_v7  ;;  %11172 = vst [vmem:[#allocation6 + $0x18] sm:$0xff] %v11140_v24 }
 0x8dd   :  { %v11435_v47 = vsel %vm3330_vm12, %v11404_v21, 0.0  ;;  %v11236_v54 = vsel %vm3330_vm12, %v11208_v62, 0.0  ;;  %v11648_v44 = vmul.f32 0.0625, %v11632_v27  ;;  %v11855_v19 = vrot.slane %v11854_v37, 1 }
 0x8de   :  { %v19609_v43 = vsel %vm3330_vm12, %v11405_v55, 0.0  ;;  %v11843_v60 = vadd.f32 %v11842_v0, %v11841_v57  ;;  %v11649_v1 = vmul.f32 0.0625, %v11645_v48  ;;  %v11398_v58 = vrot.slane %v11366_v28, 4 }
 0x8df   :  { %v11905_v33 = vrot.slane %v11883_v49, %v19558_v20  ;;  %v19612_v8 = vmul.f32 0.0625, %v11468_v3  ;;  %v19614_v31 = vmul.f32 0.0625, %v11481_v46  ;;  %v11856_v51 = vadd.f32 %v11855_v19, %v11854_v37  ;;  %v11202_v34 = vld [vmem:[#allocation6 + $0x8] sm:$0xf]  ;;  %v11203_v21 = vld [vmem:[#allocation6 + $0x10] sm:$0xf] }
 0x8e0   :  { %v19617_v4 = vrot.slane %v13295_v35, %v19484_v40  ;;  %v11859_v6 = vmul.f32 0.0625, %v11843_v60  ;;  %v13301_v22 = vpack.c.bf16 %v11649_v1, %v11648_v44  ;;  %v11367_v9 = vld [vmem:[#allocation6 + $0x8] sm:$0xf0]  ;;  %v11368_v5 = vld [vmem:[#allocation6 + $0x10] sm:$0xf0]  ;;  %v19620_v50 = vrot.slane %v11694_v36, %v19558_v20 }
 0x8e1   :  { %v11860_v2 = vmul.f32 0.0625, %v11856_v51  ;;  %v11218_v13 = vsel %vm3330_vm12, %v11201_v15, 0.0  ;;  %v11219_v18 = vsel %vm3330_vm12, %v11203_v21, 0.0  ;;  %v11400_v61 = vrot.slane %v11368_v5, 4 }
 0x8e2   :  { %v11680_v53 = vrot.slane %v13301_v22, %v19484_v40  ;;  %v11430_v11 = vsel %vm3330_vm12, %v11398_v58, 0.0  ;;  %v11231_v41 = vsel %vm3330_vm12, %v11202_v34, 0.0  ;;  %v11220_v30 = vadd.f32 %v11219_v18, %v11218_v13 }
 0x8e3   :  { %v13298_v63 = vpack.c.bf16 %v19614_v31, %v19612_v8  ;;  %v13304_v26 = vpack.c.bf16 %v11860_v2, %v11859_v6  ;;  %v11399_v23 = vrot.slane %v11367_v9, 4  ;;  %v11431_v29 = vsel %vm3330_vm12, %v11400_v61, 0.0  ;;  %v11204_v25 = vld [vmem:[#allocation6 + $0x18] sm:$0xf]  ;;  %v11369_v45 = vld [vmem:[#allocation6 + $0x18] sm:$0xf0] }
 0x8e4   :  { %v11687_v39 = vrot.slane %v11680_v53, %v19484_v40  ;;  %v11222_v38 = vadd.f32 %v19457_v56, %v11220_v30  ;;  %v11432_v7 = vadd.f32 %v11431_v29, %v11430_v11  ;;  %v11232_v52 = vsel %vm3330_vm12, %v11204_v25, 0.0 }
 0x8e5   :  { %v11891_v59 = vrot.slane %v13304_v26, %v19484_v40  ;;  %v11233_v55 = vadd.f32 %v11232_v52, %v11231_v41  ;;  %v11401_v32 = vrot.slane %v11369_v45, 4  ;;  %v11912_v10 = vrot.slane %v11905_v33, %v19558_v20 }
 0x8e6   :  { %v11708_v62 = vrot.slane %v11687_v39, %v19558_v20  ;;  %v11224_v49 = vadd.f32 %v19540_v16, %v11222_v38  ;;  %v11434_v57 = vadd.f32 %v19489_v14, %v11432_v7  ;;  %v11716_v42 = vunpack.c.l.b16 %v19620_v50 }
 0x8e7   :  { %v11898_v24 = vrot.slane %v11891_v59, %v19484_v40  ;;  %v11443_v56 = vsel %vm3330_vm12, %v11399_v23, 0.0  ;;  %v11235_v3 = vadd.f32 %v19479_v17, %v11233_v55  ;;  %v11444_v46 = vsel %vm3330_vm12, %v11401_v32, 0.0 }
 0x8e8   :  { %v11715_v27 = vrot.slane %v11708_v62, %v19558_v20  ;;  %v11225_v37 = vrot.slane %v11224_v49, 4  ;;  %v11436_v28 = vadd.f32 %v11435_v47, %v11434_v57  ;;  %v11445_v36 = vadd.f32 %v11444_v46, %v11443_v56 }
 0x8e9   :  { %v11919_v35 = vrot.slane %v11898_v24, %v19558_v20  ;;  %v11237_v16 = vadd.f32 %v11236_v54, %v11235_v3  ;;  %v11717_v14 = vunpack.c.h.b16 %v19620_v50  ;;  %v11927_v0 = vunpack.c.l.b16 %v11912_v10 }
 0x8ea   :  { %v11226_v48 = vadd.f32 %v11225_v37, %v11224_v49  ;;  %v11437_v44 = vrot.slane %v11436_v28, 4  ;;  %v11447_v19 = vadd.f32 %v19597_v12, %v11445_v36  ;;  %v11718_v60 = vunpack.c.l.b16 %v11715_v27 }
 0x8eb   :  { %v11238_v1 = vrot.slane %v11237_v16, 4  ;;  %v11719_v17 = vunpack.c.h.b16 %v11715_v27  ;;  %v11926_v15 = vrot.slane %v11919_v35, %v19558_v20  ;;  %v11928_v58 = vunpack.c.h.b16 %v11912_v10 }
 0x8ec   :  { %v11227_v33 = vrot.slane %v11226_v48, 2  ;;  %v11438_v8 = vadd.f32 %v11437_v44, %v11436_v28  ;;  %v11449_v47 = vadd.f32 %v19609_v43, %v11447_v19  ;;  %v11720_v31 = vrot.slane %v11718_v60, 7 }
 0x8ed   :  { %v11239_v51 = vadd.f32 %v11238_v1, %v11237_v16  ;;  %v11722_v54 = vrot.slane %v11719_v17, 7  ;;  %v11929_v34 = vunpack.c.l.b16 %v11926_v15  ;;  %v11930_v21 = vunpack.c.h.b16 %v11926_v15 }
 0x8ee   :  { %v11228_v6 = vadd.f32 %v11227_v33, %v11226_v48  ;;  %v11439_v22 = vrot.slane %v11438_v8, 2  ;;  %v11450_v9 = vrot.slane %v11449_v47, 4  ;;  %v11721_v12 = vsel %vm11345_vm10, %v11720_v31, %v11716_v42 }
 0x8ef   :  { %v11240_v5 = vrot.slane %v11239_v51, 2  ;;  %v11723_v50 = vsel %vm11345_vm10, %v11722_v54, %v11717_v14  ;;  %v11931_v2 = vrot.slane %v11929_v34, 7  ;;  %v11933_v13 = vrot.slane %v11930_v21, 7 }
 0x8f0   :  { %v11229_v18 = vrot.slane %v11228_v6, 1  ;;  %v11440_v61 = vadd.f32 %v11439_v22, %v11438_v8  ;;  %v11451_v53 = vadd.f32 %v11450_v9, %v11449_v47  ;;  %v11724_v11 = vpack.c.b16 %v11723_v50, %v11721_v12 }
 0x8f1   :  { %v11516_v43 = vrot.slane %v13298_v63, %v19484_v40  ;;  %v11241_v41 = vadd.f32 %v11240_v5, %v11239_v51  ;;  %v11932_v30 = vsel %vm11345_vm10, %v11931_v2, %v11927_v0  ;;  %v11934_v26 = vsel %vm11345_vm10, %v11933_v13, %v11928_v58 }
 0x8f2   :  { %v11230_v23 = vadd.f32 %v11229_v18, %v11228_v6  ;;  %v11441_v29 = vrot.slane %v11440_v61, 1  ;;  %v11452_v25 = vrot.slane %v11451_v53, 2  ;;  %v11731_v45 = vrot.slane %v11724_v11, %v19484_v40  ;;  %v14375_v11 = vld [vmem:[%s19841_s5 + $0xc8] sm:$0xff]  }
 0x8f3   :  { %v11311_v39 = vrot.slane %v19617_v4, %v19484_v40  ;;  %v11242_v38 = vrot.slane %v11241_v41, 1  ;;  %v11935_v7 = vpack.c.b16 %v11934_v26, %v11932_v30  ;;  %v11523_v63 = vrot.slane %v11516_v43, %v19484_v40  ;;  %v14377_v30 = vld [vmem:[%s19841_s5 + $0xd0] sm:$0xff]  }
 0x8f4   :  { %v11442_v52 = vadd.f32 %v11441_v29, %v11440_v61  ;;  %v11453_v59 = vadd.f32 %v11452_v25, %v11451_v53  ;;  %13302 = vst.sshfl [vmem:[#allocation9 + $0x4] sm:$0x5 pattern:$0x73625140] %v11731_v45  ;;  %v11270_v55 = vmul.f32 0.0625, %v11230_v23  ;;  %v14374_v61 = vld [vmem:[%s19841_s5 + $0x80] sm:$0xff]  }
 0x8f5   :  { %v11243_v32 = vadd.f32 %v11242_v38, %v11241_v41  ;;  %v11942_v10 = vrot.slane %v11935_v7, %v19484_v40  ;;  %v11332_v49 = vrot.slane %v11311_v39, %v19558_v20  ;;  %v11544_v4 = vrot.slane %v11523_v63, %v19558_v20  ;;  %v14376_v41 = vld [vmem:[%s19841_s5 + $0x88] sm:$0xff]   ;;  %v14378_v26 = vld [vmem:[%s19841_s5 + $0x90] sm:$0xff]   ;;  %v14379_v23 = vld [vmem:[%s19841_s5 + $0xd8] sm:$0xff]  }
 0x8f6   :  { %v11454_v62 = vrot.slane %v11453_v59, 1  ;;  %v11482_v42 = vmul.f32 0.0625, %v11442_v52  ;;  %v14380_v29 = vld [vmem:[%s19841_s5 + $0x98] sm:$0xff]   ;;  %v14381_v25 = vld [vmem:[%s19841_s5 + $0xe0] sm:$0xff]   ;;  %v14383_v39 = vld [vmem:[%s19841_s5 + $0xe8] sm:$0xff]  }
 0x8f7   :  { %v11271_v57 = vmul.f32 0.0625, %v11243_v32  ;;  %13305 = vst.sshfl [vmem:[#allocation9 + $0x6] sm:$0x5 pattern:$0x73625140] %v11942_v10  ;;  %v11339_v46 = vrot.slane %v11332_v49, %v19558_v20  ;;  %v11551_v36 = vrot.slane %v11544_v4, %v19558_v20  ;;  %v14382_v45 = vld [vmem:[%s19841_s5 + $0xa0] sm:$0xff]  }
 0x8f8   :  { %v11455_v24 = vadd.f32 %v11454_v62, %v11453_v59  ;;  %v14384_v38 = vld [vmem:[%s19841_s5 + $0xa8] sm:$0xff]   ;;  %v14385_v7 = vld [vmem:[%s19841_s5 + $0xf0] sm:$0xff]   ;;  %v14387_v63 = vld [vmem:[%s19841_s5 + $0xf8] sm:$0xff]  }
 0x8f9   :  { %v13294_v56 = vpack.c.bf16 %v11271_v57, %v11270_v55  ;;  %v11342_v14 = vunpack.c.l.b16 %v11339_v46  ;;  %v11343_v0 = vunpack.c.h.b16 %v11339_v46  ;;  %v11554_v19 = vunpack.c.l.b16 %v11551_v36  ;;  %v14386_v59 = vld [vmem:[%s19841_s5 + $0xb0] sm:$0xff]   ;;  %v14388_v32 = vld [vmem:[%s19841_s5 + $0xb8] sm:$0xff]   ;;  %v14389_v10 = vld [vmem:[%s19841_s5 + $0x140] sm:$0xff]  }
 0x8fa   :  { %v11483_v3 = vmul.f32 0.0625, %v11455_v24  ;;  %v11555_v1 = vunpack.c.h.b16 %v11551_v36  ;;  %v14390_v49 = vld [vmem:[%s19841_s5 + $0x100] sm:$0xff]   ;;  %v14393_v4 = vld [vmem:[%s19841_s5 + $0x108] sm:$0xff]   ;;  %v14396_v46 = vld [vmem:[%s19841_s5 + $0x158] sm:$0xff]  }
 0x8fb   :  { %v11289_v27 = vrot.slane %v13294_v56, %v19484_v40  ;;  %v11344_v58 = vrot.slane %v11342_v14, 7  ;;  %v11347_v33 = vrot.slane %v11343_v0, 7  ;;  %v11556_v51 = vrot.slane %v11554_v19, 7  ;;  %v14394_v56 = vld [vmem:[%s19841_s5 + $0x150] sm:$0xff]   ;;  %v14400_v36 = vld [vmem:[%s19841_s5 + $0x168] sm:$0xff]   ;;  %v14404_v0 = vld [vmem:[%s19841_s5 + $0x178] sm:$0xff]  }
 0x8fc   :  { %v13297_v37 = vpack.c.bf16 %v11483_v3, %v11482_v42  ;;  %v11558_v6 = vrot.slane %v11555_v1, 7  ;;  %v14392_v42 = vld [vmem:[%s19841_s5 + $0x148] sm:$0xff]   ;;  %v14395_v3 = vld [vmem:[%s19841_s5 + $0x110] sm:$0xff]   ;;  %v14407_v19 = vld [vmem:[%s19841_s5 + $0x180] sm:$0xff]  }
 0x8fd   :  { %v11296_v28 = vrot.slane %v11289_v27, %v19484_v40  ;;  %v14397_v27 = vld [vmem:[%s19841_s5 + $0x118] sm:$0xff]   ;;  %v14403_v14 = vld [vmem:[%s19841_s5 + $0x130] sm:$0xff]   ;;  %v14408_v1 = vld [vmem:[%s19841_s5 + $0x1c8] sm:$0xff]  }
 0x8fe   :  { %v11501_v35 = vrot.slane %v13297_v37, %v19484_v40  ;;  %v14398_v37 = vld [vmem:[%s19841_s5 + $0x160] sm:$0xff]  }
 0x8ff   :  { %v11318_v16 = vrot.slane %v11296_v28, %v19558_v20  ;;  %v14399_v28 = vld [vmem:[%s19841_s5 + $0x120] sm:$0xff]  }
 0x900   :  { %v11508_v48 = vrot.slane %v11501_v35, %v19484_v40  ;;  %v14401_v35 = vld [vmem:[%s19841_s5 + $0x128] sm:$0xff]  }
 0x901   :  { %v11325_v44 = vrot.slane %v11318_v16, %v19558_v20  ;;  %v14402_v16 = vld [vmem:[%s19841_s5 + $0x170] sm:$0xff]  }
 0x902   :  { %v11530_v60 = vrot.slane %v11508_v48, %v19558_v20  ;;  %v14405_v48 = vld [vmem:[%s19841_s5 + $0x138] sm:$0xff]  }
 0x903   :  { %v11340_v17 = vunpack.c.l.b16 %v11325_v44  ;;  %v11341_v15 = vunpack.c.h.b16 %v11325_v44  ;;  %v14406_v44 = vld [vmem:[%s19841_s5 + $0x1c0] sm:$0xff]  }
 0x904   :  { %v11537_v8 = vrot.slane %v11530_v60, %v19558_v20 }
 0x905   :  { %v11346_v47 = vsel %vm11345_vm10, %v11344_v58, %v11340_v17  ;;  %v11348_v31 = vsel %vm11345_vm10, %v11347_v33, %v11341_v15  ;;  %v14409_v15 = vld [vmem:[%s19841_s5 + $0x188] sm:$0xff]   ;;  %v14410_v58 = vld [vmem:[%s19841_s5 + $0x1d0] sm:$0xff]   ;;  %v14412_v33 = vld [vmem:[%s19841_s5 + $0x1d8] sm:$0xff]  }
 0x906   :  { %v11349_v54 = vpack.c.b16 %v11348_v31, %v11346_v47  ;;  %v11552_v34 = vunpack.c.l.b16 %v11537_v8  ;;  %v11553_v21 = vunpack.c.h.b16 %v11537_v8  ;;  %v14413_v8 = vld [vmem:[%s19841_s5 + $0x198] sm:$0xff]   ;;  %v14414_v47 = vld [vmem:[%s19841_s5 + $0x1e0] sm:$0xff]  }
 0x907   :  { %v14415_v31 = vld [vmem:[%s19841_s5 + $0x1a0] sm:$0xff]  }
 0x908   :  { %v11356_v22 = vrot.slane %v11349_v54, %v19484_v40  ;;  %v11557_v9 = vsel %vm11345_vm10, %v11556_v51, %v11552_v34  ;;  %v11559_v12 = vsel %vm11345_vm10, %v11558_v6, %v11553_v21  ;;  %v14416_v51 = vld [vmem:[%s19841_s5 + $0x1e8] sm:$0xff]   ;;  %v14418_v34 = vld [vmem:[%s19841_s5 + $0x1f0] sm:$0xff]   ;;  %v14420_v6 = vld [vmem:[%s19841_s5 + $0x1f8] sm:$0xff]  }
 0x909   :  { %v11560_v5 = vpack.c.b16 %v11559_v12, %v11557_v9  ;;  %v14417_v54 = vld [vmem:[%s19841_s5 + $0x1a8] sm:$0xff]   ;;  %v14419_v21 = vld [vmem:[%s19841_s5 + $0x1b0] sm:$0xff]  }
 0x90a   :  { %13296 = vst.sshfl [vmem:[#allocation9] sm:$0x5 pattern:$0x73625140] %v11356_v22  ;;  %v14421_v22 = vld [vmem:[%s19841_s5 + $0x1b8] sm:$0xff]  }
 0x90b   :  { %v11567_v50 = vrot.slane %v11560_v5, %v19484_v40 }
 0x90d   :  { %13299 = vst.sshfl [vmem:[#allocation9 + $0x2] sm:$0x5 pattern:$0x73625140] %v11567_v50 }
 0x914   :  { %v11952_v20 = vld [vmem:[#allocation9] sm:$0xff] }
 0x915   :  { %v12096_v2 = vrot.slane %v11952_v20, %v19484_v40  ;;  %v12089_v52 = vcombine.high %v11952_v20, %v11952_v20 }
 0x917   :  { %v12104_v13 = vcombine.high %v12096_v2, %v12096_v2  ;;  %v12112_v53 = vrot.slane %v12096_v2, %v19484_v40  ;;  %v12103_v55 = vrot.slane %v12089_v52, %v19484_v40 }
 0x919   :  { %v12126_v18 = vrot.slane %v12104_v13, %v19484_v40  ;;  %v12105_v62 = vcombine.high %v12103_v55, %v12103_v55  ;;  %v12134_v57 = vcombine.high %v12112_v53, %v12112_v53  ;;  %v12119_v60 = vrot.slane %v12103_v55, %v19484_v40  ;;  %v13306_v13 = vld [vmem:[#allocation17] ss:$0 sm:$0xff] }
 0x91b   :  { %12562 = vmatprep.mubr.bf16.mxu1 %v12126_v18  ;;  %v12136_v43 = vcombine.high %v12126_v18, %v12126_v18  ;;  %v12133_v24 = vrot.slane %v12105_v62, %v19484_v40  ;;  %v14411_v40 = vld [vmem:[%s19841_s5 + $0x190] sm:$0xff]   ;;  %v12135_v9 = vcombine.high %v12119_v60, %v12119_v60  ;;  %s14564_s5 = smov [#allocation19]  }
 0x91c   :  { %12563 = vmatmul.mubr.bf16.vlgmr.msra.gmra.mrb[124].mxu1 %v12112_v53  ;;  %s12698_s8 = sshll.u32 %s14564_s5, 4  ;;  %s12699_s8 = int_to_ptr.vmem [resolvable:$true] %s12698_s8 }
 0x91d   :  { %13444 = vmatpush3.bf16.msra.mxu1 %v14374_v61  ;;  %12602 = vmatprep.mubr.bf16.mxu1 %v12136_v43  ;;  %v12137_v17 = vcombine.high %v12133_v24, %v12133_v24  ;;  %s14510_s9 = scalar_lea.vmem %s12699_s8, 32  ;;  %p14515_p5 = scmp.lt.s32.totalorder %s12699_s8, %s12699_s8 }
 0x91e   :  { %13445 = vmatprep.subr.bf16.mxu1 %v14375_v11  ;;  %p14511_p4 = scmp.ne.s32.totalorder %s12699_s8, %s14510_s9  ;;  %p14516_p6 = scmp.lt.s32.totalorder %s14510_s9, %s14510_s9 }
 0x920   :  { %p14517_p7 = por %p14516_p6, %p14515_p5 }
 0x921   :  { %13446 = vmatpush3.bf16.msra.mxu1 %v14376_v41 }
 0x922   :  { %13447 = vmatprep.subr.bf16.mxu1 %v14377_v30  ;;  %p14518_p8 = pnand %p14517_p7, %p14511_p4 }
 0x925   :  { %13448 = vmatpush3.bf16.msra.mxu1 %v14378_v26 }
 0x926   :  { %13449 = vmatprep.subr.bf16.mxu1 %v14379_v23 }
 0x929   :  { %13450 = vmatpush3.bf16.msra.mxu1 %v14380_v29 }
 0x92a   :  { %13451 = vmatprep.subr.bf16.mxu1 %v14381_v25 }
 0x92d   :  { %13452 = vmatpush3.bf16.msra.mxu1 %v14382_v45 }
 0x92e   :  { %13453 = vmatprep.subr.bf16.mxu1 %v14383_v39 }
 0x931   :  { %13454 = vmatpush3.bf16.msra.mxu1 %v14384_v38 }
 0x932   :  { %13455 = vmatprep.subr.bf16.mxu1 %v14385_v7 }
 0x935   :  { %13456 = vmatpush3.bf16.msra.mxu1 %v14386_v59 }
 0x936   :  { %13457 = vmatprep.subr.bf16.mxu1 %v14387_v63 }
 0x939   :  { %13458 = vmatpush3.bf16.msra.mxu1 %v14388_v32 }
 0x93a   :  { %13465 = vmatprep.subr.bf16.mxu1 %v14389_v10 }
 0x93c   :  { %12603 = vmatmul.mubr.bf16.vlgmr.msra.gmra.mrb[128].mxu1 %v12134_v57 }
 0x93d   :  { %13466 = vmatpush3.bf16.msra.mxu1 %v14390_v49  ;;  %12642 = vmatprep.mubr.bf16.mxu1 %v12133_v24 }
 0x93e   :  { %13467 = vmatprep.subr.bf16.mxu1 %v14392_v42 }
 0x941   :  { %13468 = vmatpush3.bf16.msra.mxu1 %v14393_v4 }
 0x942   :  { %13469 = vmatprep.subr.bf16.mxu1 %v14394_v56 }
 0x945   :  { %13470 = vmatpush3.bf16.msra.mxu1 %v14395_v3 }
 0x946   :  { %13471 = vmatprep.subr.bf16.mxu1 %v14396_v46 }
 0x949   :  { %13472 = vmatpush3.bf16.msra.mxu1 %v14397_v27 }
 0x94a   :  { %13473 = vmatprep.subr.bf16.mxu1 %v14398_v37 }
 0x94d   :  { %13474 = vmatpush3.bf16.msra.mxu1 %v14399_v28 }
 0x94e   :  { %13475 = vmatprep.subr.bf16.mxu1 %v14400_v36 }
 0x951   :  { %13476 = vmatpush3.bf16.msra.mxu1 %v14401_v35 }
 0x952   :  { %13477 = vmatprep.subr.bf16.mxu1 %v14402_v16 }
 0x955   :  { %13478 = vmatpush3.bf16.msra.mxu1 %v14403_v14 }
 0x956   :  { %13479 = vmatprep.subr.bf16.mxu1 %v14404_v0 }
 0x959   :  { %13480 = vmatpush3.bf16.msra.mxu1 %v14405_v48 }
 0x95a   :  { %13487 = vmatprep.subr.bf16.mxu1 %v14406_v44 }
 0x95c   :  { %12643 = vmatmul.mubr.bf16.vlgmr.msra.gmra.mrb[132].mxu1 %v12119_v60 }
 0x95d   :  { %13488 = vmatpush3.bf16.msra.mxu1 %v14407_v19  ;;  %12682 = vmatprep.mubr.bf16.mxu1 %v12137_v17 }
 0x95e   :  { %13489 = vmatprep.subr.bf16.mxu1 %v14408_v1 }
 0x961   :  { %13490 = vmatpush3.bf16.msra.mxu1 %v14409_v15 }
 0x962   :  { %13491 = vmatprep.subr.bf16.mxu1 %v14410_v58 }
 0x965   :  { %13492 = vmatpush3.bf16.msra.mxu1 %v14411_v40 }
 0x966   :  { %13493 = vmatprep.subr.bf16.mxu1 %v14412_v33 }
 0x969   :  { %13494 = vmatpush3.bf16.msra.mxu1 %v14413_v8 }
 0x96a   :  { %13495 = vmatprep.subr.bf16.mxu1 %v14414_v47 }
 0x96d   :  { %13496 = vmatpush3.bf16.msra.mxu1 %v14415_v31 }
 0x96e   :  { %13497 = vmatprep.subr.bf16.mxu1 %v14416_v51 }
 0x971   :  { %13498 = vmatpush3.bf16.msra.mxu1 %v14417_v54 }
 0x972   :  { %13499 = vmatprep.subr.bf16.mxu1 %v14418_v34 }
 0x975   :  { %13500 = vmatpush3.bf16.msra.mxu1 %v14419_v21 }
 0x976   :  { %13501 = vmatprep.subr.bf16.mxu1 %v14420_v6 }
 0x979   :  { %13502 = vmatpush3.bf16.msra.mxu1 %v14421_v22 }
 0x97c   :  { %12683 = vmatmul.mubr.bf16.vlgmr.msra.gmra.mrb[136].mxu1 %v12135_v9 }
 0x9ef   :  { %v13437_v12 = vpop.f32.mrb[124].mxu1 }
 0x9f0   :  { %v13438_v5 = vpop.f32.mrb[125].mxu1 }
 0x9f1   :  { %v13439_v50 = vadd.f32 %v13438_v5, %v13437_v12  ;;  %v13440_v20 = vpop.f32.mrb[126].mxu1 }
 0x9f2   :  { %v13441_v2 = vpop.f32.mrb[127].mxu1 }
 0x9f3   :  { %v12565_v53 = vadd.f32 %v13439_v50, %v13306_v13 }
 0xa0f   :  { %v13459_v18 = vpop.f32.mrb[128].mxu1 }
 0xa10   :  { %v13460_v61 = vpop.f32.mrb[129].mxu1 }
 0xa11   :  { %v13461_v11 = vadd.f32 %v13460_v61, %v13459_v18  ;;  %v13462_v43 = vpop.f32.mrb[130].mxu1 }
 0xa12   :  { %v13463_v41 = vpop.f32.mrb[131].mxu1 }
 0xa13   :  { %v12605_v30 = vadd.f32 %v13461_v11, %v12565_v53 }
 0xa2f   :  { %v13481_v26 = vpop.f32.mrb[132].mxu1 }
 0xa30   :  { %v13482_v23 = vpop.f32.mrb[133].mxu1 }
 0xa31   :  { %v13483_v29 = vadd.f32 %v13482_v23, %v13481_v26  ;;  %v13484_v25 = vpop.f32.mrb[134].mxu1 }
 0xa32   :  { %v13485_v45 = vpop.f32.mrb[135].mxu1 }
 0xa33   :  { %v12645_v39 = vadd.f32 %v13483_v29, %v12605_v30 }
 0xa4f   :  { %v13503_v38 = vpop.f32.mrb[136].mxu1 }
 0xa50   :  { %v13504_v7 = vpop.f32.mrb[137].mxu1 }
 0xa51   :  { %v13505_v52 = vadd.f32 %v13504_v7, %v13503_v38  ;;  %v13506_v59 = vpop.f32.mrb[138].mxu1 }
 0xa52   :  { %v13507_v63 = vpop.f32.mrb[139].mxu1 }
 0xa53   :  { %v12685_v55 = vadd.f32 %v13505_v52, %v12645_v39 }
 0xa55   :  { %12691 = vst.msk [vmem:[#allocation19] sm:$0x3] %vm12690_vm11, %v12685_v55 }
 0xa56   :  { %14521 = shalt.err (!%p14518_p8)
}
 0xa57   :  { %s14522_s10 = scalar_lea.hbm %s19843_s7, 32 }
 0xa58   :  { %p14523_p9 = scmp.ne.s32.totalorder %s19843_s7, %s14522_s10  ;;  %p14526_p10 = scmp.lt.u32.totalorder %s14522_s10, %s19843_s7 }
 0xa5a   :  { %p14528_p11 = pnand %p14526_p10, %p14523_p9 }
 0xa5c   :  { %14531 = shalt.err (!%p14528_p11)
}
 0xa5d   :  { %12701 = dma.vmem_to_hbm [thread:$0]  %s12699_s8, 32, %s19843_s7, [#allocation13]  }
 0xa5e   :  { %14542 = dma.done.wait [#allocation13], 32  }
 0xa5f   :  { %14543 = vsyncadd [#allocation13], 4294967264 }
 0xa60   :  { %12705 = vsyncpa [#allocation12], 1 }
 0xa61   :  { %12706 = vsyncpa [#allocation15], 1 }
 0xa62   :  { %12707 = vsyncpa [#allocation18], 1 }
 0xa63   :  { %12708 = vsyncpa [#allocation13], 1 }
 0xa64   :  { %12709 = vsyncmov [#allocation10] }
 0xa67   :  { %s12710_s15 = vpop.sfrf %12709 }
 0xa68   :  { %p13371_p12 = scmp.ne.s32.totalorder %s12710_s15, 0 }
 0xa6a   :  { %12714 = shalt.err (%p13371_p12)  }
 0xa6b   :  { %12716 = vsyncmov [#allocation10 + $0x1] }
 0xa6e   :  { %s12717_s16 = vpop.sfrf %12716 }
 0xa6f   :  { %p13372_p13 = scmp.ne.s32.totalorder %s12717_s16, 0 }
 0xa71   :  { %12721 = shalt.err (%p13372_p13)  }

</bundles_post_ra>
